<compile_context>
chip_gen: v7x
topology: tpu7x:2x2x1
jax: 0.10.0
libtpu: 0.0.40
codegen_flags: <defaults>
</compile_context>

<pallas_src>
import jax
import jax.numpy as jnp
from jax.experimental import pallas as pl
from jax.experimental.pallas import tpu as pltpu


def _fold_bn_into_conv(w_hwio, bn, eps=1e-5):
    """Fold eval-mode BatchNorm into conv weights -> (bf16 weights, f32 bias)."""
    gamma, beta, mean, var = bn
    scale = gamma / jnp.sqrt(var + eps)
    w_eff = (w_hwio * scale[None, None, None, :]).astype(jnp.bfloat16)
    bias = (beta - mean * scale).astype(jnp.float32)
    return w_eff, bias


def _make_fused_kernel(W, C, planes, P1, WPAD):
    row = W + 2  # row pitch of the spatially padded grid, in flat-index units

    def tap_offset(t):
        return WPAD + (t // 3 - 1) * row + (t % 3 - 1)

    def kernel(x_ref, mask_ref, w1_ref, b1_ref, w2_ref, b2_ref, o_ref,
               xf_ref, mid_ref):
        # x_ref:    (PF, C)  bf16  zero-padded, flattened NHWC image (+ flat halo)
        # mask_ref: (P1, 1)  f32   1.0 on real pixels of the padded grid, 0 on the ring
        # w*_ref:   (9, C, C) bf16 BN-folded conv weights, one (C, C) block per 3x3 tap
        # b*_ref:   (1, C)   f32   BN-folded bias
        # o_ref:    (P1, C)  f32
        # xf_ref:   (PF, C)  f32   staged f32 copy of the input tile
        # mid_ref:  (PF, C)  f32   conv1 output, VMEM resident (never written to HBM)

        # Stage the input once in f32: every shifted tap becomes a plain 32-bit
        # slice, and the residual add reuses the same staged copy.
        xf_ref[...] = x_ref[...].astype(jnp.float32)

        # ---- conv1 (+ folded bn1 scale): 9 shifted MXU dots, f32 accumulation ----
        def tap1(t):
            xs = xf_ref[pl.ds(tap_offset(t), P1), :].astype(jnp.bfloat16)
            return jnp.dot(xs, w1_ref[t], preferred_element_type=jnp.float32)

        acc = tap1(0)
        for t in range(1, 9):
            acc = acc + tap1(t)

        # bn1 bias + relu; zero the padded-grid ring so it acts as conv2's zero pad.
        mid = jnp.maximum(acc + b1_ref[...], 0.0) * mask_ref[...]

        # Clear only the flat halo rows (the ring inside P1 is already zeroed by
        # the mask); conv2 outputs that read the halo are the ring positions,
        # which the wrapper crops anyway.
        zeros_halo = jnp.zeros((WPAD, planes), jnp.float32)
        mid_ref[pl.ds(0, WPAD), :] = zeros_halo
        mid_ref[pl.ds(WPAD + P1, WPAD), :] = zeros_halo
        mid_ref[pl.ds(WPAD, P1), :] = mid

        # ---- conv2 (+ folded bn2 scale) + bias + residual + relu ----
        def tap2(t):
            ms = mid_ref[pl.ds(tap_offset(t), P1), :].astype(jnp.bfloat16)
            return jnp.dot(ms, w2_ref[t], preferred_element_type=jnp.float32)

        acc2 = tap2(0)
        for t in range(1, 9):
            acc2 = acc2 + tap2(t)

        identity = xf_ref[pl.ds(WPAD, P1), :]
        o_ref[...] = jnp.maximum(acc2 + b2_ref[...] + identity, 0.0)

    return kernel


@jax.jit
def basic_block_forward(x_nchw, params):
    """Fused BasicBlock forward. x_nchw: (N, C, H, W) float32. Returns NCHW float32."""
    w1, bn1, w2, bn2 = params["w1"], params["bn1"], params["w2"], params["bn2"]
    N, C, H, W = x_nchw.shape
    planes = w1.shape[-1]
    assert planes == C, "identity path requires inplanes == planes (downsample=None)"

    w1e, b1 = _fold_bn_into_conv(w1, bn1)
    w2e, b2 = _fold_bn_into_conv(w2, bn2)
    w1e = w1e.reshape(9, C, planes)
    w2e = w2e.reshape(9, planes, planes)
    b1 = b1.reshape(1, planes)
    b2 = b2.reshape(1, planes)

    P1 = (H + 2) * (W + 2)            # pixels in the spatially zero-padded grid
    WPAD = ((W + 3 + 7) // 8) * 8     # flat halo so every tap slice is in bounds (8-aligned)
    PF = P1 + 2 * WPAD

    # NHWC, spatial zero-pad, flatten spatial dims, add flat halo, cast to bf16.
    x = jnp.transpose(x_nchw, (0, 2, 3, 1))
    xp = jnp.pad(x, ((0, 0), (1, 1), (1, 1), (0, 0)))
    xf = xp.reshape(N, P1, C)
    xf = jnp.pad(xf, ((0, 0), (WPAD, WPAD), (0, 0))).astype(jnp.bfloat16)

    # Interior mask on the padded grid (1 = real pixel, 0 = padding ring).
    ii = jnp.arange(P1, dtype=jnp.int32) // (W + 2)
    jj = jnp.arange(P1, dtype=jnp.int32) % (W + 2)
    interior = (ii >= 1) & (ii <= H) & (jj >= 1) & (jj <= W)
    mask = interior.astype(jnp.float32).reshape(P1, 1)

    kernel = _make_fused_kernel(W, C, planes, P1, WPAD)

    out_flat = pl.pallas_call(
        kernel,
        out_shape=jax.ShapeDtypeStruct((N, P1, planes), jnp.float32),
        grid_spec=pltpu.PrefetchScalarGridSpec(
            num_scalar_prefetch=0,
            grid=(N,),
            in_specs=[
                pl.BlockSpec((None, PF, C), lambda n: (n, 0, 0)),
                pl.BlockSpec((P1, 1), lambda n: (0, 0)),
                pl.BlockSpec((9, C, planes), lambda n: (0, 0, 0)),
                pl.BlockSpec((1, planes), lambda n: (0, 0)),
                pl.BlockSpec((9, planes, planes), lambda n: (0, 0, 0)),
                pl.BlockSpec((1, planes), lambda n: (0, 0)),
            ],
            out_specs=pl.BlockSpec((None, P1, planes), lambda n: (n, 0, 0)),
            scratch_shapes=[
                pltpu.VMEM((PF, C), jnp.float32),       # f32 staged input tile
                pltpu.VMEM((PF, planes), jnp.float32),  # conv1 output, VMEM-resident
            ],
        ),
        compiler_params=pltpu.CompilerParams(dimension_semantics=("parallel",)),
    )(xf, mask, w1e, b1, w2e, b2)

    # Crop the padding ring and return NCHW (slice + transpose fuse in XLA).
    out = out_flat.reshape(N, H + 2, W + 2, planes)[:, 1:H + 1, 1:W + 1, :]
    return jnp.transpose(out, (0, 3, 1, 2))


# ------------------------------ reference ------------------------------------

def basic_block_reference(x_nchw, params):
    """XLA reference using the same BN folding and bf16 rounding as the kernel."""
    w1, bn1, w2, bn2 = params["w1"], params["bn1"], params["w2"], params["bn2"]
    w1e, b1 = _fold_bn_into_conv(w1, bn1)
    w2e, b2 = _fold_bn_into_conv(w2, bn2)
    w1f = w1e.astype(jnp.float32)
    w2f = w2e.astype(jnp.float32)

    x = jnp.transpose(x_nchw, (0, 2, 3, 1))
    xb = x.astype(jnp.bfloat16).astype(jnp.float32)
    dn = ("NHWC", "HWIO", "NHWC")

    def conv(a, w):
        return jax.lax.conv_general_dilated(
            a, w, (1, 1), "SAME", dimension_numbers=dn,
            precision=jax.lax.Precision.HIGHEST)

    m = jnp.maximum(conv(xb, w1f) + b1, 0.0)
    mb = m.astype(jnp.bfloat16).astype(jnp.float32)
    out = jnp.maximum(conv(mb, w2f) + b2 + xb, 0.0)
    return jnp.transpose(out, (0, 3, 1, 2))


# ------------------------------ main ------------------------------------------

if __name__ == "__main__":
    N, C, H, W = 2, 64, 16, 16     # inplanes == planes (no downsample), stride=1
    planes = C

    key = jax.random.PRNGKey(0)
    ks = jax.random.split(key, 8)
    x = jax.random.normal(ks[0], (N, C, H, W), dtype=jnp.float32)

    # Conv weights in HWIO layout (3, 3, Cin, Cout), no bias.
    w1 = 0.1 * jax.random.normal(ks[1], (3, 3, C, planes), dtype=jnp.float32)
    w2 = 0.1 * jax.random.normal(ks[2], (3, 3, planes, planes), dtype=jnp.float32)

    # BatchNorm (eval) params: gamma, beta, running_mean, running_var.
    bn1 = (1.0 + 0.1 * jax.random.normal(ks[3], (planes,), dtype=jnp.float32),
           0.1 * jax.random.normal(ks[4], (planes,), dtype=jnp.float32),
           0.05 * jax.random.normal(ks[5], (planes,), dtype=jnp.float32),
           jnp.abs(jax.random.normal(ks[6], (planes,), dtype=jnp.float32)) + 0.5)
    bn2 = (1.0 + 0.1 * jax.random.normal(ks[7], (planes,), dtype=jnp.float32),
           jnp.zeros((planes,), jnp.float32),
           jnp.zeros((planes,), jnp.float32),
           jnp.ones((planes,), jnp.float32))

    params = {"w1": w1, "bn1": bn1, "w2": w2, "bn2": bn2}

    out = jax.block_until_ready(basic_block_forward(x, params))
    ref = jax.block_until_ready(basic_block_reference(x, params))

    assert out.shape == (N, planes, H, W)
    err = float(jnp.max(jnp.abs(out - ref)))
    assert err < 5e-3, f"mismatch vs reference: max abs err = {err}"

    print("KERNEL_OK")
</pallas_src>

<mosaic_0001>
module attributes {stable_mosaic.version = 11 : i64} {
  func.func @kernel(%arg0: i32, %arg1: memref<1x372x64xbf16, #tpu.memory_space<vmem>>, %arg2: memref<324x1xf32, #tpu.memory_space<vmem>>, %arg3: memref<9x64x64xbf16, #tpu.memory_space<vmem>>, %arg4: memref<1x64xf32, #tpu.memory_space<vmem>>, %arg5: memref<9x64x64xbf16, #tpu.memory_space<vmem>>, %arg6: memref<1x64xf32, #tpu.memory_space<vmem>>, %arg7: memref<1x324x64xf32, #tpu.memory_space<vmem>>, %arg8: memref<372x64xf32, #tpu.memory_space<vmem>>, %arg9: memref<372x64xf32, #tpu.memory_space<vmem>>) attributes {dimension_semantics = [#tpu.dimension_semantics<parallel>], iteration_bounds = array<i64: 2>, scalar_prefetch = 0 : i64, scratch_operands = 2 : i64, tpu.core_type = #tpu.core_type<tc>, window_params = [{transform_indices = @transform_0, window_bounds = array<i64: 1, 372, 64>}, {pipeline_mode = #tpu.pipeline_mode<synchronous>, transform_indices = @transform_1, window_bounds = array<i64: 324, 1>}, {pipeline_mode = #tpu.pipeline_mode<synchronous>, transform_indices = @transform_2, window_bounds = array<i64: 9, 64, 64>}, {pipeline_mode = #tpu.pipeline_mode<synchronous>, transform_indices = @transform_3, window_bounds = array<i64: 1, 64>}, {pipeline_mode = #tpu.pipeline_mode<synchronous>, transform_indices = @transform_4, window_bounds = array<i64: 9, 64, 64>}, {pipeline_mode = #tpu.pipeline_mode<synchronous>, transform_indices = @transform_5, window_bounds = array<i64: 1, 64>}, {transform_indices = @transform_6, window_bounds = array<i64: 1, 324, 64>}]} {
    %c0 = arith.constant 0 : index
    %c0_0 = arith.constant 0 : index
    %c0_1 = arith.constant 0 : index
    %0 = vector.load %arg1[%c0, %c0_0, %c0_1] : memref<1x372x64xbf16, #tpu.memory_space<vmem>>, vector<1x372x64xbf16>
    %1 = vector.shape_cast %0 : vector<1x372x64xbf16> to vector<372x64xbf16>
    %2 = arith.extf %1 : vector<372x64xbf16> to vector<372x64xf32>
    %c0_2 = arith.constant 0 : index
    %c0_3 = arith.constant 0 : index
    %3 = vector.load %arg8[%c0_2, %c0_3] : memref<372x64xf32, #tpu.memory_space<vmem>>, vector<372x64xf32>
    tpu.vector_store %arg8[%c0_2, %c0_3], %2 {strides = array<i32>} : memref<372x64xf32, #tpu.memory_space<vmem>>, vector<372x64xf32>,
    %c5 = arith.constant 5 : index
    %c0_4 = arith.constant 0 : index
    %4 = vector.load %arg8[%c5, %c0_4] : memref<372x64xf32, #tpu.memory_space<vmem>>, vector<324x64xf32>
    %5 = arith.truncf %4 : vector<324x64xf32> to vector<324x64xbf16>
    %c0_5 = arith.constant 0 : index
    %c0_6 = arith.constant 0 : index
    %c0_7 = arith.constant 0 : index
    %6 = vector.load %arg3[%c0_5, %c0_6, %c0_7] : memref<9x64x64xbf16, #tpu.memory_space<vmem>>, vector<1x64x64xbf16>
    %7 = vector.shape_cast %6 : vector<1x64x64xbf16> to vector<64x64xbf16>
    %cst = arith.constant dense<0.000000e+00> : vector<324x64xf32>
    %8 = tpu.matmul %5, %7, %cst {dimension_numbers = #tpu.dot_dimension_numbers<[1], [0], [0], [1], [0, 0, 1, 1], [], []>} : vector<324x64xbf16>, vector<64x64xbf16>, vector<324x64xf32> -> vector<324x64xf32>
    %c6 = arith.constant 6 : index
    %c0_8 = arith.constant 0 : index
    %9 = vector.load %arg8[%c6, %c0_8] : memref<372x64xf32, #tpu.memory_space<vmem>>, vector<324x64xf32>
    %10 = arith.truncf %9 : vector<324x64xf32> to vector<324x64xbf16>
    %c1 = arith.constant 1 : index
    %c0_9 = arith.constant 0 : index
    %c0_10 = arith.constant 0 : index
    %11 = vector.load %arg3[%c1, %c0_9, %c0_10] : memref<9x64x64xbf16, #tpu.memory_space<vmem>>, vector<1x64x64xbf16>
    %12 = vector.shape_cast %11 : vector<1x64x64xbf16> to vector<64x64xbf16>
    %cst_11 = arith.constant dense<0.000000e+00> : vector<324x64xf32>
    %13 = tpu.matmul %10, %12, %cst_11 {dimension_numbers = #tpu.dot_dimension_numbers<[1], [0], [0], [1], [0, 0, 1, 1], [], []>} : vector<324x64xbf16>, vector<64x64xbf16>, vector<324x64xf32> -> vector<324x64xf32>
    %14 = arith.addf %8, %13 : vector<324x64xf32>
    %c7 = arith.constant 7 : index
    %c0_12 = arith.constant 0 : index
    %15 = vector.load %arg8[%c7, %c0_12] : memref<372x64xf32, #tpu.memory_space<vmem>>, vector<324x64xf32>
    %16 = arith.truncf %15 : vector<324x64xf32> to vector<324x64xbf16>
    %c2 = arith.constant 2 : index
    %c0_13 = arith.constant 0 : index
    %c0_14 = arith.constant 0 : index
    %17 = vector.load %arg3[%c2, %c0_13, %c0_14] : memref<9x64x64xbf16, #tpu.memory_space<vmem>>, vector<1x64x64xbf16>
    %18 = vector.shape_cast %17 : vector<1x64x64xbf16> to vector<64x64xbf16>
    %cst_15 = arith.constant dense<0.000000e+00> : vector<324x64xf32>
    %19 = tpu.matmul %16, %18, %cst_15 {dimension_numbers = #tpu.dot_dimension_numbers<[1], [0], [0], [1], [0, 0, 1, 1], [], []>} : vector<324x64xbf16>, vector<64x64xbf16>, vector<324x64xf32> -> vector<324x64xf32>
    %20 = arith.addf %14, %19 : vector<324x64xf32>
    %c23 = arith.constant 23 : index
    %c0_16 = arith.constant 0 : index
    %21 = vector.load %arg8[%c23, %c0_16] : memref<372x64xf32, #tpu.memory_space<vmem>>, vector<324x64xf32>
    %22 = arith.truncf %21 : vector<324x64xf32> to vector<324x64xbf16>
    %c3 = arith.constant 3 : index
    %c0_17 = arith.constant 0 : index
    %c0_18 = arith.constant 0 : index
    %23 = vector.load %arg3[%c3, %c0_17, %c0_18] : memref<9x64x64xbf16, #tpu.memory_space<vmem>>, vector<1x64x64xbf16>
    %24 = vector.shape_cast %23 : vector<1x64x64xbf16> to vector<64x64xbf16>
    %cst_19 = arith.constant dense<0.000000e+00> : vector<324x64xf32>
    %25 = tpu.matmul %22, %24, %cst_19 {dimension_numbers = #tpu.dot_dimension_numbers<[1], [0], [0], [1], [0, 0, 1, 1], [], []>} : vector<324x64xbf16>, vector<64x64xbf16>, vector<324x64xf32> -> vector<324x64xf32>
    %26 = arith.addf %20, %25 : vector<324x64xf32>
    %c24 = arith.constant 24 : index
    %c0_20 = arith.constant 0 : index
    %27 = vector.load %arg8[%c24, %c0_20] : memref<372x64xf32, #tpu.memory_space<vmem>>, vector<324x64xf32>
    %28 = arith.truncf %27 : vector<324x64xf32> to vector<324x64xbf16>
    %c4 = arith.constant 4 : index
    %c0_21 = arith.constant 0 : index
    %c0_22 = arith.constant 0 : index
    %29 = vector.load %arg3[%c4, %c0_21, %c0_22] : memref<9x64x64xbf16, #tpu.memory_space<vmem>>, vector<1x64x64xbf16>
    %30 = vector.shape_cast %29 : vector<1x64x64xbf16> to vector<64x64xbf16>
    %cst_23 = arith.constant dense<0.000000e+00> : vector<324x64xf32>
    %31 = tpu.matmul %28, %30, %cst_23 {dimension_numbers = #tpu.dot_dimension_numbers<[1], [0], [0], [1], [0, 0, 1, 1], [], []>} : vector<324x64xbf16>, vector<64x64xbf16>, vector<324x64xf32> -> vector<324x64xf32>
    %32 = arith.addf %26, %31 : vector<324x64xf32>
    %c25 = arith.constant 25 : index
    %c0_24 = arith.constant 0 : index
    %33 = vector.load %arg8[%c25, %c0_24] : memref<372x64xf32, #tpu.memory_space<vmem>>, vector<324x64xf32>
    %34 = arith.truncf %33 : vector<324x64xf32> to vector<324x64xbf16>
    %c5_25 = arith.constant 5 : index
    %c0_26 = arith.constant 0 : index
    %c0_27 = arith.constant 0 : index
    %35 = vector.load %arg3[%c5_25, %c0_26, %c0_27] : memref<9x64x64xbf16, #tpu.memory_space<vmem>>, vector<1x64x64xbf16>
    %36 = vector.shape_cast %35 : vector<1x64x64xbf16> to vector<64x64xbf16>
    %cst_28 = arith.constant dense<0.000000e+00> : vector<324x64xf32>
    %37 = tpu.matmul %34, %36, %cst_28 {dimension_numbers = #tpu.dot_dimension_numbers<[1], [0], [0], [1], [0, 0, 1, 1], [], []>} : vector<324x64xbf16>, vector<64x64xbf16>, vector<324x64xf32> -> vector<324x64xf32>
    %38 = arith.addf %32, %37 : vector<324x64xf32>
    %c41 = arith.constant 41 : index
    %c0_29 = arith.constant 0 : index
    %39 = vector.load %arg8[%c41, %c0_29] : memref<372x64xf32, #tpu.memory_space<vmem>>, vector<324x64xf32>
    %40 = arith.truncf %39 : vector<324x64xf32> to vector<324x64xbf16>
    %c6_30 = arith.constant 6 : index
    %c0_31 = arith.constant 0 : index
    %c0_32 = arith.constant 0 : index
    %41 = vector.load %arg3[%c6_30, %c0_31, %c0_32] : memref<9x64x64xbf16, #tpu.memory_space<vmem>>, vector<1x64x64xbf16>
    %42 = vector.shape_cast %41 : vector<1x64x64xbf16> to vector<64x64xbf16>
    %cst_33 = arith.constant dense<0.000000e+00> : vector<324x64xf32>
    %43 = tpu.matmul %40, %42, %cst_33 {dimension_numbers = #tpu.dot_dimension_numbers<[1], [0], [0], [1], [0, 0, 1, 1], [], []>} : vector<324x64xbf16>, vector<64x64xbf16>, vector<324x64xf32> -> vector<324x64xf32>
    %44 = arith.addf %38, %43 : vector<324x64xf32>
    %c42 = arith.constant 42 : index
    %c0_34 = arith.constant 0 : index
    %45 = vector.load %arg8[%c42, %c0_34] : memref<372x64xf32, #tpu.memory_space<vmem>>, vector<324x64xf32>
    %46 = arith.truncf %45 : vector<324x64xf32> to vector<324x64xbf16>
    %c7_35 = arith.constant 7 : index
    %c0_36 = arith.constant 0 : index
    %c0_37 = arith.constant 0 : index
    %47 = vector.load %arg3[%c7_35, %c0_36, %c0_37] : memref<9x64x64xbf16, #tpu.memory_space<vmem>>, vector<1x64x64xbf16>
    %48 = vector.shape_cast %47 : vector<1x64x64xbf16> to vector<64x64xbf16>
    %cst_38 = arith.constant dense<0.000000e+00> : vector<324x64xf32>
    %49 = tpu.matmul %46, %48, %cst_38 {dimension_numbers = #tpu.dot_dimension_numbers<[1], [0], [0], [1], [0, 0, 1, 1], [], []>} : vector<324x64xbf16>, vector<64x64xbf16>, vector<324x64xf32> -> vector<324x64xf32>
    %50 = arith.addf %44, %49 : vector<324x64xf32>
    %c43 = arith.constant 43 : index
    %c0_39 = arith.constant 0 : index
    %51 = vector.load %arg8[%c43, %c0_39] : memref<372x64xf32, #tpu.memory_space<vmem>>, vector<324x64xf32>
    %52 = arith.truncf %51 : vector<324x64xf32> to vector<324x64xbf16>
    %c8 = arith.constant 8 : index
    %c0_40 = arith.constant 0 : index
    %c0_41 = arith.constant 0 : index
    %53 = vector.load %arg3[%c8, %c0_40, %c0_41] : memref<9x64x64xbf16, #tpu.memory_space<vmem>>, vector<1x64x64xbf16>
    %54 = vector.shape_cast %53 : vector<1x64x64xbf16> to vector<64x64xbf16>
    %cst_42 = arith.constant dense<0.000000e+00> : vector<324x64xf32>
    %55 = tpu.matmul %52, %54, %cst_42 {dimension_numbers = #tpu.dot_dimension_numbers<[1], [0], [0], [1], [0, 0, 1, 1], [], []>} : vector<324x64xbf16>, vector<64x64xbf16>, vector<324x64xf32> -> vector<324x64xf32>
    %56 = arith.addf %50, %55 : vector<324x64xf32>
    %c0_43 = arith.constant 0 : index
    %c0_44 = arith.constant 0 : index
    %57 = vector.load %arg4[%c0_43, %c0_44] : memref<1x64xf32, #tpu.memory_space<vmem>>, vector<1x64xf32>
    %58 = vector.broadcast %57 : vector<1x64xf32> to vector<324x64xf32>
    %59 = arith.addf %56, %58 : vector<324x64xf32>
    %cst_45 = arith.constant 0.000000e+00 : f32
    %60 = vector.broadcast %cst_45 : f32 to vector<324x64xf32>
    %61 = arith.maximumf %59, %60 : vector<324x64xf32>
    %c0_46 = arith.constant 0 : index
    %c0_47 = arith.constant 0 : index
    %62 = vector.load %arg2[%c0_46, %c0_47] : memref<324x1xf32, #tpu.memory_space<vmem>>, vector<324x1xf32>
    %63 = vector.broadcast %62 : vector<324x1xf32> to vector<324x64xf32>
    %64 = arith.mulf %61, %63 : vector<324x64xf32>
    %cst_48 = arith.constant 0.000000e+00 : f32
    %65 = vector.broadcast %cst_48 : f32 to vector<24x64xf32>
    %c0_49 = arith.constant 0 : index
    %c0_50 = arith.constant 0 : index
    %66 = vector.load %arg9[%c0_49, %c0_50] : memref<372x64xf32, #tpu.memory_space<vmem>>, vector<24x64xf32>
    tpu.vector_store %arg9[%c0_49, %c0_50], %65 {strides = array<i32>} : memref<372x64xf32, #tpu.memory_space<vmem>>, vector<24x64xf32>,
    %c348 = arith.constant 348 : index
    %c0_51 = arith.constant 0 : index
    %67 = vector.load %arg9[%c348, %c0_51] : memref<372x64xf32, #tpu.memory_space<vmem>>, vector<24x64xf32>
    tpu.vector_store %arg9[%c348, %c0_51], %65 {strides = array<i32>} : memref<372x64xf32, #tpu.memory_space<vmem>>, vector<24x64xf32>,
    %c24_52 = arith.constant 24 : index
    %c0_53 = arith.constant 0 : index
    %68 = vector.load %arg9[%c24_52, %c0_53] : memref<372x64xf32, #tpu.memory_space<vmem>>, vector<324x64xf32>
    tpu.vector_store %arg9[%c24_52, %c0_53], %64 {strides = array<i32>} : memref<372x64xf32, #tpu.memory_space<vmem>>, vector<324x64xf32>,
    %c5_54 = arith.constant 5 : index
    %c0_55 = arith.constant 0 : index
    %69 = vector.load %arg9[%c5_54, %c0_55] : memref<372x64xf32, #tpu.memory_space<vmem>>, vector<324x64xf32>
    %70 = arith.truncf %69 : vector<324x64xf32> to vector<324x64xbf16>
    %c0_56 = arith.constant 0 : index
    %c0_57 = arith.constant 0 : index
    %c0_58 = arith.constant 0 : index
    %71 = vector.load %arg5[%c0_56, %c0_57, %c0_58] : memref<9x64x64xbf16, #tpu.memory_space<vmem>>, vector<1x64x64xbf16>
    %72 = vector.shape_cast %71 : vector<1x64x64xbf16> to vector<64x64xbf16>
    %cst_59 = arith.constant dense<0.000000e+00> : vector<324x64xf32>
    %73 = tpu.matmul %70, %72, %cst_59 {dimension_numbers = #tpu.dot_dimension_numbers<[1], [0], [0], [1], [0, 0, 1, 1], [], []>} : vector<324x64xbf16>, vector<64x64xbf16>, vector<324x64xf32> -> vector<324x64xf32>
    %c6_60 = arith.constant 6 : index
    %c0_61 = arith.constant 0 : index
    %74 = vector.load %arg9[%c6_60, %c0_61] : memref<372x64xf32, #tpu.memory_space<vmem>>, vector<324x64xf32>
    %75 = arith.truncf %74 : vector<324x64xf32> to vector<324x64xbf16>
    %c1_62 = arith.constant 1 : index
    %c0_63 = arith.constant 0 : index
    %c0_64 = arith.constant 0 : index
    %76 = vector.load %arg5[%c1_62, %c0_63, %c0_64] : memref<9x64x64xbf16, #tpu.memory_space<vmem>>, vector<1x64x64xbf16>
    %77 = vector.shape_cast %76 : vector<1x64x64xbf16> to vector<64x64xbf16>
    %cst_65 = arith.constant dense<0.000000e+00> : vector<324x64xf32>
    %78 = tpu.matmul %75, %77, %cst_65 {dimension_numbers = #tpu.dot_dimension_numbers<[1], [0], [0], [1], [0, 0, 1, 1], [], []>} : vector<324x64xbf16>, vector<64x64xbf16>, vector<324x64xf32> -> vector<324x64xf32>
    %79 = arith.addf %73, %78 : vector<324x64xf32>
    %c7_66 = arith.constant 7 : index
    %c0_67 = arith.constant 0 : index
    %80 = vector.load %arg9[%c7_66, %c0_67] : memref<372x64xf32, #tpu.memory_space<vmem>>, vector<324x64xf32>
    %81 = arith.truncf %80 : vector<324x64xf32> to vector<324x64xbf16>
    %c2_68 = arith.constant 2 : index
    %c0_69 = arith.constant 0 : index
    %c0_70 = arith.constant 0 : index
    %82 = vector.load %arg5[%c2_68, %c0_69, %c0_70] : memref<9x64x64xbf16, #tpu.memory_space<vmem>>, vector<1x64x64xbf16>
    %83 = vector.shape_cast %82 : vector<1x64x64xbf16> to vector<64x64xbf16>
    %cst_71 = arith.constant dense<0.000000e+00> : vector<324x64xf32>
    %84 = tpu.matmul %81, %83, %cst_71 {dimension_numbers = #tpu.dot_dimension_numbers<[1], [0], [0], [1], [0, 0, 1, 1], [], []>} : vector<324x64xbf16>, vector<64x64xbf16>, vector<324x64xf32> -> vector<324x64xf32>
    %85 = arith.addf %79, %84 : vector<324x64xf32>
    %c23_72 = arith.constant 23 : index
    %c0_73 = arith.constant 0 : index
    %86 = vector.load %arg9[%c23_72, %c0_73] : memref<372x64xf32, #tpu.memory_space<vmem>>, vector<324x64xf32>
    %87 = arith.truncf %86 : vector<324x64xf32> to vector<324x64xbf16>
    %c3_74 = arith.constant 3 : index
    %c0_75 = arith.constant 0 : index
    %c0_76 = arith.constant 0 : index
    %88 = vector.load %arg5[%c3_74, %c0_75, %c0_76] : memref<9x64x64xbf16, #tpu.memory_space<vmem>>, vector<1x64x64xbf16>
    %89 = vector.shape_cast %88 : vector<1x64x64xbf16> to vector<64x64xbf16>
    %cst_77 = arith.constant dense<0.000000e+00> : vector<324x64xf32>
    %90 = tpu.matmul %87, %89, %cst_77 {dimension_numbers = #tpu.dot_dimension_numbers<[1], [0], [0], [1], [0, 0, 1, 1], [], []>} : vector<324x64xbf16>, vector<64x64xbf16>, vector<324x64xf32> -> vector<324x64xf32>
    %91 = arith.addf %85, %90 : vector<324x64xf32>
    %c24_78 = arith.constant 24 : index
    %c0_79 = arith.constant 0 : index
    %92 = vector.load %arg9[%c24_78, %c0_79] : memref<372x64xf32, #tpu.memory_space<vmem>>, vector<324x64xf32>
    %93 = arith.truncf %92 : vector<324x64xf32> to vector<324x64xbf16>
    %c4_80 = arith.constant 4 : index
    %c0_81 = arith.constant 0 : index
    %c0_82 = arith.constant 0 : index
    %94 = vector.load %arg5[%c4_80, %c0_81, %c0_82] : memref<9x64x64xbf16, #tpu.memory_space<vmem>>, vector<1x64x64xbf16>
    %95 = vector.shape_cast %94 : vector<1x64x64xbf16> to vector<64x64xbf16>
    %cst_83 = arith.constant dense<0.000000e+00> : vector<324x64xf32>
    %96 = tpu.matmul %93, %95, %cst_83 {dimension_numbers = #tpu.dot_dimension_numbers<[1], [0], [0], [1], [0, 0, 1, 1], [], []>} : vector<324x64xbf16>, vector<64x64xbf16>, vector<324x64xf32> -> vector<324x64xf32>
    %97 = arith.addf %91, %96 : vector<324x64xf32>
    %c25_84 = arith.constant 25 : index
    %c0_85 = arith.constant 0 : index
    %98 = vector.load %arg9[%c25_84, %c0_85] : memref<372x64xf32, #tpu.memory_space<vmem>>, vector<324x64xf32>
    %99 = arith.truncf %98 : vector<324x64xf32> to vector<324x64xbf16>
    %c5_86 = arith.constant 5 : index
    %c0_87 = arith.constant 0 : index
    %c0_88 = arith.constant 0 : index
    %100 = vector.load %arg5[%c5_86, %c0_87, %c0_88] : memref<9x64x64xbf16, #tpu.memory_space<vmem>>, vector<1x64x64xbf16>
    %101 = vector.shape_cast %100 : vector<1x64x64xbf16> to vector<64x64xbf16>
    %cst_89 = arith.constant dense<0.000000e+00> : vector<324x64xf32>
    %102 = tpu.matmul %99, %101, %cst_89 {dimension_numbers = #tpu.dot_dimension_numbers<[1], [0], [0], [1], [0, 0, 1, 1], [], []>} : vector<324x64xbf16>, vector<64x64xbf16>, vector<324x64xf32> -> vector<324x64xf32>
    %103 = arith.addf %97, %102 : vector<324x64xf32>
    %c41_90 = arith.constant 41 : index
    %c0_91 = arith.constant 0 : index
    %104 = vector.load %arg9[%c41_90, %c0_91] : memref<372x64xf32, #tpu.memory_space<vmem>>, vector<324x64xf32>
    %105 = arith.truncf %104 : vector<324x64xf32> to vector<324x64xbf16>
    %c6_92 = arith.constant 6 : index
    %c0_93 = arith.constant 0 : index
    %c0_94 = arith.constant 0 : index
    %106 = vector.load %arg5[%c6_92, %c0_93, %c0_94] : memref<9x64x64xbf16, #tpu.memory_space<vmem>>, vector<1x64x64xbf16>
    %107 = vector.shape_cast %106 : vector<1x64x64xbf16> to vector<64x64xbf16>
    %cst_95 = arith.constant dense<0.000000e+00> : vector<324x64xf32>
    %108 = tpu.matmul %105, %107, %cst_95 {dimension_numbers = #tpu.dot_dimension_numbers<[1], [0], [0], [1], [0, 0, 1, 1], [], []>} : vector<324x64xbf16>, vector<64x64xbf16>, vector<324x64xf32> -> vector<324x64xf32>
    %109 = arith.addf %103, %108 : vector<324x64xf32>
    %c42_96 = arith.constant 42 : index
    %c0_97 = arith.constant 0 : index
    %110 = vector.load %arg9[%c42_96, %c0_97] : memref<372x64xf32, #tpu.memory_space<vmem>>, vector<324x64xf32>
    %111 = arith.truncf %110 : vector<324x64xf32> to vector<324x64xbf16>
    %c7_98 = arith.constant 7 : index
    %c0_99 = arith.constant 0 : index
    %c0_100 = arith.constant 0 : index
    %112 = vector.load %arg5[%c7_98, %c0_99, %c0_100] : memref<9x64x64xbf16, #tpu.memory_space<vmem>>, vector<1x64x64xbf16>
    %113 = vector.shape_cast %112 : vector<1x64x64xbf16> to vector<64x64xbf16>
    %cst_101 = arith.constant dense<0.000000e+00> : vector<324x64xf32>
    %114 = tpu.matmul %111, %113, %cst_101 {dimension_numbers = #tpu.dot_dimension_numbers<[1], [0], [0], [1], [0, 0, 1, 1], [], []>} : vector<324x64xbf16>, vector<64x64xbf16>, vector<324x64xf32> -> vector<324x64xf32>
    %115 = arith.addf %109, %114 : vector<324x64xf32>
    %c43_102 = arith.constant 43 : index
    %c0_103 = arith.constant 0 : index
    %116 = vector.load %arg9[%c43_102, %c0_103] : memref<372x64xf32, #tpu.memory_space<vmem>>, vector<324x64xf32>
    %117 = arith.truncf %116 : vector<324x64xf32> to vector<324x64xbf16>
    %c8_104 = arith.constant 8 : index
    %c0_105 = arith.constant 0 : index
    %c0_106 = arith.constant 0 : index
    %118 = vector.load %arg5[%c8_104, %c0_105, %c0_106] : memref<9x64x64xbf16, #tpu.memory_space<vmem>>, vector<1x64x64xbf16>
    %119 = vector.shape_cast %118 : vector<1x64x64xbf16> to vector<64x64xbf16>
    %cst_107 = arith.constant dense<0.000000e+00> : vector<324x64xf32>
    %120 = tpu.matmul %117, %119, %cst_107 {dimension_numbers = #tpu.dot_dimension_numbers<[1], [0], [0], [1], [0, 0, 1, 1], [], []>} : vector<324x64xbf16>, vector<64x64xbf16>, vector<324x64xf32> -> vector<324x64xf32>
    %121 = arith.addf %115, %120 : vector<324x64xf32>
    %c24_108 = arith.constant 24 : index
    %c0_109 = arith.constant 0 : index
    %122 = vector.load %arg8[%c24_108, %c0_109] : memref<372x64xf32, #tpu.memory_space<vmem>>, vector<324x64xf32>
    %c0_110 = arith.constant 0 : index
    %c0_111 = arith.constant 0 : index
    %123 = vector.load %arg6[%c0_110, %c0_111] : memref<1x64xf32, #tpu.memory_space<vmem>>, vector<1x64xf32>
    %124 = vector.broadcast %123 : vector<1x64xf32> to vector<324x64xf32>
    %125 = arith.addf %121, %124 : vector<324x64xf32>
    %126 = arith.addf %125, %122 : vector<324x64xf32>
    %cst_112 = arith.constant 0.000000e+00 : f32
    %127 = vector.broadcast %cst_112 : f32 to vector<324x64xf32>
    %128 = arith.maximumf %126, %127 : vector<324x64xf32>
    %c0_113 = arith.constant 0 : index
    %c0_114 = arith.constant 0 : index
    %c0_115 = arith.constant 0 : index
    %129 = vector.load %arg7[%c0_113, %c0_114, %c0_115] : memref<1x324x64xf32, #tpu.memory_space<vmem>>, vector<1x324x64xf32>
    %130 = vector.shape_cast %129 : vector<1x324x64xf32> to vector<324x64xf32>
    %131 = vector.shape_cast %128 : vector<324x64xf32> to vector<1x324x64xf32>
    tpu.vector_store %arg7[%c0_113, %c0_114, %c0_115], %131 {strides = array<i32>} : memref<1x324x64xf32, #tpu.memory_space<vmem>>, vector<1x324x64xf32>,
    return
  }
  func.func @transform_0(%arg0: i32) -> (i32, i32, i32) {
    %c0_i32 = arith.constant 0 : i32
    %c0_i32_0 = arith.constant 0 : i32
    %c0_i32_1 = arith.constant 0 : i32
    return %arg0, %c0_i32, %c0_i32_0 : i32, i32, i32
  }
  func.func @transform_1(%arg0: i32) -> (i32, i32) {
    %c0_i32 = arith.constant 0 : i32
    %c0_i32_0 = arith.constant 0 : i32
    %c0_i32_1 = arith.constant 0 : i32
    return %c0_i32, %c0_i32_0 : i32, i32
  }
  func.func @transform_2(%arg0: i32) -> (i32, i32, i32) {
    %c0_i32 = arith.constant 0 : i32
    %c0_i32_0 = arith.constant 0 : i32
    %c0_i32_1 = arith.constant 0 : i32
    %c0_i32_2 = arith.constant 0 : i32
    return %c0_i32, %c0_i32_0, %c0_i32_1 : i32, i32, i32
  }
  func.func @transform_3(%arg0: i32) -> (i32, i32) {
    %c0_i32 = arith.constant 0 : i32
    %c0_i32_0 = arith.constant 0 : i32
    %c0_i32_1 = arith.constant 0 : i32
    return %c0_i32, %c0_i32_0 : i32, i32
  }
  func.func @transform_4(%arg0: i32) -> (i32, i32, i32) {
    %c0_i32 = arith.constant 0 : i32
    %c0_i32_0 = arith.constant 0 : i32
    %c0_i32_1 = arith.constant 0 : i32
    %c0_i32_2 = arith.constant 0 : i32
    return %c0_i32, %c0_i32_0, %c0_i32_1 : i32, i32, i32
  }
  func.func @transform_5(%arg0: i32) -> (i32, i32) {
    %c0_i32 = arith.constant 0 : i32
    %c0_i32_0 = arith.constant 0 : i32
    %c0_i32_1 = arith.constant 0 : i32
    return %c0_i32, %c0_i32_0 : i32, i32
  }
  func.func @transform_6(%arg0: i32) -> (i32, i32, i32) {
    %c0_i32 = arith.constant 0 : i32
    %c0_i32_0 = arith.constant 0 : i32
    %c0_i32_1 = arith.constant 0 : i32
    return %arg0, %c0_i32, %c0_i32_0 : i32, i32, i32
  }
}

</mosaic_0001>

<bundles_post_ra>
// kernel: basic_block_forward.1
= control target key start
LH: loop header
LB: loop body
LE: loop exit
PB: predicated region body
PF: predicated region fallthrough
CT: control target
= control target key end

     0   :  { %s11045_s21 = smov 0   ;;  %s14051_s0 = inlined_call_operand.vmem [shape: bf16[2,372,64], index: 0, kind: input, shape index: {}]   ;;  %s14052_s1 = inlined_call_operand.vmem [shape: f32[324,1], index: 1, kind: input, shape index: {}]   ;;  %s14053_s2 = inlined_call_operand.vmem [shape: bf16[9,64,64], index: 2, kind: input, shape index: {}]   ;;  %s14054_s3 = inlined_call_operand.vmem [shape: f32[1,64], index: 3, kind: input, shape index: {}]   ;;  %s14055_s4 = inlined_call_operand.vmem [shape: bf16[9,64,64], index: 4, kind: input, shape index: {}]   ;;  %s14056_s5 = inlined_call_operand.vmem [shape: f32[1,64], index: 5, kind: input, shape index: {}]   ;;  %s14057_s6 = inlined_call_operand.vmem [shape: f32[2,324,64], index: 6, kind: output, shape index: {}]  }
   0x1 LB: > { %s8102_s22 = sadd.s32 4294967295, %s11005_s21   ;;  %p8106_p0 = scmp.ge.s32.totalorder %s11005_s21, 1  ;;  %s11005_s21 = sphi %s11045_s21, %s16_s21  }
   0x2   : > { %p212_p1 = scmp.lt.s32.totalorder %s11005_s21, 3 }
   0x4   : > { %p213_p2 = pnand %p8106_p0, %p212_p1 }
   0x6   : > { %216 = sbr.rel (%p213_p2) target bundleno = 1982 (0x7be), region = 44 }
   0xd   : > { %v10926_v0 = vld [vmem:[%s14053_s2 + $0x20] sm:$0xff]   ;;  %v14058_v1 = vmov 0.0   ;;  %v10928_v3 = vld [vmem:[%s14053_s2 + $0x28] sm:$0xff]   ;;  %vm11008_vm0 = vmmov 0   ;;  %p242_p3 = scmp.lt.s32.totalorder %s8102_s22, 1  ;;  %vm347_vm1 = vcmask 523264  }
   0xe   : > { %9255 = vmatprep.subr.bf16.mxu0 %v14058_v1  ;;  %9347 = vmatprep.subr.bf16.mxu1 %v14058_v1  ;;  %v10927_v2 = vld [vmem:[%s14053_s2] sm:$0xff]   ;;  %v10929_v4 = vld [vmem:[%s14053_s2 + $0x8] sm:$0xff]   ;;  %4280 = vst.msk [vmem:[#allocation3] sm:$0xff] %vm347_vm1, %v14058_v1  ;;  %4281 = vst.msk [vmem:[#allocation3 + $0x8] sm:$0xff] %vm347_vm1, %v14058_v1  ;;  %vm394_vm2 = vcmask 519168  }
   0xf   : > { %9256 = vmatpush3.bf16.msra.mxu0 %v10926_v0  ;;  %9263 = vmatprep.mubr.msk.bf16.mxu0 %vm11008_vm0, %v14058_v1  ;;  %s14120_s22 = smov (!%p242_p3, %s8102_s22), 1  ;;  %4282 = vst.msk [vmem:[#allocation3 + $0x10] sm:$0xff] %vm347_vm1, %v14058_v1  ;;  %4283 = vst.msk [vmem:[#allocation3 + $0x15c] sm:$0xff] %vm347_vm1, %v14058_v1  ;;  %v10930_v5 = vld [vmem:[%s14053_s2 + $0x30] sm:$0xff]   ;;  %v10932_v7 = vld [vmem:[%s14053_s2 + $0x38] sm:$0xff]  }
  0x10   : > { %9348 = vmatpush3.bf16.msra.mxu1 %v10927_v2  ;;  %9257 = vmatprep.subr.bf16.mxu0 %v14058_v1  ;;  %4284 = vst.msk [vmem:[#allocation3 + $0x164] sm:$0xff] %vm347_vm1, %v14058_v1  ;;  %4285 = vst.msk [vmem:[#allocation3 + $0x16c] sm:$0xff] %vm347_vm1, %v14058_v1  ;;  %s10911_s9 = smul.u32 188, %s14120_s22  ;;  %v10931_v6 = vld [vmem:[%s14053_s2 + $0x10] sm:$0xff]   ;;  %v10933_v8 = vld [vmem:[%s14053_s2 + $0x18] sm:$0xff]  }
  0x11   : > { %9349 = vmatprep.subr.bf16.mxu1 %v14058_v1  ;;  %9355 = vmatprep.mubr.msk.bf16.mxu1 %vm11008_vm0, %v14058_v1  ;;  %v10934_v54 = vld [vmem:[%s14053_s2 + $0x40] sm:$0xff]   ;;  %s10912_s17 = smul.u32 328, %s14120_s22 }
  0x12   : > { %s11102_s16 = scalar_lea.vmem %s14051_s0, %s10911_s9 }
  0x13   : > { %9258 = vmatpush3.bf16.msra.mxu0 %v10928_v3  ;;  %v8692_v9 = vld [vmem:[%s11102_s16] sm:$0xff]   ;;  %v8783_v10 = vld [vmem:[%s11102_s16 + $0x8] sm:$0xff]   ;;  %v8784_v11 = vld [vmem:[%s11102_s16 + $0x10] sm:$0xff]   ;;  %s13886_s20 = scalar_lea.vmem %s14057_s6, %s10912_s17 }
  0x14   : > { %9350 = vmatpush3.bf16.msra.mxu1 %v10929_v4  ;;  %9259 = vmatprep.subr.bf16.mxu0 %v14058_v1  ;;  %v8693_v12 = vunpack.c.l.bf16 %v8692_v9  ;;  %v8694_v13 = vunpack.c.h.bf16 %v8692_v9  ;;  %v8697_v14 = vunpack.c.l.bf16 %v8783_v10  ;;  %v8698_v15 = vunpack.c.h.bf16 %v8783_v10  ;;  %v8785_v16 = vld [vmem:[%s11102_s16 + $0x18] sm:$0xff]   ;;  %v8786_v17 = vld [vmem:[%s11102_s16 + $0x20] sm:$0xff]   ;;  %v8787_v18 = vld [vmem:[%s11102_s16 + $0x28] sm:$0xff]  }
  0x15   : > { %9351 = vmatprep.subr.bf16.mxu1 %v14058_v1  ;;  %v8701_v19 = vunpack.c.l.bf16 %v8784_v11  ;;  %v8702_v20 = vunpack.c.h.bf16 %v8784_v11  ;;  %v8705_v21 = vunpack.c.l.bf16 %v8785_v16  ;;  %v8706_v22 = vunpack.c.h.bf16 %v8785_v16  ;;  %v8788_v23 = vld [vmem:[%s11102_s16 + $0x30] sm:$0xff]   ;;  %v8789_v28 = vld [vmem:[%s11102_s16 + $0x38] sm:$0xff]   ;;  %v8790_v29 = vld [vmem:[%s11102_s16 + $0x40] sm:$0xff]  }
  0x16   : > { %348 = vst.msk [vmem:[#allocation2] sm:$0xff] %vm347_vm1, %v8693_v12  ;;  %349 = vst.msk [vmem:[#allocation2 + $0x8] sm:$0xff] %vm347_vm1, %v8694_v13  ;;  %v8709_v24 = vunpack.c.l.bf16 %v8786_v17  ;;  %v8710_v25 = vunpack.c.h.bf16 %v8786_v17  ;;  %v8713_v26 = vunpack.c.l.bf16 %v8787_v18  ;;  %v8714_v27 = vunpack.c.h.bf16 %v8787_v18  ;;  %v8791_v34 = vld [vmem:[%s11102_s16 + $0x48] sm:$0xff]   ;;  %v8792_v35 = vld [vmem:[%s11102_s16 + $0x50] sm:$0xff]  }
  0x17   : > { %9260 = vmatpush3.bf16.msra.mxu0 %v10930_v5  ;;  %350 = vst.msk [vmem:[#allocation2 + $0x10] sm:$0xff] %vm347_vm1, %v8697_v14  ;;  %351 = vst.msk [vmem:[#allocation2 + $0x18] sm:$0xff] %vm347_vm1, %v8698_v15  ;;  %v8717_v30 = vunpack.c.l.bf16 %v8788_v23  ;;  %v8718_v31 = vunpack.c.h.bf16 %v8788_v23  ;;  %v8721_v32 = vunpack.c.l.bf16 %v8789_v28  ;;  %v8722_v33 = vunpack.c.h.bf16 %v8789_v28  ;;  %v8793_v36 = vld [vmem:[%s11102_s16 + $0x58] sm:$0xff]   ;;  %v8794_v45 = vld [vmem:[%s11102_s16 + $0x60] sm:$0xff]  }
  0x18   : > { %9352 = vmatpush3.bf16.msra.mxu1 %v10931_v6  ;;  %9261 = vmatprep.subr.bf16.mxu0 %v14058_v1  ;;  %352 = vst.msk [vmem:[#allocation2 + $0x20] sm:$0xff] %vm347_vm1, %v8701_v19  ;;  %353 = vst.msk [vmem:[#allocation2 + $0x28] sm:$0xff] %vm347_vm1, %v8702_v20  ;;  %v8725_v37 = vunpack.c.l.bf16 %v8790_v29  ;;  %v8726_v38 = vunpack.c.h.bf16 %v8790_v29  ;;  %v8729_v39 = vunpack.c.l.bf16 %v8791_v34  ;;  %v8730_v40 = vunpack.c.h.bf16 %v8791_v34  ;;  %v8795_v46 = vld [vmem:[%s11102_s16 + $0x68] sm:$0xff]   ;;  %v8796_v47 = vld [vmem:[%s11102_s16 + $0x70] sm:$0xff]  }
  0x19   : > { %9353 = vmatprep.subr.bf16.mxu1 %v14058_v1  ;;  %354 = vst.msk [vmem:[#allocation2 + $0x30] sm:$0xff] %vm347_vm1, %v8705_v21  ;;  %355 = vst.msk [vmem:[#allocation2 + $0x38] sm:$0xff] %vm347_vm1, %v8706_v22  ;;  %v8733_v41 = vunpack.c.l.bf16 %v8792_v35  ;;  %v8734_v42 = vunpack.c.h.bf16 %v8792_v35  ;;  %v8737_v43 = vunpack.c.l.bf16 %v8793_v36  ;;  %v8738_v44 = vunpack.c.h.bf16 %v8793_v36  ;;  %v8797_v52 = vld [vmem:[%s11102_s16 + $0x78] sm:$0xff]   ;;  %v8798_v53 = vld [vmem:[%s11102_s16 + $0x80] sm:$0xff]  }
  0x1a   : > { %356 = vst.msk [vmem:[#allocation2 + $0x40] sm:$0xff] %vm347_vm1, %v8709_v24  ;;  %357 = vst.msk [vmem:[#allocation2 + $0x48] sm:$0xff] %vm347_vm1, %v8710_v25  ;;  %v8741_v48 = vunpack.c.l.bf16 %v8794_v45  ;;  %v8742_v49 = vunpack.c.h.bf16 %v8794_v45  ;;  %v8745_v50 = vunpack.c.l.bf16 %v8795_v46  ;;  %v8746_v51 = vunpack.c.h.bf16 %v8795_v46  ;;  %v8799_v59 = vld [vmem:[%s11102_s16 + $0x88] sm:$0xff]   ;;  %v8800_v63 = vld [vmem:[%s11102_s16 + $0x90] sm:$0xff]  }
  0x1b   : > { %9262 = vmatpush3.bf16.msra.mxu0 %v10932_v7  ;;  %358 = vst.msk [vmem:[#allocation2 + $0x50] sm:$0xff] %vm347_vm1, %v8713_v26  ;;  %359 = vst.msk [vmem:[#allocation2 + $0x58] sm:$0xff] %vm347_vm1, %v8714_v27  ;;  %v8749_v55 = vunpack.c.l.bf16 %v8796_v47  ;;  %v8750_v56 = vunpack.c.h.bf16 %v8796_v47  ;;  %v8753_v57 = vunpack.c.l.bf16 %v8797_v52  ;;  %v8754_v58 = vunpack.c.h.bf16 %v8797_v52  ;;  %v10935_v11 = vld [vmem:[%s14053_s2 + $0x48] sm:$0xff]   ;;  %v10936_v17 = vld [vmem:[%s14053_s2 + $0x50] sm:$0xff]  }
  0x1c   : > { %9354 = vmatpush3.bf16.msra.mxu1 %v10933_v8  ;;  %9439 = vmatprep.subr.bf16.mxu0 %v14058_v1  ;;  %360 = vst.msk [vmem:[#allocation2 + $0x60] sm:$0xff] %vm347_vm1, %v8717_v30  ;;  %361 = vst.msk [vmem:[#allocation2 + $0x68] sm:$0xff] %vm347_vm1, %v8718_v31  ;;  %v8757_v60 = vunpack.c.l.bf16 %v8798_v53  ;;  %v8758_v61 = vunpack.c.h.bf16 %v8798_v53  ;;  %v8761_v62 = vunpack.c.l.bf16 %v8799_v59  ;;  %v8762_v4 = vunpack.c.h.bf16 %v8799_v59  ;;  %v10937_v22 = vld [vmem:[%s14053_s2 + $0x58] sm:$0xff]   ;;  %v8802_v34 = vld [vmem:[%s11102_s16 + $0xa0] sm:$0xff]  }
  0x1d   : > { %362 = vst.msk [vmem:[#allocation2 + $0x70] sm:$0xff] %vm347_vm1, %v8721_v32  ;;  %363 = vst.msk [vmem:[#allocation2 + $0x78] sm:$0xff] %vm347_vm1, %v8722_v33  ;;  %9531 = vmatprep.subr.bf16.mxu1 %v14058_v1  ;;  %v466_v0 = vld [vmem:[#allocation2 + $0x6] sm:$0xff]  ;;  %v8765_v5 = vunpack.c.l.bf16 %v8800_v63  ;;  %v8766_v16 = vunpack.c.h.bf16 %v8800_v63  ;;  %v8801_v31 = vld [vmem:[%s11102_s16 + $0x98] sm:$0xff]  }
  0x1e   : > { %364 = vst.msk [vmem:[#allocation2 + $0x80] sm:$0xff] %vm347_vm1, %v8725_v37  ;;  %365 = vst.msk [vmem:[#allocation2 + $0x88] sm:$0xff] %vm347_vm1, %v8726_v38  ;;  %v467_v2 = vld [vmem:[#allocation2 + $0xe] sm:$0xff]  ;;  %v396_v3 = vld [vmem:[#allocation2 + $0x5] sm:$0xff]  ;;  %v8769_v32 = vunpack.c.l.bf16 %v8801_v31  ;;  %v8770_v33 = vunpack.c.h.bf16 %v8801_v31  ;;  %v8773_v37 = vunpack.c.l.bf16 %v8802_v34  ;;  %v8774_v38 = vunpack.c.h.bf16 %v8802_v34 }
  0x1f   : > { %366 = vst.msk [vmem:[#allocation2 + $0x90] sm:$0xff] %vm347_vm1, %v8729_v39  ;;  %367 = vst.msk [vmem:[#allocation2 + $0x98] sm:$0xff] %vm347_vm1, %v8730_v40  ;;  %v507_v6 = vpack.c.bf16 %v467_v2, %v466_v0  ;;  %v397_v7 = vld [vmem:[#allocation2 + $0xd] sm:$0xff]  ;;  %v468_v9 = vld [vmem:[#allocation2 + $0x16] sm:$0xff] }
  0x20   : > { %368 = vst.msk [vmem:[#allocation2 + $0xa0] sm:$0xff] %vm347_vm1, %v8733_v41  ;;  %369 = vst.msk [vmem:[#allocation2 + $0xa8] sm:$0xff] %vm347_vm1, %v8734_v42  ;;  %v437_v8 = vpack.c.bf16 %v397_v7, %v396_v3  ;;  %v469_v10 = vld [vmem:[#allocation2 + $0x1e] sm:$0xff]  ;;  %v398_v12 = vld [vmem:[#allocation2 + $0x15] sm:$0xff] }
  0x21   : > { %370 = vst.msk [vmem:[#allocation2 + $0xb0] sm:$0xff] %vm347_vm1, %v8737_v43  ;;  %371 = vst.msk [vmem:[#allocation2 + $0xb8] sm:$0xff] %vm347_vm1, %v8738_v44  ;;  %9264 = vmatmul.mubr.msk.bf16.vlgmr.msra.gmra.mrb[0].mxu0 %vm347_vm1, %v507_v6  ;;  %v399_v13 = vld [vmem:[#allocation2 + $0x1d] sm:$0xff]  ;;  %v508_v14 = vpack.c.bf16 %v469_v10, %v468_v9  ;;  %v470_v18 = vld [vmem:[#allocation2 + $0x26] sm:$0xff] }
  0x22   : > { %372 = vst.msk [vmem:[#allocation2 + $0xc0] sm:$0xff] %vm347_vm1, %v8741_v48  ;;  %373 = vst.msk [vmem:[#allocation2 + $0xc8] sm:$0xff] %vm347_vm1, %v8742_v49  ;;  %9356 = vmatmul.mubr.msk.bf16.vlgmr.msra.gmra.mrb[0].mxu1 %vm347_vm1, %v437_v8  ;;  %9440 = vmatpush3.bf16.msra.mxu0 %v10934_v54  ;;  %v438_v15 = vpack.c.bf16 %v399_v13, %v398_v12  ;;  %v471_v19 = vld [vmem:[#allocation2 + $0x2e] sm:$0xff]  ;;  %v400_v20 = vld [vmem:[#allocation2 + $0x25] sm:$0xff] }
  0x23   : > { %374 = vst.msk [vmem:[#allocation2 + $0xd0] sm:$0xff] %vm347_vm1, %v8745_v50  ;;  %375 = vst.msk [vmem:[#allocation2 + $0xd8] sm:$0xff] %vm347_vm1, %v8746_v51  ;;  %9267 = vmatprep.mubr.msk.bf16.mxu0 %vm11008_vm0, %v14058_v1  ;;  %9359 = vmatprep.mubr.msk.bf16.mxu1 %vm11008_vm0, %v14058_v1  ;;  %v401_v21 = vld [vmem:[#allocation2 + $0x2d] sm:$0xff]  ;;  %v509_v23 = vpack.c.bf16 %v471_v19, %v470_v18  ;;  %v472_v25 = vld [vmem:[#allocation2 + $0x36] sm:$0xff] }
  0x24   : > { %376 = vst.msk [vmem:[#allocation2 + $0xe0] sm:$0xff] %vm347_vm1, %v8749_v55  ;;  %377 = vst.msk [vmem:[#allocation2 + $0xe8] sm:$0xff] %vm347_vm1, %v8750_v56  ;;  %9441 = vmatprep.subr.bf16.mxu0 %v14058_v1  ;;  %v439_v24 = vpack.c.bf16 %v401_v21, %v400_v20  ;;  %v473_v26 = vld [vmem:[#allocation2 + $0x3e] sm:$0xff]  ;;  %v402_v27 = vld [vmem:[#allocation2 + $0x35] sm:$0xff] }
  0x25   : > { %378 = vst.msk [vmem:[#allocation2 + $0xf0] sm:$0xff] %vm347_vm1, %v8753_v57  ;;  %379 = vst.msk [vmem:[#allocation2 + $0xf8] sm:$0xff] %vm347_vm1, %v8754_v58  ;;  %v403_v28 = vld [vmem:[#allocation2 + $0x3d] sm:$0xff]  ;;  %v510_v29 = vpack.c.bf16 %v473_v26, %v472_v25  ;;  %v474_v35 = vld [vmem:[#allocation2 + $0x46] sm:$0xff] }
  0x26   : > { %380 = vst.msk [vmem:[#allocation2 + $0x100] sm:$0xff] %vm347_vm1, %v8757_v60  ;;  %381 = vst.msk [vmem:[#allocation2 + $0x108] sm:$0xff] %vm347_vm1, %v8758_v61  ;;  %9442 = vmatpush3.bf16.msra.mxu0 %v10935_v11  ;;  %v440_v30 = vpack.c.bf16 %v403_v28, %v402_v27  ;;  %v475_v36 = vld [vmem:[#allocation2 + $0x4e] sm:$0xff]  ;;  %v404_v39 = vld [vmem:[#allocation2 + $0x45] sm:$0xff] }
  0x27   : > { %382 = vst.msk [vmem:[#allocation2 + $0x110] sm:$0xff] %vm347_vm1, %v8761_v62  ;;  %383 = vst.msk [vmem:[#allocation2 + $0x118] sm:$0xff] %vm347_vm1, %v8762_v4  ;;  %9443 = vmatprep.subr.bf16.mxu0 %v14058_v1  ;;  %v405_v40 = vld [vmem:[#allocation2 + $0x4d] sm:$0xff]  ;;  %v10938_v41 = vld [vmem:[%s14053_s2 + $0x60] sm:$0xff]   ;;  %v511_v43 = vpack.c.bf16 %v475_v36, %v474_v35 }
  0x28   : > { %384 = vst.msk [vmem:[#allocation2 + $0x120] sm:$0xff] %vm347_vm1, %v8765_v5  ;;  %385 = vst.msk [vmem:[#allocation2 + $0x128] sm:$0xff] %vm347_vm1, %v8766_v16  ;;  %v10939_v42 = vld [vmem:[%s14053_s2 + $0x68] sm:$0xff]   ;;  %9532 = vmatpush3.bf16.msra.mxu1 %v10938_v41  ;;  %v441_v44 = vpack.c.bf16 %v405_v40, %v404_v39  ;;  %v476_v45 = vld [vmem:[#allocation2 + $0x56] sm:$0xff] }
  0x29   : > { %9268 = vmatmul.mubr.msk.bf16.gmra.mrb[4].mxu0 %vm347_vm1, %v508_v14  ;;  %386 = vst.msk [vmem:[#allocation2 + $0x130] sm:$0xff] %vm347_vm1, %v8769_v32  ;;  %387 = vst.msk [vmem:[#allocation2 + $0x138] sm:$0xff] %vm347_vm1, %v8770_v33  ;;  %9533 = vmatprep.subr.bf16.mxu1 %v14058_v1  ;;  %v477_v46 = vld [vmem:[#allocation2 + $0x5e] sm:$0xff]  ;;  %v10940_v47 = vld [vmem:[%s14053_s2 + $0x70] sm:$0xff]  }
  0x2a   : > { %9360 = vmatmul.mubr.msk.bf16.gmra.mrb[4].mxu1 %vm347_vm1, %v438_v15  ;;  %9271 = vmatprep.mubr.msk.bf16.mxu0 %vm11008_vm0, %v14058_v1  ;;  %388 = vst.msk [vmem:[#allocation2 + $0x140] sm:$0xff] %vm347_vm1, %v8773_v37  ;;  %389 = vst.msk [vmem:[#allocation2 + $0x148] sm:$0xff] %vm347_vm1, %v8774_v38  ;;  %v406_v48 = vld [vmem:[#allocation2 + $0x55] sm:$0xff]  ;;  %v407_v49 = vld [vmem:[#allocation2 + $0x5d] sm:$0xff]  ;;  %v512_v51 = vpack.c.bf16 %v477_v46, %v476_v45 }
  0x2b   : > { %9363 = vmatprep.mubr.msk.bf16.mxu1 %vm11008_vm0, %v14058_v1  ;;  %9444 = vmatpush3.bf16.msra.mxu0 %v10936_v17  ;;  %v10941_v50 = vld [vmem:[%s14053_s2 + $0x78] sm:$0xff]   ;;  %v442_v52 = vpack.c.bf16 %v407_v49, %v406_v48  ;;  %v478_v53 = vld [vmem:[#allocation2 + $0x66] sm:$0xff]  ;;  %v479_v54 = vld [vmem:[#allocation2 + $0x6e] sm:$0xff] }
  0x2c   : > { %9445 = vmatprep.subr.bf16.mxu0 %v14058_v1  ;;  %9534 = vmatpush3.bf16.msra.mxu1 %v10939_v42  ;;  %v408_v55 = vld [vmem:[#allocation2 + $0x65] sm:$0xff]  ;;  %v409_v56 = vld [vmem:[#allocation2 + $0x6d] sm:$0xff]  ;;  %v513_v57 = vpack.c.bf16 %v479_v54, %v478_v53  ;;  %v480_v59 = vld [vmem:[#allocation2 + $0x76] sm:$0xff] }
  0x2d   : > { %9535 = vmatprep.subr.bf16.mxu1 %v14058_v1  ;;  %v443_v58 = vpack.c.bf16 %v409_v56, %v408_v55  ;;  %v481_v60 = vld [vmem:[#allocation2 + $0x7e] sm:$0xff]  ;;  %v410_v61 = vld [vmem:[#allocation2 + $0x75] sm:$0xff]  ;;  %v482_v2 = vld [vmem:[#allocation2 + $0x86] sm:$0xff] }
  0x2e   : > { %v411_v62 = vld [vmem:[#allocation2 + $0x7d] sm:$0xff]  ;;  %v514_v63 = vpack.c.bf16 %v481_v60, %v480_v59  ;;  %v483_v3 = vld [vmem:[#allocation2 + $0x8e] sm:$0xff]  ;;  %v412_v4 = vld [vmem:[#allocation2 + $0x85] sm:$0xff] }
  0x2f   : > { %9446 = vmatpush3.bf16.msra.mxu0 %v10937_v22  ;;  %v444_v0 = vpack.c.bf16 %v411_v62, %v410_v61  ;;  %v413_v5 = vld [vmem:[#allocation2 + $0x8d] sm:$0xff]  ;;  %v515_v6 = vpack.c.bf16 %v483_v3, %v482_v2  ;;  %v484_v8 = vld [vmem:[#allocation2 + $0x96] sm:$0xff]  ;;  %v485_v9 = vld [vmem:[#allocation2 + $0x9e] sm:$0xff] }
  0x30   : > { %9623 = vmatprep.subr.bf16.mxu0 %v14058_v1  ;;  %9536 = vmatpush3.bf16.msra.mxu1 %v10940_v47  ;;  %v445_v7 = vpack.c.bf16 %v413_v5, %v412_v4  ;;  %v414_v10 = vld [vmem:[#allocation2 + $0x95] sm:$0xff]  ;;  %v415_v11 = vld [vmem:[#allocation2 + $0x9d] sm:$0xff]  ;;  %v516_v12 = vpack.c.bf16 %v485_v9, %v484_v8  ;;  %v486_v14 = vld [vmem:[#allocation2 + $0xa6] sm:$0xff] }
  0x31   : > { %9272 = vmatmul.mubr.msk.bf16.gmra.mrb[8].mxu0 %vm347_vm1, %v509_v23  ;;  %9537 = vmatprep.subr.bf16.mxu1 %v14058_v1  ;;  %v446_v13 = vpack.c.bf16 %v415_v11, %v414_v10  ;;  %v487_v15 = vld [vmem:[#allocation2 + $0xae] sm:$0xff]  ;;  %v416_v16 = vld [vmem:[#allocation2 + $0xa5] sm:$0xff]  ;;  %v488_v20 = vld [vmem:[#allocation2 + $0xb6] sm:$0xff] }
  0x32   : > { %9364 = vmatmul.mubr.msk.bf16.gmra.mrb[8].mxu1 %vm347_vm1, %v439_v24  ;;  %9275 = vmatprep.mubr.msk.bf16.mxu0 %vm11008_vm0, %v14058_v1  ;;  %v417_v17 = vld [vmem:[#allocation2 + $0xad] sm:$0xff]  ;;  %v517_v18 = vpack.c.bf16 %v487_v15, %v486_v14  ;;  %v489_v21 = vld [vmem:[#allocation2 + $0xbe] sm:$0xff]  ;;  %v418_v22 = vld [vmem:[#allocation2 + $0xb5] sm:$0xff] }
  0x33   : > { %9367 = vmatprep.mubr.msk.bf16.mxu1 %vm11008_vm0, %v14058_v1  ;;  %v447_v19 = vpack.c.bf16 %v417_v17, %v416_v16  ;;  %v419_v23 = vld [vmem:[#allocation2 + $0xbd] sm:$0xff]  ;;  %v518_v24 = vpack.c.bf16 %v489_v21, %v488_v20  ;;  %v490_v26 = vld [vmem:[#allocation2 + $0xc6] sm:$0xff]  ;;  %v491_v27 = vld [vmem:[#allocation2 + $0xce] sm:$0xff] }
  0x34   : > { %9538 = vmatpush3.bf16.msra.mxu1 %v10941_v50  ;;  %v448_v25 = vpack.c.bf16 %v419_v23, %v418_v22  ;;  %v420_v28 = vld [vmem:[#allocation2 + $0xc5] sm:$0xff]  ;;  %v492_v32 = vld [vmem:[#allocation2 + $0xd6] sm:$0xff]  ;;  %v495_v39 = vld [vmem:[#allocation2 + $0xee] sm:$0xff] }
  0x35   : > { %9715 = vmatprep.subr.bf16.mxu1 %v14058_v1  ;;  %v493_v33 = vld [vmem:[#allocation2 + $0xde] sm:$0xff]  ;;  %v422_v34 = vld [vmem:[#allocation2 + $0xd5] sm:$0xff]  ;;  %v494_v38 = vld [vmem:[#allocation2 + $0xe6] sm:$0xff] }
  0x36   : > { %v423_v35 = vld [vmem:[#allocation2 + $0xdd] sm:$0xff]  ;;  %v520_v36 = vpack.c.bf16 %v493_v33, %v492_v32  ;;  %v424_v40 = vld [vmem:[#allocation2 + $0xe5] sm:$0xff]  ;;  %v425_v41 = vld [vmem:[#allocation2 + $0xed] sm:$0xff]  ;;  %v521_v42 = vpack.c.bf16 %v495_v39, %v494_v38 }
  0x37   : > { %v450_v37 = vpack.c.bf16 %v423_v35, %v422_v34  ;;  %v497_v45 = vld [vmem:[#allocation2 + $0xfe] sm:$0xff]  ;;  %v426_v46 = vld [vmem:[#allocation2 + $0xf5] sm:$0xff]  ;;  %v498_v50 = vld [vmem:[#allocation2 + $0x106] sm:$0xff] }
  0x38   : > { %v427_v47 = vld [vmem:[#allocation2 + $0xfd] sm:$0xff]  ;;  %v429_v53 = vld [vmem:[#allocation2 + $0x10d] sm:$0xff]  ;;  %v506_v11 = vld [vmem:[#allocation2 + $0x146] sm:$0xf] }
  0x39   : > { %9276 = vmatmul.mubr.msk.bf16.gmra.mrb[12].mxu0 %vm347_vm1, %v510_v29  ;;  %v421_v29 = vld [vmem:[#allocation2 + $0xcd] sm:$0xff]  ;;  %v452_v49 = vpack.c.bf16 %v427_v47, %v426_v46  ;;  %v500_v56 = vld [vmem:[#allocation2 + $0x116] sm:$0xff]  ;;  %v10942_v20 = vld [vmem:[%s14053_s2 + $0x80] sm:$0xff]  }
  0x3a   : > { %9368 = vmatmul.mubr.msk.bf16.gmra.mrb[12].mxu1 %vm347_vm1, %v440_v30  ;;  %9279 = vmatprep.mubr.msk.bf16.mxu0 %vm11008_vm0, %v14058_v1  ;;  %v519_v30 = vpack.c.bf16 %v491_v27, %v490_v26  ;;  %v449_v31 = vpack.c.bf16 %v421_v29, %v420_v28  ;;  %v431_v59 = vld [vmem:[#allocation2 + $0x11d] sm:$0xff]  ;;  %v502_v62 = vld [vmem:[#allocation2 + $0x126] sm:$0xff]  ;;  %v1112_v16 = vld [vmem:[#allocation2 + $0xf] sm:$0xff] }
  0x3b   : > { %9371 = vmatprep.mubr.msk.bf16.mxu1 %vm11008_vm0, %v14058_v1  ;;  %v433_v2 = vld [vmem:[#allocation2 + $0x12d] sm:$0xff]  ;;  %v504_v5 = vld [vmem:[#allocation2 + $0x136] sm:$0xff]  ;;  %v1515_v28 = vld [vmem:[#allocation2 + $0x3f] sm:$0xff] }
  0x3c   : > { %v435_v8 = vld [vmem:[#allocation2 + $0x13d] sm:$0xff]  ;;  %v1111_v15 = vld [vmem:[#allocation2 + $0x7] sm:$0xff]  ;;  %v10944_v26 = vld [vmem:[%s14053_s2 + $0x90] sm:$0xff]  }
  0x3d   : > { %v1510_v17 = vld [vmem:[#allocation2 + $0x17] sm:$0xff]  ;;  %v10943_v22 = vld [vmem:[%s14053_s2 + $0x88] sm:$0xff]   ;;  %v1519_v38 = vld [vmem:[#allocation2 + $0x5f] sm:$0xff] }
  0x3e   : > { %v1512_v23 = vld [vmem:[#allocation2 + $0x27] sm:$0xff]  ;;  %v1514_v27 = vld [vmem:[#allocation2 + $0x37] sm:$0xff]  ;;  %v1517_v34 = vld [vmem:[#allocation2 + $0x4f] sm:$0xff] }
  0x3f   : > { %v10945_v29 = vld [vmem:[%s14053_s2 + $0x98] sm:$0xff]   ;;  %v1516_v33 = vld [vmem:[#allocation2 + $0x47] sm:$0xff] }
  0x40   : > { %v1554_v35 = vpack.c.bf16 %v1517_v34, %v1516_v33  ;;  %v10946_v39 = vld [vmem:[%s14053_s2 + $0xa0] sm:$0xff]   ;;  %v10949_v46 = vld [vmem:[%s14053_s2 + $0xb8] sm:$0xff]  }
  0x41   : > { %9280 = vmatmul.mubr.msk.bf16.gmra.mrb[16].mxu0 %vm347_vm1, %v511_v43  ;;  %v451_v43 = vpack.c.bf16 %v425_v41, %v424_v40  ;;  %v10947_v41 = vld [vmem:[%s14053_s2 + $0xa8] sm:$0xff]   ;;  %v1522_v47 = vld [vmem:[#allocation2 + $0x77] sm:$0xff] }
  0x42   : > { %9372 = vmatmul.mubr.msk.bf16.gmra.mrb[16].mxu1 %vm347_vm1, %v441_v44  ;;  %9283 = vmatprep.mubr.msk.bf16.mxu0 %vm11008_vm0, %v14058_v1  ;;  %v496_v44 = vld [vmem:[#allocation2 + $0xf6] sm:$0xff] }
  0x43   : > { %9375 = vmatprep.mubr.msk.bf16.mxu1 %vm11008_vm0, %v14058_v1  ;;  %v522_v48 = vpack.c.bf16 %v497_v45, %v496_v44  ;;  %v10948_v44 = vld [vmem:[%s14053_s2 + $0xb0] sm:$0xff]  }
  0x49   : > { %9284 = vmatmul.mubr.msk.bf16.gmra.mrb[20].mxu0 %vm347_vm1, %v512_v51  ;;  %v499_v51 = vld [vmem:[#allocation2 + $0x10e] sm:$0xff] }
  0x4a   : > { %9376 = vmatmul.mubr.msk.bf16.gmra.mrb[20].mxu1 %vm347_vm1, %v442_v52  ;;  %9287 = vmatprep.mubr.msk.bf16.mxu0 %vm11008_vm0, %v14058_v1  ;;  %v428_v52 = vld [vmem:[#allocation2 + $0x105] sm:$0xff]  ;;  %v523_v54 = vpack.c.bf16 %v499_v51, %v498_v50 }
  0x4b   : > { %9379 = vmatprep.mubr.msk.bf16.mxu1 %vm11008_vm0, %v14058_v1  ;;  %v453_v55 = vpack.c.bf16 %v429_v53, %v428_v52 }
  0x51   : > { %9288 = vmatmul.mubr.msk.bf16.gmra.mrb[24].mxu0 %vm347_vm1, %v513_v57  ;;  %v501_v57 = vld [vmem:[#allocation2 + $0x11e] sm:$0xff] }
  0x52   : > { %9380 = vmatmul.mubr.msk.bf16.gmra.mrb[24].mxu1 %vm347_vm1, %v443_v58  ;;  %9291 = vmatprep.mubr.msk.bf16.mxu0 %vm11008_vm0, %v14058_v1  ;;  %v430_v58 = vld [vmem:[#allocation2 + $0x115] sm:$0xff]  ;;  %v524_v60 = vpack.c.bf16 %v501_v57, %v500_v56 }
  0x53   : > { %9383 = vmatprep.mubr.msk.bf16.mxu1 %vm11008_vm0, %v14058_v1  ;;  %v454_v61 = vpack.c.bf16 %v431_v59, %v430_v58 }
  0x59   : > { %9292 = vmatmul.mubr.msk.bf16.gmra.mrb[28].mxu0 %vm347_vm1, %v514_v63  ;;  %v503_v63 = vld [vmem:[#allocation2 + $0x12e] sm:$0xff] }
  0x5a   : > { %9384 = vmatmul.mubr.msk.bf16.gmra.mrb[28].mxu1 %vm347_vm1, %v444_v0  ;;  %9295 = vmatprep.mubr.msk.bf16.mxu0 %vm11008_vm0, %v14058_v1  ;;  %v432_v0 = vld [vmem:[#allocation2 + $0x125] sm:$0xff]  ;;  %v525_v3 = vpack.c.bf16 %v503_v63, %v502_v62 }
  0x5b   : > { %9387 = vmatprep.mubr.msk.bf16.mxu1 %vm11008_vm0, %v14058_v1  ;;  %v455_v4 = vpack.c.bf16 %v433_v2, %v432_v0 }
  0x61   : > { %9296 = vmatmul.mubr.msk.bf16.gmra.mrb[32].mxu0 %vm347_vm1, %v515_v6  ;;  %v505_v6 = vld [vmem:[#allocation2 + $0x13e] sm:$0xff] }
  0x62   : > { %9388 = vmatmul.mubr.msk.bf16.gmra.mrb[32].mxu1 %vm347_vm1, %v445_v7  ;;  %9299 = vmatprep.mubr.msk.bf16.mxu0 %vm11008_vm0, %v14058_v1  ;;  %v434_v7 = vld [vmem:[#allocation2 + $0x135] sm:$0xff]  ;;  %v526_v9 = vpack.c.bf16 %v505_v6, %v504_v5 }
  0x63   : > { %9391 = vmatprep.mubr.msk.bf16.mxu1 %vm11008_vm0, %v14058_v1  ;;  %v456_v10 = vpack.c.bf16 %v435_v8, %v434_v7 }
  0x69   : > { %9300 = vmatmul.mubr.msk.bf16.gmra.mrb[36].mxu0 %vm347_vm1, %v516_v12  ;;  %v436_v12 = vld [vmem:[#allocation2 + $0x145] sm:$0xf] }
  0x6a   : > { %9392 = vmatmul.mubr.msk.bf16.gmra.mrb[36].mxu1 %vm347_vm1, %v446_v13  ;;  %9303 = vmatprep.mubr.msk.bf16.mxu0 %vm11008_vm0, %v14058_v1  ;;  %v527_v13 = vpack.c.bf16 %v506_v11, %v506_v11  ;;  %v457_v14 = vpack.c.bf16 %v436_v12, %v436_v12  ;;  %v1527_v11 = vld [vmem:[#allocation2 + $0x9f] sm:$0xff] }
  0x6b   : > { %9395 = vmatprep.mubr.msk.bf16.mxu1 %vm11008_vm0, %v14058_v1 }
  0x71   : > { %9304 = vmatmul.mubr.msk.bf16.gmra.mrb[40].mxu0 %vm347_vm1, %v517_v18  ;;  %v1511_v18 = vld [vmem:[#allocation2 + $0x1f] sm:$0xff] }
  0x72   : > { %9396 = vmatmul.mubr.msk.bf16.gmra.mrb[40].mxu1 %vm347_vm1, %v447_v19  ;;  %9307 = vmatprep.mubr.msk.bf16.mxu0 %vm11008_vm0, %v14058_v1  ;;  %v1152_v19 = vpack.c.bf16 %v1112_v16, %v1111_v15  ;;  %v1551_v21 = vpack.c.bf16 %v1511_v18, %v1510_v17 }
  0x73   : > { %9399 = vmatprep.mubr.msk.bf16.mxu1 %vm11008_vm0, %v14058_v1 }
  0x79   : > { %9308 = vmatmul.mubr.msk.bf16.gmra.mrb[44].mxu0 %vm347_vm1, %v518_v24  ;;  %v1513_v24 = vld [vmem:[#allocation2 + $0x2f] sm:$0xff] }
  0x7a   : > { %9400 = vmatmul.mubr.msk.bf16.gmra.mrb[44].mxu1 %vm347_vm1, %v448_v25  ;;  %9311 = vmatprep.mubr.msk.bf16.mxu0 %vm11008_vm0, %v14058_v1  ;;  %v1552_v25 = vpack.c.bf16 %v1513_v24, %v1512_v23  ;;  %v1528_v23 = vld [vmem:[#allocation2 + $0xa7] sm:$0xff]  ;;  %v1529_v24 = vld [vmem:[#allocation2 + $0xaf] sm:$0xff] }
  0x7b   : > { %9403 = vmatprep.mubr.msk.bf16.mxu1 %vm11008_vm0, %v14058_v1 }
  0x81   : > { %9312 = vmatmul.mubr.msk.bf16.gmra.mrb[48].mxu0 %vm347_vm1, %v519_v30  ;;  %v1553_v30 = vpack.c.bf16 %v1515_v28, %v1514_v27 }
  0x82   : > { %9404 = vmatmul.mubr.msk.bf16.gmra.mrb[48].mxu1 %vm347_vm1, %v449_v31  ;;  %9315 = vmatprep.mubr.msk.bf16.mxu0 %vm11008_vm0, %v14058_v1  ;;  %v8803_v31 = vld [vmem:[%s11102_s16 + $0xa8] sm:$0xff]  }
  0x83   : > { %9407 = vmatprep.mubr.msk.bf16.mxu1 %vm11008_vm0, %v14058_v1  ;;  %v8777_v32 = vunpack.c.l.bf16 %v8803_v31 }
  0x85   : > { %390 = vst.msk [vmem:[#allocation2 + $0x150] sm:$0xff] %vm347_vm1, %v8777_v32 }
  0x89   : > { %9316 = vmatmul.mubr.msk.bf16.gmra.mrb[52].mxu0 %vm347_vm1, %v520_v36  ;;  %v8778_v36 = vunpack.c.h.bf16 %v8803_v31  ;;  %v1560_v31 = vpack.c.bf16 %v1529_v24, %v1528_v23 }
  0x8a   : > { %9408 = vmatmul.mubr.msk.bf16.gmra.mrb[52].mxu1 %vm347_vm1, %v450_v37  ;;  %9319 = vmatprep.mubr.msk.bf16.mxu0 %vm11008_vm0, %v14058_v1  ;;  %v1518_v37 = vld [vmem:[#allocation2 + $0x57] sm:$0xff] }
  0x8b   : > { %9411 = vmatprep.mubr.msk.bf16.mxu1 %vm11008_vm0, %v14058_v1  ;;  %391 = vst.msk [vmem:[#allocation2 + $0x158] sm:$0xff] %vm347_vm1, %v8778_v36  ;;  %v1555_v40 = vpack.c.bf16 %v1519_v38, %v1518_v37  ;;  %v1530_v36 = vld [vmem:[#allocation2 + $0xb7] sm:$0xff]  ;;  %v1531_v37 = vld [vmem:[#allocation2 + $0xbf] sm:$0xff] }
  0x91   : > { %9320 = vmatmul.mubr.msk.bf16.gmra.mrb[56].mxu0 %vm347_vm1, %v521_v42  ;;  %v1520_v42 = vld [vmem:[#allocation2 + $0x67] sm:$0xff] }
  0x92   : > { %9412 = vmatmul.mubr.msk.bf16.gmra.mrb[56].mxu1 %vm347_vm1, %v451_v43  ;;  %9323 = vmatprep.mubr.msk.bf16.mxu0 %vm11008_vm0, %v14058_v1  ;;  %v1521_v43 = vld [vmem:[#allocation2 + $0x6f] sm:$0xff] }
  0x93   : > { %9415 = vmatprep.mubr.msk.bf16.mxu1 %vm11008_vm0, %v14058_v1  ;;  %v1556_v45 = vpack.c.bf16 %v1521_v43, %v1520_v42 }
  0x99   : > { %9324 = vmatmul.mubr.msk.bf16.gmra.mrb[60].mxu0 %vm347_vm1, %v522_v48  ;;  %v1523_v48 = vld [vmem:[#allocation2 + $0x7f] sm:$0xff] }
  0x9a   : > { %9416 = vmatmul.mubr.msk.bf16.gmra.mrb[60].mxu1 %vm347_vm1, %v452_v49  ;;  %9327 = vmatprep.mubr.msk.bf16.mxu0 %vm11008_vm0, %v14058_v1 }
  0x9b   : > { %9419 = vmatprep.mubr.msk.bf16.mxu1 %vm11008_vm0, %v14058_v1 }
  0xa1   : > { %9328 = vmatmul.mubr.msk.bf16.gmra.mrb[64].mxu0 %vm347_vm1, %v523_v54 }
  0xa2   : > { %9420 = vmatmul.mubr.msk.bf16.gmra.mrb[64].mxu1 %vm347_vm1, %v453_v55  ;;  %9331 = vmatprep.mubr.msk.bf16.mxu0 %vm11008_vm0, %v14058_v1  ;;  %v1557_v55 = vpack.c.bf16 %v1523_v48, %v1522_v47 }
  0xa3   : > { %9423 = vmatprep.mubr.msk.bf16.mxu1 %vm11008_vm0, %v14058_v1 }
  0xa9   : > { %9332 = vmatmul.mubr.msk.bf16.gmra.mrb[68].mxu0 %vm347_vm1, %v524_v60  ;;  %v1524_v60 = vld [vmem:[#allocation2 + $0x87] sm:$0xff] }
  0xaa   : > { %9424 = vmatmul.mubr.msk.bf16.gmra.mrb[68].mxu1 %vm347_vm1, %v454_v61  ;;  %9335 = vmatprep.mubr.msk.bf16.mxu0 %vm11008_vm0, %v14058_v1  ;;  %v1525_v61 = vld [vmem:[#allocation2 + $0x8f] sm:$0xff] }
  0xab   : > { %9427 = vmatprep.mubr.msk.bf16.mxu1 %vm11008_vm0, %v14058_v1  ;;  %v1558_v5 = vpack.c.bf16 %v1525_v61, %v1524_v60 }
  0xb1   : > { %9336 = vmatmul.mubr.msk.bf16.gmra.mrb[72].mxu0 %vm347_vm1, %v525_v3 }
  0xb2   : > { %9428 = vmatmul.mubr.msk.bf16.gmra.mrb[72].mxu1 %vm347_vm1, %v455_v4  ;;  %9339 = vmatprep.mubr.msk.bf16.mxu0 %vm11008_vm0, %v14058_v1 }
  0xb3   : > { %9431 = vmatprep.mubr.msk.bf16.mxu1 %vm11008_vm0, %v14058_v1 }
  0xb9   : > { %9340 = vmatmul.mubr.msk.bf16.gmra.mrb[76].mxu0 %vm347_vm1, %v526_v9 }
  0xba   : > { %9432 = vmatmul.mubr.msk.bf16.gmra.mrb[76].mxu1 %vm347_vm1, %v456_v10  ;;  %9343 = vmatprep.mubr.msk.bf16.mxu0 %vm11008_vm0, %v14058_v1  ;;  %v1526_v10 = vld [vmem:[#allocation2 + $0x97] sm:$0xff] }
  0xbb   : > { %9435 = vmatprep.mubr.msk.bf16.mxu1 %vm11008_vm0, %v14058_v1  ;;  %v1559_v18 = vpack.c.bf16 %v1527_v11, %v1526_v10 }
  0xc1   : > { %9344 = vmatmul.mubr.msk.bf16.gmra.mrb[80].mxu0 %vm347_vm1, %v527_v13 }
  0xc2   : > { %9436 = vmatmul.mubr.msk.bf16.gmra.mrb[80].mxu1 %vm347_vm1, %v457_v14  ;;  %9447 = vmatprep.mubr.msk.bf16.mxu0 %vm11008_vm0, %v14058_v1 }
  0xc3   : > { %9539 = vmatprep.mubr.msk.bf16.mxu1 %vm11008_vm0, %v14058_v1 }
  0xc9   : > { %9448 = vmatmul.mubr.msk.bf16.vlgmr.msra.gmra.mrb[84].mxu0 %vm347_vm1, %v1152_v19 }
  0xca   : > { %9624 = vmatpush3.bf16.msra.mxu0 %v10942_v20  ;;  %9540 = vmatmul.mubr.msk.bf16.vlgmr.msra.gmra.mrb[84].mxu1 %vm347_vm1, %v1551_v21 }
  0xcb   : > { %9451 = vmatprep.mubr.msk.bf16.mxu0 %vm11008_vm0, %v14058_v1  ;;  %9543 = vmatprep.mubr.msk.bf16.mxu1 %vm11008_vm0, %v14058_v1 }
  0xcc   : > { %9625 = vmatprep.subr.bf16.mxu0 %v14058_v1  ;;  %9716 = vmatpush3.bf16.msra.mxu1 %v10946_v39 }
  0xcd   : > { %9717 = vmatprep.subr.bf16.mxu1 %v14058_v1 }
  0xce   : > { %9626 = vmatpush3.bf16.msra.mxu0 %v10943_v22 }
  0xcf   : > { %9627 = vmatprep.subr.bf16.mxu0 %v14058_v1 }
  0xd0   : > { %9718 = vmatpush3.bf16.msra.mxu1 %v10947_v41 }
  0xd1   : > { %9452 = vmatmul.mubr.msk.bf16.gmra.mrb[88].mxu0 %vm347_vm1, %v1551_v21  ;;  %9719 = vmatprep.subr.bf16.mxu1 %v14058_v1 }
  0xd2   : > { %9544 = vmatmul.mubr.msk.bf16.gmra.mrb[88].mxu1 %vm347_vm1, %v1552_v25  ;;  %9455 = vmatprep.mubr.msk.bf16.mxu0 %vm11008_vm0, %v14058_v1 }
  0xd3   : > { %9547 = vmatprep.mubr.msk.bf16.mxu1 %vm11008_vm0, %v14058_v1  ;;  %9628 = vmatpush3.bf16.msra.mxu0 %v10944_v26 }
  0xd4   : > { %9629 = vmatprep.subr.bf16.mxu0 %v14058_v1  ;;  %9720 = vmatpush3.bf16.msra.mxu1 %v10948_v44  ;;  %v1561_v44 = vpack.c.bf16 %v1531_v37, %v1530_v36 }
  0xd5   : > { %9721 = vmatprep.subr.bf16.mxu1 %v14058_v1 }
  0xd7   : > { %9630 = vmatpush3.bf16.msra.mxu0 %v10945_v29 }
  0xd8   : > { %9807 = vmatprep.subr.bf16.mxu0 %v14058_v1  ;;  %9722 = vmatpush3.bf16.msra.mxu1 %v10949_v46 }
  0xd9   : > { %9456 = vmatmul.mubr.msk.bf16.gmra.mrb[92].mxu0 %vm347_vm1, %v1552_v25  ;;  %9899 = vmatprep.subr.bf16.mxu1 %v14058_v1 }
  0xda   : > { %9548 = vmatmul.mubr.msk.bf16.gmra.mrb[92].mxu1 %vm347_vm1, %v1553_v30  ;;  %9459 = vmatprep.mubr.msk.bf16.mxu0 %vm11008_vm0, %v14058_v1 }
  0xdb   : > { %9551 = vmatprep.mubr.msk.bf16.mxu1 %vm11008_vm0, %v14058_v1 }
  0xe1   : > { %9460 = vmatmul.mubr.msk.bf16.gmra.mrb[96].mxu0 %vm347_vm1, %v1553_v30 }
  0xe2   : > { %9552 = vmatmul.mubr.msk.bf16.gmra.mrb[96].mxu1 %vm347_vm1, %v1554_v35  ;;  %9463 = vmatprep.mubr.msk.bf16.mxu0 %vm11008_vm0, %v14058_v1 }
  0xe3   : > { %9555 = vmatprep.mubr.msk.bf16.mxu1 %vm11008_vm0, %v14058_v1 }
  0xe9   : > { %9464 = vmatmul.mubr.msk.bf16.gmra.mrb[100].mxu0 %vm347_vm1, %v1554_v35 }
  0xea   : > { %9556 = vmatmul.mubr.msk.bf16.gmra.mrb[100].mxu1 %vm347_vm1, %v1555_v40  ;;  %9467 = vmatprep.mubr.msk.bf16.mxu0 %vm11008_vm0, %v14058_v1 }
  0xeb   : > { %9559 = vmatprep.mubr.msk.bf16.mxu1 %vm11008_vm0, %v14058_v1 }
  0xf1   : > { %9468 = vmatmul.mubr.msk.bf16.gmra.mrb[104].mxu0 %vm347_vm1, %v1555_v40 }
  0xf2   : > { %9560 = vmatmul.mubr.msk.bf16.gmra.mrb[104].mxu1 %vm347_vm1, %v1556_v45  ;;  %9471 = vmatprep.mubr.msk.bf16.mxu0 %vm11008_vm0, %v14058_v1 }
  0xf3   : > { %9563 = vmatprep.mubr.msk.bf16.mxu1 %vm11008_vm0, %v14058_v1 }
  0xf4   : > { %v658_v49 = vpop.f32.mrb[0].mxu0 }
  0xf5   : > { %v945_v50 = vpop.f32.mrb[0].mxu1  ;;  %v9265_v51 = vpop.f32.mrb[1].mxu0 }
  0xf6   : > { %v11403_v52 = vadd.f32 %v945_v50, %v658_v49  ;;  %v9357_v53 = vpop.f32.mrb[1].mxu1  ;;  %v661_v54 = vpop.f32.mrb[2].mxu0  ;;  %v1532_v49 = vld [vmem:[#allocation2 + $0xc7] sm:$0xff]  ;;  %v1533_v50 = vld [vmem:[#allocation2 + $0xcf] sm:$0xff] }
  0xf7   : > { %v948_v56 = vpop.f32.mrb[2].mxu1  ;;  %v9266_v57 = vpop.f32.mrb[3].mxu0 }
  0xf8   : > { %v11405_v58 = vadd.f32 %v948_v56, %v661_v54  ;;  %v9358_v59 = vpop.f32.mrb[3].mxu1 }
  0xf9   : > { %9472 = vmatmul.mubr.msk.bf16.gmra.mrb[108].mxu0 %vm347_vm1, %v1556_v45  ;;  %v1562_v59 = vpack.c.bf16 %v1533_v50, %v1532_v49  ;;  %v1541_v49 = vld [vmem:[#allocation2 + $0x10f] sm:$0xff] }
  0xfa   : > { %9564 = vmatmul.mubr.msk.bf16.gmra.mrb[108].mxu1 %vm347_vm1, %v1557_v55  ;;  %9475 = vmatprep.mubr.msk.bf16.mxu0 %vm11008_vm0, %v14058_v1 }
  0xfb   : > { %9567 = vmatprep.mubr.msk.bf16.mxu1 %vm11008_vm0, %v14058_v1 }
  0xfc   : > { %v666_v62 = vpop.f32.mrb[4].mxu0 }
  0xfd   : > { %v953_v63 = vpop.f32.mrb[4].mxu1  ;;  %v9269_v0 = vpop.f32.mrb[5].mxu0 }
  0xfe   : > { %v11413_v2 = vadd.f32 %v953_v63, %v666_v62  ;;  %v9361_v3 = vpop.f32.mrb[5].mxu1  ;;  %v669_v4 = vpop.f32.mrb[6].mxu0  ;;  %v1534_v0 = vld [vmem:[#allocation2 + $0xd7] sm:$0xff] }
  0xff   : > { %v956_v6 = vpop.f32.mrb[6].mxu1  ;;  %v9270_v7 = vpop.f32.mrb[7].mxu0  ;;  %v1535_v3 = vld [vmem:[#allocation2 + $0xdf] sm:$0xff] }
 0x100   : > { %v11415_v8 = vadd.f32 %v956_v6, %v669_v4  ;;  %v9362_v9 = vpop.f32.mrb[7].mxu1  ;;  %v1563_v11 = vpack.c.bf16 %v1535_v3, %v1534_v0  ;;  %v1542_v3 = vld [vmem:[#allocation2 + $0x117] sm:$0xff] }
 0x101   : > { %9476 = vmatmul.mubr.msk.bf16.gmra.mrb[112].mxu0 %vm347_vm1, %v1557_v55 }
 0x102   : > { %9568 = vmatmul.mubr.msk.bf16.gmra.mrb[112].mxu1 %vm347_vm1, %v1558_v5  ;;  %9479 = vmatprep.mubr.msk.bf16.mxu0 %vm11008_vm0, %v14058_v1 }
 0x103   : > { %9571 = vmatprep.mubr.msk.bf16.mxu1 %vm11008_vm0, %v14058_v1 }
 0x104   : > { %v674_v12 = vpop.f32.mrb[8].mxu0 }
 0x105   : > { %v961_v13 = vpop.f32.mrb[8].mxu1  ;;  %v9273_v14 = vpop.f32.mrb[9].mxu0 }
 0x106   : > { %v11423_v15 = vadd.f32 %v961_v13, %v674_v12  ;;  %v9365_v16 = vpop.f32.mrb[9].mxu1  ;;  %v677_v17 = vpop.f32.mrb[10].mxu0 }
 0x107   : > { %v964_v19 = vpop.f32.mrb[10].mxu1  ;;  %v9274_v20 = vpop.f32.mrb[11].mxu0 }
 0x108   : > { %v11425_v21 = vadd.f32 %v964_v19, %v677_v17  ;;  %v9366_v22 = vpop.f32.mrb[11].mxu1  ;;  %v1536_v17 = vld [vmem:[#allocation2 + $0xe7] sm:$0xff] }
 0x109   : > { %9480 = vmatmul.mubr.msk.bf16.gmra.mrb[116].mxu0 %vm347_vm1, %v1558_v5 }
 0x10a   : > { %9572 = vmatmul.mubr.msk.bf16.gmra.mrb[116].mxu1 %vm347_vm1, %v1559_v18  ;;  %9483 = vmatprep.mubr.msk.bf16.mxu0 %vm11008_vm0, %v14058_v1 }
 0x10b   : > { %9575 = vmatprep.mubr.msk.bf16.mxu1 %vm11008_vm0, %v14058_v1 }
 0x10c   : > { %v682_v25 = vpop.f32.mrb[12].mxu0 }
 0x10d   : > { %v969_v26 = vpop.f32.mrb[12].mxu1  ;;  %v9277_v27 = vpop.f32.mrb[13].mxu0 }
 0x10e   : > { %v11433_v28 = vadd.f32 %v969_v26, %v682_v25  ;;  %v9369_v29 = vpop.f32.mrb[13].mxu1  ;;  %v685_v30 = vpop.f32.mrb[14].mxu0 }
 0x10f   : > { %v972_v32 = vpop.f32.mrb[14].mxu1  ;;  %v9278_v33 = vpop.f32.mrb[15].mxu0 }
 0x110   : > { %v11435_v34 = vadd.f32 %v972_v32, %v685_v30  ;;  %v9370_v35 = vpop.f32.mrb[15].mxu1  ;;  %v1538_v32 = vld [vmem:[#allocation2 + $0xf7] sm:$0xff]  ;;  %v1539_v33 = vld [vmem:[#allocation2 + $0xff] sm:$0xff] }
 0x111   : > { %9484 = vmatmul.mubr.msk.bf16.gmra.mrb[120].mxu0 %vm347_vm1, %v1559_v18  ;;  %v1537_v18 = vld [vmem:[#allocation2 + $0xef] sm:$0xff] }
 0x112   : > { %9576 = vmatmul.mubr.msk.bf16.gmra.mrb[120].mxu1 %vm347_vm1, %v1560_v31  ;;  %9487 = vmatprep.mubr.msk.bf16.mxu0 %vm11008_vm0, %v14058_v1  ;;  %v1564_v26 = vpack.c.bf16 %v1537_v18, %v1536_v17 }
 0x113   : > { %9579 = vmatprep.mubr.msk.bf16.mxu1 %vm11008_vm0, %v14058_v1 }
 0x114   : > { %v690_v38 = vpop.f32.mrb[16].mxu0 }
 0x115   : > { %v977_v39 = vpop.f32.mrb[16].mxu1  ;;  %v9281_v40 = vpop.f32.mrb[17].mxu0 }
 0x116   : > { %v11443_v41 = vadd.f32 %v977_v39, %v690_v38  ;;  %v9373_v42 = vpop.f32.mrb[17].mxu1  ;;  %v693_v43 = vpop.f32.mrb[18].mxu0 }
 0x117   : > { %v980_v45 = vpop.f32.mrb[18].mxu1  ;;  %v9282_v46 = vpop.f32.mrb[19].mxu0  ;;  %v1565_v42 = vpack.c.bf16 %v1539_v33, %v1538_v32 }
 0x118   : > { %v11445_v47 = vadd.f32 %v980_v45, %v693_v43  ;;  %v9374_v48 = vpop.f32.mrb[19].mxu1 }
 0x119   : > { %9488 = vmatmul.mubr.msk.bf16.gmra.mrb[124].mxu0 %vm347_vm1, %v1560_v31  ;;  %v1540_v48 = vld [vmem:[#allocation2 + $0x107] sm:$0xff] }
 0x11a   : > { %9580 = vmatmul.mubr.msk.bf16.gmra.mrb[124].mxu1 %vm347_vm1, %v1561_v44  ;;  %9491 = vmatprep.mubr.msk.bf16.mxu0 %vm11008_vm0, %v14058_v1 }
 0x11b   : > { %9583 = vmatprep.mubr.msk.bf16.mxu1 %vm11008_vm0, %v14058_v1 }
 0x11c   : > { %v698_v51 = vpop.f32.mrb[20].mxu0 }
 0x11d   : > { %v985_v53 = vpop.f32.mrb[20].mxu1  ;;  %v9285_v54 = vpop.f32.mrb[21].mxu0 }
 0x11e   : > { %v11453_v55 = vadd.f32 %v985_v53, %v698_v51  ;;  %v9377_v56 = vpop.f32.mrb[21].mxu1  ;;  %v701_v57 = vpop.f32.mrb[22].mxu0 }
 0x11f   : > { %v988_v60 = vpop.f32.mrb[22].mxu1  ;;  %v9286_v61 = vpop.f32.mrb[23].mxu0 }
 0x120   : > { %v11455_v62 = vadd.f32 %v988_v60, %v701_v57  ;;  %v9378_v63 = vpop.f32.mrb[23].mxu1 }
 0x121   : > { %9492 = vmatmul.mubr.msk.bf16.gmra.mrb[128].mxu0 %vm347_vm1, %v1561_v44 }
 0x122   : > { %9584 = vmatmul.mubr.msk.bf16.gmra.mrb[128].mxu1 %vm347_vm1, %v1562_v59  ;;  %9495 = vmatprep.mubr.msk.bf16.mxu0 %vm11008_vm0, %v14058_v1 }
 0x123   : > { %9587 = vmatprep.mubr.msk.bf16.mxu1 %vm11008_vm0, %v14058_v1 }
 0x124   : > { %v706_v4 = vpop.f32.mrb[24].mxu0 }
 0x125   : > { %v993_v5 = vpop.f32.mrb[24].mxu1  ;;  %v9289_v6 = vpop.f32.mrb[25].mxu0 }
 0x126   : > { %v11463_v7 = vadd.f32 %v993_v5, %v706_v4  ;;  %v9381_v9 = vpop.f32.mrb[25].mxu1  ;;  %v709_v10 = vpop.f32.mrb[26].mxu0  ;;  %v1543_v4 = vld [vmem:[#allocation2 + $0x11f] sm:$0xff] }
 0x127   : > { %v996_v12 = vpop.f32.mrb[26].mxu1  ;;  %v9290_v13 = vpop.f32.mrb[27].mxu0 }
 0x128   : > { %v11465_v14 = vadd.f32 %v996_v12, %v709_v10  ;;  %v9382_v16 = vpop.f32.mrb[27].mxu1  ;;  %v1567_v13 = vpack.c.bf16 %v1543_v4, %v1542_v3 }
 0x129   : > { %9496 = vmatmul.mubr.msk.bf16.gmra.mrb[132].mxu0 %vm347_vm1, %v1562_v59  ;;  %v1566_v59 = vpack.c.bf16 %v1541_v49, %v1540_v48 }
 0x12a   : > { %9588 = vmatmul.mubr.msk.bf16.gmra.mrb[132].mxu1 %vm347_vm1, %v1563_v11  ;;  %9499 = vmatprep.mubr.msk.bf16.mxu0 %vm11008_vm0, %v14058_v1 }
 0x12b   : > { %9591 = vmatprep.mubr.msk.bf16.mxu1 %vm11008_vm0, %v14058_v1 }
 0x12c   : > { %v714_v19 = vpop.f32.mrb[28].mxu0 }
 0x12d   : > { %v1001_v20 = vpop.f32.mrb[28].mxu1  ;;  %v9293_v22 = vpop.f32.mrb[29].mxu0 }
 0x12e   : > { %v11473_v23 = vadd.f32 %v1001_v20, %v714_v19  ;;  %v9385_v24 = vpop.f32.mrb[29].mxu1  ;;  %v717_v25 = vpop.f32.mrb[30].mxu0  ;;  %v1544_v20 = vld [vmem:[#allocation2 + $0x127] sm:$0xff]  ;;  %v1545_v22 = vld [vmem:[#allocation2 + $0x12f] sm:$0xff] }
 0x12f   : > { %v1004_v27 = vpop.f32.mrb[30].mxu1  ;;  %v9294_v29 = vpop.f32.mrb[31].mxu0  ;;  %v1568_v32 = vpack.c.bf16 %v1545_v22, %v1544_v20 }
 0x130   : > { %v11475_v30 = vadd.f32 %v1004_v27, %v717_v25  ;;  %v9386_v31 = vpop.f32.mrb[31].mxu1 }
 0x131   : > { %9500 = vmatmul.mubr.msk.bf16.gmra.mrb[136].mxu0 %vm347_vm1, %v1563_v11 }
 0x132   : > { %9592 = vmatmul.mubr.msk.bf16.gmra.mrb[136].mxu1 %vm347_vm1, %v1564_v26  ;;  %9503 = vmatprep.mubr.msk.bf16.mxu0 %vm11008_vm0, %v14058_v1 }
 0x133   : > { %9595 = vmatprep.mubr.msk.bf16.mxu1 %vm11008_vm0, %v14058_v1 }
 0x134   : > { %v722_v35 = vpop.f32.mrb[32].mxu0 }
 0x135   : > { %v1009_v36 = vpop.f32.mrb[32].mxu1  ;;  %v9297_v37 = vpop.f32.mrb[33].mxu0 }
 0x136   : > { %v11483_v38 = vadd.f32 %v1009_v36, %v722_v35  ;;  %v9389_v39 = vpop.f32.mrb[33].mxu1  ;;  %v725_v40 = vpop.f32.mrb[34].mxu0 }
 0x137   : > { %v1012_v43 = vpop.f32.mrb[34].mxu1  ;;  %v9298_v44 = vpop.f32.mrb[35].mxu0  ;;  %v1546_v39 = vld [vmem:[#allocation2 + $0x137] sm:$0xff] }
 0x138   : > { %v11485_v45 = vadd.f32 %v1012_v43, %v725_v40  ;;  %v9390_v46 = vpop.f32.mrb[35].mxu1  ;;  %v1547_v40 = vld [vmem:[#allocation2 + $0x13f] sm:$0xff] }
 0x139   : > { %9504 = vmatmul.mubr.msk.bf16.gmra.mrb[140].mxu0 %vm347_vm1, %v1564_v26 }
 0x13a   : > { %9596 = vmatmul.mubr.msk.bf16.gmra.mrb[140].mxu1 %vm347_vm1, %v1565_v42  ;;  %9507 = vmatprep.mubr.msk.bf16.mxu0 %vm11008_vm0, %v14058_v1 }
 0x13b   : > { %9599 = vmatprep.mubr.msk.bf16.mxu1 %vm11008_vm0, %v14058_v1 }
 0x13c   : > { %v730_v50 = vpop.f32.mrb[36].mxu0 }
 0x13d   : > { %v1017_v51 = vpop.f32.mrb[36].mxu1  ;;  %v9301_v53 = vpop.f32.mrb[37].mxu0 }
 0x13e   : > { %v11493_v54 = vadd.f32 %v1017_v51, %v730_v50  ;;  %v9393_v56 = vpop.f32.mrb[37].mxu1  ;;  %v733_v57 = vpop.f32.mrb[38].mxu0  ;;  %v1569_v50 = vpack.c.bf16 %v1547_v40, %v1546_v39  ;;  %v1909_v40 = vld [vmem:[#allocation2 + $0x18] sm:$0xff] }
 0x13f   : > { %v1020_v60 = vpop.f32.mrb[38].mxu1  ;;  %v9302_v61 = vpop.f32.mrb[39].mxu0 }
 0x140   : > { %v11495_v63 = vadd.f32 %v1020_v60, %v733_v57  ;;  %v9394_v0 = vpop.f32.mrb[39].mxu1  ;;  %v1549_v60 = vld [vmem:[#allocation2 + $0x14f] sm:$0xff] }
 0x141   : > { %9508 = vmatmul.mubr.msk.bf16.gmra.mrb[144].mxu0 %vm347_vm1, %v1565_v42 }
 0x142   : > { %9600 = vmatmul.mubr.msk.bf16.gmra.mrb[144].mxu1 %vm347_vm1, %v1566_v59  ;;  %9511 = vmatprep.mubr.msk.bf16.mxu0 %vm11008_vm0, %v14058_v1 }
 0x143   : > { %9603 = vmatprep.mubr.msk.bf16.mxu1 %vm11008_vm0, %v14058_v1 }
 0x144   : > { %v738_v5 = vpop.f32.mrb[40].mxu0 }
 0x145   : > { %v1025_v6 = vpop.f32.mrb[40].mxu1  ;;  %v9305_v9 = vpop.f32.mrb[41].mxu0 }
 0x146   : > { %v11503_v10 = vadd.f32 %v1025_v6, %v738_v5  ;;  %v9397_v11 = vpop.f32.mrb[41].mxu1  ;;  %v741_v12 = vpop.f32.mrb[42].mxu0 }
 0x147   : > { %v1028_v16 = vpop.f32.mrb[42].mxu1  ;;  %v9306_v17 = vpop.f32.mrb[43].mxu0 }
 0x148   : > { %v11505_v18 = vadd.f32 %v1028_v16, %v741_v12  ;;  %v9398_v19 = vpop.f32.mrb[43].mxu1  ;;  %v1151_v17 = vld [vmem:[#allocation2 + $0x147] sm:$0xf] }
 0x149   : > { %9512 = vmatmul.mubr.msk.bf16.gmra.mrb[148].mxu0 %vm347_vm1, %v1566_v59  ;;  %v1548_v59 = vld [vmem:[#allocation2 + $0x147] sm:$0xff]  ;;  %v1550_v19 = vld [vmem:[#allocation2 + $0x157] sm:$0xf] }
 0x14a   : > { %9604 = vmatmul.mubr.msk.bf16.gmra.mrb[148].mxu1 %vm347_vm1, %v1567_v13  ;;  %9515 = vmatprep.mubr.msk.bf16.mxu0 %vm11008_vm0, %v14058_v1  ;;  %v1570_v9 = vpack.c.bf16 %v1549_v60, %v1548_v59  ;;  %v10950_v60 = vld [vmem:[%s14053_s2 + $0xc0] sm:$0xff]  }
 0x14b   : > { %9607 = vmatprep.mubr.msk.bf16.mxu1 %vm11008_vm0, %v14058_v1 }
 0x14c   : > { %v746_v24 = vpop.f32.mrb[44].mxu0 }
 0x14d   : > { %v1033_v25 = vpop.f32.mrb[44].mxu1  ;;  %v9309_v26 = vpop.f32.mrb[45].mxu0 }
 0x14e   : > { %v11513_v27 = vadd.f32 %v1033_v25, %v746_v24  ;;  %v9401_v29 = vpop.f32.mrb[45].mxu1  ;;  %v749_v31 = vpop.f32.mrb[46].mxu0  ;;  %v1172_v25 = vpack.c.bf16 %v1151_v17, %v1151_v17  ;;  %v2311_v17 = vld [vmem:[#allocation2 + $0x31] sm:$0xff] }
 0x14f   : > { %v1036_v33 = vpop.f32.mrb[46].mxu1  ;;  %v9310_v35 = vpop.f32.mrb[47].mxu0 }
 0x150   : > { %v11515_v36 = vadd.f32 %v1036_v33, %v749_v31  ;;  %v9402_v37 = vpop.f32.mrb[47].mxu1 }
 0x151   : > { %9516 = vmatmul.mubr.msk.bf16.gmra.mrb[152].mxu0 %vm347_vm1, %v1567_v13 }
 0x152   : > { %9608 = vmatmul.mubr.msk.bf16.gmra.mrb[152].mxu1 %vm347_vm1, %v1568_v32  ;;  %9519 = vmatprep.mubr.msk.bf16.mxu0 %vm11008_vm0, %v14058_v1 }
 0x153   : > { %9611 = vmatprep.mubr.msk.bf16.mxu1 %vm11008_vm0, %v14058_v1 }
 0x154   : > { %v754_v42 = vpop.f32.mrb[48].mxu0 }
 0x155   : > { %v1041_v43 = vpop.f32.mrb[48].mxu1  ;;  %v9313_v44 = vpop.f32.mrb[49].mxu0 }
 0x156   : > { %v11523_v46 = vadd.f32 %v1041_v43, %v754_v42  ;;  %v9405_v48 = vpop.f32.mrb[49].mxu1  ;;  %v757_v49 = vpop.f32.mrb[50].mxu0  ;;  %v1910_v42 = vld [vmem:[#allocation2 + $0x20] sm:$0xff] }
 0x157   : > { %v1044_v51 = vpop.f32.mrb[50].mxu1  ;;  %v9314_v53 = vpop.f32.mrb[51].mxu0  ;;  %v2308_v43 = vld [vmem:[#allocation2 + $0x19] sm:$0xff]  ;;  %v2309_v44 = vld [vmem:[#allocation2 + $0x21] sm:$0xff] }
 0x158   : > { %v11525_v56 = vadd.f32 %v1044_v51, %v757_v49  ;;  %v9406_v57 = vpop.f32.mrb[51].mxu1  ;;  %v1950_v51 = vpack.c.bf16 %v1910_v42, %v1909_v40 }
 0x159   : > { %9520 = vmatmul.mubr.msk.bf16.gmra.mrb[156].mxu0 %vm347_vm1, %v1568_v32  ;;  %v1571_v32 = vpack.c.bf16 %v1550_v19, %v1550_v19 }
 0x15a   : > { %9612 = vmatmul.mubr.msk.bf16.gmra.mrb[156].mxu1 %vm347_vm1, %v1569_v50  ;;  %9523 = vmatprep.mubr.msk.bf16.mxu0 %vm11008_vm0, %v14058_v1 }
 0x15b   : > { %9615 = vmatprep.mubr.msk.bf16.mxu1 %vm11008_vm0, %v14058_v1 }
 0x15c   : > { %v762_v61 = vpop.f32.mrb[52].mxu0 }
 0x15d   : > { %v1049_v0 = vpop.f32.mrb[52].mxu1  ;;  %v9317_v3 = vpop.f32.mrb[53].mxu0 }
 0x15e   : > { %v11533_v4 = vadd.f32 %v1049_v0, %v762_v61  ;;  %v9409_v5 = vpop.f32.mrb[53].mxu1  ;;  %v765_v6 = vpop.f32.mrb[54].mxu0  ;;  %v2349_v61 = vpack.c.bf16 %v2309_v44, %v2308_v43  ;;  %v1913_v43 = vld [vmem:[#allocation2 + $0x38] sm:$0xff]  ;;  %v1914_v44 = vld [vmem:[#allocation2 + $0x40] sm:$0xff] }
 0x15f   : > { %v1052_v11 = vpop.f32.mrb[54].mxu1  ;;  %v9318_v12 = vpop.f32.mrb[55].mxu0 }
 0x160   : > { %v11535_v13 = vadd.f32 %v1052_v11, %v765_v6  ;;  %v9410_v16 = vpop.f32.mrb[55].mxu1  ;;  %v1912_v11 = vld [vmem:[#allocation2 + $0x30] sm:$0xff]  ;;  %v10951_v12 = vld [vmem:[%s14053_s2 + $0xc8] sm:$0xff]  }
 0x161   : > { %9524 = vmatmul.mubr.msk.bf16.gmra.mrb[160].mxu0 %vm347_vm1, %v1569_v50  ;;  %v2310_v16 = vld [vmem:[#allocation2 + $0x29] sm:$0xff] }
 0x162   : > { %9616 = vmatmul.mubr.msk.bf16.gmra.mrb[160].mxu1 %vm347_vm1, %v1570_v9  ;;  %9527 = vmatprep.mubr.msk.bf16.mxu0 %vm11008_vm0, %v14058_v1  ;;  %v1911_v9 = vld [vmem:[#allocation2 + $0x28] sm:$0xff] }
 0x163   : > { %9619 = vmatprep.mubr.msk.bf16.mxu1 %vm11008_vm0, %v14058_v1 }
 0x164   : > { %v770_v20 = vpop.f32.mrb[56].mxu0 }
 0x165   : > { %v1057_v22 = vpop.f32.mrb[56].mxu1  ;;  %v9321_v24 = vpop.f32.mrb[57].mxu0 }
 0x166   : > { %v11543_v26 = vadd.f32 %v1057_v22, %v770_v20  ;;  %v9413_v29 = vpop.f32.mrb[57].mxu1  ;;  %v773_v31 = vpop.f32.mrb[58].mxu0  ;;  %v1951_v24 = vpack.c.bf16 %v1912_v11, %v1911_v9 }
 0x167   : > { %v1060_v33 = vpop.f32.mrb[58].mxu1  ;;  %v9322_v35 = vpop.f32.mrb[59].mxu0 }
 0x168   : > { %v11545_v37 = vadd.f32 %v1060_v33, %v773_v31  ;;  %v9414_v39 = vpop.f32.mrb[59].mxu1 }
 0x169   : > { %9528 = vmatmul.mubr.msk.bf16.gmra.mrb[164].mxu0 %vm347_vm1, %v1172_v25  ;;  %v10952_v39 = vld [vmem:[%s14053_s2 + $0xd0] sm:$0xff]  }
 0x16a   : > { %9620 = vmatmul.mubr.msk.bf16.gmra.mrb[164].mxu1 %vm347_vm1, %v1571_v32  ;;  %9631 = vmatprep.mubr.msk.bf16.mxu0 %vm11008_vm0, %v14058_v1  ;;  %v11572_v32 = vpack.c.bf16 %v2311_v17, %v2310_v16  ;;  %v1915_v17 = vld [vmem:[#allocation2 + $0x48] sm:$0xff] }
 0x16b   : > { %9723 = vmatprep.mubr.msk.bf16.mxu1 %vm11008_vm0, %v14058_v1 }
 0x16c   : > { %v778_v48 = vpop.f32.mrb[60].mxu0 }
 0x16d   : > { %v1065_v49 = vpop.f32.mrb[60].mxu1  ;;  %v9325_v50 = vpop.f32.mrb[61].mxu0 }
 0x16e   : > { %v11553_v53 = vadd.f32 %v1065_v49, %v778_v48  ;;  %v9417_v57 = vpop.f32.mrb[61].mxu1  ;;  %v781_v59 = vpop.f32.mrb[62].mxu0  ;;  %v2312_v48 = vld [vmem:[#allocation2 + $0x39] sm:$0xff]  ;;  %v2313_v49 = vld [vmem:[#allocation2 + $0x41] sm:$0xff] }
 0x16f   : > { %v1068_v0 = vpop.f32.mrb[62].mxu1  ;;  %v9326_v3 = vpop.f32.mrb[63].mxu0  ;;  %v10953_v50 = vld [vmem:[%s14053_s2 + $0xd8] sm:$0xff]  }
 0x170   : > { %v11558_v5 = vadd.f32 %v1068_v0, %v781_v59  ;;  %v9418_v6 = vpop.f32.mrb[63].mxu1 }
 0x171   : > { %9632 = vmatmul.mubr.msk.bf16.vlgmr.msra.gmra.mrb[168].mxu0 %vm347_vm1, %v1950_v51  ;;  %v11593_v6 = vpack.c.bf16 %v2313_v49, %v2312_v48 }
 0x172   : > { %9808 = vmatpush3.bf16.msra.mxu0 %v10950_v60  ;;  %9724 = vmatmul.mubr.msk.bf16.vlgmr.msra.gmra.mrb[168].mxu1 %vm347_vm1, %v2349_v61  ;;  %v1952_v60 = vpack.c.bf16 %v1914_v44, %v1913_v43 }
 0x173   : > { %9635 = vmatprep.mubr.msk.bf16.mxu0 %vm11008_vm0, %v14058_v1  ;;  %9727 = vmatprep.mubr.msk.bf16.mxu1 %vm11008_vm0, %v14058_v1 }
 0x174   : > { %v786_v19 = vpop.f32.mrb[64].mxu0  ;;  %9809 = vmatprep.subr.bf16.mxu0 %v14058_v1 }
 0x175   : > { %v1073_v20 = vpop.f32.mrb[64].mxu1  ;;  %v9329_v22 = vpop.f32.mrb[65].mxu0 }
 0x176   : > { %v11570_v25 = vadd.f32 %v1073_v20, %v786_v19  ;;  %v9421_v29 = vpop.f32.mrb[65].mxu1  ;;  %v789_v31 = vpop.f32.mrb[66].mxu0  ;;  %9810 = vmatpush3.bf16.msra.mxu0 %v10951_v12  ;;  %v1916_v19 = vld [vmem:[#allocation2 + $0x50] sm:$0xff] }
 0x177   : > { %v1076_v33 = vpop.f32.mrb[66].mxu1  ;;  %v9330_v35 = vpop.f32.mrb[67].mxu0  ;;  %9811 = vmatprep.subr.bf16.mxu0 %v14058_v1  ;;  %v2314_v20 = vld [vmem:[#allocation2 + $0x49] sm:$0xff]  ;;  %v2315_v22 = vld [vmem:[#allocation2 + $0x51] sm:$0xff] }
 0x178   : > { %v11578_v40 = vadd.f32 %v1076_v33, %v789_v31  ;;  %v9422_v42 = vpop.f32.mrb[67].mxu1  ;;  %v1953_v33 = vpack.c.bf16 %v1916_v19, %v1915_v17  ;;  %v11607_v43 = vpack.c.bf16 %v2315_v22, %v2314_v20 }
 0x179   : > { %9636 = vmatmul.mubr.msk.bf16.gmra.mrb[172].mxu0 %vm347_vm1, %v1951_v24 }
 0x17a   : > { %9728 = vmatmul.mubr.msk.bf16.gmra.mrb[172].mxu1 %vm347_vm1, %v11572_v32  ;;  %9639 = vmatprep.mubr.msk.bf16.mxu0 %vm11008_vm0, %v14058_v1 }
 0x17b   : > { %9731 = vmatprep.mubr.msk.bf16.mxu1 %vm11008_vm0, %v14058_v1  ;;  %9812 = vmatpush3.bf16.msra.mxu0 %v10952_v39 }
 0x17c   : > { %v794_v51 = vpop.f32.mrb[68].mxu0  ;;  %9813 = vmatprep.subr.bf16.mxu0 %v14058_v1 }
 0x17d   : > { %v1081_v57 = vpop.f32.mrb[68].mxu1  ;;  %v9333_v59 = vpop.f32.mrb[69].mxu0 }
 0x17e   : > { %v11591_v61 = vadd.f32 %v1081_v57, %v794_v51  ;;  %v9425_v0 = vpop.f32.mrb[69].mxu1  ;;  %v797_v3 = vpop.f32.mrb[70].mxu0  ;;  %v1917_v51 = vld [vmem:[#allocation2 + $0x58] sm:$0xff]  ;;  %v1918_v57 = vld [vmem:[#allocation2 + $0x60] sm:$0xff] }
 0x17f   : > { %v1084_v9 = vpop.f32.mrb[70].mxu1  ;;  %v9334_v11 = vpop.f32.mrb[71].mxu0  ;;  %9814 = vmatpush3.bf16.msra.mxu0 %v10953_v50  ;;  %v2316_v59 = vld [vmem:[#allocation2 + $0x59] sm:$0xff] }
 0x180   : > { %v11595_v12 = vadd.f32 %v1084_v9, %v797_v3  ;;  %v9426_v16 = vpop.f32.mrb[71].mxu1  ;;  %9991 = vmatprep.subr.bf16.mxu0 %v14058_v1  ;;  %v10954_v0 = vld [vmem:[%s14053_s2 + $0xe0] sm:$0xff]  }
 0x181   : > { %9640 = vmatmul.mubr.msk.bf16.gmra.mrb[176].mxu0 %vm347_vm1, %v1952_v60  ;;  %v2317_v60 = vld [vmem:[#allocation2 + $0x61] sm:$0xff]  ;;  %v1954_v16 = vpack.c.bf16 %v1918_v57, %v1917_v51  ;;  %9900 = vmatpush3.bf16.msra.mxu1 %v10954_v0  ;;  %v10956_v51 = vld [vmem:[%s14053_s2 + $0xf0] sm:$0xff]  }
 0x182   : > { %9732 = vmatmul.mubr.msk.bf16.gmra.mrb[176].mxu1 %vm347_vm1, %v11593_v6  ;;  %9643 = vmatprep.mubr.msk.bf16.mxu0 %vm11008_vm0, %v14058_v1  ;;  %v11623_v22 = vpack.c.bf16 %v2317_v60, %v2316_v59 }
 0x183   : > { %9735 = vmatprep.mubr.msk.bf16.mxu1 %vm11008_vm0, %v14058_v1  ;;  %9901 = vmatprep.subr.bf16.mxu1 %v14058_v1 }
 0x184   : > { %v802_v24 = vpop.f32.mrb[72].mxu0 }
 0x185   : > { %v1089_v29 = vpop.f32.mrb[72].mxu1  ;;  %v9337_v31 = vpop.f32.mrb[73].mxu0 }
 0x186   : > { %v11605_v35 = vadd.f32 %v1089_v29, %v802_v24  ;;  %v9429_v39 = vpop.f32.mrb[73].mxu1  ;;  %v805_v42 = vpop.f32.mrb[74].mxu0  ;;  %v10955_v31 = vld [vmem:[%s14053_s2 + $0xe8] sm:$0xff]  }
 0x187   : > { %v1092_v44 = vpop.f32.mrb[74].mxu1  ;;  %v9338_v48 = vpop.f32.mrb[75].mxu0  ;;  %9902 = vmatpush3.bf16.msra.mxu1 %v10955_v31  ;;  %v1921_v31 = vld [vmem:[#allocation2 + $0x78] sm:$0xff] }
 0x188   : > { %v11609_v49 = vadd.f32 %v1092_v44, %v805_v42  ;;  %v9430_v50 = vpop.f32.mrb[75].mxu1  ;;  %v1919_v42 = vld [vmem:[#allocation2 + $0x68] sm:$0xff]  ;;  %v1920_v44 = vld [vmem:[#allocation2 + $0x70] sm:$0xff]  ;;  %9903 = vmatprep.subr.bf16.mxu1 %v14058_v1 }
 0x189   : > { %9644 = vmatmul.mubr.msk.bf16.gmra.mrb[180].mxu0 %vm347_vm1, %v1953_v33  ;;  %v2318_v48 = vld [vmem:[#allocation2 + $0x69] sm:$0xff]  ;;  %v2319_v50 = vld [vmem:[#allocation2 + $0x71] sm:$0xff]  ;;  %v1955_v0 = vpack.c.bf16 %v1920_v44, %v1919_v42  ;;  %v2320_v42 = vld [vmem:[#allocation2 + $0x79] sm:$0xff] }
 0x18a   : > { %9736 = vmatmul.mubr.msk.bf16.gmra.mrb[180].mxu1 %vm347_vm1, %v11607_v43  ;;  %9647 = vmatprep.mubr.msk.bf16.mxu0 %vm11008_vm0, %v14058_v1  ;;  %v2321_v44 = vld [vmem:[#allocation2 + $0x81] sm:$0xff] }
 0x18b   : > { %9739 = vmatprep.mubr.msk.bf16.mxu1 %vm11008_vm0, %v14058_v1  ;;  %9904 = vmatpush3.bf16.msra.mxu1 %v10956_v51 }
 0x18c   : > { %v810_v3 = vpop.f32.mrb[76].mxu0  ;;  %9905 = vmatprep.subr.bf16.mxu1 %v14058_v1 }
 0x18d   : > { %v1097_v9 = vpop.f32.mrb[76].mxu1  ;;  %v9341_v11 = vpop.f32.mrb[77].mxu0 }
 0x18e   : > { %v11621_v17 = vadd.f32 %v1097_v9, %v810_v3  ;;  %v9433_v19 = vpop.f32.mrb[77].mxu1  ;;  %v813_v20 = vpop.f32.mrb[78].mxu0 }
 0x18f   : > { %v1100_v24 = vpop.f32.mrb[78].mxu1  ;;  %v9342_v29 = vpop.f32.mrb[79].mxu0 }
 0x190   : > { %v11629_v33 = vadd.f32 %v1100_v24, %v813_v20  ;;  %v9434_v39 = vpop.f32.mrb[79].mxu1  ;;  %v10957_v24 = vld [vmem:[%s14053_s2 + $0xf8] sm:$0xff]  }
 0x191   : > { %9648 = vmatmul.mubr.msk.bf16.gmra.mrb[184].mxu0 %vm347_vm1, %v1954_v16  ;;  %v11644_v16 = vpack.c.bf16 %v2319_v50, %v2318_v48  ;;  %9906 = vmatpush3.bf16.msra.mxu1 %v10957_v24  ;;  %v1922_v39 = vld [vmem:[#allocation2 + $0x80] sm:$0xff] }
 0x192   : > { %9740 = vmatmul.mubr.msk.bf16.gmra.mrb[184].mxu1 %vm347_vm1, %v11623_v22  ;;  %9651 = vmatprep.mubr.msk.bf16.mxu0 %vm11008_vm0, %v14058_v1 }
 0x193   : > { %9743 = vmatprep.mubr.msk.bf16.mxu1 %vm11008_vm0, %v14058_v1  ;;  %10083 = vmatprep.subr.bf16.mxu1 %v14058_v1 }
 0x194   : > { %v818_v57 = vpop.f32.mrb[80].mxu0 }
 0x195   : > { %v1105_v59 = vpop.f32.mrb[80].mxu1  ;;  %v9345_v60 = vpop.f32.mrb[81].mxu0 }
 0x196   : > { %v11642_v3 = vadd.f32 %v1105_v59, %v818_v57  ;;  %v821_v9 = vpop.f32.mrb[82].mxu0  ;;  %v9437_v11 = vpop.f32.mrb[81].mxu1  ;;  %v1956_v59 = vpack.c.bf16 %v1922_v39, %v1921_v31  ;;  %v1924_v31 = vld [vmem:[#allocation2 + $0x90] sm:$0xff] }
 0x197   : > { %v9346_v19 = vpop.f32.mrb[83].mxu0  ;;  %v1108_v20 = vpop.f32.mrb[82].mxu1  ;;  %v11659_v9 = vpack.c.bf16 %v2321_v44, %v2320_v42  ;;  %v2323_v39 = vld [vmem:[#allocation2 + $0x91] sm:$0xff] }
 0x198   : > { %14060 = vst [vmem:[#allocation4_spill] sm:$0xff] %v11642_v3  ;;  %v9438_v29 = vpop.f32.mrb[83].mxu1 }
 0x199   : > { %9652 = vmatmul.mubr.msk.bf16.gmra.mrb[188].mxu0 %vm347_vm1, %v1955_v0 }
 0x19a   : > { %9744 = vmatmul.mubr.msk.bf16.gmra.mrb[188].mxu1 %vm347_vm1, %v11644_v16  ;;  %9655 = vmatprep.mubr.msk.bf16.mxu0 %vm11008_vm0, %v14058_v1 }
 0x19b   : > { %9747 = vmatprep.mubr.msk.bf16.mxu1 %vm11008_vm0, %v14058_v1 }
 0x19c   : > { %v1303_v48 = vpop.f32.mrb[84].mxu0 }
 0x19d   : > { %v1469_v50 = vadd.f32 %v1303_v48, %v11403_v52  ;;  %v9449_v51 = vpop.f32.mrb[85].mxu0  ;;  %v1702_v57 = vpop.f32.mrb[84].mxu1  ;;  %v1923_v52 = vld [vmem:[#allocation2 + $0x88] sm:$0xff] }
 0x19e   : > { %v1306_v60 = vpop.f32.mrb[86].mxu0  ;;  %v9541_v0 = vpop.f32.mrb[85].mxu1  ;;  %v1957_v51 = vpack.c.bf16 %v1924_v31, %v1923_v52  ;;  %v1925_v52 = vld [vmem:[#allocation2 + $0x98] sm:$0xff]  ;;  %v1926_v31 = vld [vmem:[#allocation2 + $0xa0] sm:$0xff] }
 0x19f   : > { %v1470_v11 = vadd.f32 %v1306_v60, %v11405_v58  ;;  %v11662_v19 = vadd.f32 %v1702_v57, %v1469_v50  ;;  %v9450_v20 = vpop.f32.mrb[87].mxu0  ;;  %v1705_v24 = vpop.f32.mrb[86].mxu1  ;;  %v2322_v58 = vld [vmem:[#allocation2 + $0x89] sm:$0xff] }
 0x1a0   : > { %v9542_v29 = vpop.f32.mrb[87].mxu1  ;;  %v11674_v60 = vpack.c.bf16 %v2323_v39, %v2322_v58  ;;  %v2325_v58 = vld [vmem:[#allocation2 + $0xa1] sm:$0xff] }
 0x1a1   : > { %v11664_v3 = vadd.f32 %v1705_v24, %v1470_v11  ;;  %9656 = vmatmul.mubr.msk.bf16.gmra.mrb[192].mxu0 %vm347_vm1, %v1956_v59 }
 0x1a2   : > { %9748 = vmatmul.mubr.msk.bf16.gmra.mrb[192].mxu1 %vm347_vm1, %v11659_v9  ;;  %9659 = vmatprep.mubr.msk.bf16.mxu0 %vm11008_vm0, %v14058_v1 }
 0x1a3   : > { %9751 = vmatprep.mubr.msk.bf16.mxu1 %vm11008_vm0, %v14058_v1 }
 0x1a4   : > { %v1311_v42 = vpop.f32.mrb[88].mxu0 }
 0x1a5   : > { %v1471_v44 = vadd.f32 %v1311_v42, %v11413_v2  ;;  %v9453_v48 = vpop.f32.mrb[89].mxu0  ;;  %v1710_v50 = vpop.f32.mrb[88].mxu1  ;;  %v14063_v2 = vmov 0.0  }
 0x1a6   : > { %v1314_v57 = vpop.f32.mrb[90].mxu0  ;;  %v9545_v59 = vpop.f32.mrb[89].mxu1 }
 0x1a7   : > { %v1472_v0 = vadd.f32 %v1314_v57, %v11415_v8  ;;  %v11677_v11 = vadd.f32 %v1710_v50, %v1471_v44  ;;  %v9454_v20 = vpop.f32.mrb[91].mxu0  ;;  %v1713_v24 = vpop.f32.mrb[90].mxu1  ;;  %v2324_v8 = vld [vmem:[#allocation2 + $0x99] sm:$0xff]  ;;  %v1958_v50 = vpack.c.bf16 %v1926_v31, %v1925_v52  ;;  %v1928_v52 = vld [vmem:[#allocation2 + $0xb0] sm:$0xff] }
 0x1a8   : > { %v9546_v29 = vpop.f32.mrb[91].mxu1  ;;  %v11689_v59 = vpack.c.bf16 %v2325_v58, %v2324_v8  ;;  %v2327_v31 = vld [vmem:[#allocation2 + $0xb1] sm:$0xff] }
 0x1a9   : > { %14061 = vst [vmem:[#allocation5_spill] sm:$0xff] %v11677_v11  ;;  %v11679_v1 = vadd.f32 %v1713_v24, %v1472_v0  ;;  %9660 = vmatmul.mubr.msk.bf16.gmra.mrb[196].mxu0 %vm347_vm1, %v1957_v51 }
 0x1aa   : > { %9752 = vmatmul.mubr.msk.bf16.gmra.mrb[196].mxu1 %vm347_vm1, %v11674_v60  ;;  %9663 = vmatprep.mubr.msk.bf16.mxu0 %vm11008_vm0, %v14063_v2 }
 0x1ab   : > { %14062 = vst [vmem:[#allocation6_spill] sm:$0xff] %v11679_v1  ;;  %9755 = vmatprep.mubr.msk.bf16.mxu1 %vm11008_vm0, %v14063_v2 }
 0x1ac   : > { %v1319_v39 = vpop.f32.mrb[92].mxu0 }
 0x1ad   : > { %v1473_v42 = vadd.f32 %v1319_v39, %v11423_v15  ;;  %v9457_v44 = vpop.f32.mrb[93].mxu0  ;;  %v1718_v48 = vpop.f32.mrb[92].mxu1  ;;  %v1927_v15 = vld [vmem:[#allocation2 + $0xa8] sm:$0xff] }
 0x1ae   : > { %v1322_v51 = vpop.f32.mrb[94].mxu0  ;;  %v9549_v57 = vpop.f32.mrb[93].mxu1 }
 0x1af   : > { %v1474_v0 = vadd.f32 %v1322_v51, %v11425_v21  ;;  %v11692_v20 = vadd.f32 %v1718_v48, %v1473_v42  ;;  %v9458_v24 = vpop.f32.mrb[95].mxu0  ;;  %v1721_v29 = vpop.f32.mrb[94].mxu1  ;;  %v2326_v21 = vld [vmem:[#allocation2 + $0xa9] sm:$0xff]  ;;  %v1959_v42 = vpack.c.bf16 %v1928_v52, %v1927_v15  ;;  %v1930_v15 = vld [vmem:[#allocation2 + $0xc0] sm:$0xff] }
 0x1b0   : > { %v9550_v1 = vpop.f32.mrb[95].mxu1  ;;  %v2329_v52 = vld [vmem:[#allocation2 + $0xc1] sm:$0xff] }
 0x1b1   : > { %v11694_v11 = vadd.f32 %v1721_v29, %v1474_v0  ;;  %9664 = vmatmul.mubr.msk.bf16.gmra.mrb[200].mxu0 %vm347_vm1, %v1958_v50  ;;  %v11704_v50 = vpack.c.bf16 %v2327_v31, %v2326_v21 }
 0x1b2   : > { %9756 = vmatmul.mubr.msk.bf16.gmra.mrb[200].mxu1 %vm347_vm1, %v11689_v59  ;;  %9667 = vmatprep.mubr.msk.bf16.mxu0 %vm11008_vm0, %v14063_v2 }
 0x1b3   : > { %14064 = vst [vmem:[#allocation7_spill] sm:$0xff] %v11694_v11  ;;  %9759 = vmatprep.mubr.msk.bf16.mxu1 %vm11008_vm0, %v14063_v2 }
 0x1b4   : > { %v1327_v8 = vpop.f32.mrb[96].mxu0 }
 0x1b5   : > { %v1475_v1 = vadd.f32 %v1327_v8, %v11433_v28  ;;  %v9461_v58 = vpop.f32.mrb[97].mxu0  ;;  %v1726_v39 = vpop.f32.mrb[96].mxu1  ;;  %v1929_v28 = vld [vmem:[#allocation2 + $0xb8] sm:$0xff] }
 0x1b6   : > { %v1330_v44 = vpop.f32.mrb[98].mxu0  ;;  %v9553_v48 = vpop.f32.mrb[97].mxu1  ;;  %v1960_v58 = vpack.c.bf16 %v1930_v15, %v1929_v28  ;;  %v1932_v28 = vld [vmem:[#allocation2 + $0xd0] sm:$0xff] }
 0x1b7   : > { %v1476_v51 = vadd.f32 %v1330_v44, %v11435_v34  ;;  %v11707_v57 = vadd.f32 %v1726_v39, %v1475_v1  ;;  %v9462_v0 = vpop.f32.mrb[99].mxu0  ;;  %v1729_v24 = vpop.f32.mrb[98].mxu1  ;;  %v2328_v34 = vld [vmem:[#allocation2 + $0xb9] sm:$0xff]  ;;  %v2331_v15 = vld [vmem:[#allocation2 + $0xd1] sm:$0xff] }
 0x1b8   : > { %v9554_v29 = vpop.f32.mrb[99].mxu1  ;;  %v11719_v44 = vpack.c.bf16 %v2329_v52, %v2328_v34 }
 0x1b9   : > { %v11709_v11 = vadd.f32 %v1729_v24, %v1476_v51  ;;  %9668 = vmatmul.mubr.msk.bf16.gmra.mrb[204].mxu0 %vm347_vm1, %v1959_v42 }
 0x1ba   : > { %9760 = vmatmul.mubr.msk.bf16.gmra.mrb[204].mxu1 %vm347_vm1, %v11704_v50  ;;  %9671 = vmatprep.mubr.msk.bf16.mxu0 %vm11008_vm0, %v14063_v2 }
 0x1bb   : > { %14065 = vst [vmem:[#allocation8_spill] sm:$0xff] %v11709_v11  ;;  %9763 = vmatprep.mubr.msk.bf16.mxu1 %vm11008_vm0, %v14063_v2 }
 0x1bc   : > { %v1335_v21 = vpop.f32.mrb[100].mxu0 }
 0x1bd   : > { %v1477_v31 = vadd.f32 %v1335_v21, %v11443_v41  ;;  %v9465_v8 = vpop.f32.mrb[101].mxu0  ;;  %v1734_v1 = vpop.f32.mrb[100].mxu1  ;;  %v1931_v41 = vld [vmem:[#allocation2 + $0xc8] sm:$0xff] }
 0x1be   : > { %v1338_v39 = vpop.f32.mrb[102].mxu0  ;;  %v9557_v42 = vpop.f32.mrb[101].mxu1  ;;  %v1961_v8 = vpack.c.bf16 %v1932_v28, %v1931_v41  ;;  %v1934_v41 = vld [vmem:[#allocation2 + $0xe0] sm:$0xff] }
 0x1bf   : > { %v1478_v48 = vadd.f32 %v1338_v39, %v11445_v47  ;;  %v11722_v51 = vadd.f32 %v1734_v1, %v1477_v31  ;;  %v9466_v0 = vpop.f32.mrb[103].mxu0  ;;  %v1737_v24 = vpop.f32.mrb[102].mxu1  ;;  %v2330_v47 = vld [vmem:[#allocation2 + $0xc9] sm:$0xff]  ;;  %v2333_v28 = vld [vmem:[#allocation2 + $0xe1] sm:$0xff] }
 0x1c0   : > { %v9558_v29 = vpop.f32.mrb[103].mxu1  ;;  %v11734_v39 = vpack.c.bf16 %v2331_v15, %v2330_v47 }
 0x1c1   : > { %v11724_v11 = vadd.f32 %v1737_v24, %v1478_v48  ;;  %9672 = vmatmul.mubr.msk.bf16.gmra.mrb[208].mxu0 %vm347_vm1, %v1960_v58 }
 0x1c2   : > { %9764 = vmatmul.mubr.msk.bf16.gmra.mrb[208].mxu1 %vm347_vm1, %v11719_v44  ;;  %9675 = vmatprep.mubr.msk.bf16.mxu0 %vm11008_vm0, %v14063_v2 }
 0x1c3   : > { %14066 = vst [vmem:[#allocation9_spill] sm:$0xff] %v11724_v11  ;;  %9767 = vmatprep.mubr.msk.bf16.mxu1 %vm11008_vm0, %v14063_v2 }
 0x1c4   : > { %v1343_v34 = vpop.f32.mrb[104].mxu0 }
 0x1c5   : > { %v1479_v52 = vadd.f32 %v1343_v34, %v11453_v55  ;;  %v9469_v21 = vpop.f32.mrb[105].mxu0  ;;  %v1742_v31 = vpop.f32.mrb[104].mxu1  ;;  %v1933_v55 = vld [vmem:[#allocation2 + $0xd8] sm:$0xff] }
 0x1c6   : > { %v1346_v1 = vpop.f32.mrb[106].mxu0  ;;  %v9561_v58 = vpop.f32.mrb[105].mxu1  ;;  %v1962_v21 = vpack.c.bf16 %v1934_v41, %v1933_v55  ;;  %v1936_v55 = vld [vmem:[#allocation2 + $0xf0] sm:$0xff] }
 0x1c7   : > { %v1480_v42 = vadd.f32 %v1346_v1, %v11455_v62  ;;  %v11737_v48 = vadd.f32 %v1742_v31, %v1479_v52  ;;  %v9470_v0 = vpop.f32.mrb[107].mxu0  ;;  %v1745_v24 = vpop.f32.mrb[106].mxu1  ;;  %v2332_v62 = vld [vmem:[#allocation2 + $0xd9] sm:$0xff]  ;;  %v2335_v41 = vld [vmem:[#allocation2 + $0xf1] sm:$0xff] }
 0x1c8   : > { %v9562_v29 = vpop.f32.mrb[107].mxu1  ;;  %v11749_v1 = vpack.c.bf16 %v2333_v28, %v2332_v62 }
 0x1c9   : > { %v11739_v11 = vadd.f32 %v1745_v24, %v1480_v42  ;;  %9676 = vmatmul.mubr.msk.bf16.gmra.mrb[212].mxu0 %vm347_vm1, %v1961_v8 }
 0x1ca   : > { %9768 = vmatmul.mubr.msk.bf16.gmra.mrb[212].mxu1 %vm347_vm1, %v11734_v39  ;;  %9679 = vmatprep.mubr.msk.bf16.mxu0 %vm11008_vm0, %v14063_v2 }
 0x1cb   : > { %14067 = vst [vmem:[#allocation10_spill] sm:$0xff] %v11739_v11  ;;  %9771 = vmatprep.mubr.msk.bf16.mxu1 %vm11008_vm0, %v14063_v2 }
 0x1cc   : > { %v1351_v47 = vpop.f32.mrb[108].mxu0 }
 0x1cd   : > { %v1481_v15 = vadd.f32 %v1351_v47, %v11463_v7  ;;  %v9473_v34 = vpop.f32.mrb[109].mxu0  ;;  %v1750_v52 = vpop.f32.mrb[108].mxu1  ;;  %v1935_v7 = vld [vmem:[#allocation2 + $0xe8] sm:$0xff] }
 0x1ce   : > { %v1354_v31 = vpop.f32.mrb[110].mxu0  ;;  %v9565_v8 = vpop.f32.mrb[109].mxu1  ;;  %v1963_v34 = vpack.c.bf16 %v1936_v55, %v1935_v7  ;;  %v1938_v7 = vld [vmem:[#allocation2 + $0x100] sm:$0xff] }
 0x1cf   : > { %v1482_v58 = vadd.f32 %v1354_v31, %v11465_v14  ;;  %v11752_v42 = vadd.f32 %v1750_v52, %v1481_v15  ;;  %v9474_v0 = vpop.f32.mrb[111].mxu0  ;;  %v1753_v24 = vpop.f32.mrb[110].mxu1  ;;  %v2334_v14 = vld [vmem:[#allocation2 + $0xe9] sm:$0xff]  ;;  %v2337_v55 = vld [vmem:[#allocation2 + $0x101] sm:$0xff] }
 0x1d0   : > { %v9566_v29 = vpop.f32.mrb[111].mxu1  ;;  %v11764_v31 = vpack.c.bf16 %v2335_v41, %v2334_v14 }
 0x1d1   : > { %v11754_v11 = vadd.f32 %v1753_v24, %v1482_v58  ;;  %9680 = vmatmul.mubr.msk.bf16.gmra.mrb[216].mxu0 %vm347_vm1, %v1962_v21 }
 0x1d2   : > { %9772 = vmatmul.mubr.msk.bf16.gmra.mrb[216].mxu1 %vm347_vm1, %v11749_v1  ;;  %9683 = vmatprep.mubr.msk.bf16.mxu0 %vm11008_vm0, %v14063_v2 }
 0x1d3   : > { %14068 = vst [vmem:[#allocation11_spill] sm:$0xff] %v11754_v11  ;;  %9775 = vmatprep.mubr.msk.bf16.mxu1 %vm11008_vm0, %v14063_v2 }
 0x1d4   : > { %v1359_v62 = vpop.f32.mrb[112].mxu0 }
 0x1d5   : > { %v1483_v28 = vadd.f32 %v1359_v62, %v11473_v23  ;;  %v9477_v47 = vpop.f32.mrb[113].mxu0  ;;  %v1758_v15 = vpop.f32.mrb[112].mxu1  ;;  %v1937_v23 = vld [vmem:[#allocation2 + $0xf8] sm:$0xff] }
 0x1d6   : > { %v1362_v52 = vpop.f32.mrb[114].mxu0  ;;  %v9569_v21 = vpop.f32.mrb[113].mxu1  ;;  %v1964_v47 = vpack.c.bf16 %v1938_v7, %v1937_v23  ;;  %v1940_v23 = vld [vmem:[#allocation2 + $0x110] sm:$0xff] }
 0x1d7   : > { %v1484_v8 = vadd.f32 %v1362_v52, %v11475_v30  ;;  %v11767_v58 = vadd.f32 %v1758_v15, %v1483_v28  ;;  %v9478_v0 = vpop.f32.mrb[115].mxu0  ;;  %v1761_v24 = vpop.f32.mrb[114].mxu1  ;;  %v2336_v30 = vld [vmem:[#allocation2 + $0xf9] sm:$0xff]  ;;  %v2339_v7 = vld [vmem:[#allocation2 + $0x111] sm:$0xff] }
 0x1d8   : > { %v9570_v29 = vpop.f32.mrb[115].mxu1  ;;  %v11779_v52 = vpack.c.bf16 %v2337_v55, %v2336_v30 }
 0x1d9   : > { %v11769_v11 = vadd.f32 %v1761_v24, %v1484_v8  ;;  %9684 = vmatmul.mubr.msk.bf16.gmra.mrb[220].mxu0 %vm347_vm1, %v1963_v34 }
 0x1da   : > { %9776 = vmatmul.mubr.msk.bf16.gmra.mrb[220].mxu1 %vm347_vm1, %v11764_v31  ;;  %9687 = vmatprep.mubr.msk.bf16.mxu0 %vm11008_vm0, %v14063_v2 }
 0x1db   : > { %14069 = vst [vmem:[#allocation12_spill] sm:$0xff] %v11769_v11  ;;  %9779 = vmatprep.mubr.msk.bf16.mxu1 %vm11008_vm0, %v14063_v2 }
 0x1dc   : > { %v1367_v14 = vpop.f32.mrb[116].mxu0 }
 0x1dd   : > { %v1485_v41 = vadd.f32 %v1367_v14, %v11483_v38  ;;  %v9481_v62 = vpop.f32.mrb[117].mxu0  ;;  %v1766_v28 = vpop.f32.mrb[116].mxu1  ;;  %v1939_v38 = vld [vmem:[#allocation2 + $0x108] sm:$0xff] }
 0x1de   : > { %v1370_v15 = vpop.f32.mrb[118].mxu0  ;;  %v9573_v34 = vpop.f32.mrb[117].mxu1  ;;  %v1965_v62 = vpack.c.bf16 %v1940_v23, %v1939_v38  ;;  %v1942_v38 = vld [vmem:[#allocation2 + $0x120] sm:$0xff] }
 0x1df   : > { %v1486_v21 = vadd.f32 %v1370_v15, %v11485_v45  ;;  %v11782_v8 = vadd.f32 %v1766_v28, %v1485_v41  ;;  %v9482_v0 = vpop.f32.mrb[119].mxu0  ;;  %v1769_v24 = vpop.f32.mrb[118].mxu1  ;;  %v2338_v45 = vld [vmem:[#allocation2 + $0x109] sm:$0xff]  ;;  %v2341_v23 = vld [vmem:[#allocation2 + $0x121] sm:$0xff] }
 0x1e0   : > { %v9574_v29 = vpop.f32.mrb[119].mxu1  ;;  %v11794_v15 = vpack.c.bf16 %v2339_v7, %v2338_v45 }
 0x1e1   : > { %v11784_v11 = vadd.f32 %v1769_v24, %v1486_v21  ;;  %9688 = vmatmul.mubr.msk.bf16.gmra.mrb[224].mxu0 %vm347_vm1, %v1964_v47 }
 0x1e2   : > { %9780 = vmatmul.mubr.msk.bf16.gmra.mrb[224].mxu1 %vm347_vm1, %v11779_v52  ;;  %9691 = vmatprep.mubr.msk.bf16.mxu0 %vm11008_vm0, %v14063_v2 }
 0x1e3   : > { %14070 = vst [vmem:[#allocation13_spill] sm:$0xff] %v11784_v11  ;;  %9783 = vmatprep.mubr.msk.bf16.mxu1 %vm11008_vm0, %v14063_v2 }
 0x1e4   : > { %v1375_v30 = vpop.f32.mrb[120].mxu0 }
 0x1e5   : > { %v1487_v55 = vadd.f32 %v1375_v30, %v11493_v54  ;;  %v9485_v14 = vpop.f32.mrb[121].mxu0  ;;  %v1774_v41 = vpop.f32.mrb[120].mxu1  ;;  %v1941_v54 = vld [vmem:[#allocation2 + $0x118] sm:$0xff] }
 0x1e6   : > { %v1378_v28 = vpop.f32.mrb[122].mxu0  ;;  %v9577_v47 = vpop.f32.mrb[121].mxu1  ;;  %v1966_v14 = vpack.c.bf16 %v1942_v38, %v1941_v54  ;;  %v1944_v54 = vld [vmem:[#allocation2 + $0x130] sm:$0xff] }
 0x1e7   : > { %v1488_v34 = vadd.f32 %v1378_v28, %v11495_v63  ;;  %v11797_v21 = vadd.f32 %v1774_v41, %v1487_v55  ;;  %v9486_v0 = vpop.f32.mrb[123].mxu0  ;;  %v1777_v24 = vpop.f32.mrb[122].mxu1  ;;  %v2340_v63 = vld [vmem:[#allocation2 + $0x119] sm:$0xff]  ;;  %v2343_v38 = vld [vmem:[#allocation2 + $0x131] sm:$0xff] }
 0x1e8   : > { %v9578_v29 = vpop.f32.mrb[123].mxu1  ;;  %v11809_v28 = vpack.c.bf16 %v2341_v23, %v2340_v63 }
 0x1e9   : > { %v11799_v11 = vadd.f32 %v1777_v24, %v1488_v34  ;;  %9692 = vmatmul.mubr.msk.bf16.gmra.mrb[228].mxu0 %vm347_vm1, %v1965_v62 }
 0x1ea   : > { %9784 = vmatmul.mubr.msk.bf16.gmra.mrb[228].mxu1 %vm347_vm1, %v11794_v15  ;;  %9695 = vmatprep.mubr.msk.bf16.mxu0 %vm11008_vm0, %v14063_v2 }
 0x1eb   : > { %14071 = vst [vmem:[#allocation14_spill] sm:$0xff] %v11799_v11  ;;  %9787 = vmatprep.mubr.msk.bf16.mxu1 %vm11008_vm0, %v14063_v2 }
 0x1ec   : > { %v1383_v45 = vpop.f32.mrb[124].mxu0 }
 0x1ed   : > { %v1489_v7 = vadd.f32 %v1383_v45, %v11503_v10  ;;  %v9489_v30 = vpop.f32.mrb[125].mxu0  ;;  %v1782_v55 = vpop.f32.mrb[124].mxu1  ;;  %v1943_v10 = vld [vmem:[#allocation2 + $0x128] sm:$0xff] }
 0x1ee   : > { %v1386_v41 = vpop.f32.mrb[126].mxu0  ;;  %v9581_v62 = vpop.f32.mrb[125].mxu1  ;;  %v1967_v30 = vpack.c.bf16 %v1944_v54, %v1943_v10  ;;  %v1946_v10 = vld [vmem:[#allocation2 + $0x140] sm:$0xff] }
 0x1ef   : > { %v1490_v47 = vadd.f32 %v1386_v41, %v11505_v18  ;;  %v11812_v34 = vadd.f32 %v1782_v55, %v1489_v7  ;;  %v9490_v0 = vpop.f32.mrb[127].mxu0  ;;  %v1785_v24 = vpop.f32.mrb[126].mxu1  ;;  %v2342_v18 = vld [vmem:[#allocation2 + $0x129] sm:$0xff]  ;;  %v2345_v54 = vld [vmem:[#allocation2 + $0x141] sm:$0xff] }
 0x1f0   : > { %v9582_v29 = vpop.f32.mrb[127].mxu1  ;;  %v11824_v41 = vpack.c.bf16 %v2343_v38, %v2342_v18 }
 0x1f1   : > { %v11814_v11 = vadd.f32 %v1785_v24, %v1490_v47  ;;  %9696 = vmatmul.mubr.msk.bf16.gmra.mrb[232].mxu0 %vm347_vm1, %v1966_v14 }
 0x1f2   : > { %9788 = vmatmul.mubr.msk.bf16.gmra.mrb[232].mxu1 %vm347_vm1, %v11809_v28  ;;  %9699 = vmatprep.mubr.msk.bf16.mxu0 %vm11008_vm0, %v14063_v2 }
 0x1f3   : > { %14072 = vst [vmem:[#allocation15_spill] sm:$0xff] %v11814_v11  ;;  %9791 = vmatprep.mubr.msk.bf16.mxu1 %vm11008_vm0, %v14063_v2 }
 0x1f4   : > { %v1391_v63 = vpop.f32.mrb[128].mxu0 }
 0x1f5   : > { %v1491_v23 = vadd.f32 %v1391_v63, %v11513_v27  ;;  %v9493_v45 = vpop.f32.mrb[129].mxu0  ;;  %v1790_v7 = vpop.f32.mrb[128].mxu1  ;;  %v1945_v27 = vld [vmem:[#allocation2 + $0x138] sm:$0xff] }
 0x1f6   : > { %v1394_v55 = vpop.f32.mrb[130].mxu0  ;;  %v9585_v14 = vpop.f32.mrb[129].mxu1  ;;  %v1968_v45 = vpack.c.bf16 %v1946_v10, %v1945_v27  ;;  %v1948_v27 = vld [vmem:[#allocation2 + $0x150] sm:$0xff] }
 0x1f7   : > { %v1492_v62 = vadd.f32 %v1394_v55, %v11515_v36  ;;  %v11827_v47 = vadd.f32 %v1790_v7, %v1491_v23  ;;  %v9494_v0 = vpop.f32.mrb[131].mxu0  ;;  %v1793_v24 = vpop.f32.mrb[130].mxu1  ;;  %v2344_v36 = vld [vmem:[#allocation2 + $0x139] sm:$0xff]  ;;  %v2347_v10 = vld [vmem:[#allocation2 + $0x151] sm:$0xff] }
 0x1f8   : > { %v9586_v29 = vpop.f32.mrb[131].mxu1  ;;  %v11839_v55 = vpack.c.bf16 %v2345_v54, %v2344_v36 }
 0x1f9   : > { %v11829_v11 = vadd.f32 %v1793_v24, %v1492_v62  ;;  %9700 = vmatmul.mubr.msk.bf16.gmra.mrb[236].mxu0 %vm347_vm1, %v1967_v30 }
 0x1fa   : > { %9792 = vmatmul.mubr.msk.bf16.gmra.mrb[236].mxu1 %vm347_vm1, %v11824_v41  ;;  %9703 = vmatprep.mubr.msk.bf16.mxu0 %vm11008_vm0, %v14063_v2 }
 0x1fb   : > { %14073 = vst [vmem:[#allocation16_spill] sm:$0xff] %v11829_v11  ;;  %9795 = vmatprep.mubr.msk.bf16.mxu1 %vm11008_vm0, %v14063_v2 }
 0x1fc   : > { %v1399_v18 = vpop.f32.mrb[132].mxu0 }
 0x1fd   : > { %v1493_v38 = vadd.f32 %v1399_v18, %v11523_v46  ;;  %v9497_v63 = vpop.f32.mrb[133].mxu0  ;;  %v1798_v23 = vpop.f32.mrb[132].mxu1  ;;  %v1947_v46 = vld [vmem:[#allocation2 + $0x148] sm:$0xff] }
 0x1fe   : > { %v1402_v7 = vpop.f32.mrb[134].mxu0  ;;  %v9589_v30 = vpop.f32.mrb[133].mxu1  ;;  %v1969_v63 = vpack.c.bf16 %v1948_v27, %v1947_v46 }
 0x1ff   : > { %v1494_v14 = vadd.f32 %v1402_v7, %v11525_v56  ;;  %v11842_v62 = vadd.f32 %v1798_v23, %v1493_v38  ;;  %v9498_v0 = vpop.f32.mrb[135].mxu0  ;;  %v1801_v24 = vpop.f32.mrb[134].mxu1  ;;  %v2346_v56 = vld [vmem:[#allocation2 + $0x149] sm:$0xff] }
 0x200   : > { %v9590_v29 = vpop.f32.mrb[135].mxu1  ;;  %v11854_v7 = vpack.c.bf16 %v2347_v10, %v2346_v56 }
 0x201   : > { %v11844_v11 = vadd.f32 %v1801_v24, %v1494_v14  ;;  %9704 = vmatmul.mubr.msk.bf16.gmra.mrb[240].mxu0 %vm347_vm1, %v1968_v45 }
 0x202   : > { %9796 = vmatmul.mubr.msk.bf16.gmra.mrb[240].mxu1 %vm347_vm1, %v11839_v55  ;;  %9707 = vmatprep.mubr.msk.bf16.mxu0 %vm11008_vm0, %v14063_v2 }
 0x203   : > { %14074 = vst [vmem:[#allocation17_spill] sm:$0xff] %v11844_v11  ;;  %9799 = vmatprep.mubr.msk.bf16.mxu1 %vm11008_vm0, %v14063_v2 }
 0x204   : > { %v1407_v36 = vpop.f32.mrb[136].mxu0 }
 0x205   : > { %v1495_v54 = vadd.f32 %v1407_v36, %v11533_v4  ;;  %v9501_v18 = vpop.f32.mrb[137].mxu0  ;;  %v1806_v38 = vpop.f32.mrb[136].mxu1  ;;  %v1949_v4 = vld [vmem:[#allocation2 + $0x158] sm:$0xf] }
 0x206   : > { %v1410_v23 = vpop.f32.mrb[138].mxu0  ;;  %v9593_v45 = vpop.f32.mrb[137].mxu1  ;;  %v1970_v36 = vpack.c.bf16 %v1949_v4, %v1949_v4 }
 0x207   : > { %v1496_v30 = vadd.f32 %v1410_v23, %v11535_v13  ;;  %v11857_v14 = vadd.f32 %v1806_v38, %v1495_v54  ;;  %v9502_v0 = vpop.f32.mrb[139].mxu0  ;;  %v1809_v24 = vpop.f32.mrb[138].mxu1  ;;  %v2348_v13 = vld [vmem:[#allocation2 + $0x159] sm:$0xf] }
 0x208   : > { %v9594_v29 = vpop.f32.mrb[139].mxu1  ;;  %v2369_v38 = vpack.c.bf16 %v2348_v13, %v2348_v13 }
 0x209   : > { %v11859_v11 = vadd.f32 %v1809_v24, %v1496_v30  ;;  %9708 = vmatmul.mubr.msk.bf16.gmra.mrb[244].mxu0 %vm347_vm1, %v1969_v63  ;;  %v3107_v29 = vld [vmem:[#allocation2 + $0x32] sm:$0xff] }
 0x20a   : > { %9800 = vmatmul.mubr.msk.bf16.gmra.mrb[244].mxu1 %vm347_vm1, %v11854_v7  ;;  %9711 = vmatprep.mubr.msk.bf16.mxu0 %vm11008_vm0, %v14063_v2 }
 0x20b   : > { %9803 = vmatprep.mubr.msk.bf16.mxu1 %vm11008_vm0, %v14063_v2 }
 0x20c   : > { %v1415_v46 = vpop.f32.mrb[140].mxu0 }
 0x20d   : > { %v1497_v27 = vadd.f32 %v1415_v46, %v11543_v26  ;;  %v9505_v56 = vpop.f32.mrb[141].mxu0  ;;  %v1814_v10 = vpop.f32.mrb[140].mxu1  ;;  %v3106_v26 = vld [vmem:[#allocation2 + $0x2a] sm:$0xff] }
 0x20e   : > { %v1418_v54 = vpop.f32.mrb[142].mxu0  ;;  %v9597_v18 = vpop.f32.mrb[141].mxu1 }
 0x20f   : > { %v1498_v63 = vadd.f32 %v1418_v54, %v11545_v37  ;;  %v11870_v23 = vadd.f32 %v1814_v10, %v1497_v27  ;;  %v9506_v45 = vpop.f32.mrb[143].mxu0  ;;  %v1817_v30 = vpop.f32.mrb[142].mxu1  ;;  %v10958_v10 = vld [vmem:[%s14053_s2 + $0x100] sm:$0xff]  }
 0x210   : > { %v9598_v0 = vpop.f32.mrb[143].mxu1 }
 0x211   : > { %v11872_v24 = vadd.f32 %v1817_v30, %v1498_v63  ;;  %9712 = vmatmul.mubr.msk.bf16.gmra.mrb[248].mxu0 %vm347_vm1, %v1970_v36  ;;  %v3147_v36 = vpack.c.bf16 %v3107_v29, %v3106_v26  ;;  %v3109_v0 = vld [vmem:[#allocation2 + $0x42] sm:$0xff] }
 0x212   : > { %9804 = vmatmul.mubr.msk.bf16.gmra.mrb[248].mxu1 %vm347_vm1, %v2369_v38  ;;  %9815 = vmatprep.mubr.msk.bf16.mxu0 %vm11008_vm0, %v14063_v2 }
 0x213   : > { %9907 = vmatprep.mubr.msk.bf16.mxu1 %vm11008_vm0, %v14063_v2 }
 0x214   : > { %v1423_v37 = vpop.f32.mrb[144].mxu0 }
 0x215   : > { %v1499_v4 = vadd.f32 %v1423_v37, %v11553_v53  ;;  %v9509_v13 = vpop.f32.mrb[145].mxu0  ;;  %v1822_v46 = vpop.f32.mrb[144].mxu1  ;;  %v10959_v53 = vld [vmem:[%s14053_s2 + $0x108] sm:$0xff]  }
 0x216   : > { %v1426_v27 = vpop.f32.mrb[146].mxu0  ;;  %v9601_v56 = vpop.f32.mrb[145].mxu1 }
 0x217   : > { %v1500_v54 = vadd.f32 %v1426_v27, %v11558_v5  ;;  %v11885_v18 = vadd.f32 %v1822_v46, %v1499_v4  ;;  %v9510_v38 = vpop.f32.mrb[147].mxu0  ;;  %v1825_v63 = vpop.f32.mrb[146].mxu1  ;;  %v3108_v5 = vld [vmem:[#allocation2 + $0x3a] sm:$0xff] }
 0x218   : > { %v9602_v45 = vpop.f32.mrb[147].mxu1  ;;  %v3148_v46 = vpack.c.bf16 %v3109_v0, %v3108_v5 }
 0x219   : > { %v11887_v30 = vadd.f32 %v1825_v63, %v1500_v54  ;;  %9816 = vmatmul.mubr.msk.bf16.vlgmr.msra.gmra.mrb[252].mxu0 %vm347_vm1, %v11572_v32  ;;  %v10960_v54 = vld [vmem:[%s14053_s2 + $0x110] sm:$0xff]   ;;  %v10961_v45 = vld [vmem:[%s14053_s2 + $0x118] sm:$0xff]  }
 0x21a   : > { %9992 = vmatpush3.bf16.msra.mxu0 %v10958_v10  ;;  %9908 = vmatmul.mubr.msk.bf16.vlgmr.msra.gmra.mrb[252].mxu1 %vm347_vm1, %v3147_v36  ;;  %v3111_v63 = vld [vmem:[#allocation2 + $0x52] sm:$0xff] }
 0x21b   : > { %9819 = vmatprep.mubr.msk.bf16.mxu0 %vm11008_vm0, %v14063_v2  ;;  %9911 = vmatprep.mubr.msk.bf16.mxu1 %vm11008_vm0, %v14063_v2 }
 0x21c   : > { %v1431_v26 = vpop.f32.mrb[148].mxu0  ;;  %9993 = vmatprep.subr.bf16.mxu0 %v14063_v2 }
 0x21d   : > { %v1501_v32 = vadd.f32 %v1431_v26, %v11570_v25  ;;  %v9513_v29 = vpop.f32.mrb[149].mxu0  ;;  %v1830_v37 = vpop.f32.mrb[148].mxu1  ;;  %v8804_v26 = vld [vmem:[%s11102_s16 + $0xb0] sm:$0xff]  }
 0x21e   : > { %v1434_v4 = vpop.f32.mrb[150].mxu0  ;;  %v9605_v13 = vpop.f32.mrb[149].mxu1  ;;  %9994 = vmatpush3.bf16.msra.mxu0 %v10959_v53 }
 0x21f   : > { %v1502_v27 = vadd.f32 %v1434_v4, %v11578_v40  ;;  %v11902_v56 = vadd.f32 %v1830_v37, %v1501_v32  ;;  %v9514_v10 = vpop.f32.mrb[151].mxu0  ;;  %v1833_v36 = vpop.f32.mrb[150].mxu1  ;;  %9995 = vmatprep.subr.bf16.mxu0 %v14063_v2  ;;  %v3110_v40 = vld [vmem:[#allocation2 + $0x4a] sm:$0xff]  ;;  %v8781_v4 = vunpack.c.l.bf16 %v8804_v26  ;;  %v8782_v13 = vunpack.c.h.bf16 %v8804_v26 }
 0x220   : > { %v9606_v25 = vpop.f32.mrb[151].mxu1  ;;  %v3149_v37 = vpack.c.bf16 %v3111_v63, %v3110_v40 }
 0x221   : > { %v11908_v38 = vadd.f32 %v1833_v36, %v1502_v27  ;;  %9820 = vmatmul.mubr.msk.bf16.gmra.mrb[0].mxu0 %vm347_vm1, %v11593_v6  ;;  %392 = vst.msk [vmem:[#allocation2 + $0x160] sm:$0xff] %vm347_vm1, %v8781_v4  ;;  %393 = vst.msk [vmem:[#allocation2 + $0x168] sm:$0xff] %vm347_vm1, %v8782_v13  ;;  %v3113_v25 = vld [vmem:[#allocation2 + $0x62] sm:$0xff] }
 0x222   : > { %9912 = vmatmul.mubr.msk.bf16.gmra.mrb[0].mxu1 %vm347_vm1, %v3148_v46  ;;  %9823 = vmatprep.mubr.msk.bf16.mxu0 %vm11008_vm0, %v14063_v2 }
 0x223   : > { %9915 = vmatprep.mubr.msk.bf16.mxu1 %vm11008_vm0, %v14063_v2  ;;  %9996 = vmatpush3.bf16.msra.mxu0 %v10960_v54 }
 0x224   : > { %v1439_v53 = vpop.f32.mrb[152].mxu0  ;;  %9997 = vmatprep.subr.bf16.mxu0 %v14063_v2 }
 0x225   : > { %v1503_v6 = vadd.f32 %v1439_v53, %v11591_v61  ;;  %v9517_v5 = vpop.f32.mrb[153].mxu0  ;;  %v1838_v0 = vpop.f32.mrb[152].mxu1 }
 0x226   : > { %v1442_v32 = vpop.f32.mrb[154].mxu0  ;;  %v9609_v29 = vpop.f32.mrb[153].mxu1 }
 0x227   : > { %v1504_v46 = vadd.f32 %v1442_v32, %v11595_v12  ;;  %v11924_v27 = vadd.f32 %v1838_v0, %v1503_v6  ;;  %v9518_v10 = vpop.f32.mrb[155].mxu0  ;;  %v1841_v36 = vpop.f32.mrb[154].mxu1  ;;  %9998 = vmatpush3.bf16.msra.mxu0 %v10961_v45  ;;  %v3112_v12 = vld [vmem:[#allocation2 + $0x5a] sm:$0xff] }
 0x228   : > { %v9610_v54 = vpop.f32.mrb[155].mxu1  ;;  %10175 = vmatprep.subr.bf16.mxu0 %v14063_v2  ;;  %v3150_v0 = vpack.c.bf16 %v3113_v25, %v3112_v12 }
 0x229   : > { %v11929_v61 = vadd.f32 %v1841_v36, %v1504_v46  ;;  %9824 = vmatmul.mubr.msk.bf16.gmra.mrb[4].mxu0 %vm347_vm1, %v11607_v43 }
 0x22a   : > { %9916 = vmatmul.mubr.msk.bf16.gmra.mrb[4].mxu1 %vm347_vm1, %v3149_v37  ;;  %9827 = vmatprep.mubr.msk.bf16.mxu0 %vm11008_vm0, %v14063_v2 }
 0x22b   : > { %9919 = vmatprep.mubr.msk.bf16.mxu1 %vm11008_vm0, %v14063_v2 }
 0x22c   : > { %v1447_v40 = vpop.f32.mrb[156].mxu0 }
 0x22d   : > { %v1505_v63 = vadd.f32 %v1447_v40, %v11605_v35  ;;  %v9521_v45 = vpop.f32.mrb[157].mxu0  ;;  %v1846_v53 = vpop.f32.mrb[156].mxu1  ;;  %v3114_v35 = vld [vmem:[#allocation2 + $0x6a] sm:$0xff] }
 0x22e   : > { %v1450_v6 = vpop.f32.mrb[158].mxu0  ;;  %v9613_v5 = vpop.f32.mrb[157].mxu1 }
 0x22f   : > { %v1506_v43 = vadd.f32 %v1450_v6, %v11609_v49  ;;  %v11940_v26 = vadd.f32 %v1846_v53, %v1505_v63  ;;  %v9522_v32 = vpop.f32.mrb[159].mxu0  ;;  %v1849_v29 = vpop.f32.mrb[158].mxu1  ;;  %v3115_v49 = vld [vmem:[#allocation2 + $0x72] sm:$0xff] }
 0x230   : > { %v9614_v37 = vpop.f32.mrb[159].mxu1  ;;  %v3151_v25 = vpack.c.bf16 %v3115_v49, %v3114_v35 }
 0x231   : > { %v11942_v4 = vadd.f32 %v1849_v29, %v1506_v43  ;;  %9828 = vmatmul.mubr.msk.bf16.gmra.mrb[8].mxu0 %vm347_vm1, %v11623_v22 }
 0x232   : > { %9920 = vmatmul.mubr.msk.bf16.gmra.mrb[8].mxu1 %vm347_vm1, %v3150_v0  ;;  %9831 = vmatprep.mubr.msk.bf16.mxu0 %vm11008_vm0, %v14063_v2  ;;  %v14075_v0 = vld [vmem:[#allocation4_spill] sm:$0xff] }
 0x233   : > { %9923 = vmatprep.mubr.msk.bf16.mxu1 %vm11008_vm0, %v14063_v2 }
 0x234   : > { %v1455_v13 = vpop.f32.mrb[160].mxu0 }
 0x235   : > { %v1507_v46 = vadd.f32 %v1455_v13, %v11621_v17  ;;  %v9525_v10 = vpop.f32.mrb[161].mxu0  ;;  %v1854_v36 = vpop.f32.mrb[160].mxu1  ;;  %v3116_v17 = vld [vmem:[#allocation2 + $0x7a] sm:$0xff] }
 0x236   : > { %v1458_v54 = vpop.f32.mrb[162].mxu0  ;;  %v9617_v12 = vpop.f32.mrb[161].mxu1 }
 0x237   : > { %v1508_v22 = vadd.f32 %v1458_v54, %v11629_v33  ;;  %v11953_v40 = vadd.f32 %v1854_v36, %v1507_v46  ;;  %v9526_v63 = vpop.f32.mrb[163].mxu0  ;;  %v1857_v45 = vpop.f32.mrb[162].mxu1  ;;  %v3117_v33 = vld [vmem:[#allocation2 + $0x82] sm:$0xff]  ;;  %v3118_v36 = vld [vmem:[#allocation2 + $0x8a] sm:$0xff]  ;;  %v3119_v54 = vld [vmem:[#allocation2 + $0x92] sm:$0xff] }
 0x238   : > { %v9618_v53 = vpop.f32.mrb[163].mxu1  ;;  %v3152_v49 = vpack.c.bf16 %v3117_v33, %v3116_v17  ;;  %v3153_v17 = vpack.c.bf16 %v3119_v54, %v3118_v36 }
 0x239   : > { %v11955_v6 = vadd.f32 %v1857_v45, %v1508_v22  ;;  %9832 = vmatmul.mubr.msk.bf16.gmra.mrb[12].mxu0 %vm347_vm1, %v11644_v16 }
 0x23a   : > { %9924 = vmatmul.mubr.msk.bf16.gmra.mrb[12].mxu1 %vm347_vm1, %v3151_v25  ;;  %9835 = vmatprep.mubr.msk.bf16.mxu0 %vm11008_vm0, %v14063_v2 }
 0x23b   : > { %9927 = vmatprep.mubr.msk.bf16.mxu1 %vm11008_vm0, %v14063_v2 }
 0x23c   : > { %v1463_v5 = vpop.f32.mrb[164].mxu0 }
 0x23d   : > { %v1509_v43 = vadd.f32 %v1463_v5, %v14075_v0  ;;  %v9529_v32 = vpop.f32.mrb[165].mxu0  ;;  %v1862_v29 = vpop.f32.mrb[164].mxu1 }
 0x23e   : > { %v1466_v37 = vpop.f32.mrb[166].mxu0  ;;  %v9621_v35 = vpop.f32.mrb[165].mxu1  ;;  %v11009_v32 = vmov 0  }
 0x23f   : > { %v11965_v13 = vadd.f32 %v1862_v29, %v1509_v43  ;;  %v9530_v16 = vpop.f32.mrb[167].mxu0  ;;  %v1865_v46 = vpop.f32.mrb[166].mxu1  ;;  %10924 = vset.pattern.permute.xlu0 %v11009_v32  ;;  %10925 = vset.pattern.permute.xlu1 %v11009_v32  ;;  %v3121_v37 = vld [vmem:[#allocation2 + $0xa2] sm:$0xff] }
 0x240   : > { %v9622_v10 = vpop.f32.mrb[167].mxu1 }
 0x241   : > { %9836 = vmatmul.mubr.msk.bf16.gmra.mrb[16].mxu0 %vm347_vm1, %v11659_v9  ;;  %v3994_v10 = vld [vmem:[%s14052_s1 + $0x8] sm:$0xff] }
 0x242   : > { %9928 = vmatmul.mubr.msk.bf16.gmra.mrb[16].mxu1 %vm347_vm1, %v3152_v49  ;;  %9839 = vmatprep.mubr.msk.bf16.mxu0 %vm11008_vm0, %v14063_v2  ;;  %v14076_v49 = vld [vmem:[#allocation5_spill] sm:$0xff] }
 0x243   : > { %9931 = vmatprep.mubr.msk.bf16.mxu1 %vm11008_vm0, %v14063_v2 }
 0x244   : > { %v2101_v12 = vpop.f32.mrb[168].mxu0 }
 0x245   : > { %v2267_v25 = vadd.f32 %v2101_v12, %v11662_v19  ;;  %v9633_v22 = vpop.f32.mrb[169].mxu0  ;;  %v2500_v63 = vpop.f32.mrb[168].mxu1  ;;  %v3993_v19 = vld [vmem:[%s14052_s1] sm:$0xff] }
 0x246   : > { %v2104_v45 = vpop.f32.mrb[170].mxu0  ;;  %v9725_v53 = vpop.f32.mrb[169].mxu1  ;;  %4036 = vperm.xlu0 %10924, %v3993_v19  }
 0x247   : > { %v2268_v9 = vadd.f32 %v2104_v45, %v11664_v3  ;;  %v11976_v33 = vadd.f32 %v2500_v63, %v2267_v25  ;;  %v9634_v5 = vpop.f32.mrb[171].mxu0  ;;  %v2503_v0 = vpop.f32.mrb[170].mxu1  ;;  %v3120_v3 = vld [vmem:[#allocation2 + $0x9a] sm:$0xff] }
 0x248   : > { %v9726_v43 = vpop.f32.mrb[171].mxu1  ;;  %v3154_v12 = vpack.c.bf16 %v3121_v37, %v3120_v3  ;;  %v14077_v25 = vld [vmem:[#allocation6_spill] sm:$0xff]  ;;  %v3995_v37 = vld [vmem:[%s14052_s1 + $0x10] sm:$0xff] }
 0x249   : > { %v11978_v29 = vadd.f32 %v2503_v0, %v2268_v9  ;;  %9840 = vmatmul.mubr.msk.bf16.gmra.mrb[20].mxu0 %vm347_vm1, %v11674_v60  ;;  %v3997_v5 = vld [vmem:[%s14052_s1 + $0x20] sm:$0xff]  ;;  %v3122_v0 = vld [vmem:[#allocation2 + $0xaa] sm:$0xff]  ;;  %v3123_v43 = vld [vmem:[#allocation2 + $0xb2] sm:$0xff]  ;;  %4046 = vperm.xlu1 %10925, %v3995_v37  }
 0x24a   : > { %9932 = vmatmul.mubr.msk.bf16.gmra.mrb[20].mxu1 %vm347_vm1, %v3153_v17  ;;  %9843 = vmatprep.mubr.msk.bf16.mxu0 %vm11008_vm0, %v14063_v2 }
 0x24b   : > { %9935 = vmatprep.mubr.msk.bf16.mxu1 %vm11008_vm0, %v14063_v2  ;;  %4041 = vperm.xlu0 %10924, %v3994_v10  }
 0x24c   : > { %v2109_v35 = vpop.f32.mrb[172].mxu0 }
 0x24d   : > { %v2269_v16 = vadd.f32 %v2109_v35, %v14076_v49  ;;  %v9637_v46 = vpop.f32.mrb[173].mxu0  ;;  %v2508_v60 = vpop.f32.mrb[172].mxu1  ;;  %v3999_v35 = vld [vmem:[%s14052_s1 + $0x30] sm:$0xff] }
 0x24e   : > { %v2112_v36 = vpop.f32.mrb[174].mxu0  ;;  %v9729_v54 = vpop.f32.mrb[173].mxu1  ;;  %v3155_v46 = vpack.c.bf16 %v3123_v43, %v3122_v0 }
 0x24f   : > { %v2270_v22 = vadd.f32 %v2112_v36, %v14077_v25  ;;  %v11995_v63 = vadd.f32 %v2508_v60, %v2269_v16  ;;  %v9638_v45 = vpop.f32.mrb[175].mxu0  ;;  %v2511_v53 = vpop.f32.mrb[174].mxu1  ;;  %4056 = vperm.xlu0 %10924, %v3997_v5   ;;  %v14078_v60 = vld [vmem:[#allocation7_spill] sm:$0xff] }
 0x250   : > { %v9730_v17 = vpop.f32.mrb[175].mxu1  ;;  %v4001_v45 = vld [vmem:[%s14052_s1 + $0x40] sm:$0xff] }
 0x251   : > { %v11997_v9 = vadd.f32 %v2511_v53, %v2270_v22  ;;  %9844 = vmatmul.mubr.msk.bf16.gmra.mrb[24].mxu0 %vm347_vm1, %v11689_v59  ;;  %v3996_v22 = vld [vmem:[%s14052_s1 + $0x18] sm:$0xff]  ;;  %v3125_v17 = vld [vmem:[#allocation2 + $0xc2] sm:$0xff] }
 0x252   : > { %9936 = vmatmul.mubr.msk.bf16.gmra.mrb[24].mxu1 %vm347_vm1, %v3154_v12  ;;  %9847 = vmatprep.mubr.msk.bf16.mxu0 %vm11008_vm0, %v14063_v2  ;;  %v3124_v53 = vld [vmem:[#allocation2 + $0xba] sm:$0xff] }
 0x253   : > { %9939 = vmatprep.mubr.msk.bf16.mxu1 %vm11008_vm0, %v14063_v2  ;;  %4066 = vperm.xlu0 %10924, %v3999_v35   ;;  %v3156_v37 = vpack.c.bf16 %v3125_v17, %v3124_v53  ;;  %v14079_v35 = vld [vmem:[#allocation8_spill] sm:$0xff] }
 0x254   : > { %v2117_v32 = vpop.f32.mrb[176].mxu0  ;;  %4051 = vperm.xlu1 %10925, %v3996_v22   ;;  %v3127_v22 = vld [vmem:[#allocation2 + $0xd2] sm:$0xff] }
 0x255   : > { %v2271_v19 = vadd.f32 %v2117_v32, %v11692_v20  ;;  %v9641_v3 = vpop.f32.mrb[177].mxu0  ;;  %v2516_v59 = vpop.f32.mrb[176].mxu1  ;;  %v3998_v32 = vld [vmem:[%s14052_s1 + $0x28] sm:$0xff] }
 0x256   : > { %v2120_v49 = vpop.f32.mrb[178].mxu0  ;;  %v9733_v16 = vpop.f32.mrb[177].mxu1 }
 0x257   : > { %v2272_v10 = vadd.f32 %v2120_v49, %v14078_v60  ;;  %v12017_v36 = vadd.f32 %v2516_v59, %v2271_v19  ;;  %v9642_v54 = vpop.f32.mrb[179].mxu0  ;;  %v2519_v20 = vpop.f32.mrb[178].mxu1  ;;  %4076 = vperm.xlu0 %10924, %v4001_v45   ;;  %v4003_v19 = vld [vmem:[%s14052_s1 + $0x50] sm:$0xff] }
 0x258   : > { %v9734_v12 = vpop.f32.mrb[179].mxu1  ;;  %4061 = vperm.xlu1 %10925, %v3998_v32   ;;  %v4000_v54 = vld [vmem:[%s14052_s1 + $0x38] sm:$0xff] }
 0x259   : > { %v12019_v25 = vadd.f32 %v2519_v20, %v2272_v10  ;;  %9848 = vmatmul.mubr.msk.bf16.gmra.mrb[28].mxu0 %vm347_vm1, %v11704_v50  ;;  %v4005_v20 = vld [vmem:[%s14052_s1 + $0x60] sm:$0xff]  ;;  %v3126_v12 = vld [vmem:[#allocation2 + $0xca] sm:$0xff] }
 0x25a   : > { %9940 = vmatmul.mubr.msk.bf16.gmra.mrb[28].mxu1 %vm347_vm1, %v3155_v46  ;;  %9851 = vmatprep.mubr.msk.bf16.mxu0 %vm11008_vm0, %v14063_v2  ;;  %v3157_v32 = vpack.c.bf16 %v3127_v22, %v3126_v12 }
 0x25b   : > { %9943 = vmatprep.mubr.msk.bf16.mxu1 %vm11008_vm0, %v14063_v2  ;;  %4086 = vperm.xlu0 %10924, %v4003_v19   ;;  %v14080_v19 = vld [vmem:[#allocation9_spill] sm:$0xff] }
 0x25c   : > { %v2125_v50 = vpop.f32.mrb[180].mxu0  ;;  %4071 = vperm.xlu1 %10925, %v4000_v54   ;;  %v3129_v54 = vld [vmem:[#allocation2 + $0xe2] sm:$0xff] }
 0x25d   : > { %v2273_v5 = vadd.f32 %v2125_v50, %v11707_v57  ;;  %v9645_v0 = vpop.f32.mrb[181].mxu0  ;;  %v2524_v43 = vpop.f32.mrb[180].mxu1  ;;  %v4002_v50 = vld [vmem:[%s14052_s1 + $0x48] sm:$0xff] }
 0x25e   : > { %v2128_v3 = vpop.f32.mrb[182].mxu0  ;;  %v9737_v59 = vpop.f32.mrb[181].mxu1 }
 0x25f   : > { %v2274_v49 = vadd.f32 %v2128_v3, %v14079_v35  ;;  %v12042_v16 = vadd.f32 %v2524_v43, %v2273_v5  ;;  %v9646_v46 = vpop.f32.mrb[183].mxu0  ;;  %v2527_v60 = vpop.f32.mrb[182].mxu1  ;;  %4096 = vperm.xlu0 %10924, %v4005_v20   ;;  %v4007_v5 = vld [vmem:[%s14052_s1 + $0x70] sm:$0xff] }
 0x260   : > { %v9738_v57 = vpop.f32.mrb[183].mxu1  ;;  %4081 = vperm.xlu1 %10925, %v4002_v50  }
 0x261   : > { %v12044_v10 = vadd.f32 %v2527_v60, %v2274_v49  ;;  %9852 = vmatmul.mubr.msk.bf16.gmra.mrb[32].mxu0 %vm347_vm1, %v11719_v44  ;;  %v4004_v49 = vld [vmem:[%s14052_s1 + $0x58] sm:$0xff]  ;;  %v4009_v60 = vld [vmem:[%s14052_s1 + $0x80] sm:$0xff] }
 0x262   : > { %9944 = vmatmul.mubr.msk.bf16.gmra.mrb[32].mxu1 %vm347_vm1, %v3156_v37  ;;  %9855 = vmatprep.mubr.msk.bf16.mxu0 %vm11008_vm0, %v14063_v2  ;;  %v3128_v57 = vld [vmem:[#allocation2 + $0xda] sm:$0xff] }
 0x263   : > { %9947 = vmatprep.mubr.msk.bf16.mxu1 %vm11008_vm0, %v14063_v2  ;;  %4106 = vperm.xlu0 %10924, %v4007_v5   ;;  %v3158_v50 = vpack.c.bf16 %v3129_v54, %v3128_v57  ;;  %v14081_v5 = vld [vmem:[#allocation10_spill] sm:$0xff] }
 0x264   : > { %v2133_v44 = vpop.f32.mrb[184].mxu0  ;;  %4091 = vperm.xlu1 %10925, %v4004_v49   ;;  %v3131_v49 = vld [vmem:[#allocation2 + $0xf2] sm:$0xff] }
 0x265   : > { %v2275_v45 = vadd.f32 %v2133_v44, %v11722_v51  ;;  %v9649_v53 = vpop.f32.mrb[185].mxu0  ;;  %v2532_v17 = vpop.f32.mrb[184].mxu1  ;;  %v4006_v44 = vld [vmem:[%s14052_s1 + $0x68] sm:$0xff] }
 0x266   : > { %v2136_v0 = vpop.f32.mrb[186].mxu0  ;;  %v9741_v43 = vpop.f32.mrb[185].mxu1 }
 0x267   : > { %v2276_v3 = vadd.f32 %v2136_v0, %v14080_v19  ;;  %v12067_v59 = vadd.f32 %v2532_v17, %v2275_v45  ;;  %v9650_v37 = vpop.f32.mrb[187].mxu0  ;;  %v2535_v35 = vpop.f32.mrb[186].mxu1  ;;  %4116 = vperm.xlu0 %10924, %v4009_v60   ;;  %v4011_v45 = vld [vmem:[%s14052_s1 + $0x90] sm:$0xff] }
 0x268   : > { %v9742_v51 = vpop.f32.mrb[187].mxu1  ;;  %4101 = vperm.xlu1 %10925, %v4006_v44   ;;  %v4008_v37 = vld [vmem:[%s14052_s1 + $0x78] sm:$0xff] }
 0x269   : > { %v12072_v46 = vadd.f32 %v2535_v35, %v2276_v3  ;;  %9856 = vmatmul.mubr.msk.bf16.gmra.mrb[36].mxu0 %vm347_vm1, %v11734_v39  ;;  %v4013_v35 = vld [vmem:[%s14052_s1 + $0xa0] sm:$0xff]  ;;  %v3130_v51 = vld [vmem:[#allocation2 + $0xea] sm:$0xff] }
 0x26a   : > { %9948 = vmatmul.mubr.msk.bf16.gmra.mrb[36].mxu1 %vm347_vm1, %v3157_v32  ;;  %9859 = vmatprep.mubr.msk.bf16.mxu0 %vm11008_vm0, %v14063_v2  ;;  %v3159_v44 = vpack.c.bf16 %v3131_v49, %v3130_v51 }
 0x26b   : > { %9951 = vmatprep.mubr.msk.bf16.mxu1 %vm11008_vm0, %v14063_v2  ;;  %4126 = vperm.xlu0 %10924, %v4011_v45   ;;  %v14082_v45 = vld [vmem:[#allocation11_spill] sm:$0xff] }
 0x26c   : > { %v2141_v20 = vpop.f32.mrb[188].mxu0  ;;  %4111 = vperm.xlu1 %10925, %v4008_v37   ;;  %v3133_v37 = vld [vmem:[#allocation2 + $0x102] sm:$0xff] }
 0x26d   : > { %v2277_v12 = vadd.f32 %v2141_v20, %v11737_v48  ;;  %v9653_v39 = vpop.f32.mrb[189].mxu0  ;;  %v2540_v22 = vpop.f32.mrb[188].mxu1  ;;  %v4010_v20 = vld [vmem:[%s14052_s1 + $0x88] sm:$0xff] }
 0x26e   : > { %v2144_v53 = vpop.f32.mrb[190].mxu0  ;;  %v9745_v17 = vpop.f32.mrb[189].mxu1 }
 0x26f   : > { %v2278_v0 = vadd.f32 %v2144_v53, %v14081_v5  ;;  %v12092_v43 = vadd.f32 %v2540_v22, %v2277_v12  ;;  %v9654_v32 = vpop.f32.mrb[191].mxu0  ;;  %v2543_v19 = vpop.f32.mrb[190].mxu1  ;;  %4136 = vperm.xlu0 %10924, %v4013_v35   ;;  %v4015_v12 = vld [vmem:[%s14052_s1 + $0xb0] sm:$0xff] }
 0x270   : > { %v9746_v48 = vpop.f32.mrb[191].mxu1  ;;  %4121 = vperm.xlu1 %10925, %v4010_v20   ;;  %v4012_v32 = vld [vmem:[%s14052_s1 + $0x98] sm:$0xff] }
 0x271   : > { %v12094_v3 = vadd.f32 %v2543_v19, %v2278_v0  ;;  %9860 = vmatmul.mubr.msk.bf16.gmra.mrb[40].mxu0 %vm347_vm1, %v11749_v1  ;;  %v4017_v19 = vld [vmem:[%s14052_s1 + $0xc0] sm:$0xff] }
 0x272   : > { %9952 = vmatmul.mubr.msk.bf16.gmra.mrb[40].mxu1 %vm347_vm1, %v3158_v50  ;;  %9863 = vmatprep.mubr.msk.bf16.mxu0 %vm11008_vm0, %v14063_v2  ;;  %v10962_v48 = vld [vmem:[%s14055_s4 + $0x20] sm:$0xff]  }
 0x273   : > { %9955 = vmatprep.mubr.msk.bf16.mxu1 %vm11008_vm0, %v14063_v2  ;;  %4146 = vperm.xlu0 %10924, %v4015_v12  }
 0x274   : > { %v2149_v1 = vpop.f32.mrb[192].mxu0  ;;  %4131 = vperm.xlu1 %10925, %v4012_v32   ;;  %10084 = vmatpush3.bf16.msra.mxu1 %v10962_v48  ;;  %v3134_v32 = vld [vmem:[#allocation2 + $0x10a] sm:$0xff] }
 0x275   : > { %v2279_v60 = vadd.f32 %v2149_v1, %v11752_v42  ;;  %v9657_v57 = vpop.f32.mrb[193].mxu0  ;;  %v2548_v54 = vpop.f32.mrb[192].mxu1  ;;  %10085 = vmatprep.subr.bf16.mxu1 %v14063_v2 }
 0x276   : > { %v2152_v39 = vpop.f32.mrb[194].mxu0  ;;  %v9749_v22 = vpop.f32.mrb[193].mxu1  ;;  %v4019_v57 = vld [vmem:[%s14052_s1 + $0xd0] sm:$0xff] }
 0x277   : > { %v2280_v53 = vadd.f32 %v2152_v39, %v14082_v45  ;;  %v12117_v17 = vadd.f32 %v2548_v54, %v2279_v60  ;;  %v9658_v50 = vpop.f32.mrb[195].mxu0  ;;  %v2551_v5 = vpop.f32.mrb[194].mxu1  ;;  %4156 = vperm.xlu0 %10924, %v4017_v19   ;;  %v4014_v60 = vld [vmem:[%s14052_s1 + $0xa8] sm:$0xff]  ;;  %v14083_v39 = vld [vmem:[#allocation12_spill] sm:$0xff] }
 0x278   : > { %v9750_v42 = vpop.f32.mrb[195].mxu1  ;;  %4141 = vperm.xlu1 %10925, %v4014_v60   ;;  %v3135_v19 = vld [vmem:[#allocation2 + $0x112] sm:$0xff] }
 0x279   : > { %v12119_v0 = vadd.f32 %v2551_v5, %v2280_v53  ;;  %9864 = vmatmul.mubr.msk.bf16.gmra.mrb[44].mxu0 %vm347_vm1, %v11764_v31  ;;  %v3132_v31 = vld [vmem:[#allocation2 + $0xfa] sm:$0xff]  ;;  %v3161_v60 = vpack.c.bf16 %v3135_v19, %v3134_v32 }
 0x27a   : > { %9956 = vmatmul.mubr.msk.bf16.gmra.mrb[44].mxu1 %vm347_vm1, %v3159_v44  ;;  %9867 = vmatprep.mubr.msk.bf16.mxu0 %vm11008_vm0, %v14063_v2  ;;  %v3160_v12 = vpack.c.bf16 %v3133_v37, %v3132_v31  ;;  %v4016_v5 = vld [vmem:[%s14052_s1 + $0xb8] sm:$0xff]  ;;  %v4021_v42 = vld [vmem:[%s14052_s1 + $0xe0] sm:$0xff] }
 0x27b   : > { %9959 = vmatprep.mubr.msk.bf16.mxu1 %vm11008_vm0, %v14063_v2  ;;  %4166 = vperm.xlu0 %10924, %v4019_v57   ;;  %v14084_v57 = vld [vmem:[#allocation13_spill] sm:$0xff] }
 0x27c   : > { %v2157_v35 = vpop.f32.mrb[196].mxu0  ;;  %4151 = vperm.xlu1 %10925, %v4016_v5   ;;  %v3137_v5 = vld [vmem:[#allocation2 + $0x122] sm:$0xff] }
 0x27d   : > { %v2281_v51 = vadd.f32 %v2157_v35, %v11767_v58  ;;  %v9661_v49 = vpop.f32.mrb[197].mxu0  ;;  %v2556_v1 = vpop.f32.mrb[196].mxu1  ;;  %v4018_v35 = vld [vmem:[%s14052_s1 + $0xc8] sm:$0xff] }
 0x27e   : > { %v2160_v54 = vpop.f32.mrb[198].mxu0  ;;  %v9753_v20 = vpop.f32.mrb[197].mxu1 }
 0x27f   : > { %v2282_v22 = vadd.f32 %v2160_v54, %v14083_v39  ;;  %v12146_v44 = vadd.f32 %v2556_v1, %v2281_v51  ;;  %v9662_v58 = vpop.f32.mrb[199].mxu0  ;;  %v2559_v45 = vpop.f32.mrb[198].mxu1  ;;  %4176 = vperm.xlu0 %10924, %v4021_v42   ;;  %v4023_v51 = vld [vmem:[%s14052_s1 + $0xf0] sm:$0xff] }
 0x280   : > { %v9754_v53 = vpop.f32.mrb[199].mxu1  ;;  %4161 = vperm.xlu1 %10925, %v4018_v35   ;;  %v4020_v58 = vld [vmem:[%s14052_s1 + $0xd8] sm:$0xff] }
 0x281   : > { %v12148_v50 = vadd.f32 %v2559_v45, %v2282_v22  ;;  %9868 = vmatmul.mubr.msk.bf16.gmra.mrb[48].mxu0 %vm347_vm1, %v11779_v52  ;;  %v4025_v45 = vld [vmem:[%s14052_s1 + $0x100] sm:$0xff] }
 0x282   : > { %9960 = vmatmul.mubr.msk.bf16.gmra.mrb[48].mxu1 %vm347_vm1, %v3160_v12  ;;  %9871 = vmatprep.mubr.msk.bf16.mxu0 %vm11008_vm0, %v14063_v2  ;;  %v3136_v53 = vld [vmem:[#allocation2 + $0x11a] sm:$0xff] }
 0x283   : > { %9963 = vmatprep.mubr.msk.bf16.mxu1 %vm11008_vm0, %v14063_v2  ;;  %4186 = vperm.xlu0 %10924, %v4023_v51   ;;  %v3162_v35 = vpack.c.bf16 %v3137_v5, %v3136_v53  ;;  %v14085_v51 = vld [vmem:[#allocation14_spill] sm:$0xff] }
 0x284   : > { %v2165_v52 = vpop.f32.mrb[200].mxu0  ;;  %4171 = vperm.xlu1 %10925, %v4020_v58   ;;  %v3139_v58 = vld [vmem:[#allocation2 + $0x132] sm:$0xff] }
 0x285   : > { %v2283_v48 = vadd.f32 %v2165_v52, %v11782_v8  ;;  %v9665_v31 = vpop.f32.mrb[201].mxu0  ;;  %v2564_v37 = vpop.f32.mrb[200].mxu1  ;;  %v4022_v52 = vld [vmem:[%s14052_s1 + $0xe8] sm:$0xff] }
 0x286   : > { %v2168_v49 = vpop.f32.mrb[202].mxu0  ;;  %v9757_v1 = vpop.f32.mrb[201].mxu1 }
 0x287   : > { %v2284_v54 = vadd.f32 %v2168_v49, %v14084_v57  ;;  %v12171_v20 = vadd.f32 %v2564_v37, %v2283_v48  ;;  %v9666_v12 = vpop.f32.mrb[203].mxu0  ;;  %v2567_v39 = vpop.f32.mrb[202].mxu1  ;;  %4196 = vperm.xlu0 %10924, %v4025_v45   ;;  %v4027_v48 = vld [vmem:[%s14052_s1 + $0x110] sm:$0xff] }
 0x288   : > { %v9758_v8 = vpop.f32.mrb[203].mxu1  ;;  %4181 = vperm.xlu1 %10925, %v4022_v52   ;;  %v4024_v12 = vld [vmem:[%s14052_s1 + $0xf8] sm:$0xff] }
 0x289   : > { %v12173_v22 = vadd.f32 %v2567_v39, %v2284_v54  ;;  %9872 = vmatmul.mubr.msk.bf16.gmra.mrb[52].mxu0 %vm347_vm1, %v11794_v15  ;;  %v4029_v39 = vld [vmem:[%s14052_s1 + $0x120] sm:$0xff]  ;;  %v3138_v8 = vld [vmem:[#allocation2 + $0x12a] sm:$0xff] }
 0x28a   : > { %9964 = vmatmul.mubr.msk.bf16.gmra.mrb[52].mxu1 %vm347_vm1, %v3161_v60  ;;  %9875 = vmatprep.mubr.msk.bf16.mxu0 %vm11008_vm0, %v14063_v2  ;;  %v3163_v52 = vpack.c.bf16 %v3139_v58, %v3138_v8 }
 0x28b   : > { %9967 = vmatprep.mubr.msk.bf16.mxu1 %vm11008_vm0, %v14063_v2  ;;  %4206 = vperm.xlu0 %10924, %v4027_v48   ;;  %v14086_v48 = vld [vmem:[#allocation15_spill] sm:$0xff] }
 0x28c   : > { %v2173_v15 = vpop.f32.mrb[204].mxu0  ;;  %4191 = vperm.xlu1 %10925, %v4024_v12   ;;  %v3141_v12 = vld [vmem:[#allocation2 + $0x142] sm:$0xff] }
 0x28d   : > { %v2285_v42 = vadd.f32 %v2173_v15, %v11797_v21  ;;  %v9669_v32 = vpop.f32.mrb[205].mxu0  ;;  %v2572_v19 = vpop.f32.mrb[204].mxu1  ;;  %v4026_v15 = vld [vmem:[%s14052_s1 + $0x108] sm:$0xff] }
 0x28e   : > { %v2176_v31 = vpop.f32.mrb[206].mxu0  ;;  %v9761_v37 = vpop.f32.mrb[205].mxu1 }
 0x28f   : > { %v2286_v49 = vadd.f32 %v2176_v31, %v14085_v51  ;;  %v12196_v1 = vadd.f32 %v2572_v19, %v2285_v42  ;;  %v9670_v60 = vpop.f32.mrb[207].mxu0  ;;  %v2575_v57 = vpop.f32.mrb[206].mxu1  ;;  %4216 = vperm.xlu0 %10924, %v4029_v39   ;;  %v4031_v42 = vld [vmem:[%s14052_s1 + $0x130] sm:$0xff] }
 0x290   : > { %v9762_v21 = vpop.f32.mrb[207].mxu1  ;;  %4201 = vperm.xlu1 %10925, %v4026_v15   ;;  %v4028_v60 = vld [vmem:[%s14052_s1 + $0x118] sm:$0xff]  ;;  %v14087_v15 = vld [vmem:[#allocation16_spill] sm:$0xff] }
 0x291   : > { %v12198_v54 = vadd.f32 %v2575_v57, %v2286_v49  ;;  %9876 = vmatmul.mubr.msk.bf16.gmra.mrb[56].mxu0 %vm347_vm1, %v11809_v28  ;;  %v4033_v57 = vld [vmem:[%s14052_s1 + $0x140] sm:$0xf] }
 0x292   : > { %9968 = vmatmul.mubr.msk.bf16.gmra.mrb[56].mxu1 %vm347_vm1, %v3162_v35  ;;  %9879 = vmatprep.mubr.msk.bf16.mxu0 %vm11008_vm0, %v14063_v2  ;;  %v3140_v21 = vld [vmem:[#allocation2 + $0x13a] sm:$0xff] }
 0x293   : > { %9971 = vmatprep.mubr.msk.bf16.mxu1 %vm11008_vm0, %v14063_v2  ;;  %4226 = vperm.xlu0 %10924, %v4031_v42  }
 0x294   : > { %v2181_v28 = vpop.f32.mrb[208].mxu0  ;;  %4211 = vperm.xlu1 %10925, %v4028_v60  }
 0x295   : > { %v2287_v45 = vadd.f32 %v2181_v28, %v11812_v34  ;;  %v9673_v53 = vpop.f32.mrb[209].mxu0  ;;  %v2580_v5 = vpop.f32.mrb[208].mxu1  ;;  %v4030_v28 = vld [vmem:[%s14052_s1 + $0x128] sm:$0xff] }
 0x296   : > { %v2184_v32 = vpop.f32.mrb[210].mxu0  ;;  %v9765_v19 = vpop.f32.mrb[209].mxu1 }
 0x297   : > { %v2288_v31 = vadd.f32 %v2184_v32, %v14086_v48  ;;  %v12221_v37 = vadd.f32 %v2580_v5, %v2287_v45  ;;  %v9674_v35 = vpop.f32.mrb[211].mxu0  ;;  %v2583_v51 = vpop.f32.mrb[210].mxu1  ;;  %4236 = vperm.xlu0 %10924, %v4033_v57   ;;  %v3164_v5 = vpack.c.bf16 %v3141_v12, %v3140_v21 }
 0x298   : > { %v9766_v34 = vpop.f32.mrb[211].mxu1  ;;  %4221 = vperm.xlu1 %10925, %v4030_v28   ;;  %v10963_v35 = vld [vmem:[%s14055_s4 + $0x28] sm:$0xff]  }
 0x299   : > { %v12223_v49 = vadd.f32 %v2583_v51, %v2288_v31  ;;  %9880 = vmatmul.mubr.msk.bf16.gmra.mrb[60].mxu0 %vm347_vm1, %v11824_v41  ;;  %v3142_v51 = vld [vmem:[#allocation2 + $0x14a] sm:$0xff]  ;;  %v3143_v34 = vld [vmem:[#allocation2 + $0x152] sm:$0xff]  ;;  %10086 = vmatpush3.bf16.msra.mxu1 %v10963_v35 }
 0x29a   : > { %9972 = vmatmul.mubr.msk.bf16.gmra.mrb[60].mxu1 %vm347_vm1, %v3163_v52  ;;  %9883 = vmatprep.mubr.msk.bf16.mxu0 %vm11008_vm0, %v14063_v2 }
 0x29b   : > { %9975 = vmatprep.mubr.msk.bf16.mxu1 %vm11008_vm0, %v14063_v2  ;;  %10087 = vmatprep.subr.bf16.mxu1 %v14063_v2 }
 0x29c   : > { %v2189_v41 = vpop.f32.mrb[212].mxu0 }
 0x29d   : > { %v2289_v39 = vadd.f32 %v2189_v41, %v11827_v47  ;;  %v9677_v8 = vpop.f32.mrb[213].mxu0  ;;  %v2588_v58 = vpop.f32.mrb[212].mxu1  ;;  %v4032_v47 = vld [vmem:[%s14052_s1 + $0x138] sm:$0xff] }
 0x29e   : > { %v2192_v45 = vpop.f32.mrb[214].mxu0  ;;  %v9769_v53 = vpop.f32.mrb[213].mxu1  ;;  %4231 = vperm.xlu1 %10925, %v4032_v47   ;;  %v14088_v8 = vld [vmem:[#allocation17_spill] sm:$0xff] }
 0x29f   : > { %v2290_v42 = vadd.f32 %v2192_v45, %v14087_v15  ;;  %v12243_v32 = vadd.f32 %v2588_v58, %v2289_v39  ;;  %v9678_v19 = vpop.f32.mrb[215].mxu0  ;;  %v2591_v52 = vpop.f32.mrb[214].mxu1  ;;  %v3165_v39 = vpack.c.bf16 %v3143_v34, %v3142_v51 }
 0x2a0   : > { %v9770_v48 = vpop.f32.mrb[215].mxu1  ;;  %v3144_v19 = vld [vmem:[#allocation2 + $0x15a] sm:$0xff] }
 0x2a1   : > { %v12245_v31 = vadd.f32 %v2591_v52, %v2290_v42  ;;  %9884 = vmatmul.mubr.msk.bf16.gmra.mrb[64].mxu0 %vm347_vm1, %v11839_v55  ;;  %v2746_v42 = vld [vmem:[#allocation2 + $0x161] sm:$0xff] }
 0x2a2   : > { %9976 = vmatmul.mubr.msk.bf16.gmra.mrb[64].mxu1 %vm347_vm1, %v3164_v5  ;;  %9887 = vmatprep.mubr.msk.bf16.mxu0 %vm11008_vm0, %v14063_v2  ;;  %v3145_v52 = vld [vmem:[#allocation2 + $0x162] sm:$0xff] }
 0x2a3   : > { %9979 = vmatprep.mubr.msk.bf16.mxu1 %vm11008_vm0, %v14063_v2 }
 0x2a4   : > { %v2197_v55 = vpop.f32.mrb[216].mxu0 }
 0x2a5   : > { %v2291_v60 = vadd.f32 %v2197_v55, %v11842_v62  ;;  %v9681_v57 = vpop.f32.mrb[217].mxu0  ;;  %v2596_v21 = vpop.f32.mrb[216].mxu1  ;;  %v2745_v62 = vld [vmem:[#allocation2 + $0x159] sm:$0xff] }
 0x2a6   : > { %v2200_v12 = vpop.f32.mrb[218].mxu0  ;;  %v9773_v41 = vpop.f32.mrb[217].mxu1  ;;  %v2767_v34 = vpack.c.bf16 %v2746_v42, %v2745_v62 }
 0x2a7   : > { %v2292_v58 = vadd.f32 %v2200_v12, %v14088_v8  ;;  %v12263_v28 = vadd.f32 %v2596_v21, %v2291_v60  ;;  %v9682_v45 = vpop.f32.mrb[219].mxu0  ;;  %v2599_v53 = vpop.f32.mrb[218].mxu1  ;;  %v3166_v60 = vpack.c.bf16 %v3145_v52, %v3144_v19 }
 0x2a8   : > { %v9774_v5 = vpop.f32.mrb[219].mxu1 }
 0x2a9   : > { %v12265_v15 = vadd.f32 %v2599_v53, %v2292_v58  ;;  %9888 = vmatmul.mubr.msk.bf16.gmra.mrb[68].mxu0 %vm347_vm1, %v11854_v7  ;;  %v3146_v58 = vld [vmem:[#allocation2 + $0x16a] sm:$0xf] }
 0x2aa   : > { %9980 = vmatmul.mubr.msk.bf16.gmra.mrb[68].mxu1 %vm347_vm1, %v3165_v39  ;;  %9891 = vmatprep.mubr.msk.bf16.mxu0 %vm11008_vm0, %v14063_v2  ;;  %v3167_v52 = vpack.c.bf16 %v3146_v58, %v3146_v58 }
 0x2ab   : > { %9983 = vmatprep.mubr.msk.bf16.mxu1 %vm11008_vm0, %v14063_v2 }
 0x2ac   : > { %v2205_v48 = vpop.f32.mrb[220].mxu0 }
 0x2ad   : > { %v2293_v47 = vadd.f32 %v2205_v48, %v11857_v14  ;;  %v9685_v35 = vpop.f32.mrb[221].mxu0  ;;  %v2604_v51 = vpop.f32.mrb[220].mxu1  ;;  %v2747_v14 = vld [vmem:[#allocation2 + $0x169] sm:$0xf] }
 0x2ae   : > { %v2208_v55 = vpop.f32.mrb[222].mxu0  ;;  %v9777_v7 = vpop.f32.mrb[221].mxu1  ;;  %v2768_v62 = vpack.c.bf16 %v2747_v14, %v2747_v14 }
 0x2af   : > { %v2294_v57 = vadd.f32 %v2208_v55, %v11859_v11  ;;  %v12276_v21 = vadd.f32 %v2604_v51, %v2293_v47  ;;  %v9686_v12 = vpop.f32.mrb[223].mxu0  ;;  %v2607_v41 = vpop.f32.mrb[222].mxu1  ;;  %v3506_v7 = vld [vmem:[#allocation2 + $0x33] sm:$0xff] }
 0x2b0   : > { %v9778_v39 = vpop.f32.mrb[223].mxu1 }
 0x2b1   : > { %v12278_v8 = vadd.f32 %v2607_v41, %v2294_v57  ;;  %9892 = vmatmul.mubr.msk.bf16.gmra.mrb[72].mxu0 %vm347_vm1, %v2767_v34 }
 0x2b2   : > { %9984 = vmatmul.mubr.msk.bf16.gmra.mrb[72].mxu1 %vm347_vm1, %v3166_v60  ;;  %9895 = vmatprep.mubr.msk.bf16.mxu0 %vm11008_vm0, %v14063_v2 }
 0x2b3   : > { %9987 = vmatprep.mubr.msk.bf16.mxu1 %vm11008_vm0, %v14063_v2 }
 0x2b4   : > { %v2213_v11 = vpop.f32.mrb[224].mxu0 }
 0x2b5   : > { %v2295_v45 = vadd.f32 %v2213_v11, %v11870_v23  ;;  %v9689_v53 = vpop.f32.mrb[225].mxu0  ;;  %v2612_v5 = vpop.f32.mrb[224].mxu1  ;;  %v3505_v23 = vld [vmem:[#allocation2 + $0x2b] sm:$0xff] }
 0x2b6   : > { %v2216_v42 = vpop.f32.mrb[226].mxu0  ;;  %v9781_v19 = vpop.f32.mrb[225].mxu1  ;;  %v3546_v41 = vpack.c.bf16 %v3506_v7, %v3505_v23 }
 0x2b7   : > { %v2296_v48 = vadd.f32 %v2216_v42, %v11872_v24  ;;  %v12288_v47 = vadd.f32 %v2612_v5, %v2295_v45  ;;  %v9690_v35 = vpop.f32.mrb[227].mxu0  ;;  %v2615_v51 = vpop.f32.mrb[226].mxu1  ;;  %v3508_v42 = vld [vmem:[#allocation2 + $0x43] sm:$0xff] }
 0x2b8   : > { %v9782_v34 = vpop.f32.mrb[227].mxu1 }
 0x2b9   : > { %v12290_v55 = vadd.f32 %v2615_v51, %v2296_v48  ;;  %9896 = vmatmul.mubr.msk.bf16.gmra.mrb[76].mxu0 %vm347_vm1, %v2768_v62 }
 0x2ba   : > { %9988 = vmatmul.mubr.msk.bf16.gmra.mrb[76].mxu1 %vm347_vm1, %v3167_v52  ;;  %9999 = vmatprep.mubr.msk.bf16.mxu0 %vm11008_vm0, %v14063_v2 }
 0x2bb   : > { %10091 = vmatprep.mubr.msk.bf16.mxu1 %vm11008_vm0, %v14063_v2 }
 0x2bc   : > { %v2221_v24 = vpop.f32.mrb[228].mxu0 }
 0x2bd   : > { %v2297_v60 = vadd.f32 %v2221_v24, %v11885_v18  ;;  %v9693_v57 = vpop.f32.mrb[229].mxu0  ;;  %v2620_v12 = vpop.f32.mrb[228].mxu1  ;;  %v3507_v18 = vld [vmem:[#allocation2 + $0x3b] sm:$0xff] }
 0x2be   : > { %v2224_v39 = vpop.f32.mrb[230].mxu0  ;;  %v9785_v14 = vpop.f32.mrb[229].mxu1 }
 0x2bf   : > { %v2298_v58 = vadd.f32 %v2224_v39, %v11887_v30  ;;  %v12300_v11 = vadd.f32 %v2620_v12, %v2297_v60  ;;  %v9694_v45 = vpop.f32.mrb[231].mxu0  ;;  %v2623_v53 = vpop.f32.mrb[230].mxu1  ;;  %v3547_v30 = vpack.c.bf16 %v3508_v42, %v3507_v18 }
 0x2c0   : > { %v9786_v5 = vpop.f32.mrb[231].mxu1 }
 0x2c1   : > { %v12302_v62 = vadd.f32 %v2623_v53, %v2298_v58  ;;  %10000 = vmatmul.mubr.msk.bf16.vlgmr.msra.gmra.mrb[80].mxu0 %vm347_vm1, %v3546_v41  ;;  %v3510_v41 = vld [vmem:[#allocation2 + $0x53] sm:$0xff] }
 0x2c2   : > { %10003 = vmatprep.mubr.msk.bf16.mxu0 %vm11008_vm0, %v14063_v2  ;;  %v10964_v53 = vld [vmem:[%s14055_s4 + $0x30] sm:$0xff]  }
 0x2c3   : > { %10088 = vmatpush3.bf16.msra.mxu1 %v10964_v53  ;;  %v3514_v53 = vld [vmem:[#allocation2 + $0x73] sm:$0xff] }
 0x2c4   : > { %v2229_v19 = vpop.f32.mrb[232].mxu0  ;;  %10089 = vmatprep.subr.bf16.mxu1 %v14063_v2 }
 0x2c5   : > { %v2299_v52 = vadd.f32 %v2229_v19, %v11902_v56  ;;  %v9697_v48 = vpop.f32.mrb[233].mxu0  ;;  %v2628_v35 = vpop.f32.mrb[232].mxu1  ;;  %v3509_v56 = vld [vmem:[#allocation2 + $0x4b] sm:$0xff] }
 0x2c6   : > { %v2232_v51 = vpop.f32.mrb[234].mxu0  ;;  %v9789_v34 = vpop.f32.mrb[233].mxu1 }
 0x2c7   : > { %v2300_v23 = vadd.f32 %v2232_v51, %v11908_v38  ;;  %v12309_v7 = vadd.f32 %v2628_v35, %v2299_v52  ;;  %v9698_v24 = vpop.f32.mrb[235].mxu0  ;;  %v2631_v60 = vpop.f32.mrb[234].mxu1  ;;  %v3548_v38 = vpack.c.bf16 %v3510_v41, %v3509_v56  ;;  %v3512_v51 = vld [vmem:[#allocation2 + $0x63] sm:$0xff] }
 0x2c8   : > { %v9790_v57 = vpop.f32.mrb[235].mxu1 }
 0x2c9   : > { %v12311_v12 = vadd.f32 %v2631_v60, %v2300_v23  ;;  %10004 = vmatmul.mubr.msk.bf16.gmra.mrb[84].mxu0 %vm347_vm1, %v3547_v30  ;;  %v3511_v30 = vld [vmem:[#allocation2 + $0x5b] sm:$0xff] }
 0x2ca   : > { %10007 = vmatprep.mubr.msk.bf16.mxu0 %vm11008_vm0, %v14063_v2  ;;  %v3549_v60 = vpack.c.bf16 %v3512_v51, %v3511_v30 }
 0x2cc   : > { %v2237_v39 = vpop.f32.mrb[236].mxu0 }
 0x2cd   : > { %v2301_v14 = vadd.f32 %v2237_v39, %v11924_v27  ;;  %v9701_v58 = vpop.f32.mrb[237].mxu0  ;;  %v2636_v45 = vpop.f32.mrb[236].mxu1 }
 0x2ce   : > { %v2240_v5 = vpop.f32.mrb[238].mxu0  ;;  %v9793_v18 = vpop.f32.mrb[237].mxu1 }
 0x2cf   : > { %v2302_v42 = vadd.f32 %v2240_v5, %v11929_v61  ;;  %v12321_v19 = vadd.f32 %v2636_v45, %v2301_v14  ;;  %v9702_v52 = vpop.f32.mrb[239].mxu0  ;;  %v2639_v48 = vpop.f32.mrb[238].mxu1 }
 0x2d0   : > { %v9794_v35 = vpop.f32.mrb[239].mxu1 }
 0x2d1   : > { %v12324_v27 = vadd.f32 %v2639_v48, %v2302_v42  ;;  %10008 = vmatmul.mubr.msk.bf16.gmra.mrb[88].mxu0 %vm347_vm1, %v3548_v38 }
 0x2d2   : > { %10011 = vmatprep.mubr.msk.bf16.mxu0 %vm11008_vm0, %v14063_v2 }
 0x2d4   : > { %v2245_v34 = vpop.f32.mrb[240].mxu0 }
 0x2d5   : > { %v2303_v61 = vadd.f32 %v2245_v34, %v11940_v26  ;;  %v9705_v23 = vpop.f32.mrb[241].mxu0  ;;  %v2644_v24 = vpop.f32.mrb[240].mxu1  ;;  %v3513_v26 = vld [vmem:[#allocation2 + $0x6b] sm:$0xff] }
 0x2d6   : > { %v2248_v57 = vpop.f32.mrb[242].mxu0  ;;  %v9797_v56 = vpop.f32.mrb[241].mxu1 }
 0x2d7   : > { %v2304_v41 = vadd.f32 %v2248_v57, %v11942_v4  ;;  %v12331_v39 = vadd.f32 %v2644_v24, %v2303_v61  ;;  %v9706_v14 = vpop.f32.mrb[243].mxu0  ;;  %v2647_v58 = vpop.f32.mrb[242].mxu1  ;;  %v3550_v4 = vpack.c.bf16 %v3514_v53, %v3513_v26 }
 0x2d8   : > { %v9798_v45 = vpop.f32.mrb[243].mxu1 }
 0x2d9   : > { %v12333_v38 = vadd.f32 %v2647_v58, %v2304_v41  ;;  %10012 = vmatmul.mubr.msk.bf16.gmra.mrb[92].mxu0 %vm347_vm1, %v3549_v60  ;;  %v3516_v60 = vld [vmem:[#allocation2 + $0x83] sm:$0xff] }
 0x2da   : > { %10015 = vmatprep.mubr.msk.bf16.mxu0 %vm11008_vm0, %v14063_v2 }
 0x2dc   : > { %v2253_v5 = vpop.f32.mrb[244].mxu0 }
 0x2dd   : > { %v2305_v18 = vadd.f32 %v2253_v5, %v11953_v40  ;;  %v9709_v42 = vpop.f32.mrb[245].mxu0  ;;  %v2652_v52 = vpop.f32.mrb[244].mxu1  ;;  %v3515_v40 = vld [vmem:[#allocation2 + $0x7b] sm:$0xff] }
 0x2de   : > { %v2256_v48 = vpop.f32.mrb[246].mxu0  ;;  %v9801_v35 = vpop.f32.mrb[245].mxu1  ;;  %v3517_v42 = vld [vmem:[#allocation2 + $0x8b] sm:$0xff] }
 0x2df   : > { %v2306_v30 = vadd.f32 %v2256_v48, %v11955_v6  ;;  %v12340_v51 = vadd.f32 %v2652_v52, %v2305_v18  ;;  %v9710_v34 = vpop.f32.mrb[247].mxu0  ;;  %v2655_v61 = vpop.f32.mrb[246].mxu1  ;;  %v3551_v6 = vpack.c.bf16 %v3516_v60, %v3515_v40  ;;  %v3518_v52 = vld [vmem:[#allocation2 + $0x93] sm:$0xff] }
 0x2e0   : > { %v9802_v23 = vpop.f32.mrb[247].mxu1 }
 0x2e1   : > { %v12342_v24 = vadd.f32 %v2655_v61, %v2306_v30  ;;  %10016 = vmatmul.mubr.msk.bf16.gmra.mrb[96].mxu0 %vm347_vm1, %v3550_v4  ;;  %v3552_v30 = vpack.c.bf16 %v3518_v52, %v3517_v42 }
 0x2e2   : > { %10019 = vmatprep.mubr.msk.bf16.mxu0 %vm11008_vm0, %v14063_v2 }
 0x2e4   : > { %v2261_v57 = vpop.f32.mrb[248].mxu0 }
 0x2e5   : > { %v2307_v56 = vadd.f32 %v2261_v57, %v11965_v13  ;;  %v9713_v41 = vpop.f32.mrb[249].mxu0  ;;  %v2660_v14 = vpop.f32.mrb[248].mxu1 }
 0x2e6   : > { %v2264_v58 = vpop.f32.mrb[250].mxu0  ;;  %v9805_v45 = vpop.f32.mrb[249].mxu1 }
 0x2e7   : > { %v12348_v26 = vadd.f32 %v2660_v14, %v2307_v56  ;;  %v9714_v53 = vpop.f32.mrb[251].mxu0  ;;  %v2663_v5 = vpop.f32.mrb[250].mxu1  ;;  %v3520_v14 = vld [vmem:[#allocation2 + $0xa3] sm:$0xff] }
 0x2e8   : > { %v9806_v18 = vpop.f32.mrb[251].mxu1 }
 0x2e9   : > { %10020 = vmatmul.mubr.msk.bf16.gmra.mrb[100].mxu0 %vm347_vm1, %v3551_v6 }
 0x2ea   : > { %10023 = vmatprep.mubr.msk.bf16.mxu0 %vm11008_vm0, %v14063_v2 }
 0x2ec   : > { %v2899_v4 = vpop.f32.mrb[252].mxu0 }
 0x2ed   : > { %v3065_v13 = vadd.f32 %v2899_v4, %v11976_v33  ;;  %v9817_v48 = vpop.f32.mrb[253].mxu0  ;;  %v3298_v35 = vpop.f32.mrb[252].mxu1  ;;  %v3519_v33 = vld [vmem:[#allocation2 + $0x9b] sm:$0xff] }
 0x2ee   : > { %v2902_v34 = vpop.f32.mrb[254].mxu0  ;;  %v9909_v61 = vpop.f32.mrb[253].mxu1  ;;  %v10965_v48 = vld [vmem:[%s14055_s4 + $0x38] sm:$0xff]  }
 0x2ef   : > { %v3066_v23 = vadd.f32 %v2902_v34, %v11978_v29  ;;  %v12355_v40 = vadd.f32 %v3298_v35, %v3065_v13  ;;  %v9818_v60 = vpop.f32.mrb[255].mxu0  ;;  %v3301_v57 = vpop.f32.mrb[254].mxu1  ;;  %v3553_v29 = vpack.c.bf16 %v3520_v14, %v3519_v33  ;;  %10090 = vmatpush3.bf16.msra.mxu1 %v10965_v48  ;;  %v3522_v34 = vld [vmem:[#allocation2 + $0xb3] sm:$0xff] }
 0x2f0   : > { %v9910_v56 = vpop.f32.mrb[255].mxu1  ;;  %10267 = vmatprep.subr.bf16.mxu1 %v14063_v2 }
 0x2f1   : > { %v12357_v41 = vadd.f32 %v3301_v57, %v3066_v23  ;;  %10024 = vmatmul.mubr.msk.bf16.gmra.mrb[104].mxu0 %vm347_vm1, %v3552_v30 }
 0x2f2   : > { %10027 = vmatprep.mubr.msk.bf16.mxu0 %vm11008_vm0, %v14063_v2 }
 0x2f4   : > { %v2907_v6 = vpop.f32.mrb[0].mxu0 }
 0x2f5   : > { %v3067_v58 = vadd.f32 %v2907_v6, %v11995_v63  ;;  %v9821_v45 = vpop.f32.mrb[1].mxu0  ;;  %v3306_v53 = vpop.f32.mrb[0].mxu1  ;;  %v3521_v63 = vld [vmem:[#allocation2 + $0xab] sm:$0xff] }
 0x2f6   : > { %v2910_v5 = vpop.f32.mrb[2].mxu0  ;;  %v9913_v18 = vpop.f32.mrb[1].mxu1  ;;  %v3554_v57 = vpack.c.bf16 %v3522_v34, %v3521_v63 }
 0x2f7   : > { %v3068_v42 = vadd.f32 %v2910_v5, %v11997_v9  ;;  %v12364_v52 = vadd.f32 %v3306_v53, %v3067_v58  ;;  %v9822_v4 = vpop.f32.mrb[3].mxu0  ;;  %v3309_v13 = vpop.f32.mrb[2].mxu1  ;;  %v3524_v5 = vld [vmem:[#allocation2 + $0xc3] sm:$0xff] }
 0x2f8   : > { %v9914_v35 = vpop.f32.mrb[3].mxu1 }
 0x2f9   : > { %v12369_v30 = vadd.f32 %v3309_v13, %v3068_v42  ;;  %10028 = vmatmul.mubr.msk.bf16.gmra.mrb[108].mxu0 %vm347_vm1, %v3553_v29 }
 0x2fa   : > { %10031 = vmatprep.mubr.msk.bf16.mxu0 %vm11008_vm0, %v14063_v2 }
 0x2fc   : > { %v2915_v9 = vpop.f32.mrb[4].mxu0 }
 0x2fd   : > { %v3069_v61 = vadd.f32 %v2915_v9, %v12017_v36  ;;  %v9825_v23 = vpop.f32.mrb[5].mxu0  ;;  %v3314_v60 = vpop.f32.mrb[4].mxu1  ;;  %v3523_v36 = vld [vmem:[#allocation2 + $0xbb] sm:$0xff] }
 0x2fe   : > { %v2918_v56 = vpop.f32.mrb[6].mxu0  ;;  %v9917_v33 = vpop.f32.mrb[5].mxu1 }
 0x2ff   : > { %v3070_v14 = vadd.f32 %v2918_v56, %v12019_v25  ;;  %v12377_v6 = vadd.f32 %v3314_v60, %v3069_v61  ;;  %v9826_v58 = vpop.f32.mrb[7].mxu0  ;;  %v3317_v45 = vpop.f32.mrb[6].mxu1  ;;  %v3555_v25 = vpack.c.bf16 %v3524_v5, %v3523_v36 }
 0x300   : > { %v9918_v53 = vpop.f32.mrb[7].mxu1 }
 0x301   : > { %v12379_v29 = vadd.f32 %v3317_v45, %v3070_v14  ;;  %10032 = vmatmul.mubr.msk.bf16.gmra.mrb[112].mxu0 %vm347_vm1, %v3554_v57  ;;  %v3526_v57 = vld [vmem:[#allocation2 + $0xd3] sm:$0xff] }
 0x302   : > { %10035 = vmatprep.mubr.msk.bf16.mxu0 %vm11008_vm0, %v14063_v2 }
 0x304   : > { %v2923_v18 = vpop.f32.mrb[8].mxu0 }
 0x305   : > { %v3071_v42 = vadd.f32 %v2923_v18, %v12042_v16  ;;  %v9829_v4 = vpop.f32.mrb[9].mxu0  ;;  %v3322_v13 = vpop.f32.mrb[8].mxu1  ;;  %v3525_v16 = vld [vmem:[#allocation2 + $0xcb] sm:$0xff] }
 0x306   : > { %v2926_v48 = vpop.f32.mrb[10].mxu0  ;;  %v9921_v35 = vpop.f32.mrb[9].mxu1  ;;  %v10966_v4 = vld [vmem:[%s14055_s4] sm:$0xff]  }
 0x307   : > { %v3072_v63 = vadd.f32 %v2926_v48, %v12044_v10  ;;  %v12386_v34 = vadd.f32 %v3322_v13, %v3071_v42  ;;  %v9830_v9 = vpop.f32.mrb[11].mxu0  ;;  %v3325_v61 = vpop.f32.mrb[10].mxu1  ;;  %v3556_v10 = vpack.c.bf16 %v3526_v57, %v3525_v16  ;;  %v3528_v48 = vld [vmem:[#allocation2 + $0xe3] sm:$0xff]  ;;  %10176 = vmatpush3.bf16.msra.mxu0 %v10966_v4 }
 0x308   : > { %v9922_v23 = vpop.f32.mrb[11].mxu1  ;;  %10177 = vmatprep.subr.bf16.mxu0 %v14063_v2  ;;  %v4398_v4 = vld [vmem:[#allocation3 + $0xe] sm:$0xff] }
 0x309   : > { %v12388_v60 = vadd.f32 %v3325_v61, %v3072_v63  ;;  %10036 = vmatmul.mubr.msk.bf16.gmra.mrb[116].mxu0 %vm347_vm1, %v3555_v25 }
 0x30a   : > { %10039 = vmatprep.mubr.msk.bf16.mxu0 %vm11008_vm0, %v14063_v2 }
 0x30c   : > { %v2931_v56 = vpop.f32.mrb[12].mxu0 }
 0x30d   : > { %v3073_v33 = vadd.f32 %v2931_v56, %v12067_v59  ;;  %v9833_v14 = vpop.f32.mrb[13].mxu0  ;;  %v3330_v58 = vpop.f32.mrb[12].mxu1  ;;  %v3527_v59 = vld [vmem:[#allocation2 + $0xdb] sm:$0xff] }
 0x30e   : > { %v2934_v45 = vpop.f32.mrb[14].mxu0  ;;  %v9925_v53 = vpop.f32.mrb[13].mxu1  ;;  %v3557_v23 = vpack.c.bf16 %v3528_v48, %v3527_v59 }
 0x30f   : > { %v3074_v36 = vadd.f32 %v2934_v45, %v12072_v46  ;;  %v12395_v5 = vadd.f32 %v3330_v58, %v3073_v33  ;;  %v9834_v18 = vpop.f32.mrb[15].mxu0  ;;  %v3333_v42 = vpop.f32.mrb[14].mxu1  ;;  %v10967_v46 = vld [vmem:[%s14055_s4 + $0x8] sm:$0xff]  }
 0x310   : > { %v9926_v13 = vpop.f32.mrb[15].mxu1  ;;  %10178 = vmatpush3.bf16.msra.mxu0 %v10967_v46  ;;  %v3529_v53 = vld [vmem:[#allocation2 + $0xeb] sm:$0xff] }
 0x311   : > { %v12400_v25 = vadd.f32 %v3333_v42, %v3074_v36  ;;  %10040 = vmatmul.mubr.msk.bf16.gmra.mrb[120].mxu0 %vm347_vm1, %v3556_v10  ;;  %10179 = vmatprep.subr.bf16.mxu0 %v14063_v2  ;;  %v10968_v10 = vld [vmem:[%s14055_s4 + $0x10] sm:$0xff]   ;;  %v10969_v36 = vld [vmem:[%s14055_s4 + $0x18] sm:$0xff]  }
 0x312   : > { %10043 = vmatprep.mubr.msk.bf16.mxu0 %vm11008_vm0, %v14063_v2  ;;  %v4397_v42 = vld [vmem:[#allocation3 + $0x6] sm:$0xff] }
 0x314   : > { %v2939_v35 = vpop.f32.mrb[16].mxu0  ;;  %10180 = vmatpush3.bf16.msra.mxu0 %v10968_v10 }
 0x315   : > { %v3075_v63 = vadd.f32 %v2939_v35, %v12092_v43  ;;  %v9837_v9 = vpop.f32.mrb[17].mxu0  ;;  %v3338_v61 = vpop.f32.mrb[16].mxu1  ;;  %10181 = vmatprep.subr.bf16.mxu0 %v14063_v2  ;;  %v4438_v35 = vpack.c.bf16 %v4398_v4, %v4397_v42 }
 0x316   : > { %v2942_v16 = vpop.f32.mrb[18].mxu0  ;;  %v9929_v57 = vpop.f32.mrb[17].mxu1 }
 0x317   : > { %v3076_v56 = vadd.f32 %v2942_v16, %v12094_v3  ;;  %v12411_v33 = vadd.f32 %v3338_v61, %v3075_v63  ;;  %v9838_v14 = vpop.f32.mrb[19].mxu0  ;;  %v3341_v58 = vpop.f32.mrb[18].mxu1  ;;  %v3530_v3 = vld [vmem:[#allocation2 + $0xf3] sm:$0xff]  ;;  %10092 = vmatmul.mubr.msk.bf16.vlgmr.msra.gmra.mrb[80].mxu1 %vm347_vm1, %v4438_v35 }
 0x318   : > { %v9930_v45 = vpop.f32.mrb[19].mxu1  ;;  %v3558_v46 = vpack.c.bf16 %v3530_v3, %v3529_v53  ;;  %10182 = vmatpush3.bf16.msra.mxu0 %v10969_v36  ;;  %10095 = vmatprep.mubr.msk.bf16.mxu1 %vm11008_vm0, %v14063_v2  ;;  %v3532_v14 = vld [vmem:[#allocation2 + $0x103] sm:$0xff]  ;;  %v3534_v35 = vld [vmem:[#allocation2 + $0x113] sm:$0xff] }
 0x319   : > { %v12417_v43 = vadd.f32 %v3341_v58, %v3076_v56  ;;  %10044 = vmatmul.mubr.msk.bf16.gmra.mrb[124].mxu0 %vm347_vm1, %v3557_v23  ;;  %10359 = vmatprep.subr.bf16.mxu0 %v14063_v2 }
 0x31a   : > { %10047 = vmatprep.mubr.msk.bf16.mxu0 %vm11008_vm0, %v14063_v2 }
 0x31c   : > { %v2947_v18 = vpop.f32.mrb[20].mxu0 }
 0x31d   : > { %v3077_v13 = vadd.f32 %v2947_v18, %v12117_v17  ;;  %v9841_v59 = vpop.f32.mrb[21].mxu0  ;;  %v3346_v48 = vpop.f32.mrb[20].mxu1 }
 0x31e   : > { %v2950_v63 = vpop.f32.mrb[22].mxu0  ;;  %v9933_v9 = vpop.f32.mrb[21].mxu1 }
 0x31f   : > { %v3078_v61 = vadd.f32 %v2950_v63, %v12119_v0  ;;  %v12428_v23 = vadd.f32 %v3346_v48, %v3077_v13  ;;  %v9842_v16 = vpop.f32.mrb[23].mxu0  ;;  %v3349_v57 = vpop.f32.mrb[22].mxu1  ;;  %v3531_v0 = vld [vmem:[#allocation2 + $0xfb] sm:$0xff] }
 0x320   : > { %v9934_v56 = vpop.f32.mrb[23].mxu1  ;;  %v3559_v3 = vpack.c.bf16 %v3532_v14, %v3531_v0  ;;  %v10970_v0 = vld [vmem:[%s14055_s4 + $0x40] sm:$0xff]  }
 0x321   : > { %v12434_v17 = vadd.f32 %v3349_v57, %v3078_v61  ;;  %10048 = vmatmul.mubr.msk.bf16.gmra.mrb[128].mxu0 %vm347_vm1, %v3558_v46  ;;  %10268 = vmatpush3.bf16.msra.mxu1 %v10970_v0 }
 0x322   : > { %10051 = vmatprep.mubr.msk.bf16.mxu0 %vm11008_vm0, %v14063_v2  ;;  %10269 = vmatprep.subr.bf16.mxu1 %v14063_v2 }
 0x324   : > { %v2955_v58 = vpop.f32.mrb[24].mxu0 }
 0x325   : > { %v3079_v10 = vadd.f32 %v2955_v58, %v12146_v44  ;;  %v9845_v45 = vpop.f32.mrb[25].mxu0  ;;  %v3354_v53 = vpop.f32.mrb[24].mxu1  ;;  %v3533_v44 = vld [vmem:[#allocation2 + $0x10b] sm:$0xff] }
 0x326   : > { %v2958_v36 = vpop.f32.mrb[26].mxu0  ;;  %v9937_v18 = vpop.f32.mrb[25].mxu1 }
 0x327   : > { %v3080_v42 = vadd.f32 %v2958_v36, %v12148_v50  ;;  %v12441_v4 = vadd.f32 %v3354_v53, %v3079_v10  ;;  %v9846_v13 = vpop.f32.mrb[27].mxu0  ;;  %v3357_v59 = vpop.f32.mrb[26].mxu1  ;;  %v3560_v50 = vpack.c.bf16 %v3534_v35, %v3533_v44  ;;  %v3536_v36 = vld [vmem:[#allocation2 + $0x123] sm:$0xff] }
 0x328   : > { %v9938_v48 = vpop.f32.mrb[27].mxu1 }
 0x329   : > { %v12443_v46 = vadd.f32 %v3357_v59, %v3080_v42  ;;  %10052 = vmatmul.mubr.msk.bf16.gmra.mrb[132].mxu0 %vm347_vm1, %v3559_v3 }
 0x32a   : > { %10055 = vmatprep.mubr.msk.bf16.mxu0 %vm11008_vm0, %v14063_v2 }
 0x32c   : > { %v2963_v63 = vpop.f32.mrb[28].mxu0 }
 0x32d   : > { %v3081_v9 = vadd.f32 %v2963_v63, %v12171_v20  ;;  %v9849_v61 = vpop.f32.mrb[29].mxu0  ;;  %v3362_v16 = vpop.f32.mrb[28].mxu1  ;;  %v3535_v20 = vld [vmem:[#allocation2 + $0x11b] sm:$0xff] }
 0x32e   : > { %v2966_v57 = vpop.f32.mrb[30].mxu0  ;;  %v9941_v56 = vpop.f32.mrb[29].mxu1  ;;  %v3561_v59 = vpack.c.bf16 %v3536_v36, %v3535_v20 }
 0x32f   : > { %v3082_v14 = vadd.f32 %v2966_v57, %v12173_v22  ;;  %v12453_v58 = vadd.f32 %v3362_v16, %v3081_v9  ;;  %v9850_v10 = vpop.f32.mrb[31].mxu0  ;;  %v3365_v45 = vpop.f32.mrb[30].mxu1  ;;  %v3538_v57 = vld [vmem:[#allocation2 + $0x133] sm:$0xff] }
 0x330   : > { %v9942_v53 = vpop.f32.mrb[31].mxu1 }
 0x331   : > { %v12455_v3 = vadd.f32 %v3365_v45, %v3082_v14  ;;  %10056 = vmatmul.mubr.msk.bf16.gmra.mrb[136].mxu0 %vm347_vm1, %v3560_v50 }
 0x332   : > { %10059 = vmatprep.mubr.msk.bf16.mxu0 %vm11008_vm0, %v14063_v2 }
 0x334   : > { %v2971_v18 = vpop.f32.mrb[32].mxu0 }
 0x335   : > { %v3083_v22 = vadd.f32 %v2971_v18, %v12196_v1  ;;  %v9853_v42 = vpop.f32.mrb[33].mxu0  ;;  %v3370_v13 = vpop.f32.mrb[32].mxu1  ;;  %v3537_v1 = vld [vmem:[#allocation2 + $0x12b] sm:$0xff] }
 0x336   : > { %v2974_v48 = vpop.f32.mrb[34].mxu0  ;;  %v9945_v44 = vpop.f32.mrb[33].mxu1 }
 0x337   : > { %v3084_v35 = vadd.f32 %v2974_v48, %v12198_v54  ;;  %v12463_v63 = vadd.f32 %v3370_v13, %v3083_v22  ;;  %v9854_v9 = vpop.f32.mrb[35].mxu0  ;;  %v3373_v61 = vpop.f32.mrb[34].mxu1  ;;  %v3562_v54 = vpack.c.bf16 %v3538_v57, %v3537_v1 }
 0x338   : > { %v9946_v16 = vpop.f32.mrb[35].mxu1 }
 0x339   : > { %v12465_v50 = vadd.f32 %v3373_v61, %v3084_v35  ;;  %10060 = vmatmul.mubr.msk.bf16.gmra.mrb[140].mxu0 %vm347_vm1, %v3561_v59  ;;  %v3540_v59 = vld [vmem:[#allocation2 + $0x143] sm:$0xff] }
 0x33a   : > { %10063 = vmatprep.mubr.msk.bf16.mxu0 %vm11008_vm0, %v14063_v2 }
 0x33c   : > { %v2979_v56 = vpop.f32.mrb[36].mxu0 }
 0x33d   : > { %v3085_v0 = vadd.f32 %v2979_v56, %v12221_v37  ;;  %v9857_v14 = vpop.f32.mrb[37].mxu0  ;;  %v3378_v10 = vpop.f32.mrb[36].mxu1  ;;  %v3539_v37 = vld [vmem:[#allocation2 + $0x13b] sm:$0xff] }
 0x33e   : > { %v2982_v45 = vpop.f32.mrb[38].mxu0  ;;  %v9949_v53 = vpop.f32.mrb[37].mxu1 }
 0x33f   : > { %v3086_v20 = vadd.f32 %v2982_v45, %v12223_v49  ;;  %v12472_v36 = vadd.f32 %v3378_v10, %v3085_v0  ;;  %v9858_v18 = vpop.f32.mrb[39].mxu0  ;;  %v3381_v22 = vpop.f32.mrb[38].mxu1  ;;  %v3563_v49 = vpack.c.bf16 %v3540_v59, %v3539_v37 }
 0x340   : > { %v9950_v42 = vpop.f32.mrb[39].mxu1 }
 0x341   : > { %v12474_v13 = vadd.f32 %v3381_v22, %v3086_v20  ;;  %10064 = vmatmul.mubr.msk.bf16.gmra.mrb[144].mxu0 %vm347_vm1, %v3562_v54  ;;  %v3542_v54 = vld [vmem:[#allocation2 + $0x153] sm:$0xff] }
 0x342   : > { %10067 = vmatprep.mubr.msk.bf16.mxu0 %vm11008_vm0, %v14063_v2 }
 0x344   : > { %v2987_v48 = vpop.f32.mrb[40].mxu0 }
 0x345   : > { %v3087_v44 = vadd.f32 %v2987_v48, %v12243_v32  ;;  %v9861_v35 = vpop.f32.mrb[41].mxu0  ;;  %v3386_v9 = vpop.f32.mrb[40].mxu1  ;;  %v3541_v32 = vld [vmem:[#allocation2 + $0x14b] sm:$0xff] }
 0x346   : > { %v2990_v61 = vpop.f32.mrb[42].mxu0  ;;  %v9953_v16 = vpop.f32.mrb[41].mxu1  ;;  %v10971_v35 = vld [vmem:[%s14055_s4 + $0x48] sm:$0xff]  }
 0x347   : > { %v3088_v1 = vadd.f32 %v2990_v61, %v12245_v31  ;;  %v12481_v57 = vadd.f32 %v3386_v9, %v3087_v44  ;;  %v9862_v56 = vpop.f32.mrb[43].mxu0  ;;  %v3389_v0 = vpop.f32.mrb[42].mxu1  ;;  %v3564_v31 = vpack.c.bf16 %v3542_v54, %v3541_v32  ;;  %10270 = vmatpush3.bf16.msra.mxu1 %v10971_v35  ;;  %v3544_v61 = vld [vmem:[#allocation2 + $0x163] sm:$0xff] }
 0x348   : > { %v9954_v14 = vpop.f32.mrb[43].mxu1  ;;  %10271 = vmatprep.subr.bf16.mxu1 %v14063_v2 }
 0x349   : > { %v12483_v10 = vadd.f32 %v3389_v0, %v3088_v1  ;;  %10068 = vmatmul.mubr.msk.bf16.gmra.mrb[148].mxu0 %vm347_vm1, %v3563_v49 }
 0x34a   : > { %10071 = vmatprep.mubr.msk.bf16.mxu0 %vm11008_vm0, %v14063_v2 }
 0x34c   : > { %v2995_v45 = vpop.f32.mrb[44].mxu0 }
 0x34d   : > { %v3089_v53 = vadd.f32 %v2995_v45, %v12263_v28  ;;  %v9865_v20 = vpop.f32.mrb[45].mxu0  ;;  %v3394_v18 = vpop.f32.mrb[44].mxu1  ;;  %v3543_v28 = vld [vmem:[#allocation2 + $0x15b] sm:$0xff] }
 0x34e   : > { %v2998_v22 = vpop.f32.mrb[46].mxu0  ;;  %v9957_v42 = vpop.f32.mrb[45].mxu1  ;;  %v3565_v0 = vpack.c.bf16 %v3544_v61, %v3543_v28 }
 0x34f   : > { %v3090_v37 = vadd.f32 %v2998_v22, %v12265_v15  ;;  %v12490_v59 = vadd.f32 %v3394_v18, %v3089_v53  ;;  %v9866_v48 = vpop.f32.mrb[47].mxu0  ;;  %v3397_v44 = vpop.f32.mrb[46].mxu1 }
 0x350   : > { %v9958_v9 = vpop.f32.mrb[47].mxu1 }
 0x351   : > { %v12495_v49 = vadd.f32 %v3397_v44, %v3090_v37  ;;  %10072 = vmatmul.mubr.msk.bf16.gmra.mrb[152].mxu0 %vm347_vm1, %v3564_v31 }
 0x352   : > { %10075 = vmatprep.mubr.msk.bf16.mxu0 %vm11008_vm0, %v14063_v2 }
 0x354   : > { %v3003_v15 = vpop.f32.mrb[48].mxu0 }
 0x355   : > { %v3091_v16 = vadd.f32 %v3003_v15, %v12276_v21  ;;  %v9869_v1 = vpop.f32.mrb[49].mxu0  ;;  %v3402_v56 = vpop.f32.mrb[48].mxu1  ;;  %v3545_v21 = vld [vmem:[#allocation2 + $0x16b] sm:$0xf] }
 0x356   : > { %v3006_v14 = vpop.f32.mrb[50].mxu0  ;;  %v9961_v32 = vpop.f32.mrb[49].mxu1  ;;  %v3566_v44 = vpack.c.bf16 %v3545_v21, %v3545_v21 }
 0x357   : > { %v3092_v54 = vadd.f32 %v3006_v14, %v12278_v8  ;;  %v12503_v45 = vadd.f32 %v3402_v56, %v3091_v16  ;;  %v9870_v53 = vpop.f32.mrb[51].mxu0  ;;  %v3405_v20 = vpop.f32.mrb[50].mxu1  ;;  %v4328_v56 = vld [vmem:[#allocation3 + $0xd] sm:$0xff] }
 0x358   : > { %v9962_v18 = vpop.f32.mrb[51].mxu1 }
 0x359   : > { %v12505_v31 = vadd.f32 %v3405_v20, %v3092_v54  ;;  %10076 = vmatmul.mubr.msk.bf16.gmra.mrb[156].mxu0 %vm347_vm1, %v3565_v0 }
 0x35a   : > { %10079 = vmatprep.mubr.msk.bf16.mxu0 %vm11008_vm0, %v14063_v2 }
 0x35c   : > { %v3011_v22 = vpop.f32.mrb[52].mxu0 }
 0x35d   : > { %v3093_v42 = vadd.f32 %v3011_v22, %v12288_v47  ;;  %v9873_v37 = vpop.f32.mrb[53].mxu0  ;;  %v3410_v48 = vpop.f32.mrb[52].mxu1  ;;  %v4327_v47 = vld [vmem:[#allocation3 + $0x5] sm:$0xff] }
 0x35e   : > { %v3014_v8 = vpop.f32.mrb[54].mxu0  ;;  %v9965_v35 = vpop.f32.mrb[53].mxu1 }
 0x35f   : > { %v3094_v9 = vadd.f32 %v3014_v8, %v12290_v55  ;;  %v12512_v28 = vadd.f32 %v3410_v48, %v3093_v42  ;;  %v9874_v61 = vpop.f32.mrb[55].mxu0  ;;  %v3413_v15 = vpop.f32.mrb[54].mxu1  ;;  %v4368_v55 = vpack.c.bf16 %v4328_v56, %v4327_v47 }
 0x360   : > { %v9966_v16 = vpop.f32.mrb[55].mxu1 }
 0x361   : > { %v12514_v1 = vadd.f32 %v3413_v15, %v3094_v9  ;;  %10080 = vmatmul.mubr.msk.bf16.gmra.mrb[160].mxu0 %vm347_vm1, %v3566_v44 }
 0x362   : > { %10183 = vmatprep.mubr.msk.bf16.mxu0 %vm11008_vm0, %v14063_v2 }
 0x364   : > { %v3019_v0 = vpop.f32.mrb[56].mxu0 }
 0x365   : > { %v3095_v14 = vadd.f32 %v3019_v0, %v12300_v11  ;;  %v9877_v32 = vpop.f32.mrb[57].mxu0  ;;  %v3418_v54 = vpop.f32.mrb[56].mxu1 }
 0x366   : > { %v3022_v53 = vpop.f32.mrb[58].mxu0  ;;  %v9969_v20 = vpop.f32.mrb[57].mxu1 }
 0x367   : > { %v3096_v18 = vadd.f32 %v3022_v53, %v12302_v62  ;;  %v12521_v21 = vadd.f32 %v3418_v54, %v3095_v14  ;;  %v9878_v22 = vpop.f32.mrb[59].mxu0  ;;  %v3421_v42 = vpop.f32.mrb[58].mxu1 }
 0x368   : > { %v9970_v37 = vpop.f32.mrb[59].mxu1 }
 0x369   : > { %v12523_v48 = vadd.f32 %v3421_v42, %v3096_v18  ;;  %10184 = vmatmul.mubr.msk.bf16.vlgmr.msra.gmra.mrb[164].mxu0 %vm347_vm1, %v4368_v55 }
 0x36a   : > { %10187 = vmatprep.mubr.msk.bf16.mxu0 %vm11008_vm0, %v14063_v2 }
 0x36c   : > { %v3027_v11 = vpop.f32.mrb[60].mxu0 }
 0x36d   : > { %v3097_v44 = vadd.f32 %v3027_v11, %v12309_v7  ;;  %v9881_v8 = vpop.f32.mrb[61].mxu0  ;;  %v3426_v35 = vpop.f32.mrb[60].mxu1 }
 0x36e   : > { %v3030_v9 = vpop.f32.mrb[62].mxu0  ;;  %v9973_v61 = vpop.f32.mrb[61].mxu1 }
 0x36f   : > { %v3098_v62 = vadd.f32 %v3030_v9, %v12311_v12  ;;  %v12530_v15 = vadd.f32 %v3426_v35, %v3097_v44  ;;  %v9882_v16 = vpop.f32.mrb[63].mxu0  ;;  %v3429_v47 = vpop.f32.mrb[62].mxu1 }
 0x370   : > { %v9974_v56 = vpop.f32.mrb[63].mxu1 }
 0x371   : > { %v12532_v0 = vadd.f32 %v3429_v47, %v3098_v62 }
 0x374   : > { %v3035_v14 = vpop.f32.mrb[64].mxu0 }
 0x375   : > { %v3099_v32 = vadd.f32 %v3035_v14, %v12321_v19  ;;  %v9885_v54 = vpop.f32.mrb[65].mxu0  ;;  %v3434_v55 = vpop.f32.mrb[64].mxu1  ;;  %v10972_v19 = vld [vmem:[%s14055_s4 + $0x50] sm:$0xff]  }
 0x376   : > { %v3038_v53 = vpop.f32.mrb[66].mxu0  ;;  %v9977_v7 = vpop.f32.mrb[65].mxu1  ;;  %10272 = vmatpush3.bf16.msra.mxu1 %v10972_v19 }
 0x377   : > { %v3100_v20 = vadd.f32 %v3038_v53, %v12324_v27  ;;  %v12536_v18 = vadd.f32 %v3434_v55, %v3099_v32  ;;  %v9886_v22 = vpop.f32.mrb[67].mxu0  ;;  %v3437_v12 = vpop.f32.mrb[66].mxu1  ;;  %10273 = vmatprep.subr.bf16.mxu1 %v14063_v2 }
 0x378   : > { %v9978_v42 = vpop.f32.mrb[67].mxu1 }
 0x379   : > { %v12538_v37 = vadd.f32 %v3437_v12, %v3100_v20 }
 0x37c   : > { %v3043_v11 = vpop.f32.mrb[68].mxu0 }
 0x37d   : > { %v3101_v44 = vadd.f32 %v3043_v11, %v12331_v39  ;;  %v9889_v8 = vpop.f32.mrb[69].mxu0  ;;  %v3442_v35 = vpop.f32.mrb[68].mxu1 }
 0x37e   : > { %v3046_v9 = vpop.f32.mrb[70].mxu0  ;;  %v9981_v61 = vpop.f32.mrb[69].mxu1 }
 0x37f   : > { %v3102_v27 = vadd.f32 %v3046_v9, %v12333_v38  ;;  %v12545_v62 = vadd.f32 %v3442_v35, %v3101_v44  ;;  %v9890_v16 = vpop.f32.mrb[71].mxu0  ;;  %v3445_v47 = vpop.f32.mrb[70].mxu1 }
 0x380   : > { %v9982_v56 = vpop.f32.mrb[71].mxu1 }
 0x381   : > { %v12548_v14 = vadd.f32 %v3445_v47, %v3102_v27  ;;  %v12562_v56 = vld [vmem:[%s14054_s3] ss:$0 sm:$0xff] }
 0x384   : > { %v3051_v39 = vpop.f32.mrb[72].mxu0 }
 0x385   : > { %v3103_v32 = vadd.f32 %v3051_v39, %v12340_v51  ;;  %v9893_v54 = vpop.f32.mrb[73].mxu0  ;;  %v3450_v55 = vpop.f32.mrb[72].mxu1 }
 0x386   : > { %v3054_v53 = vpop.f32.mrb[74].mxu0  ;;  %v9985_v7 = vpop.f32.mrb[73].mxu1 }
 0x387   : > { %v3104_v20 = vadd.f32 %v3054_v53, %v12342_v24  ;;  %v12552_v38 = vadd.f32 %v3450_v55, %v3103_v32  ;;  %v9894_v22 = vpop.f32.mrb[75].mxu0  ;;  %v3453_v12 = vpop.f32.mrb[74].mxu1 }
 0x388   : > { %v9986_v42 = vpop.f32.mrb[75].mxu1  ;;  %v4037_v54 = vpop.permute.xlu0 %4036 }
 0x389   : > { %v12554_v11 = vadd.f32 %v3453_v12, %v3104_v20 }
 0x38c   : > { %v3059_v44 = vpop.f32.mrb[76].mxu0 }
 0x38d   : > { %v3105_v8 = vadd.f32 %v3059_v44, %v12348_v26  ;;  %v9897_v35 = vpop.f32.mrb[77].mxu0  ;;  %v3458_v19 = vpop.f32.mrb[76].mxu1 }
 0x38e   : > { %v3062_v9 = vpop.f32.mrb[78].mxu0  ;;  %v9989_v51 = vpop.f32.mrb[77].mxu1 }
 0x38f   : > { %v12557_v61 = vadd.f32 %v3458_v19, %v3105_v8  ;;  %v9898_v27 = vpop.f32.mrb[79].mxu0  ;;  %v3461_v16 = vpop.f32.mrb[78].mxu1 }
 0x390   : > { %v9990_v47 = vpop.f32.mrb[79].mxu1  ;;  %v4042_v44 = vpop.permute.xlu0 %4041 }
 0x391   : > { %v4047_v9 = vpop.permute.xlu1 %4046 }
 0x394   : > { %v3697_v24 = vpop.f32.mrb[80].mxu0 }
 0x395   : > { %v3863_v39 = vadd.f32 %v3697_v24, %v12355_v40  ;;  %v10001_v32 = vpop.f32.mrb[81].mxu0 }
 0x396   : > { %v3700_v26 = vpop.f32.mrb[82].mxu0 }
 0x397   : > { %v3911_v55 = vadd.f32 %v12562_v56, %v3863_v39  ;;  %v3864_v53 = vadd.f32 %v3700_v26, %v12357_v41  ;;  %v10002_v7 = vpop.f32.mrb[83].mxu0 }
 0x399   : > { %v3952_v20 = vmax.f32 %v3911_v55, 0.0  ;;  %v3912_v22 = vadd.f32 %v12562_v56, %v3864_v53 }
 0x39b   : > { %v4239_v12 = vmul.f32 %v4037_v54, %v3952_v20  ;;  %v3953_v42 = vmax.f32 %v3912_v22, 0.0  ;;  %v4052_v54 = vpop.permute.xlu1 %4051 }
 0x39c   : > { %v3705_v8 = vpop.f32.mrb[84].mxu0 }
 0x39d   : > { %4286 = vst.msk [vmem:[#allocation3 + $0x18] sm:$0xff] %vm347_vm1, %v4239_v12  ;;  %v4240_v35 = vmul.f32 %v4042_v44, %v3953_v42  ;;  %v3865_v40 = vadd.f32 %v3705_v8, %v12364_v52  ;;  %v10005_v19 = vpop.f32.mrb[85].mxu0 }
 0x39e   : > { %v3708_v51 = vpop.f32.mrb[86].mxu0 }
 0x39f   : > { %4287 = vst.msk [vmem:[#allocation3 + $0x20] sm:$0xff] %vm347_vm1, %v4240_v35  ;;  %v3913_v41 = vadd.f32 %v12562_v56, %v3865_v40  ;;  %v3866_v27 = vadd.f32 %v3708_v51, %v12369_v30  ;;  %v10006_v16 = vpop.f32.mrb[87].mxu0  ;;  %v10973_v35 = vld [vmem:[%s14055_s4 + $0x58] sm:$0xff]   ;;  %v4057_v51 = vpop.permute.xlu0 %4056 }
 0x3a0   : > { %10274 = vmatpush3.bf16.msra.mxu1 %v10973_v35 }
 0x3a1   : > { %v3954_v47 = vmax.f32 %v3913_v41, 0.0  ;;  %v3914_v24 = vadd.f32 %v12562_v56, %v3866_v27  ;;  %v4062_v27 = vpop.permute.xlu1 %4061  ;;  %10451 = vmatprep.subr.bf16.mxu1 %v14063_v2 }
 0x3a3   : > { %v4241_v39 = vmul.f32 %v4047_v9, %v3954_v47  ;;  %v3955_v32 = vmax.f32 %v3914_v24, 0.0 }
 0x3a4   : > { %v3713_v26 = vpop.f32.mrb[88].mxu0  ;;  %v4399_v20 = vld [vmem:[#allocation3 + $0x16] sm:$0xff] }
 0x3a5   : > { %4288 = vst.msk [vmem:[#allocation3 + $0x28] sm:$0xff] %vm347_vm1, %v4241_v39  ;;  %v4242_v52 = vmul.f32 %v4052_v54, %v3955_v32  ;;  %v3867_v55 = vadd.f32 %v3713_v26, %v12377_v6  ;;  %v10009_v53 = vpop.f32.mrb[89].mxu0  ;;  %v4329_v22 = vld [vmem:[#allocation3 + $0x15] sm:$0xff] }
 0x3a6   : > { %v3716_v7 = vpop.f32.mrb[90].mxu0  ;;  %v4400_v44 = vld [vmem:[#allocation3 + $0x1e] sm:$0xff] }
 0x3a7   : > { %4289 = vst.msk [vmem:[#allocation3 + $0x30] sm:$0xff] %vm347_vm1, %v4242_v52  ;;  %v3915_v30 = vadd.f32 %v12562_v56, %v3867_v55  ;;  %v3868_v12 = vadd.f32 %v3716_v7, %v12379_v29  ;;  %v10010_v42 = vpop.f32.mrb[91].mxu0  ;;  %v4330_v8 = vld [vmem:[#allocation3 + $0x1d] sm:$0xff]  ;;  %v4439_v40 = vpack.c.bf16 %v4400_v44, %v4399_v20  ;;  %v4067_v44 = vpop.permute.xlu0 %4066 }
 0x3a8   : > { %v4369_v19 = vpack.c.bf16 %v4330_v8, %v4329_v22 }
 0x3a9   : > { %v3956_v6 = vmax.f32 %v3915_v30, 0.0  ;;  %v3916_v9 = vadd.f32 %v12562_v56, %v3868_v12  ;;  %10096 = vmatmul.mubr.msk.bf16.gmra.mrb[84].mxu1 %vm347_vm1, %v4439_v40 }
 0x3aa   : > { %10188 = vmatmul.mubr.msk.bf16.gmra.mrb[168].mxu0 %vm347_vm1, %v4369_v19  ;;  %10099 = vmatprep.mubr.msk.bf16.mxu1 %vm11008_vm0, %v14063_v2 }
 0x3ab   : > { %v4243_v41 = vmul.f32 %v4057_v51, %v3956_v6  ;;  %v3957_v29 = vmax.f32 %v3916_v9, 0.0  ;;  %10191 = vmatprep.mubr.msk.bf16.mxu0 %vm11008_vm0, %v14063_v2 }
 0x3ac   : > { %v3721_v16 = vpop.f32.mrb[92].mxu0  ;;  %v4401_v54 = vld [vmem:[#allocation3 + $0x26] sm:$0xff] }
 0x3ad   : > { %4290 = vst.msk [vmem:[#allocation3 + $0x38] sm:$0xff] %vm347_vm1, %v4243_v41  ;;  %v4244_v47 = vmul.f32 %v4062_v27, %v3957_v29  ;;  %v3869_v24 = vadd.f32 %v3721_v16, %v12386_v34  ;;  %v10013_v39 = vpop.f32.mrb[93].mxu0  ;;  %v4331_v7 = vld [vmem:[#allocation3 + $0x25] sm:$0xff] }
 0x3ae   : > { %v3724_v32 = vpop.f32.mrb[94].mxu0  ;;  %v4402_v53 = vld [vmem:[#allocation3 + $0x2e] sm:$0xff] }
 0x3af   : > { %4291 = vst.msk [vmem:[#allocation3 + $0x40] sm:$0xff] %vm347_vm1, %v4244_v47  ;;  %v3917_v26 = vadd.f32 %v12562_v56, %v3869_v24  ;;  %v3870_v52 = vadd.f32 %v3724_v32, %v12388_v60  ;;  %v10014_v55 = vpop.f32.mrb[95].mxu0  ;;  %v4332_v20 = vld [vmem:[#allocation3 + $0x2d] sm:$0xff]  ;;  %v4440_v22 = vpack.c.bf16 %v4402_v53, %v4401_v54  ;;  %v4072_v60 = vpop.permute.xlu1 %4071 }
 0x3b0   : > { %v4370_v30 = vpack.c.bf16 %v4332_v20, %v4331_v7 }
 0x3b1   : > { %v3958_v12 = vmax.f32 %v3917_v26, 0.0  ;;  %v3918_v42 = vadd.f32 %v12562_v56, %v3870_v52  ;;  %10100 = vmatmul.mubr.msk.bf16.gmra.mrb[88].mxu1 %vm347_vm1, %v4440_v22  ;;  %v4077_v52 = vpop.permute.xlu0 %4076 }
 0x3b2   : > { %10192 = vmatmul.mubr.msk.bf16.gmra.mrb[172].mxu0 %vm347_vm1, %v4370_v30  ;;  %10103 = vmatprep.mubr.msk.bf16.mxu1 %vm11008_vm0, %v14063_v2 }
 0x3b3   : > { %v4245_v34 = vmul.f32 %v4067_v44, %v3958_v12  ;;  %v3959_v8 = vmax.f32 %v3918_v42, 0.0  ;;  %10195 = vmatprep.mubr.msk.bf16.mxu0 %vm11008_vm0, %v14063_v2  ;;  %v10975_v42 = vld [vmem:[%s14055_s4 + $0x68] sm:$0xff]  }
 0x3b4   : > { %v3729_v35 = vpop.f32.mrb[96].mxu0  ;;  %v4403_v6 = vld [vmem:[#allocation3 + $0x36] sm:$0xff] }
 0x3b5   : > { %4292 = vst.msk [vmem:[#allocation3 + $0x48] sm:$0xff] %vm347_vm1, %v4245_v34  ;;  %v4246_v40 = vmul.f32 %v4072_v60, %v3959_v8  ;;  %v10017_v19 = vpop.f32.mrb[97].mxu0  ;;  %v3871_v9 = vadd.f32 %v3729_v35, %v12395_v5  ;;  %v4333_v29 = vld [vmem:[#allocation3 + $0x35] sm:$0xff]  ;;  %v10974_v5 = vld [vmem:[%s14055_s4 + $0x60] sm:$0xff]  }
 0x3b6   : > { %v3732_v51 = vpop.f32.mrb[98].mxu0  ;;  %v4404_v41 = vld [vmem:[#allocation3 + $0x3e] sm:$0xff]  ;;  %10360 = vmatpush3.bf16.msra.mxu0 %v10974_v5 }
 0x3b7   : > { %v4334_v27 = vld [vmem:[#allocation3 + $0x3d] sm:$0xff]  ;;  %4293 = vst.msk [vmem:[#allocation3 + $0x50] sm:$0xff] %vm347_vm1, %v4246_v40  ;;  %v3872_v16 = vadd.f32 %v3732_v51, %v12400_v25  ;;  %v10018_v47 = vpop.f32.mrb[99].mxu0  ;;  %v4441_v24 = vpack.c.bf16 %v4404_v41, %v4403_v6  ;;  %v3919_v32 = vadd.f32 %v12562_v56, %v3871_v9  ;;  %v4082_v25 = vpop.permute.xlu1 %4081  ;;  %10361 = vmatprep.subr.bf16.mxu0 %v14063_v2 }
 0x3b8   : > { %v4371_v39 = vpack.c.bf16 %v4334_v27, %v4333_v29  ;;  %v10976_v41 = vld [vmem:[%s14055_s4 + $0x70] sm:$0xff]   ;;  %v4087_v29 = vpop.permute.xlu0 %4086 }
 0x3b9   : > { %v3920_v54 = vadd.f32 %v12562_v56, %v3872_v16  ;;  %v3960_v26 = vmax.f32 %v3919_v32, 0.0  ;;  %10104 = vmatmul.mubr.msk.bf16.gmra.mrb[92].mxu1 %vm347_vm1, %v4441_v24  ;;  %v10977_v24 = vld [vmem:[%s14055_s4 + $0x78] sm:$0xff]  }
 0x3ba   : > { %10196 = vmatmul.mubr.msk.bf16.gmra.mrb[176].mxu0 %vm347_vm1, %v4371_v39  ;;  %10107 = vmatprep.mubr.msk.bf16.mxu1 %vm11008_vm0, %v14063_v2 }
 0x3bb   : > { %v3961_v55 = vmax.f32 %v3920_v54, 0.0  ;;  %10199 = vmatprep.mubr.msk.bf16.mxu0 %vm11008_vm0, %v14063_v2  ;;  %v4247_v53 = vmul.f32 %v4077_v52, %v3960_v26  ;;  %10362 = vmatpush3.bf16.msra.mxu0 %v10975_v42  ;;  %v4092_v16 = vpop.permute.xlu1 %4091 }
 0x3bc   : > { %v3737_v7 = vpop.f32.mrb[100].mxu0  ;;  %v4405_v12 = vld [vmem:[#allocation3 + $0x46] sm:$0xff]  ;;  %10363 = vmatprep.subr.bf16.mxu0 %v14063_v2  ;;  %v4097_v42 = vpop.permute.xlu0 %4096 }
 0x3bd   : > { %v4248_v20 = vmul.f32 %v4082_v25, %v3961_v55  ;;  %v3873_v22 = vadd.f32 %v3737_v7, %v12411_v33  ;;  %v10021_v30 = vpop.f32.mrb[101].mxu0  ;;  %4294 = vst.msk [vmem:[#allocation3 + $0x58] sm:$0xff] %vm347_vm1, %v4247_v53  ;;  %v4335_v8 = vld [vmem:[#allocation3 + $0x45] sm:$0xff] }
 0x3be   : > { %v3740_v44 = vpop.f32.mrb[102].mxu0  ;;  %v4406_v34 = vld [vmem:[#allocation3 + $0x4e] sm:$0xff] }
 0x3bf   : > { %v4336_v60 = vld [vmem:[#allocation3 + $0x4d] sm:$0xff]  ;;  %4295 = vst.msk [vmem:[#allocation3 + $0x60] sm:$0xff] %vm347_vm1, %v4248_v20  ;;  %v3921_v35 = vadd.f32 %v12562_v56, %v3873_v22  ;;  %v3874_v33 = vadd.f32 %v3740_v44, %v12417_v43  ;;  %v10022_v40 = vpop.f32.mrb[103].mxu0  ;;  %v4442_v19 = vpack.c.bf16 %v4406_v34, %v4405_v12  ;;  %10364 = vmatpush3.bf16.msra.mxu0 %v10976_v41 }
 0x3c0   : > { %v4372_v6 = vpack.c.bf16 %v4336_v60, %v4335_v8  ;;  %10365 = vmatprep.subr.bf16.mxu0 %v14063_v2 }
 0x3c1   : > { %v3962_v9 = vmax.f32 %v3921_v35, 0.0  ;;  %v3922_v51 = vadd.f32 %v12562_v56, %v3874_v33  ;;  %10108 = vmatmul.mubr.msk.bf16.gmra.mrb[96].mxu1 %vm347_vm1, %v4442_v19 }
 0x3c2   : > { %10200 = vmatmul.mubr.msk.bf16.gmra.mrb[180].mxu0 %vm347_vm1, %v4372_v6  ;;  %10111 = vmatprep.mubr.msk.bf16.mxu1 %vm11008_vm0, %v14063_v2 }
 0x3c3   : > { %v4249_v27 = vmul.f32 %v4087_v29, %v3962_v9  ;;  %v3963_v43 = vmax.f32 %v3922_v51, 0.0  ;;  %10203 = vmatprep.mubr.msk.bf16.mxu0 %vm11008_vm0, %v14063_v2  ;;  %10366 = vmatpush3.bf16.msra.mxu0 %v10977_v24 }
 0x3c4   : > { %v3745_v47 = vpop.f32.mrb[104].mxu0  ;;  %v4407_v5 = vld [vmem:[#allocation3 + $0x56] sm:$0xff]  ;;  %10543 = vmatprep.subr.bf16.mxu0 %v14063_v2 }
 0x3c5   : > { %4296 = vst.msk [vmem:[#allocation3 + $0x68] sm:$0xff] %vm347_vm1, %v4249_v27  ;;  %v4250_v39 = vmul.f32 %v4092_v16, %v3963_v43  ;;  %v3875_v32 = vadd.f32 %v3745_v47, %v12428_v23  ;;  %v10025_v54 = vpop.f32.mrb[105].mxu0  ;;  %v4337_v55 = vld [vmem:[#allocation3 + $0x55] sm:$0xff] }
 0x3c6   : > { %v3748_v26 = vpop.f32.mrb[106].mxu0  ;;  %v4408_v52 = vld [vmem:[#allocation3 + $0x5e] sm:$0xff] }
 0x3c7   : > { %v4338_v25 = vld [vmem:[#allocation3 + $0x5d] sm:$0xff]  ;;  %4297 = vst.msk [vmem:[#allocation3 + $0x70] sm:$0xff] %vm347_vm1, %v4250_v39  ;;  %v3923_v53 = vadd.f32 %v12562_v56, %v3875_v32  ;;  %v3876_v7 = vadd.f32 %v3748_v26, %v12434_v17  ;;  %v10026_v20 = vpop.f32.mrb[107].mxu0  ;;  %v4443_v22 = vpack.c.bf16 %v4408_v52, %v4407_v5  ;;  %v4102_v17 = vpop.permute.xlu1 %4101 }
 0x3c8   : > { %v4373_v30 = vpack.c.bf16 %v4338_v25, %v4337_v55  ;;  %v4107_v39 = vpop.permute.xlu0 %4106 }
 0x3c9   : > { %v3964_v12 = vmax.f32 %v3923_v53, 0.0  ;;  %v3924_v23 = vadd.f32 %v12562_v56, %v3876_v7  ;;  %10112 = vmatmul.mubr.msk.bf16.gmra.mrb[100].mxu1 %vm347_vm1, %v4443_v22 }
 0x3ca   : > { %10204 = vmatmul.mubr.msk.bf16.gmra.mrb[184].mxu0 %vm347_vm1, %v4373_v30  ;;  %10115 = vmatprep.mubr.msk.bf16.mxu1 %vm11008_vm0, %v14063_v2 }
 0x3cb   : > { %v4251_v44 = vmul.f32 %v4097_v42, %v3964_v12  ;;  %v3965_v34 = vmax.f32 %v3924_v23, 0.0  ;;  %10207 = vmatprep.mubr.msk.bf16.mxu0 %vm11008_vm0, %v14063_v2 }
 0x3cc   : > { %v3753_v8 = vpop.f32.mrb[108].mxu0  ;;  %v4409_v40 = vld [vmem:[#allocation3 + $0x66] sm:$0xff] }
 0x3cd   : > { %4298 = vst.msk [vmem:[#allocation3 + $0x78] sm:$0xff] %vm347_vm1, %v4251_v44  ;;  %v4252_v60 = vmul.f32 %v4102_v17, %v3965_v34  ;;  %v3877_v35 = vadd.f32 %v3753_v8, %v12441_v4  ;;  %v10029_v33 = vpop.f32.mrb[109].mxu0  ;;  %v4339_v9 = vld [vmem:[#allocation3 + $0x65] sm:$0xff]  ;;  %v4117_v17 = vpop.permute.xlu0 %4116 }
 0x3ce   : > { %v3756_v19 = vpop.f32.mrb[110].mxu0  ;;  %v4410_v6 = vld [vmem:[#allocation3 + $0x6e] sm:$0xff] }
 0x3cf   : > { %v4340_v51 = vld [vmem:[#allocation3 + $0x6d] sm:$0xff]  ;;  %4299 = vst.msk [vmem:[#allocation3 + $0x80] sm:$0xff] %vm347_vm1, %v4252_v60  ;;  %v3925_v41 = vadd.f32 %v12562_v56, %v3877_v35  ;;  %v3878_v29 = vadd.f32 %v3756_v19, %v12443_v46  ;;  %v10030_v27 = vpop.f32.mrb[111].mxu0  ;;  %v4444_v43 = vpack.c.bf16 %v4410_v6, %v4409_v40  ;;  %v4112_v46 = vpop.permute.xlu1 %4111 }
 0x3d0   : > { %v4374_v16 = vpack.c.bf16 %v4340_v51, %v4339_v9 }
 0x3d1   : > { %v3966_v47 = vmax.f32 %v3925_v41, 0.0  ;;  %v3926_v24 = vadd.f32 %v12562_v56, %v3878_v29  ;;  %10116 = vmatmul.mubr.msk.bf16.gmra.mrb[104].mxu1 %vm347_vm1, %v4444_v43 }
 0x3d2   : > { %10208 = vmatmul.mubr.msk.bf16.gmra.mrb[188].mxu0 %vm347_vm1, %v4374_v16  ;;  %10119 = vmatprep.mubr.msk.bf16.mxu1 %vm11008_vm0, %v14063_v2 }
 0x3d3   : > { %v4253_v4 = vmul.f32 %v4107_v39, %v3966_v47  ;;  %v3967_v32 = vmax.f32 %v3926_v24, 0.0  ;;  %10211 = vmatprep.mubr.msk.bf16.mxu0 %vm11008_vm0, %v14063_v2 }
 0x3d4   : > { %v3761_v54 = vpop.f32.mrb[112].mxu0  ;;  %v4411_v55 = vld [vmem:[#allocation3 + $0x76] sm:$0xff] }
 0x3d5   : > { %4300 = vst.msk [vmem:[#allocation3 + $0x88] sm:$0xff] %vm347_vm1, %v4253_v4  ;;  %v4254_v5 = vmul.f32 %v4112_v46, %v3967_v32  ;;  %v3879_v26 = vadd.f32 %v3761_v54, %v12453_v58  ;;  %v10033_v52 = vpop.f32.mrb[113].mxu0  ;;  %v4341_v7 = vld [vmem:[#allocation3 + $0x75] sm:$0xff]  ;;  %v4127_v4 = vpop.permute.xlu0 %4126 }
 0x3d6   : > { %v3764_v25 = vpop.f32.mrb[114].mxu0  ;;  %v4412_v53 = vld [vmem:[#allocation3 + $0x7e] sm:$0xff] }
 0x3d7   : > { %v4342_v20 = vld [vmem:[#allocation3 + $0x7d] sm:$0xff]  ;;  %4301 = vst.msk [vmem:[#allocation3 + $0x90] sm:$0xff] %vm347_vm1, %v4254_v5  ;;  %v3927_v22 = vadd.f32 %v12562_v56, %v3879_v26  ;;  %v3880_v30 = vadd.f32 %v3764_v25, %v12455_v3  ;;  %v10034_v12 = vpop.f32.mrb[115].mxu0  ;;  %v4445_v23 = vpack.c.bf16 %v4412_v53, %v4411_v55  ;;  %v4122_v3 = vpop.permute.xlu1 %4121 }
 0x3d8   : > { %v4375_v42 = vpack.c.bf16 %v4342_v20, %v4341_v7 }
 0x3d9   : > { %v3968_v44 = vmax.f32 %v3927_v22, 0.0  ;;  %v3928_v34 = vadd.f32 %v12562_v56, %v3880_v30  ;;  %10120 = vmatmul.mubr.msk.bf16.gmra.mrb[108].mxu1 %vm347_vm1, %v4445_v23 }
 0x3da   : > { %10212 = vmatmul.mubr.msk.bf16.gmra.mrb[192].mxu0 %vm347_vm1, %v4375_v42  ;;  %10123 = vmatprep.mubr.msk.bf16.mxu1 %vm11008_vm0, %v14063_v2 }
 0x3db   : > { %v4255_v58 = vmul.f32 %v4117_v17, %v3968_v44  ;;  %v3969_v8 = vmax.f32 %v3928_v34, 0.0  ;;  %10215 = vmatprep.mubr.msk.bf16.mxu0 %vm11008_vm0, %v14063_v2  ;;  %v4137_v34 = vpop.permute.xlu0 %4136 }
 0x3dc   : > { %v3769_v60 = vpop.f32.mrb[116].mxu0  ;;  %v4413_v19 = vld [vmem:[#allocation3 + $0x86] sm:$0xff] }
 0x3dd   : > { %4302 = vst.msk [vmem:[#allocation3 + $0x98] sm:$0xff] %vm347_vm1, %v4255_v58  ;;  %v4256_v35 = vmul.f32 %v4122_v3, %v3969_v8  ;;  %v3881_v33 = vadd.f32 %v3769_v60, %v12463_v63  ;;  %v10037_v40 = vpop.f32.mrb[117].mxu0  ;;  %v4343_v51 = vld [vmem:[#allocation3 + $0x85] sm:$0xff] }
 0x3de   : > { %v3772_v6 = vpop.f32.mrb[118].mxu0  ;;  %v4414_v9 = vld [vmem:[#allocation3 + $0x8e] sm:$0xff] }
 0x3df   : > { %v4344_v41 = vld [vmem:[#allocation3 + $0x8d] sm:$0xff]  ;;  %4303 = vst.msk [vmem:[#allocation3 + $0xa0] sm:$0xff] %vm347_vm1, %v4256_v35  ;;  %v3929_v29 = vadd.f32 %v12562_v56, %v3881_v33  ;;  %v3882_v27 = vadd.f32 %v3772_v6, %v12465_v50  ;;  %v10038_v43 = vpop.f32.mrb[119].mxu0  ;;  %v4446_v16 = vpack.c.bf16 %v4414_v9, %v4413_v19  ;;  %v4132_v50 = vpop.permute.xlu1 %4131 }
 0x3e0   : > { %v4376_v47 = vpack.c.bf16 %v4344_v41, %v4343_v51 }
 0x3e1   : > { %v3970_v24 = vmax.f32 %v3929_v29, 0.0  ;;  %v3930_v39 = vadd.f32 %v12562_v56, %v3882_v27  ;;  %10124 = vmatmul.mubr.msk.bf16.gmra.mrb[112].mxu1 %vm347_vm1, %v4446_v16 }
 0x3e2   : > { %10216 = vmatmul.mubr.msk.bf16.gmra.mrb[196].mxu0 %vm347_vm1, %v4376_v47  ;;  %10127 = vmatprep.mubr.msk.bf16.mxu1 %vm11008_vm0, %v14063_v2  ;;  %v4147_v47 = vpop.permute.xlu0 %4146 }
 0x3e3   : > { %v4257_v63 = vmul.f32 %v4127_v4, %v3970_v24  ;;  %v3971_v32 = vmax.f32 %v3930_v39, 0.0  ;;  %10219 = vmatprep.mubr.msk.bf16.mxu0 %vm11008_vm0, %v14063_v2 }
 0x3e4   : > { %v3777_v46 = vpop.f32.mrb[120].mxu0  ;;  %v4415_v52 = vld [vmem:[#allocation3 + $0x96] sm:$0xff] }
 0x3e5   : > { %4304 = vst.msk [vmem:[#allocation3 + $0xa8] sm:$0xff] %vm347_vm1, %v4257_v63  ;;  %v4258_v54 = vmul.f32 %v4132_v50, %v3971_v32  ;;  %v3883_v5 = vadd.f32 %v3777_v46, %v12472_v36  ;;  %v10041_v26 = vpop.f32.mrb[121].mxu0  ;;  %v4345_v53 = vld [vmem:[#allocation3 + $0x95] sm:$0xff] }
 0x3e6   : > { %v3780_v55 = vpop.f32.mrb[122].mxu0  ;;  %v4416_v25 = vld [vmem:[#allocation3 + $0x9e] sm:$0xff] }
 0x3e7   : > { %v4346_v7 = vld [vmem:[#allocation3 + $0x9d] sm:$0xff]  ;;  %4305 = vst.msk [vmem:[#allocation3 + $0xb0] sm:$0xff] %vm347_vm1, %v4258_v54  ;;  %v3931_v20 = vadd.f32 %v12562_v56, %v3883_v5  ;;  %v3884_v22 = vadd.f32 %v3780_v55, %v12474_v13  ;;  %v10042_v30 = vpop.f32.mrb[123].mxu0  ;;  %v4447_v12 = vpack.c.bf16 %v4416_v25, %v4415_v52  ;;  %v4142_v13 = vpop.permute.xlu1 %4141 }
 0x3e8   : > { %v4377_v23 = vpack.c.bf16 %v4346_v7, %v4345_v53 }
 0x3e9   : > { %v3972_v42 = vmax.f32 %v3931_v20, 0.0  ;;  %v3932_v44 = vadd.f32 %v12562_v56, %v3884_v22  ;;  %10128 = vmatmul.mubr.msk.bf16.gmra.mrb[116].mxu1 %vm347_vm1, %v4447_v12 }
 0x3ea   : > { %10220 = vmatmul.mubr.msk.bf16.gmra.mrb[200].mxu0 %vm347_vm1, %v4377_v23  ;;  %10131 = vmatprep.mubr.msk.bf16.mxu1 %vm11008_vm0, %v14063_v2 }
 0x3eb   : > { %v4259_v36 = vmul.f32 %v4137_v34, %v3972_v42  ;;  %v3973_v17 = vmax.f32 %v3932_v44, 0.0  ;;  %10223 = vmatprep.mubr.msk.bf16.mxu0 %vm11008_vm0, %v14063_v2  ;;  %v4152_v24 = vpop.permute.xlu1 %4151 }
 0x3ec   : > { %v3785_v58 = vpop.f32.mrb[124].mxu0  ;;  %v4417_v35 = vld [vmem:[#allocation3 + $0xa6] sm:$0xff] }
 0x3ed   : > { %4306 = vst.msk [vmem:[#allocation3 + $0xb8] sm:$0xff] %vm347_vm1, %v4259_v36  ;;  %v4260_v8 = vmul.f32 %v4142_v13, %v3973_v17  ;;  %v3885_v3 = vadd.f32 %v3785_v58, %v12481_v57  ;;  %v10045_v60 = vpop.f32.mrb[125].mxu0  ;;  %v4347_v19 = vld [vmem:[#allocation3 + $0xa5] sm:$0xff]  ;;  %v12710_v57 = vpop.f32.mrb[80].mxu1 }
 0x3ee   : > { %v3788_v33 = vpop.f32.mrb[126].mxu0  ;;  %v4418_v40 = vld [vmem:[#allocation3 + $0xae] sm:$0xff] }
 0x3ef   : > { %v4348_v6 = vld [vmem:[#allocation3 + $0xad] sm:$0xff]  ;;  %4307 = vst.msk [vmem:[#allocation3 + $0xc0] sm:$0xff] %vm347_vm1, %v4260_v8  ;;  %v3933_v9 = vadd.f32 %v12562_v56, %v3885_v3  ;;  %v3886_v51 = vadd.f32 %v3788_v33, %v12483_v10  ;;  %v10046_v41 = vpop.f32.mrb[127].mxu0  ;;  %v4448_v29 = vpack.c.bf16 %v4418_v40, %v4417_v35  ;;  %v10093_v10 = vpop.f32.mrb[81].mxu1 }
 0x3f0   : > { %v4378_v27 = vpack.c.bf16 %v4348_v6, %v4347_v19  ;;  %v12716_v32 = vpop.f32.mrb[82].mxu1 }
 0x3f1   : > { %v3974_v43 = vmax.f32 %v3933_v9, 0.0  ;;  %v3934_v16 = vadd.f32 %v12562_v56, %v3886_v51  ;;  %10132 = vmatmul.mubr.msk.bf16.gmra.mrb[120].mxu1 %vm347_vm1, %v4448_v29  ;;  %v10094_v26 = vpop.f32.mrb[83].mxu1 }
 0x3f2   : > { %10224 = vmatmul.mubr.msk.bf16.gmra.mrb[204].mxu0 %vm347_vm1, %v4378_v27  ;;  %10135 = vmatprep.mubr.msk.bf16.mxu1 %vm11008_vm0, %v14063_v2 }
 0x3f3   : > { %v4261_v39 = vmul.f32 %v4147_v47, %v3974_v43  ;;  %v3975_v4 = vmax.f32 %v3934_v16, 0.0  ;;  %10227 = vmatprep.mubr.msk.bf16.mxu0 %vm11008_vm0, %v14063_v2 }
 0x3f4   : > { %v3793_v63 = vpop.f32.mrb[128].mxu0  ;;  %v4419_v5 = vld [vmem:[#allocation3 + $0xb6] sm:$0xff] }
 0x3f5   : > { %4308 = vst.msk [vmem:[#allocation3 + $0xc8] sm:$0xff] %vm347_vm1, %v4261_v39  ;;  %v4262_v50 = vmul.f32 %v4152_v24, %v3975_v4  ;;  %v3887_v46 = vadd.f32 %v3793_v63, %v12490_v59  ;;  %v10049_v54 = vpop.f32.mrb[129].mxu0  ;;  %v4349_v25 = vld [vmem:[#allocation3 + $0xb5] sm:$0xff]  ;;  %v4157_v59 = vpop.permute.xlu0 %4156 }
 0x3f6   : > { %v3796_v52 = vpop.f32.mrb[130].mxu0  ;;  %v4420_v55 = vld [vmem:[#allocation3 + $0xbe] sm:$0xff] }
 0x3f7   : > { %v4350_v53 = vld [vmem:[#allocation3 + $0xbd] sm:$0xff]  ;;  %4309 = vst.msk [vmem:[#allocation3 + $0xd0] sm:$0xff] %vm347_vm1, %v4262_v50  ;;  %v3935_v7 = vadd.f32 %v12562_v56, %v3887_v46  ;;  %v3888_v20 = vadd.f32 %v3796_v52, %v12495_v49  ;;  %v10050_v22 = vpop.f32.mrb[131].mxu0  ;;  %v4449_v30 = vpack.c.bf16 %v4420_v55, %v4419_v5  ;;  %v4162_v49 = vpop.permute.xlu1 %4161 }
 0x3f8   : > { %v4379_v12 = vpack.c.bf16 %v4350_v53, %v4349_v25 }
 0x3f9   : > { %v3976_v23 = vmax.f32 %v3935_v7, 0.0  ;;  %v3936_v42 = vadd.f32 %v12562_v56, %v3888_v20  ;;  %10136 = vmatmul.mubr.msk.bf16.gmra.mrb[124].mxu1 %vm347_vm1, %v4449_v30  ;;  %v4167_v27 = vpop.permute.xlu0 %4166 }
 0x3fa   : > { %10228 = vmatmul.mubr.msk.bf16.gmra.mrb[208].mxu0 %vm347_vm1, %v4379_v12  ;;  %10139 = vmatprep.mubr.msk.bf16.mxu1 %vm11008_vm0, %v14063_v2 }
 0x3fb   : > { %v4263_v44 = vmul.f32 %v4157_v59, %v3976_v23  ;;  %v3977_v34 = vmax.f32 %v3936_v42, 0.0  ;;  %10231 = vmatprep.mubr.msk.bf16.mxu0 %vm11008_vm0, %v14063_v2 }
 0x3fc   : > { %v3801_v36 = vpop.f32.mrb[132].mxu0  ;;  %v4421_v8 = vld [vmem:[#allocation3 + $0xc6] sm:$0xff] }
 0x3fd   : > { %4310 = vst.msk [vmem:[#allocation3 + $0xd8] sm:$0xff] %vm347_vm1, %v4263_v44  ;;  %v4264_v17 = vmul.f32 %v4162_v49, %v3977_v34  ;;  %v3889_v13 = vadd.f32 %v3801_v36, %v12503_v45  ;;  %v10053_v58 = vpop.f32.mrb[133].mxu0  ;;  %v4351_v35 = vld [vmem:[#allocation3 + $0xc5] sm:$0xff]  ;;  %v4177_v7 = vpop.permute.xlu0 %4176 }
 0x3fe   : > { %v3804_v3 = vpop.f32.mrb[134].mxu0  ;;  %v4422_v60 = vld [vmem:[#allocation3 + $0xce] sm:$0xff] }
 0x3ff   : > { %v4352_v33 = vld [vmem:[#allocation3 + $0xcd] sm:$0xff]  ;;  %4311 = vst.msk [vmem:[#allocation3 + $0xe0] sm:$0xff] %vm347_vm1, %v4264_v17  ;;  %v3937_v40 = vadd.f32 %v12562_v56, %v3889_v13  ;;  %v3890_v19 = vadd.f32 %v3804_v3, %v12505_v31  ;;  %v10054_v6 = vpop.f32.mrb[135].mxu0  ;;  %v4450_v9 = vpack.c.bf16 %v4422_v60, %v4421_v8  ;;  %v4172_v31 = vpop.permute.xlu1 %4171 }
 0x400   : > { %v4380_v51 = vpack.c.bf16 %v4352_v33, %v4351_v35 }
 0x401   : > { %v3978_v41 = vmax.f32 %v3937_v40, 0.0  ;;  %v3938_v29 = vadd.f32 %v12562_v56, %v3890_v19  ;;  %10140 = vmatmul.mubr.msk.bf16.gmra.mrb[128].mxu1 %vm347_vm1, %v4450_v9  ;;  %v4187_v35 = vpop.permute.xlu0 %4186 }
 0x402   : > { %10232 = vmatmul.mubr.msk.bf16.gmra.mrb[212].mxu0 %vm347_vm1, %v4380_v51  ;;  %10143 = vmatprep.mubr.msk.bf16.mxu1 %vm11008_vm0, %v14063_v2 }
 0x403   : > { %v4265_v45 = vmul.f32 %v4167_v27, %v3978_v41  ;;  %v3979_v43 = vmax.f32 %v3938_v29, 0.0  ;;  %10235 = vmatprep.mubr.msk.bf16.mxu0 %vm11008_vm0, %v14063_v2 }
 0x404   : > { %v3809_v16 = vpop.f32.mrb[136].mxu0  ;;  %v4423_v4 = vld [vmem:[#allocation3 + $0xd6] sm:$0xff] }
 0x405   : > { %4312 = vst.msk [vmem:[#allocation3 + $0xe8] sm:$0xff] %vm347_vm1, %v4265_v45  ;;  %v4266_v47 = vmul.f32 %v4172_v31, %v3979_v43  ;;  %v3891_v24 = vadd.f32 %v3809_v16, %v12512_v28  ;;  %v10057_v39 = vpop.f32.mrb[137].mxu0  ;;  %v4353_v50 = vld [vmem:[#allocation3 + $0xd5] sm:$0xff] }
 0x406   : > { %v3812_v10 = vpop.f32.mrb[138].mxu0  ;;  %v4424_v63 = vld [vmem:[#allocation3 + $0xde] sm:$0xff] }
 0x407   : > { %v4354_v46 = vld [vmem:[#allocation3 + $0xdd] sm:$0xff]  ;;  %4313 = vst.msk [vmem:[#allocation3 + $0xf0] sm:$0xff] %vm347_vm1, %v4266_v47  ;;  %v3939_v54 = vadd.f32 %v12562_v56, %v3891_v24  ;;  %v3892_v5 = vadd.f32 %v3812_v10, %v12514_v1  ;;  %v10058_v26 = vpop.f32.mrb[139].mxu0  ;;  %v4451_v52 = vpack.c.bf16 %v4424_v63, %v4423_v4  ;;  %v4182_v1 = vpop.permute.xlu1 %4181 }
 0x408   : > { %v4381_v55 = vpack.c.bf16 %v4354_v46, %v4353_v50  ;;  %v4197_v10 = vpop.permute.xlu0 %4196 }
 0x409   : > { %v3980_v25 = vmax.f32 %v3939_v54, 0.0  ;;  %v3940_v53 = vadd.f32 %v12562_v56, %v3892_v5  ;;  %10144 = vmatmul.mubr.msk.bf16.gmra.mrb[132].mxu1 %vm347_vm1, %v4451_v52 }
 0x40a   : > { %10236 = vmatmul.mubr.msk.bf16.gmra.mrb[216].mxu0 %vm347_vm1, %v4381_v55  ;;  %10147 = vmatprep.mubr.msk.bf16.mxu1 %vm11008_vm0, %v14063_v2 }
 0x40b   : > { %v4267_v28 = vmul.f32 %v4177_v7, %v3980_v25  ;;  %v3981_v20 = vmax.f32 %v3940_v53, 0.0  ;;  %10239 = vmatprep.mubr.msk.bf16.mxu0 %vm11008_vm0, %v14063_v2 }
 0x40c   : > { %v3817_v22 = vpop.f32.mrb[140].mxu0  ;;  %v4425_v42 = vld [vmem:[#allocation3 + $0xe6] sm:$0xff] }
 0x40d   : > { %4314 = vst.msk [vmem:[#allocation3 + $0xf8] sm:$0xff] %vm347_vm1, %v4267_v28  ;;  %v4268_v30 = vmul.f32 %v4182_v1, %v3981_v20  ;;  %v3893_v12 = vadd.f32 %v3817_v22, %v12521_v21  ;;  %v10061_v23 = vpop.f32.mrb[141].mxu0  ;;  %v4355_v34 = vld [vmem:[#allocation3 + $0xe5] sm:$0xff] }
 0x40e   : > { %v3820_v59 = vpop.f32.mrb[142].mxu0  ;;  %v4426_v44 = vld [vmem:[#allocation3 + $0xee] sm:$0xff]  ;;  %v4207_v23 = vpop.permute.xlu0 %4206 }
 0x40f   : > { %v4356_v49 = vld [vmem:[#allocation3 + $0xed] sm:$0xff]  ;;  %4315 = vst.msk [vmem:[#allocation3 + $0x100] sm:$0xff] %vm347_vm1, %v4268_v30  ;;  %v3941_v36 = vadd.f32 %v12562_v56, %v3893_v12  ;;  %v3894_v17 = vadd.f32 %v3820_v59, %v12523_v48  ;;  %v10062_v13 = vpop.f32.mrb[143].mxu0  ;;  %v4452_v58 = vpack.c.bf16 %v4426_v44, %v4425_v42  ;;  %v4192_v48 = vpop.permute.xlu1 %4191 }
 0x410   : > { %v4382_v8 = vpack.c.bf16 %v4356_v49, %v4355_v34 }
 0x411   : > { %v3982_v3 = vmax.f32 %v3941_v36, 0.0  ;;  %v3942_v60 = vadd.f32 %v12562_v56, %v3894_v17  ;;  %10148 = vmatmul.mubr.msk.bf16.gmra.mrb[136].mxu1 %vm347_vm1, %v4452_v58 }
 0x412   : > { %10240 = vmatmul.mubr.msk.bf16.gmra.mrb[220].mxu0 %vm347_vm1, %v4382_v8  ;;  %10151 = vmatprep.mubr.msk.bf16.mxu1 %vm11008_vm0, %v14063_v2 }
 0x413   : > { %v4269_v21 = vmul.f32 %v4187_v35, %v3982_v3  ;;  %v3983_v33 = vmax.f32 %v3942_v60, 0.0  ;;  %10243 = vmatprep.mubr.msk.bf16.mxu0 %vm11008_vm0, %v14063_v2 }
 0x414   : > { %v3825_v40 = vpop.f32.mrb[144].mxu0  ;;  %v4427_v51 = vld [vmem:[#allocation3 + $0xf6] sm:$0xff] }
 0x415   : > { %4316 = vst.msk [vmem:[#allocation3 + $0x108] sm:$0xff] %vm347_vm1, %v4269_v21  ;;  %v4270_v19 = vmul.f32 %v4192_v48, %v3983_v33  ;;  %v3895_v6 = vadd.f32 %v3825_v40, %v12530_v15  ;;  %v10065_v9 = vpop.f32.mrb[145].mxu0  ;;  %v4357_v27 = vld [vmem:[#allocation3 + $0xf5] sm:$0xff] }
 0x416   : > { %v3828_v41 = vpop.f32.mrb[146].mxu0  ;;  %v4428_v29 = vld [vmem:[#allocation3 + $0xfe] sm:$0xff] }
 0x417   : > { %v4358_v45 = vld [vmem:[#allocation3 + $0xfd] sm:$0xff]  ;;  %4317 = vst.msk [vmem:[#allocation3 + $0x110] sm:$0xff] %vm347_vm1, %v4270_v19  ;;  %v3943_v43 = vadd.f32 %v12562_v56, %v3895_v6  ;;  %v3896_v31 = vadd.f32 %v3828_v41, %v12532_v0  ;;  %v10066_v16 = vpop.f32.mrb[147].mxu0  ;;  %v4453_v47 = vpack.c.bf16 %v4428_v29, %v4427_v51  ;;  %v4202_v0 = vpop.permute.xlu1 %4201 }
 0x418   : > { %v4383_v24 = vpack.c.bf16 %v4358_v45, %v4357_v27  ;;  %v4217_v19 = vpop.permute.xlu0 %4216 }
 0x419   : > { %v3984_v39 = vmax.f32 %v3943_v43, 0.0  ;;  %v3944_v4 = vadd.f32 %v12562_v56, %v3896_v31  ;;  %10152 = vmatmul.mubr.msk.bf16.gmra.mrb[140].mxu1 %vm347_vm1, %v4453_v47 }
 0x41a   : > { %10244 = vmatmul.mubr.msk.bf16.gmra.mrb[224].mxu0 %vm347_vm1, %v4383_v24  ;;  %10155 = vmatprep.mubr.msk.bf16.mxu1 %vm11008_vm0, %v14063_v2 }
 0x41b   : > { %v4271_v15 = vmul.f32 %v4197_v10, %v3984_v39  ;;  %v3985_v63 = vmax.f32 %v3944_v4, 0.0  ;;  %10247 = vmatprep.mubr.msk.bf16.mxu0 %vm11008_vm0, %v14063_v2 }
 0x41c   : > { %v3833_v50 = vpop.f32.mrb[148].mxu0  ;;  %v4429_v26 = vld [vmem:[#allocation3 + $0x106] sm:$0xff] }
 0x41d   : > { %4318 = vst.msk [vmem:[#allocation3 + $0x118] sm:$0xff] %vm347_vm1, %v4271_v15  ;;  %v4272_v46 = vmul.f32 %v4202_v0, %v3985_v63  ;;  %v3897_v54 = vadd.f32 %v3833_v50, %v12536_v18  ;;  %v10069_v5 = vpop.f32.mrb[149].mxu0  ;;  %v4359_v25 = vld [vmem:[#allocation3 + $0x105] sm:$0xff]  ;;  %v4227_v0 = vpop.permute.xlu0 %4226 }
 0x41e   : > { %v3836_v52 = vpop.f32.mrb[150].mxu0  ;;  %v4430_v55 = vld [vmem:[#allocation3 + $0x10e] sm:$0xff] }
 0x41f   : > { %v4360_v53 = vld [vmem:[#allocation3 + $0x10d] sm:$0xff]  ;;  %4319 = vst.msk [vmem:[#allocation3 + $0x120] sm:$0xff] %vm347_vm1, %v4272_v46  ;;  %v3945_v7 = vadd.f32 %v12562_v56, %v3897_v54  ;;  %v3898_v28 = vadd.f32 %v3836_v52, %v12538_v37  ;;  %v10070_v20 = vpop.f32.mrb[151].mxu0  ;;  %v4454_v1 = vpack.c.bf16 %v4430_v55, %v4429_v26  ;;  %v4212_v37 = vpop.permute.xlu1 %4211 }
 0x420   : > { %v4384_v22 = vpack.c.bf16 %v4360_v53, %v4359_v25 }
 0x421   : > { %v3986_v30 = vmax.f32 %v3945_v7, 0.0  ;;  %v3946_v12 = vadd.f32 %v12562_v56, %v3898_v28  ;;  %10156 = vmatmul.mubr.msk.bf16.gmra.mrb[144].mxu1 %vm347_vm1, %v4454_v1  ;;  %v10998_v7 = vld [vmem:[%s14054_s3] ss:$0 sm:$0xff] }
 0x422   : > { %10248 = vmatmul.mubr.msk.bf16.gmra.mrb[228].mxu0 %vm347_vm1, %v4384_v22  ;;  %10159 = vmatprep.mubr.msk.bf16.mxu1 %vm11008_vm0, %v14063_v2 }
 0x423   : > { %v4273_v18 = vmul.f32 %v4207_v23, %v3986_v30  ;;  %v3987_v42 = vmax.f32 %v3946_v12, 0.0  ;;  %10251 = vmatprep.mubr.msk.bf16.mxu0 %vm11008_vm0, %v14063_v2  ;;  %v4237_v12 = vpop.permute.xlu0 %4236 }
 0x424   : > { %v3841_v59 = vpop.f32.mrb[152].mxu0  ;;  %v4431_v36 = vld [vmem:[#allocation3 + $0x116] sm:$0xff] }
 0x425   : > { %4320 = vst.msk [vmem:[#allocation3 + $0x128] sm:$0xff] %vm347_vm1, %v4273_v18  ;;  %v4274_v44 = vmul.f32 %v4212_v37, %v3987_v42  ;;  %v3899_v34 = vadd.f32 %v3841_v59, %v12545_v62  ;;  %v10073_v49 = vpop.f32.mrb[153].mxu0  ;;  %v4361_v58 = vld [vmem:[#allocation3 + $0x115] sm:$0xff] }
 0x426   : > { %v3844_v17 = vpop.f32.mrb[154].mxu0  ;;  %v4432_v13 = vld [vmem:[#allocation3 + $0x11e] sm:$0xff] }
 0x427   : > { %v4362_v8 = vld [vmem:[#allocation3 + $0x11d] sm:$0xff]  ;;  %4321 = vst.msk [vmem:[#allocation3 + $0x130] sm:$0xff] %vm347_vm1, %v4274_v44  ;;  %v3947_v3 = vadd.f32 %v12562_v56, %v3899_v34  ;;  %v3900_v60 = vadd.f32 %v3844_v17, %v12548_v14  ;;  %v10074_v35 = vpop.f32.mrb[155].mxu0  ;;  %v4455_v21 = vpack.c.bf16 %v4432_v13, %v4431_v36  ;;  %v4222_v14 = vpop.permute.xlu1 %4221  ;;  %v5043_v13 = vld [vmem:[#allocation3 + $0xf] sm:$0xff] }
 0x428   : > { %v4385_v33 = vpack.c.bf16 %v4362_v8, %v4361_v58  ;;  %v5442_v58 = vld [vmem:[#allocation3 + $0x1f] sm:$0xff]  ;;  %v10979_v35 = vld [vmem:[%s14055_s4 + $0x88] sm:$0xff]  }
 0x429   : > { %v3988_v48 = vmax.f32 %v3947_v3, 0.0  ;;  %v3948_v40 = vadd.f32 %v12562_v56, %v3900_v60  ;;  %10160 = vmatmul.mubr.msk.bf16.gmra.mrb[148].mxu1 %vm347_vm1, %v4455_v21  ;;  %v5441_v3 = vld [vmem:[#allocation3 + $0x17] sm:$0xff]  ;;  %v5045_v21 = vld [vmem:[#allocation3 + $0x1f] sm:$0xff] }
 0x42a   : > { %10252 = vmatmul.mubr.msk.bf16.gmra.mrb[232].mxu0 %vm347_vm1, %v4385_v33  ;;  %10163 = vmatprep.mubr.msk.bf16.mxu1 %vm11008_vm0, %v14063_v2  ;;  %v5482_v60 = vpack.c.bf16 %v5442_v58, %v5441_v3  ;;  %v5444_v33 = vld [vmem:[#allocation3 + $0x2f] sm:$0xff] }
 0x42b   : > { %v4275_v62 = vmul.f32 %v4217_v19, %v3988_v48  ;;  %v3989_v6 = vmax.f32 %v3948_v40, 0.0  ;;  %10255 = vmatprep.mubr.msk.bf16.mxu0 %vm11008_vm0, %v14063_v2  ;;  %v5044_v48 = vld [vmem:[#allocation3 + $0x17] sm:$0xff]  ;;  %v5443_v40 = vld [vmem:[#allocation3 + $0x27] sm:$0xff]  ;;  %v5460_v58 = vld [vmem:[#allocation3 + $0xaf] sm:$0xff] }
 0x42c   : > { %v3849_v9 = vpop.f32.mrb[156].mxu0  ;;  %v4433_v27 = vld [vmem:[#allocation3 + $0x126] sm:$0xff]  ;;  %v5084_v19 = vpack.c.bf16 %v5045_v21, %v5044_v48 }
 0x42d   : > { %4322 = vst.msk [vmem:[#allocation3 + $0x138] sm:$0xff] %vm347_vm1, %v4275_v62  ;;  %v4276_v51 = vmul.f32 %v4222_v14, %v3989_v6  ;;  %v3901_v41 = vadd.f32 %v3849_v9, %v12552_v38  ;;  %v10077_v29 = vpop.f32.mrb[157].mxu0  ;;  %v4363_v31 = vld [vmem:[#allocation3 + $0x125] sm:$0xff]  ;;  %v5483_v62 = vpack.c.bf16 %v5444_v33, %v5443_v40  ;;  %v10980_v6 = vld [vmem:[%s14055_s4 + $0x90] sm:$0xff]  }
 0x42e   : > { %v3852_v45 = vpop.f32.mrb[158].mxu0  ;;  %v4434_v43 = vld [vmem:[#allocation3 + $0x12e] sm:$0xff]  ;;  %v10981_v14 = vld [vmem:[%s14055_s4 + $0x98] sm:$0xff]  }
 0x42f   : > { %v4364_v16 = vld [vmem:[#allocation3 + $0x12d] sm:$0xff]  ;;  %4323 = vst.msk [vmem:[#allocation3 + $0x140] sm:$0xff] %vm347_vm1, %v4276_v51  ;;  %v3949_v47 = vadd.f32 %v12562_v56, %v3901_v41  ;;  %v3902_v24 = vadd.f32 %v3852_v45, %v12554_v11  ;;  %v10078_v39 = vpop.f32.mrb[159].mxu0  ;;  %v4456_v4 = vpack.c.bf16 %v4434_v43, %v4433_v27  ;;  %v4232_v11 = vpop.permute.xlu1 %4231  ;;  %v5446_v9 = vld [vmem:[#allocation3 + $0x3f] sm:$0xff]  ;;  %v5445_v51 = vld [vmem:[#allocation3 + $0x37] sm:$0xff] }
 0x430   : > { %v4386_v10 = vpack.c.bf16 %v4364_v16, %v4363_v31  ;;  %v5484_v41 = vpack.c.bf16 %v5446_v9, %v5445_v51  ;;  %v5448_v29 = vld [vmem:[#allocation3 + $0x4f] sm:$0xff]  ;;  %v5447_v27 = vld [vmem:[#allocation3 + $0x47] sm:$0xff]  ;;  %v5450_v31 = vld [vmem:[#allocation3 + $0x5f] sm:$0xff] }
 0x431   : > { %v3990_v15 = vmax.f32 %v3949_v47, 0.0  ;;  %v3950_v63 = vadd.f32 %v12562_v56, %v3902_v24  ;;  %10164 = vmatmul.mubr.msk.bf16.gmra.mrb[152].mxu1 %vm347_vm1, %v4456_v4  ;;  %v5485_v45 = vpack.c.bf16 %v5448_v29, %v5447_v27  ;;  %v10982_v43 = vld [vmem:[%s14055_s4 + $0xa0] sm:$0xff]   ;;  %v10983_v16 = vld [vmem:[%s14055_s4 + $0xa8] sm:$0xff]   ;;  %v10984_v39 = vld [vmem:[%s14055_s4 + $0xb0] sm:$0xff]  }
 0x432   : > { %10256 = vmatmul.mubr.msk.bf16.gmra.mrb[236].mxu0 %vm347_vm1, %v4386_v10  ;;  %10167 = vmatprep.mubr.msk.bf16.mxu1 %vm11008_vm0, %v14063_v2  ;;  %v5449_v47 = vld [vmem:[#allocation3 + $0x57] sm:$0xff]  ;;  %v5452_v4 = vld [vmem:[#allocation3 + $0x6f] sm:$0xff]  ;;  %v10985_v10 = vld [vmem:[%s14055_s4 + $0xb8] sm:$0xff]  }
 0x433   : > { %v4277_v38 = vmul.f32 %v4227_v0, %v3990_v15  ;;  %v3991_v50 = vmax.f32 %v3950_v63, 0.0  ;;  %10259 = vmatprep.mubr.msk.bf16.mxu0 %vm11008_vm0, %v14063_v2  ;;  %v5486_v24 = vpack.c.bf16 %v5450_v31, %v5449_v47  ;;  %v5451_v15 = vld [vmem:[#allocation3 + $0x67] sm:$0xff]  ;;  %v5454_v0 = vld [vmem:[#allocation3 + $0x7f] sm:$0xff] }
 0x434   : > { %v3857_v46 = vpop.f32.mrb[160].mxu0  ;;  %v4435_v5 = vld [vmem:[#allocation3 + $0x136] sm:$0xff]  ;;  %v5487_v63 = vpack.c.bf16 %v5452_v4, %v5451_v15  ;;  %v5459_v21 = vld [vmem:[#allocation3 + $0xa7] sm:$0xff] }
 0x435   : > { %4324 = vst.msk [vmem:[#allocation3 + $0x148] sm:$0xff] %vm347_vm1, %v4277_v38  ;;  %v4278_v54 = vmul.f32 %v4232_v11, %v3991_v50  ;;  %v3903_v56 = vadd.f32 %v3857_v46, %v12557_v61  ;;  %v10081_v26 = vpop.f32.mrb[161].mxu0  ;;  %v4365_v55 = vld [vmem:[#allocation3 + $0x135] sm:$0xff] }
 0x436   : > { %v4436_v52 = vld [vmem:[#allocation3 + $0x13e] sm:$0xff]  ;;  %v3860_v53 = vpop.f32.mrb[162].mxu0  ;;  %v5464_v4 = vld [vmem:[#allocation3 + $0xcf] sm:$0xff] }
 0x437   : > { %v4366_v25 = vld [vmem:[#allocation3 + $0x13d] sm:$0xff]  ;;  %4325 = vst.msk [vmem:[#allocation3 + $0x150] sm:$0xff] %vm347_vm1, %v4278_v54  ;;  %v3951_v28 = vadd.f32 %v10998_v7, %v3903_v56  ;;  %v4457_v20 = vpack.c.bf16 %v4436_v52, %v4435_v5  ;;  %v10082_v22 = vpop.f32.mrb[163].mxu0  ;;  %v5456_v54 = vld [vmem:[#allocation3 + $0x8f] sm:$0xff] }
 0x438   : > { %v4387_v1 = vpack.c.bf16 %v4366_v25, %v4365_v55  ;;  %v5453_v38 = vld [vmem:[#allocation3 + $0x77] sm:$0xff]  ;;  %v5455_v25 = vld [vmem:[#allocation3 + $0x87] sm:$0xff] }
 0x439   : > { %v3992_v30 = vmax.f32 %v3951_v28, 0.0  ;;  %10168 = vmatmul.mubr.msk.bf16.gmra.mrb[156].mxu1 %vm347_vm1, %v4457_v20  ;;  %v5488_v50 = vpack.c.bf16 %v5454_v0, %v5453_v38  ;;  %v5489_v20 = vpack.c.bf16 %v5456_v54, %v5455_v25 }
 0x43a   : > { %10260 = vmatmul.mubr.msk.bf16.gmra.mrb[240].mxu0 %vm347_vm1, %v4387_v1  ;;  %10171 = vmatprep.mubr.msk.bf16.mxu1 %vm11008_vm0, %v14063_v2 }
 0x43b   : > { %v4279_v61 = vmul.f32 %v4237_v12, %v3992_v30  ;;  %10263 = vmatprep.mubr.msk.bf16.mxu0 %vm11008_vm0, %v14063_v2  ;;  %v5458_v30 = vld [vmem:[#allocation3 + $0x9f] sm:$0xff] }
 0x43c   : > { %v4876_v23 = vpop.f32.mrb[164].mxu0  ;;  %v4437_v18 = vld [vmem:[#allocation3 + $0x146] sm:$0xf] }
 0x43d   : > { %4326 = vst.msk [vmem:[#allocation3 + $0x158] sm:$0xf] %vm394_vm2, %v4279_v61  ;;  %v4367_v42 = vld [vmem:[#allocation3 + $0x145] sm:$0xf]  ;;  %v12828_v37 = vadd.f32 %v4876_v23, %v12710_v57  ;;  %v10185_v59 = vpop.f32.mrb[165].mxu0  ;;  %v4458_v36 = vpack.c.bf16 %v4437_v18, %v4437_v18 }
 0x43e   : > { %v4879_v44 = vpop.f32.mrb[166].mxu0  ;;  %v4388_v17 = vpack.c.bf16 %v4367_v42, %v4367_v42  ;;  %v5042_v57 = vld [vmem:[#allocation3 + $0x7] sm:$0xff]  ;;  %v5457_v59 = vld [vmem:[#allocation3 + $0x97] sm:$0xff] }
 0x43f   : > { %v12831_v34 = vadd.f32 %v4879_v44, %v12716_v32  ;;  %v10186_v49 = vpop.f32.mrb[167].mxu0  ;;  %v5083_v8 = vpack.c.bf16 %v5043_v13, %v5042_v57  ;;  %v10978_v32 = vld [vmem:[%s14055_s4 + $0x80] sm:$0xff]  }
 0x441   : > { %10172 = vmatmul.mubr.msk.bf16.gmra.mrb[160].mxu1 %vm347_vm1, %v4458_v36 }
 0x442   : > { %10264 = vmatmul.mubr.msk.bf16.gmra.mrb[244].mxu0 %vm347_vm1, %v4388_v17  ;;  %10275 = vmatprep.mubr.msk.bf16.mxu1 %vm11008_vm0, %v14063_v2  ;;  %v5490_v17 = vpack.c.bf16 %v5458_v30, %v5457_v59 }
 0x443   : > { %10367 = vmatprep.mubr.msk.bf16.mxu0 %vm11008_vm0, %v14063_v2 }
 0x449   : > { %10276 = vmatmul.mubr.msk.bf16.vlgmr.msra.gmra.mrb[164].mxu1 %vm347_vm1, %v5083_v8 }
 0x44a   : > { %10368 = vmatmul.mubr.msk.bf16.vlgmr.msra.gmra.mrb[248].mxu0 %vm347_vm1, %v5482_v60  ;;  %10452 = vmatpush3.bf16.msra.mxu1 %v10978_v32 }
 0x44b   : > { %10279 = vmatprep.mubr.msk.bf16.mxu1 %vm11008_vm0, %v14063_v2  ;;  %10371 = vmatprep.mubr.msk.bf16.mxu0 %vm11008_vm0, %v14063_v2 }
 0x44c   : > { %10453 = vmatprep.subr.bf16.mxu1 %v14063_v2  ;;  %10544 = vmatpush3.bf16.msra.mxu0 %v10982_v43 }
 0x44d   : > { %10545 = vmatprep.subr.bf16.mxu0 %v14063_v2 }
 0x44e   : > { %10454 = vmatpush3.bf16.msra.mxu1 %v10979_v35 }
 0x44f   : > { %10455 = vmatprep.subr.bf16.mxu1 %v14063_v2 }
 0x450   : > { %10546 = vmatpush3.bf16.msra.mxu0 %v10983_v16 }
 0x451   : > { %10280 = vmatmul.mubr.msk.bf16.gmra.mrb[168].mxu1 %vm347_vm1, %v5084_v19  ;;  %10547 = vmatprep.subr.bf16.mxu0 %v14063_v2  ;;  %v5491_v19 = vpack.c.bf16 %v5460_v58, %v5459_v21 }
 0x452   : > { %10372 = vmatmul.mubr.msk.bf16.gmra.mrb[252].mxu0 %vm347_vm1, %v5483_v62  ;;  %10283 = vmatprep.mubr.msk.bf16.mxu1 %vm11008_vm0, %v14063_v2 }
 0x453   : > { %10375 = vmatprep.mubr.msk.bf16.mxu0 %vm11008_vm0, %v14063_v2  ;;  %10456 = vmatpush3.bf16.msra.mxu1 %v10980_v6 }
 0x454   : > { %10457 = vmatprep.subr.bf16.mxu1 %v14063_v2  ;;  %10548 = vmatpush3.bf16.msra.mxu0 %v10984_v39 }
 0x455   : > { %10549 = vmatprep.subr.bf16.mxu0 %v14063_v2 }
 0x457   : > { %10458 = vmatpush3.bf16.msra.mxu1 %v10981_v14  ;;  %v5462_v14 = vld [vmem:[#allocation3 + $0xbf] sm:$0xff] }
 0x458   : > { %10635 = vmatprep.subr.bf16.mxu1 %v14063_v2  ;;  %10550 = vmatpush3.bf16.msra.mxu0 %v10985_v10 }
 0x459   : > { %10284 = vmatmul.mubr.msk.bf16.gmra.mrb[172].mxu1 %vm347_vm1, %v5483_v62  ;;  %10727 = vmatprep.subr.bf16.mxu0 %v14063_v2 }
 0x45a   : > { %10376 = vmatmul.mubr.msk.bf16.gmra.mrb[0].mxu0 %vm347_vm1, %v5484_v41  ;;  %10287 = vmatprep.mubr.msk.bf16.mxu1 %vm11008_vm0, %v14063_v2 }
 0x45b   : > { %10379 = vmatprep.mubr.msk.bf16.mxu0 %vm11008_vm0, %v14063_v2 }
 0x461   : > { %10288 = vmatmul.mubr.msk.bf16.gmra.mrb[176].mxu1 %vm347_vm1, %v5484_v41 }
 0x462   : > { %10380 = vmatmul.mubr.msk.bf16.gmra.mrb[4].mxu0 %vm347_vm1, %v5485_v45  ;;  %10291 = vmatprep.mubr.msk.bf16.mxu1 %vm11008_vm0, %v14063_v2 }
 0x463   : > { %10383 = vmatprep.mubr.msk.bf16.mxu0 %vm11008_vm0, %v14063_v2 }
 0x469   : > { %10292 = vmatmul.mubr.msk.bf16.gmra.mrb[180].mxu1 %vm347_vm1, %v5485_v45  ;;  %v5461_v45 = vld [vmem:[#allocation3 + $0xb7] sm:$0xff] }
 0x46a   : > { %10384 = vmatmul.mubr.msk.bf16.gmra.mrb[8].mxu0 %vm347_vm1, %v5486_v24  ;;  %10295 = vmatprep.mubr.msk.bf16.mxu1 %vm11008_vm0, %v14063_v2  ;;  %v5492_v47 = vpack.c.bf16 %v5462_v14, %v5461_v45 }
 0x46b   : > { %10387 = vmatprep.mubr.msk.bf16.mxu0 %vm11008_vm0, %v14063_v2 }
 0x471   : > { %10296 = vmatmul.mubr.msk.bf16.gmra.mrb[184].mxu1 %vm347_vm1, %v5486_v24 }
 0x472   : > { %10388 = vmatmul.mubr.msk.bf16.gmra.mrb[12].mxu0 %vm347_vm1, %v5487_v63  ;;  %10299 = vmatprep.mubr.msk.bf16.mxu1 %vm11008_vm0, %v14063_v2 }
 0x473   : > { %10391 = vmatprep.mubr.msk.bf16.mxu0 %vm11008_vm0, %v14063_v2 }
 0x479   : > { %10300 = vmatmul.mubr.msk.bf16.gmra.mrb[188].mxu1 %vm347_vm1, %v5487_v63 }
 0x47a   : > { %10392 = vmatmul.mubr.msk.bf16.gmra.mrb[16].mxu0 %vm347_vm1, %v5488_v50  ;;  %10303 = vmatprep.mubr.msk.bf16.mxu1 %vm11008_vm0, %v14063_v2 }
 0x47b   : > { %10395 = vmatprep.mubr.msk.bf16.mxu0 %vm11008_vm0, %v14063_v2 }
 0x47c   : > { %v4597_v11 = vpop.f32.mrb[84].mxu1 }
 0x47d   : > { %v4884_v46 = vpop.f32.mrb[168].mxu0  ;;  %v10097_v5 = vpop.f32.mrb[85].mxu1 }
 0x47e   : > { %v12913_v56 = vadd.f32 %v4884_v46, %v4597_v11  ;;  %v10189_v26 = vpop.f32.mrb[169].mxu0  ;;  %v4600_v52 = vpop.f32.mrb[86].mxu1 }
 0x47f   : > { %v4887_v55 = vpop.f32.mrb[170].mxu0  ;;  %v10098_v7 = vpop.f32.mrb[87].mxu1 }
 0x480   : > { %v12915_v53 = vadd.f32 %v4887_v55, %v4600_v52  ;;  %v10190_v28 = vpop.f32.mrb[171].mxu0  ;;  %v5466_v55 = vld [vmem:[#allocation3 + $0xdf] sm:$0xff] }
 0x481   : > { %10304 = vmatmul.mubr.msk.bf16.gmra.mrb[192].mxu1 %vm347_vm1, %v5488_v50  ;;  %v5463_v50 = vld [vmem:[#allocation3 + $0xc7] sm:$0xff] }
 0x482   : > { %10396 = vmatmul.mubr.msk.bf16.gmra.mrb[20].mxu0 %vm347_vm1, %v5489_v20  ;;  %10307 = vmatprep.mubr.msk.bf16.mxu1 %vm11008_vm0, %v14063_v2  ;;  %v5493_v5 = vpack.c.bf16 %v5464_v4, %v5463_v50  ;;  %v5471_v50 = vld [vmem:[#allocation3 + $0x107] sm:$0xff] }
 0x483   : > { %10399 = vmatprep.mubr.msk.bf16.mxu0 %vm11008_vm0, %v14063_v2 }
 0x484   : > { %v4605_v1 = vpop.f32.mrb[88].mxu1 }
 0x485   : > { %v4892_v22 = vpop.f32.mrb[172].mxu0  ;;  %v10101_v61 = vpop.f32.mrb[89].mxu1 }
 0x486   : > { %v12923_v12 = vadd.f32 %v4892_v22, %v4605_v1  ;;  %v10193_v23 = vpop.f32.mrb[173].mxu0  ;;  %v4608_v18 = vpop.f32.mrb[90].mxu1  ;;  %v5465_v22 = vld [vmem:[#allocation3 + $0xd7] sm:$0xff] }
 0x487   : > { %v4895_v42 = vpop.f32.mrb[174].mxu0  ;;  %v10102_v49 = vpop.f32.mrb[91].mxu1 }
 0x488   : > { %v12925_v44 = vadd.f32 %v4895_v42, %v4608_v18  ;;  %v10194_v36 = vpop.f32.mrb[175].mxu0  ;;  %v5494_v18 = vpack.c.bf16 %v5466_v55, %v5465_v22  ;;  %v5468_v49 = vld [vmem:[#allocation3 + $0xef] sm:$0xff] }
 0x489   : > { %10308 = vmatmul.mubr.msk.bf16.gmra.mrb[196].mxu1 %vm347_vm1, %v5489_v20 }
 0x48a   : > { %10400 = vmatmul.mubr.msk.bf16.gmra.mrb[24].mxu0 %vm347_vm1, %v5490_v17  ;;  %10311 = vmatprep.mubr.msk.bf16.mxu1 %vm11008_vm0, %v14063_v2 }
 0x48b   : > { %10403 = vmatprep.mubr.msk.bf16.mxu0 %vm11008_vm0, %v14063_v2 }
 0x48c   : > { %v4613_v57 = vpop.f32.mrb[92].mxu1 }
 0x48d   : > { %v4900_v13 = vpop.f32.mrb[176].mxu0  ;;  %v10105_v3 = vpop.f32.mrb[93].mxu1 }
 0x48e   : > { %v12933_v8 = vadd.f32 %v4900_v13, %v4613_v57  ;;  %v10197_v32 = vpop.f32.mrb[177].mxu0  ;;  %v4616_v60 = vpop.f32.mrb[94].mxu1  ;;  %v5467_v3 = vld [vmem:[#allocation3 + $0xe7] sm:$0xff] }
 0x48f   : > { %v4903_v35 = vpop.f32.mrb[178].mxu0  ;;  %v10106_v48 = vpop.f32.mrb[95].mxu1  ;;  %v5495_v21 = vpack.c.bf16 %v5468_v49, %v5467_v3 }
 0x490   : > { %v12935_v33 = vadd.f32 %v4903_v35, %v4616_v60  ;;  %v10198_v40 = vpop.f32.mrb[179].mxu0 }
 0x491   : > { %10312 = vmatmul.mubr.msk.bf16.gmra.mrb[200].mxu1 %vm347_vm1, %v5490_v17 }
 0x492   : > { %10404 = vmatmul.mubr.msk.bf16.gmra.mrb[28].mxu0 %vm347_vm1, %v5491_v19  ;;  %10315 = vmatprep.mubr.msk.bf16.mxu1 %vm11008_vm0, %v14063_v2 }
 0x493   : > { %10407 = vmatprep.mubr.msk.bf16.mxu0 %vm11008_vm0, %v14063_v2 }
 0x494   : > { %v4621_v62 = vpop.f32.mrb[96].mxu1 }
 0x495   : > { %v4908_v6 = vpop.f32.mrb[180].mxu0  ;;  %v10109_v51 = vpop.f32.mrb[97].mxu1 }
 0x496   : > { %v12943_v9 = vadd.f32 %v4908_v6, %v4621_v62  ;;  %v10201_v41 = vpop.f32.mrb[181].mxu0  ;;  %v4624_v29 = vpop.f32.mrb[98].mxu1 }
 0x497   : > { %v4911_v27 = vpop.f32.mrb[182].mxu0  ;;  %v10110_v31 = vpop.f32.mrb[99].mxu1 }
 0x498   : > { %v12945_v43 = vadd.f32 %v4911_v27, %v4624_v29  ;;  %v10202_v16 = vpop.f32.mrb[183].mxu0  ;;  %v5469_v29 = vld [vmem:[#allocation3 + $0xf7] sm:$0xff] }
 0x499   : > { %10316 = vmatmul.mubr.msk.bf16.gmra.mrb[204].mxu1 %vm347_vm1, %v5491_v19  ;;  %v5470_v19 = vld [vmem:[#allocation3 + $0xff] sm:$0xff] }
 0x49a   : > { %10408 = vmatmul.mubr.msk.bf16.gmra.mrb[32].mxu0 %vm347_vm1, %v5492_v47  ;;  %10319 = vmatprep.mubr.msk.bf16.mxu1 %vm11008_vm0, %v14063_v2  ;;  %v5496_v16 = vpack.c.bf16 %v5470_v19, %v5469_v29  ;;  %v5478_v29 = vld [vmem:[#allocation3 + $0x13f] sm:$0xff] }
 0x49b   : > { %10411 = vmatprep.mubr.msk.bf16.mxu0 %vm11008_vm0, %v14063_v2 }
 0x49c   : > { %v4629_v24 = vpop.f32.mrb[100].mxu1 }
 0x49d   : > { %v4916_v39 = vpop.f32.mrb[184].mxu0  ;;  %v10113_v15 = vpop.f32.mrb[101].mxu1 }
 0x49e   : > { %v12953_v10 = vadd.f32 %v4916_v39, %v4629_v24  ;;  %v10205_v63 = vpop.f32.mrb[185].mxu0  ;;  %v4632_v0 = vpop.f32.mrb[102].mxu1  ;;  %v5472_v39 = vld [vmem:[#allocation3 + $0x10f] sm:$0xff] }
 0x49f   : > { %v4919_v38 = vpop.f32.mrb[186].mxu0  ;;  %v10114_v46 = vpop.f32.mrb[103].mxu1 }
 0x4a0   : > { %v12955_v11 = vadd.f32 %v4919_v38, %v4632_v0  ;;  %v10206_v54 = vpop.f32.mrb[187].mxu0 }
 0x4a1   : > { %10320 = vmatmul.mubr.msk.bf16.gmra.mrb[208].mxu1 %vm347_vm1, %v5492_v47 }
 0x4a2   : > { %10412 = vmatmul.mubr.msk.bf16.gmra.mrb[36].mxu0 %vm347_vm1, %v5493_v5  ;;  %10323 = vmatprep.mubr.msk.bf16.mxu1 %vm11008_vm0, %v14063_v2 }
 0x4a3   : > { %10415 = vmatprep.mubr.msk.bf16.mxu0 %vm11008_vm0, %v14063_v2 }
 0x4a4   : > { %v4637_v26 = vpop.f32.mrb[104].mxu1 }
 0x4a5   : > { %v4924_v52 = vpop.f32.mrb[188].mxu0  ;;  %v10117_v7 = vpop.f32.mrb[105].mxu1 }
 0x4a6   : > { %v12963_v25 = vadd.f32 %v4924_v52, %v4637_v26  ;;  %v10209_v28 = vpop.f32.mrb[189].mxu0  ;;  %v4640_v20 = vpop.f32.mrb[106].mxu1  ;;  %v5497_v26 = vpack.c.bf16 %v5472_v39, %v5471_v50  ;;  %v5474_v7 = vld [vmem:[#allocation3 + $0x11f] sm:$0xff]  ;;  %v5477_v39 = vld [vmem:[#allocation3 + $0x137] sm:$0xff] }
 0x4a7   : > { %v4927_v1 = vpop.f32.mrb[190].mxu0  ;;  %v10118_v61 = vpop.f32.mrb[107].mxu1 }
 0x4a8   : > { %v12965_v30 = vadd.f32 %v4927_v1, %v4640_v20  ;;  %v10210_v23 = vpop.f32.mrb[191].mxu0 }
 0x4a9   : > { %10324 = vmatmul.mubr.msk.bf16.gmra.mrb[212].mxu1 %vm347_vm1, %v5493_v5  ;;  %v5473_v23 = vld [vmem:[#allocation3 + $0x117] sm:$0xff] }
 0x4aa   : > { %10416 = vmatmul.mubr.msk.bf16.gmra.mrb[40].mxu0 %vm347_vm1, %v5494_v18  ;;  %10327 = vmatprep.mubr.msk.bf16.mxu1 %vm11008_vm0, %v14063_v2  ;;  %v5498_v49 = vpack.c.bf16 %v5474_v7, %v5473_v23 }
 0x4ab   : > { %10419 = vmatprep.mubr.msk.bf16.mxu0 %vm11008_vm0, %v14063_v2 }
 0x4ac   : > { %v4645_v42 = vpop.f32.mrb[108].mxu1 }
 0x4ad   : > { %v4932_v59 = vpop.f32.mrb[192].mxu0  ;;  %v10121_v17 = vpop.f32.mrb[109].mxu1 }
 0x4ae   : > { %v12973_v36 = vadd.f32 %v4932_v59, %v4645_v42  ;;  %v10213_v57 = vpop.f32.mrb[193].mxu0  ;;  %v4648_v13 = vpop.f32.mrb[110].mxu1 }
 0x4af   : > { %v4935_v58 = vpop.f32.mrb[194].mxu0  ;;  %v10122_v60 = vpop.f32.mrb[111].mxu1 }
 0x4b0   : > { %v12975_v32 = vadd.f32 %v4935_v58, %v4648_v13  ;;  %v10214_v35 = vpop.f32.mrb[195].mxu0  ;;  %v5476_v13 = vld [vmem:[#allocation3 + $0x12f] sm:$0xff] }
 0x4b1   : > { %10328 = vmatmul.mubr.msk.bf16.gmra.mrb[216].mxu1 %vm347_vm1, %v5494_v18 }
 0x4b2   : > { %10420 = vmatmul.mubr.msk.bf16.gmra.mrb[44].mxu0 %vm347_vm1, %v5495_v21  ;;  %10331 = vmatprep.mubr.msk.bf16.mxu1 %vm11008_vm0, %v14063_v2 }
 0x4b3   : > { %10423 = vmatprep.mubr.msk.bf16.mxu0 %vm11008_vm0, %v14063_v2 }
 0x4b4   : > { %v4653_v48 = vpop.f32.mrb[112].mxu1 }
 0x4b5   : > { %v4940_v40 = vpop.f32.mrb[196].mxu0  ;;  %v10125_v6 = vpop.f32.mrb[113].mxu1 }
 0x4b6   : > { %v12983_v62 = vadd.f32 %v4940_v40, %v4653_v48  ;;  %v10217_v14 = vpop.f32.mrb[197].mxu0  ;;  %v4656_v51 = vpop.f32.mrb[114].mxu1  ;;  %v5475_v48 = vld [vmem:[#allocation3 + $0x127] sm:$0xff] }
 0x4b7   : > { %v4943_v41 = vpop.f32.mrb[198].mxu0  ;;  %v10126_v45 = vpop.f32.mrb[115].mxu1  ;;  %v5499_v14 = vpack.c.bf16 %v5476_v13, %v5475_v48 }
 0x4b8   : > { %v12985_v27 = vadd.f32 %v4943_v41, %v4656_v51  ;;  %v10218_v31 = vpop.f32.mrb[199].mxu0 }
 0x4b9   : > { %10332 = vmatmul.mubr.msk.bf16.gmra.mrb[220].mxu1 %vm347_vm1, %v5495_v21 }
 0x4ba   : > { %10424 = vmatmul.mubr.msk.bf16.gmra.mrb[48].mxu0 %vm347_vm1, %v5496_v16  ;;  %10335 = vmatprep.mubr.msk.bf16.mxu1 %vm11008_vm0, %v14063_v2 }
 0x4bb   : > { %10427 = vmatprep.mubr.msk.bf16.mxu0 %vm11008_vm0, %v14063_v2 }
 0x4bc   : > { %v4661_v47 = vpop.f32.mrb[116].mxu1 }
 0x4bd   : > { %v4948_v24 = vpop.f32.mrb[200].mxu0  ;;  %v10129_v15 = vpop.f32.mrb[117].mxu1 }
 0x4be   : > { %v12993_v4 = vadd.f32 %v4948_v24, %v4661_v47  ;;  %v10221_v63 = vpop.f32.mrb[201].mxu0  ;;  %v4664_v0 = vpop.f32.mrb[118].mxu1 }
 0x4bf   : > { %v4951_v38 = vpop.f32.mrb[202].mxu0  ;;  %v10130_v54 = vpop.f32.mrb[119].mxu1 }
 0x4c0   : > { %v12995_v46 = vadd.f32 %v4951_v38, %v4664_v0  ;;  %v10222_v5 = vpop.f32.mrb[203].mxu0  ;;  %v5500_v38 = vpack.c.bf16 %v5478_v29, %v5477_v39  ;;  %v6240_v29 = vld [vmem:[#allocation3 + $0x21] sm:$0xff] }
 0x4c1   : > { %10336 = vmatmul.mubr.msk.bf16.gmra.mrb[224].mxu1 %vm347_vm1, %v5496_v16  ;;  %v5480_v5 = vld [vmem:[#allocation3 + $0x14f] sm:$0xff] }
 0x4c2   : > { %10428 = vmatmul.mubr.msk.bf16.gmra.mrb[52].mxu0 %vm347_vm1, %v5497_v26  ;;  %10339 = vmatprep.mubr.msk.bf16.mxu1 %vm11008_vm0, %v14063_v2 }
 0x4c3   : > { %10431 = vmatprep.mubr.msk.bf16.mxu0 %vm11008_vm0, %v14063_v2 }
 0x4c4   : > { %v4669_v52 = vpop.f32.mrb[120].mxu1 }
 0x4c5   : > { %v4956_v55 = vpop.f32.mrb[204].mxu0  ;;  %v10133_v20 = vpop.f32.mrb[121].mxu1 }
 0x4c6   : > { %v13003_v28 = vadd.f32 %v4956_v55, %v4669_v52  ;;  %v10225_v1 = vpop.f32.mrb[205].mxu0  ;;  %v4672_v22 = vpop.f32.mrb[122].mxu1 }
 0x4c7   : > { %v4959_v61 = vpop.f32.mrb[206].mxu0  ;;  %v10134_v42 = vpop.f32.mrb[123].mxu1  ;;  %v5479_v1 = vld [vmem:[#allocation3 + $0x147] sm:$0xff] }
 0x4c8   : > { %v13005_v18 = vadd.f32 %v4959_v61, %v4672_v22  ;;  %v10226_v59 = vpop.f32.mrb[207].mxu0  ;;  %v5501_v42 = vpack.c.bf16 %v5480_v5, %v5479_v1  ;;  %v10987_v1 = vld [vmem:[%s14055_s4 + $0xc8] sm:$0xff]  }
 0x4c9   : > { %10340 = vmatmul.mubr.msk.bf16.gmra.mrb[228].mxu1 %vm347_vm1, %v5497_v26 }
 0x4ca   : > { %10432 = vmatmul.mubr.msk.bf16.gmra.mrb[56].mxu0 %vm347_vm1, %v5498_v49  ;;  %10343 = vmatprep.mubr.msk.bf16.mxu1 %vm11008_vm0, %v14063_v2 }
 0x4cb   : > { %10435 = vmatprep.mubr.msk.bf16.mxu0 %vm11008_vm0, %v14063_v2 }
 0x4cc   : > { %v4677_v17 = vpop.f32.mrb[124].mxu1 }
 0x4cd   : > { %v4964_v57 = vpop.f32.mrb[208].mxu0  ;;  %v10137_v3 = vpop.f32.mrb[125].mxu1 }
 0x4ce   : > { %v13013_v58 = vadd.f32 %v4964_v57, %v4677_v17  ;;  %v10229_v60 = vpop.f32.mrb[209].mxu0  ;;  %v4680_v35 = vpop.f32.mrb[126].mxu1  ;;  %v5082_v17 = vld [vmem:[#allocation3 + $0x147] sm:$0xf]  ;;  %v5481_v57 = vld [vmem:[#allocation3 + $0x157] sm:$0xf] }
 0x4cf   : > { %v4967_v21 = vpop.f32.mrb[210].mxu0  ;;  %v10138_v19 = vpop.f32.mrb[127].mxu1 }
 0x4d0   : > { %v13015_v40 = vadd.f32 %v4967_v21, %v4680_v35  ;;  %v10230_v6 = vpop.f32.mrb[211].mxu0 }
 0x4d1   : > { %10344 = vmatmul.mubr.msk.bf16.gmra.mrb[232].mxu1 %vm347_vm1, %v5498_v49 }
 0x4d2   : > { %10436 = vmatmul.mubr.msk.bf16.gmra.mrb[60].mxu0 %vm347_vm1, %v5499_v14  ;;  %10347 = vmatprep.mubr.msk.bf16.mxu1 %vm11008_vm0, %v14063_v2 }
 0x4d3   : > { %10439 = vmatprep.mubr.msk.bf16.mxu0 %vm11008_vm0, %v14063_v2 }
 0x4d4   : > { %v4685_v51 = vpop.f32.mrb[128].mxu1 }
 0x4d5   : > { %v4972_v41 = vpop.f32.mrb[212].mxu0  ;;  %v10141_v31 = vpop.f32.mrb[129].mxu1 }
 0x4d6   : > { %v13023_v45 = vadd.f32 %v4972_v41, %v4685_v51  ;;  %v10233_v16 = vpop.f32.mrb[213].mxu0  ;;  %v4688_v47 = vpop.f32.mrb[130].mxu1  ;;  %v5502_v51 = vpack.c.bf16 %v5481_v57, %v5481_v57  ;;  %v5841_v41 = vld [vmem:[#allocation3 + $0x20] sm:$0xff] }
 0x4d7   : > { %v4975_v24 = vpop.f32.mrb[214].mxu0  ;;  %v10142_v63 = vpop.f32.mrb[131].mxu1 }
 0x4d8   : > { %v13025_v15 = vadd.f32 %v4975_v24, %v4688_v47  ;;  %v10234_v0 = vpop.f32.mrb[215].mxu0  ;;  %v5840_v63 = vld [vmem:[#allocation3 + $0x18] sm:$0xff] }
 0x4d9   : > { %10348 = vmatmul.mubr.msk.bf16.gmra.mrb[236].mxu1 %vm347_vm1, %v5499_v14  ;;  %v5103_v14 = vpack.c.bf16 %v5082_v17, %v5082_v17  ;;  %v6239_v0 = vld [vmem:[#allocation3 + $0x19] sm:$0xff]  ;;  %v5881_v5 = vpack.c.bf16 %v5841_v41, %v5840_v63  ;;  %v6244_v63 = vld [vmem:[#allocation3 + $0x41] sm:$0xff] }
 0x4da   : > { %10440 = vmatmul.mubr.msk.bf16.gmra.mrb[64].mxu0 %vm347_vm1, %v5500_v38  ;;  %10351 = vmatprep.mubr.msk.bf16.mxu1 %vm11008_vm0, %v14063_v2 }
 0x4db   : > { %10443 = vmatprep.mubr.msk.bf16.mxu0 %vm11008_vm0, %v14063_v2 }
 0x4dc   : > { %v4693_v50 = vpop.f32.mrb[132].mxu1 }
 0x4dd   : > { %v4980_v54 = vpop.f32.mrb[216].mxu0  ;;  %v10145_v52 = vpop.f32.mrb[133].mxu1 }
 0x4de   : > { %v13033_v26 = vadd.f32 %v4980_v54, %v4693_v50  ;;  %v10237_v55 = vpop.f32.mrb[217].mxu0  ;;  %v4696_v7 = vpop.f32.mrb[134].mxu1  ;;  %v10986_v54 = vld [vmem:[%s14055_s4 + $0xc0] sm:$0xff]   ;;  %v6280_v52 = vpack.c.bf16 %v6240_v29, %v6239_v0  ;;  %v10988_v29 = vld [vmem:[%s14055_s4 + $0xd0] sm:$0xff]  }
 0x4df   : > { %v4983_v20 = vpop.f32.mrb[218].mxu0  ;;  %v10146_v61 = vpop.f32.mrb[135].mxu1 }
 0x4e0   : > { %v13035_v22 = vadd.f32 %v4983_v20, %v4696_v7  ;;  %v10238_v23 = vpop.f32.mrb[219].mxu0 }
 0x4e1   : > { %10352 = vmatmul.mubr.msk.bf16.gmra.mrb[240].mxu1 %vm347_vm1, %v5500_v38 }
 0x4e2   : > { %10444 = vmatmul.mubr.msk.bf16.gmra.mrb[68].mxu0 %vm347_vm1, %v5501_v42  ;;  %10355 = vmatprep.mubr.msk.bf16.mxu1 %vm11008_vm0, %v14063_v2  ;;  %v5843_v42 = vld [vmem:[#allocation3 + $0x30] sm:$0xff] }
 0x4e3   : > { %10447 = vmatprep.mubr.msk.bf16.mxu0 %vm11008_vm0, %v14063_v2 }
 0x4e4   : > { %v4701_v59 = vpop.f32.mrb[136].mxu1 }
 0x4e5   : > { %v4988_v49 = vpop.f32.mrb[220].mxu0  ;;  %v10149_v3 = vpop.f32.mrb[137].mxu1 }
 0x4e6   : > { %v13043_v13 = vadd.f32 %v4988_v49, %v4701_v59  ;;  %v10241_v60 = vpop.f32.mrb[221].mxu0  ;;  %v4704_v35 = vpop.f32.mrb[138].mxu1  ;;  %v6242_v59 = vld [vmem:[#allocation3 + $0x31] sm:$0xff] }
 0x4e7   : > { %v4991_v21 = vpop.f32.mrb[222].mxu0  ;;  %v10150_v19 = vpop.f32.mrb[139].mxu1 }
 0x4e8   : > { %v13045_v48 = vadd.f32 %v4991_v21, %v4704_v35  ;;  %v10242_v6 = vpop.f32.mrb[223].mxu0  ;;  %v5842_v35 = vld [vmem:[#allocation3 + $0x28] sm:$0xff] }
 0x4e9   : > { %10356 = vmatmul.mubr.msk.bf16.gmra.mrb[244].mxu1 %vm347_vm1, %v5103_v14  ;;  %v6241_v21 = vld [vmem:[#allocation3 + $0x29] sm:$0xff] }
 0x4ea   : > { %10448 = vmatmul.mubr.msk.bf16.gmra.mrb[72].mxu0 %vm347_vm1, %v5502_v51  ;;  %10459 = vmatprep.mubr.msk.bf16.mxu1 %vm11008_vm0, %v14063_v2  ;;  %v5882_v51 = vpack.c.bf16 %v5843_v42, %v5842_v35  ;;  %v6281_v41 = vpack.c.bf16 %v6242_v59, %v6241_v21 }
 0x4eb   : > { %10551 = vmatprep.mubr.msk.bf16.mxu0 %vm11008_vm0, %v14063_v2 }
 0x4ec   : > { %v4709_v31 = vpop.f32.mrb[140].mxu1 }
 0x4ed   : > { %v4996_v16 = vpop.f32.mrb[224].mxu0  ;;  %v10153_v24 = vpop.f32.mrb[141].mxu1 }
 0x4ee   : > { %v13053_v47 = vadd.f32 %v4996_v16, %v4709_v31  ;;  %v10245_v39 = vpop.f32.mrb[225].mxu0  ;;  %v4712_v38 = vpop.f32.mrb[142].mxu1  ;;  %v10989_v31 = vld [vmem:[%s14055_s4 + $0xd8] sm:$0xff]  }
 0x4ef   : > { %v4999_v50 = vpop.f32.mrb[226].mxu0  ;;  %v10154_v7 = vpop.f32.mrb[143].mxu1  ;;  %v5845_v39 = vld [vmem:[#allocation3 + $0x40] sm:$0xff] }
 0x4f0   : > { %v13058_v55 = vadd.f32 %v4999_v50, %v4712_v38  ;;  %v10246_v20 = vpop.f32.mrb[227].mxu0  ;;  %v6243_v7 = vld [vmem:[#allocation3 + $0x39] sm:$0xff] }
 0x4f1   : > { %10460 = vmatmul.mubr.msk.bf16.vlgmr.msra.gmra.mrb[248].mxu1 %vm347_vm1, %v5881_v5  ;;  %v13092_v42 = vpack.c.bf16 %v6244_v63, %v6243_v7  ;;  %v10990_v63 = vld [vmem:[%s14055_s4 + $0xe0] sm:$0xff]  }
 0x4f2   : > { %10552 = vmatmul.mubr.msk.bf16.vlgmr.msra.gmra.mrb[76].mxu0 %vm347_vm1, %v6280_v52  ;;  %10636 = vmatpush3.bf16.msra.mxu1 %v10986_v54  ;;  %v5844_v52 = vld [vmem:[#allocation3 + $0x38] sm:$0xff] }
 0x4f3   : > { %10463 = vmatprep.mubr.msk.bf16.mxu1 %vm11008_vm0, %v14063_v2  ;;  %10555 = vmatprep.mubr.msk.bf16.mxu0 %vm11008_vm0, %v14063_v2 }
 0x4f4   : > { %10637 = vmatprep.subr.bf16.mxu1 %v14063_v2  ;;  %v4717_v61 = vpop.f32.mrb[144].mxu1  ;;  %10728 = vmatpush3.bf16.msra.mxu0 %v10990_v63 }
 0x4f5   : > { %v5004_v23 = vpop.f32.mrb[228].mxu0  ;;  %v10157_v17 = vpop.f32.mrb[145].mxu1  ;;  %10729 = vmatprep.subr.bf16.mxu0 %v14063_v2 }
 0x4f6   : > { %v13070_v49 = vadd.f32 %v5004_v23, %v4717_v61  ;;  %v10249_v57 = vpop.f32.mrb[229].mxu0  ;;  %v4720_v3 = vpop.f32.mrb[146].mxu1  ;;  %10638 = vmatpush3.bf16.msra.mxu1 %v10987_v1  ;;  %v5883_v23 = vpack.c.bf16 %v5845_v39, %v5844_v52 }
 0x4f7   : > { %v5007_v60 = vpop.f32.mrb[230].mxu0  ;;  %v10158_v6 = vpop.f32.mrb[147].mxu1  ;;  %10639 = vmatprep.subr.bf16.mxu1 %v14063_v2  ;;  %v5847_v57 = vld [vmem:[#allocation3 + $0x50] sm:$0xff] }
 0x4f8   : > { %v13072_v19 = vadd.f32 %v5007_v60, %v4720_v3  ;;  %v10250_v14 = vpop.f32.mrb[231].mxu0  ;;  %v6246_v3 = vld [vmem:[#allocation3 + $0x51] sm:$0xff] }
 0x4f9   : > { %10464 = vmatmul.mubr.msk.bf16.gmra.mrb[252].mxu1 %vm347_vm1, %v5882_v51  ;;  %v5846_v51 = vld [vmem:[#allocation3 + $0x48] sm:$0xff] }
 0x4fa   : > { %10556 = vmatmul.mubr.msk.bf16.gmra.mrb[80].mxu0 %vm347_vm1, %v6281_v41  ;;  %10467 = vmatprep.mubr.msk.bf16.mxu1 %vm11008_vm0, %v14063_v2  ;;  %v6245_v41 = vld [vmem:[#allocation3 + $0x49] sm:$0xff] }
 0x4fb   : > { %10559 = vmatprep.mubr.msk.bf16.mxu0 %vm11008_vm0, %v14063_v2  ;;  %10640 = vmatpush3.bf16.msra.mxu1 %v10988_v29  ;;  %v13106_v39 = vpack.c.bf16 %v6246_v3, %v6245_v41 }
 0x4fc   : > { %v4725_v16 = vpop.f32.mrb[148].mxu1  ;;  %10641 = vmatprep.subr.bf16.mxu1 %v14063_v2 }
 0x4fd   : > { %v5012_v24 = vpop.f32.mrb[232].mxu0  ;;  %v10161_v38 = vpop.f32.mrb[149].mxu1 }
 0x4fe   : > { %v13088_v0 = vadd.f32 %v5012_v24, %v4725_v16  ;;  %v10253_v50 = vpop.f32.mrb[233].mxu0  ;;  %v4728_v54 = vpop.f32.mrb[150].mxu1  ;;  %v5884_v24 = vpack.c.bf16 %v5847_v57, %v5846_v51  ;;  %v10991_v57 = vld [vmem:[%s14055_s4 + $0xe8] sm:$0xff]   ;;  %v10992_v51 = vld [vmem:[%s14055_s4 + $0xf0] sm:$0xff]  }
 0x4ff   : > { %v5015_v5 = vpop.f32.mrb[234].mxu0  ;;  %v10162_v1 = vpop.f32.mrb[151].mxu1  ;;  %10642 = vmatpush3.bf16.msra.mxu1 %v10989_v31  ;;  %10730 = vmatpush3.bf16.msra.mxu0 %v10991_v57 }
 0x500   : > { %v13090_v20 = vadd.f32 %v5015_v5, %v4728_v54  ;;  %v10254_v61 = vpop.f32.mrb[235].mxu0  ;;  %10819 = vmatprep.subr.bf16.mxu1 %v14063_v2  ;;  %v5849_v54 = vld [vmem:[#allocation3 + $0x60] sm:$0xff]  ;;  %10731 = vmatprep.subr.bf16.mxu0 %v14063_v2 }
 0x501   : > { %10468 = vmatmul.mubr.msk.bf16.gmra.mrb[0].mxu1 %vm347_vm1, %v5883_v23  ;;  %v6248_v5 = vld [vmem:[#allocation3 + $0x61] sm:$0xff] }
 0x502   : > { %10560 = vmatmul.mubr.msk.bf16.gmra.mrb[84].mxu0 %vm347_vm1, %v13092_v42  ;;  %10471 = vmatprep.mubr.msk.bf16.mxu1 %vm11008_vm0, %v14063_v2 }
 0x503   : > { %10563 = vmatprep.mubr.msk.bf16.mxu0 %vm11008_vm0, %v14063_v2  ;;  %10732 = vmatpush3.bf16.msra.mxu0 %v10992_v51  ;;  %v6252_v51 = vld [vmem:[#allocation3 + $0x81] sm:$0xff] }
 0x504   : > { %v4733_v59 = vpop.f32.mrb[152].mxu1  ;;  %10733 = vmatprep.subr.bf16.mxu0 %v14063_v2 }
 0x505   : > { %v5020_v17 = vpop.f32.mrb[236].mxu0  ;;  %v10165_v35 = vpop.f32.mrb[153].mxu1 }
 0x506   : > { %v13102_v60 = vadd.f32 %v5020_v17, %v4733_v59  ;;  %v10257_v21 = vpop.f32.mrb[237].mxu0  ;;  %v4736_v6 = vpop.f32.mrb[154].mxu1  ;;  %v5848_v59 = vld [vmem:[#allocation3 + $0x58] sm:$0xff] }
 0x507   : > { %v5023_v14 = vpop.f32.mrb[238].mxu0  ;;  %v10166_v31 = vpop.f32.mrb[155].mxu1  ;;  %v6247_v17 = vld [vmem:[#allocation3 + $0x59] sm:$0xff] }
 0x508   : > { %v13104_v29 = vadd.f32 %v5023_v14, %v4736_v6  ;;  %v10258_v16 = vpop.f32.mrb[239].mxu0  ;;  %v5885_v6 = vpack.c.bf16 %v5849_v54, %v5848_v59  ;;  %v13126_v14 = vpack.c.bf16 %v6248_v5, %v6247_v17 }
 0x509   : > { %10472 = vmatmul.mubr.msk.bf16.gmra.mrb[4].mxu1 %vm347_vm1, %v5884_v24  ;;  %v5851_v16 = vld [vmem:[#allocation3 + $0x70] sm:$0xff] }
 0x50a   : > { %10564 = vmatmul.mubr.msk.bf16.gmra.mrb[88].mxu0 %vm347_vm1, %v13106_v39  ;;  %10475 = vmatprep.mubr.msk.bf16.mxu1 %vm11008_vm0, %v14063_v2  ;;  %v6250_v24 = vld [vmem:[#allocation3 + $0x71] sm:$0xff] }
 0x50b   : > { %10567 = vmatprep.mubr.msk.bf16.mxu0 %vm11008_vm0, %v14063_v2 }
 0x50c   : > { %v4741_v38 = vpop.f32.mrb[156].mxu1 }
 0x50d   : > { %v5028_v50 = vpop.f32.mrb[240].mxu0  ;;  %v10169_v7 = vpop.f32.mrb[157].mxu1 }
 0x50e   : > { %v13119_v52 = vadd.f32 %v5028_v50, %v4741_v38  ;;  %v10261_v1 = vpop.f32.mrb[241].mxu0  ;;  %v4744_v61 = vpop.f32.mrb[158].mxu1  ;;  %v5850_v7 = vld [vmem:[#allocation3 + $0x68] sm:$0xff] }
 0x50f   : > { %v5031_v23 = vpop.f32.mrb[242].mxu0  ;;  %v10170_v35 = vpop.f32.mrb[159].mxu1  ;;  %v6249_v1 = vld [vmem:[#allocation3 + $0x69] sm:$0xff]  ;;  %v5886_v17 = vpack.c.bf16 %v5851_v16, %v5850_v7 }
 0x510   : > { %v13124_v3 = vadd.f32 %v5031_v23, %v4744_v61  ;;  %v10262_v21 = vpop.f32.mrb[243].mxu0  ;;  %v10993_v61 = vld [vmem:[%s14055_s4 + $0xf8] sm:$0xff]   ;;  %v13145_v57 = vpack.c.bf16 %v6250_v24, %v6249_v1 }
 0x511   : > { %10476 = vmatmul.mubr.msk.bf16.gmra.mrb[8].mxu1 %vm347_vm1, %v5885_v6  ;;  %10734 = vmatpush3.bf16.msra.mxu0 %v10993_v61  ;;  %v5853_v6 = vld [vmem:[#allocation3 + $0x80] sm:$0xff] }
 0x512   : > { %10568 = vmatmul.mubr.msk.bf16.gmra.mrb[92].mxu0 %vm347_vm1, %v13126_v14  ;;  %10479 = vmatprep.mubr.msk.bf16.mxu1 %vm11008_vm0, %v14063_v2 }
 0x513   : > { %10571 = vmatprep.mubr.msk.bf16.mxu0 %vm11008_vm0, %v14063_v2 }
 0x514   : > { %v4749_v41 = vpop.f32.mrb[160].mxu1 }
 0x515   : > { %v5036_v31 = vpop.f32.mrb[244].mxu0  ;;  %v10173_v38 = vpop.f32.mrb[161].mxu1 }
 0x516   : > { %v13139_v63 = vadd.f32 %v5036_v31, %v4749_v41  ;;  %v10265_v50 = vpop.f32.mrb[245].mxu0  ;;  %v4752_v54 = vpop.f32.mrb[162].mxu1 }
 0x517   : > { %v5039_v5 = vpop.f32.mrb[246].mxu0  ;;  %v10174_v23 = vpop.f32.mrb[163].mxu1  ;;  %v5852_v50 = vld [vmem:[#allocation3 + $0x78] sm:$0xff] }
 0x518   : > { %v10266_v59 = vpop.f32.mrb[247].mxu0  ;;  %v6251_v54 = vld [vmem:[#allocation3 + $0x79] sm:$0xff]  ;;  %v5887_v23 = vpack.c.bf16 %v5853_v6, %v5852_v50 }
 0x519   : > { %10480 = vmatmul.mubr.msk.bf16.gmra.mrb[12].mxu1 %vm347_vm1, %v5886_v17  ;;  %v13158_v59 = vpack.c.bf16 %v6252_v51, %v6251_v54 }
 0x51a   : > { %10572 = vmatmul.mubr.msk.bf16.gmra.mrb[96].mxu0 %vm347_vm1, %v13145_v57  ;;  %10483 = vmatprep.mubr.msk.bf16.mxu1 %vm11008_vm0, %v14063_v2 }
 0x51b   : > { %10575 = vmatprep.mubr.msk.bf16.mxu0 %vm11008_vm0, %v14063_v2 }
 0x51c   : > { %v5234_v35 = vpop.f32.mrb[164].mxu1 }
 0x51d   : > { %v5633_v21 = vpop.f32.mrb[248].mxu0  ;;  %v5400_v41 = vadd.f32 %v5234_v35, %v12828_v37  ;;  %v10277_v31 = vpop.f32.mrb[165].mxu1  ;;  %v5855_v35 = vld [vmem:[#allocation3 + $0x90] sm:$0xff] }
 0x51e   : > { %v10369_v16 = vpop.f32.mrb[249].mxu0  ;;  %v5237_v24 = vpop.f32.mrb[166].mxu1 }
 0x51f   : > { %v5636_v38 = vpop.f32.mrb[250].mxu0  ;;  %v13155_v5 = vadd.f32 %v5633_v21, %v5400_v41  ;;  %v5401_v7 = vadd.f32 %v5237_v24, %v12831_v34  ;;  %v10278_v1 = vpop.f32.mrb[167].mxu1  ;;  %v6254_v21 = vld [vmem:[#allocation3 + $0x91] sm:$0xff]  ;;  %v5854_v24 = vld [vmem:[#allocation3 + $0x88] sm:$0xff] }
 0x520   : > { %v10370_v61 = vpop.f32.mrb[251].mxu0 }
 0x521   : > { %v13160_v17 = vadd.f32 %v5636_v38, %v5401_v7  ;;  %10484 = vmatmul.mubr.msk.bf16.gmra.mrb[16].mxu1 %vm347_vm1, %v5887_v23  ;;  %v6253_v38 = vld [vmem:[#allocation3 + $0x89] sm:$0xff]  ;;  %v5888_v61 = vpack.c.bf16 %v5855_v35, %v5854_v24 }
 0x522   : > { %10576 = vmatmul.mubr.msk.bf16.gmra.mrb[100].mxu0 %vm347_vm1, %v13158_v59  ;;  %10487 = vmatprep.mubr.msk.bf16.mxu1 %vm11008_vm0, %v14063_v2  ;;  %v13173_v23 = vpack.c.bf16 %v6254_v21, %v6253_v38 }
 0x523   : > { %14089 = vst [vmem:[#allocation4_spill] sm:$0xff] %v13160_v17  ;;  %10579 = vmatprep.mubr.msk.bf16.mxu0 %vm11008_vm0, %v14063_v2 }
 0x524   : > { %v5242_v37 = vpop.f32.mrb[168].mxu1 }
 0x525   : > { %v5641_v34 = vpop.f32.mrb[252].mxu0  ;;  %v5402_v6 = vadd.f32 %v5242_v37, %v12913_v56  ;;  %v10281_v51 = vpop.f32.mrb[169].mxu1  ;;  %v5857_v37 = vld [vmem:[#allocation3 + $0xa0] sm:$0xff] }
 0x526   : > { %v10373_v41 = vpop.f32.mrb[253].mxu0  ;;  %v5245_v31 = vpop.f32.mrb[170].mxu1 }
 0x527   : > { %v5644_v16 = vpop.f32.mrb[254].mxu0  ;;  %v13170_v50 = vadd.f32 %v5641_v34, %v5402_v6  ;;  %v5403_v54 = vadd.f32 %v5245_v31, %v12915_v53  ;;  %v10282_v7 = vpop.f32.mrb[171].mxu1  ;;  %v6256_v34 = vld [vmem:[#allocation3 + $0xa1] sm:$0xff]  ;;  %v5856_v31 = vld [vmem:[#allocation3 + $0x98] sm:$0xff] }
 0x528   : > { %v10374_v1 = vpop.f32.mrb[255].mxu0 }
 0x529   : > { %v13175_v17 = vadd.f32 %v5644_v16, %v5403_v54  ;;  %10488 = vmatmul.mubr.msk.bf16.gmra.mrb[20].mxu1 %vm347_vm1, %v5888_v61  ;;  %v6255_v16 = vld [vmem:[#allocation3 + $0x99] sm:$0xff]  ;;  %v5889_v1 = vpack.c.bf16 %v5857_v37, %v5856_v31 }
 0x52a   : > { %10580 = vmatmul.mubr.msk.bf16.gmra.mrb[104].mxu0 %vm347_vm1, %v13173_v23  ;;  %10491 = vmatprep.mubr.msk.bf16.mxu1 %vm11008_vm0, %v14063_v2  ;;  %v13188_v61 = vpack.c.bf16 %v6256_v34, %v6255_v16 }
 0x52b   : > { %14090 = vst [vmem:[#allocation5_spill] sm:$0xff] %v13175_v17  ;;  %10583 = vmatprep.mubr.msk.bf16.mxu0 %vm11008_vm0, %v14063_v2 }
 0x52c   : > { %v5250_v56 = vpop.f32.mrb[172].mxu1 }
 0x52d   : > { %v5649_v53 = vpop.f32.mrb[0].mxu0  ;;  %v5404_v35 = vadd.f32 %v5250_v56, %v12923_v12  ;;  %v10285_v21 = vpop.f32.mrb[173].mxu1  ;;  %v5859_v56 = vld [vmem:[#allocation3 + $0xb0] sm:$0xff] }
 0x52e   : > { %v10377_v6 = vpop.f32.mrb[1].mxu0  ;;  %v5253_v51 = vpop.f32.mrb[174].mxu1 }
 0x52f   : > { %v5652_v41 = vpop.f32.mrb[2].mxu0  ;;  %v13185_v24 = vadd.f32 %v5649_v53, %v5404_v35  ;;  %v5405_v38 = vadd.f32 %v5253_v51, %v12925_v44  ;;  %v10286_v54 = vpop.f32.mrb[175].mxu1  ;;  %v6258_v53 = vld [vmem:[#allocation3 + $0xb1] sm:$0xff]  ;;  %v5858_v51 = vld [vmem:[#allocation3 + $0xa8] sm:$0xff] }
 0x530   : > { %v10378_v7 = vpop.f32.mrb[3].mxu0 }
 0x531   : > { %v13190_v17 = vadd.f32 %v5652_v41, %v5405_v38  ;;  %10492 = vmatmul.mubr.msk.bf16.gmra.mrb[24].mxu1 %vm347_vm1, %v5889_v1  ;;  %v6257_v41 = vld [vmem:[#allocation3 + $0xa9] sm:$0xff]  ;;  %v5890_v7 = vpack.c.bf16 %v5859_v56, %v5858_v51 }
 0x532   : > { %10584 = vmatmul.mubr.msk.bf16.gmra.mrb[108].mxu0 %vm347_vm1, %v13188_v61  ;;  %10495 = vmatprep.mubr.msk.bf16.mxu1 %vm11008_vm0, %v14063_v2  ;;  %v13203_v1 = vpack.c.bf16 %v6258_v53, %v6257_v41 }
 0x533   : > { %14091 = vst [vmem:[#allocation6_spill] sm:$0xff] %v13190_v17  ;;  %10587 = vmatprep.mubr.msk.bf16.mxu0 %vm11008_vm0, %v14063_v2 }
 0x534   : > { %v5258_v12 = vpop.f32.mrb[176].mxu1 }
 0x535   : > { %v5657_v44 = vpop.f32.mrb[4].mxu0  ;;  %v5406_v37 = vadd.f32 %v5258_v12, %v12933_v8  ;;  %v10289_v34 = vpop.f32.mrb[177].mxu1  ;;  %v5861_v12 = vld [vmem:[#allocation3 + $0xc0] sm:$0xff] }
 0x536   : > { %v10381_v35 = vpop.f32.mrb[5].mxu0  ;;  %v5261_v21 = vpop.f32.mrb[178].mxu1 }
 0x537   : > { %v5660_v6 = vpop.f32.mrb[6].mxu0  ;;  %v13200_v31 = vadd.f32 %v5657_v44, %v5406_v37  ;;  %v5407_v16 = vadd.f32 %v5261_v21, %v12935_v33  ;;  %v10290_v38 = vpop.f32.mrb[179].mxu1  ;;  %v6260_v44 = vld [vmem:[#allocation3 + $0xc1] sm:$0xff]  ;;  %v5860_v21 = vld [vmem:[#allocation3 + $0xb8] sm:$0xff] }
 0x538   : > { %v10382_v54 = vpop.f32.mrb[7].mxu0 }
 0x539   : > { %v13205_v17 = vadd.f32 %v5660_v6, %v5407_v16  ;;  %10496 = vmatmul.mubr.msk.bf16.gmra.mrb[28].mxu1 %vm347_vm1, %v5890_v7  ;;  %v6259_v6 = vld [vmem:[#allocation3 + $0xb9] sm:$0xff]  ;;  %v5891_v54 = vpack.c.bf16 %v5861_v12, %v5860_v21 }
 0x53a   : > { %10588 = vmatmul.mubr.msk.bf16.gmra.mrb[112].mxu0 %vm347_vm1, %v13203_v1  ;;  %10499 = vmatprep.mubr.msk.bf16.mxu1 %vm11008_vm0, %v14063_v2  ;;  %v13218_v7 = vpack.c.bf16 %v6260_v44, %v6259_v6 }
 0x53b   : > { %14092 = vst [vmem:[#allocation7_spill] sm:$0xff] %v13205_v17  ;;  %10591 = vmatprep.mubr.msk.bf16.mxu0 %vm11008_vm0, %v14063_v2 }
 0x53c   : > { %v5266_v8 = vpop.f32.mrb[180].mxu1 }
 0x53d   : > { %v5665_v33 = vpop.f32.mrb[8].mxu0  ;;  %v5408_v56 = vadd.f32 %v5266_v8, %v12943_v9  ;;  %v10293_v53 = vpop.f32.mrb[181].mxu1  ;;  %v5863_v8 = vld [vmem:[#allocation3 + $0xd0] sm:$0xff] }
 0x53e   : > { %v10385_v37 = vpop.f32.mrb[9].mxu0  ;;  %v5269_v34 = vpop.f32.mrb[182].mxu1 }
 0x53f   : > { %v5668_v35 = vpop.f32.mrb[10].mxu0  ;;  %v13215_v51 = vadd.f32 %v5665_v33, %v5408_v56  ;;  %v5409_v41 = vadd.f32 %v5269_v34, %v12945_v43  ;;  %v10294_v16 = vpop.f32.mrb[183].mxu1  ;;  %v6262_v33 = vld [vmem:[#allocation3 + $0xd1] sm:$0xff]  ;;  %v5862_v34 = vld [vmem:[#allocation3 + $0xc8] sm:$0xff] }
 0x540   : > { %v10386_v38 = vpop.f32.mrb[11].mxu0 }
 0x541   : > { %v13220_v17 = vadd.f32 %v5668_v35, %v5409_v41  ;;  %10500 = vmatmul.mubr.msk.bf16.gmra.mrb[32].mxu1 %vm347_vm1, %v5891_v54  ;;  %v6261_v35 = vld [vmem:[#allocation3 + $0xc9] sm:$0xff]  ;;  %v5892_v38 = vpack.c.bf16 %v5863_v8, %v5862_v34 }
 0x542   : > { %10592 = vmatmul.mubr.msk.bf16.gmra.mrb[116].mxu0 %vm347_vm1, %v13218_v7  ;;  %10503 = vmatprep.mubr.msk.bf16.mxu1 %vm11008_vm0, %v14063_v2  ;;  %v13233_v54 = vpack.c.bf16 %v6262_v33, %v6261_v35 }
 0x543   : > { %14093 = vst [vmem:[#allocation8_spill] sm:$0xff] %v13220_v17  ;;  %10595 = vmatprep.mubr.msk.bf16.mxu0 %vm11008_vm0, %v14063_v2 }
 0x544   : > { %v5274_v9 = vpop.f32.mrb[184].mxu1 }
 0x545   : > { %v5673_v43 = vpop.f32.mrb[12].mxu0  ;;  %v5410_v12 = vadd.f32 %v5274_v9, %v12953_v10  ;;  %v10297_v44 = vpop.f32.mrb[185].mxu1  ;;  %v5865_v9 = vld [vmem:[#allocation3 + $0xe0] sm:$0xff] }
 0x546   : > { %v10389_v56 = vpop.f32.mrb[13].mxu0  ;;  %v5277_v53 = vpop.f32.mrb[186].mxu1 }
 0x547   : > { %v5676_v37 = vpop.f32.mrb[14].mxu0  ;;  %v13230_v21 = vadd.f32 %v5673_v43, %v5410_v12  ;;  %v5411_v6 = vadd.f32 %v5277_v53, %v12955_v11  ;;  %v10298_v41 = vpop.f32.mrb[187].mxu1  ;;  %v6264_v43 = vld [vmem:[#allocation3 + $0xe1] sm:$0xff]  ;;  %v5864_v53 = vld [vmem:[#allocation3 + $0xd8] sm:$0xff] }
 0x548   : > { %v10390_v16 = vpop.f32.mrb[15].mxu0 }
 0x549   : > { %v13235_v17 = vadd.f32 %v5676_v37, %v5411_v6  ;;  %10504 = vmatmul.mubr.msk.bf16.gmra.mrb[36].mxu1 %vm347_vm1, %v5892_v38  ;;  %v6263_v37 = vld [vmem:[#allocation3 + $0xd9] sm:$0xff]  ;;  %v5893_v16 = vpack.c.bf16 %v5865_v9, %v5864_v53 }
 0x54a   : > { %10596 = vmatmul.mubr.msk.bf16.gmra.mrb[120].mxu0 %vm347_vm1, %v13233_v54  ;;  %10507 = vmatprep.mubr.msk.bf16.mxu1 %vm11008_vm0, %v14063_v2  ;;  %v13248_v38 = vpack.c.bf16 %v6264_v43, %v6263_v37 }
 0x54b   : > { %14094 = vst [vmem:[#allocation9_spill] sm:$0xff] %v13235_v17  ;;  %10599 = vmatprep.mubr.msk.bf16.mxu0 %vm11008_vm0, %v14063_v2 }
 0x54c   : > { %v5282_v10 = vpop.f32.mrb[188].mxu1 }
 0x54d   : > { %v5681_v11 = vpop.f32.mrb[16].mxu0  ;;  %v5412_v8 = vadd.f32 %v5282_v10, %v12963_v25  ;;  %v10301_v33 = vpop.f32.mrb[189].mxu1  ;;  %v5867_v10 = vld [vmem:[#allocation3 + $0xf0] sm:$0xff] }
 0x54e   : > { %v10393_v12 = vpop.f32.mrb[17].mxu0  ;;  %v5285_v44 = vpop.f32.mrb[190].mxu1 }
 0x54f   : > { %v5684_v56 = vpop.f32.mrb[18].mxu0  ;;  %v13245_v34 = vadd.f32 %v5681_v11, %v5412_v8  ;;  %v5413_v35 = vadd.f32 %v5285_v44, %v12965_v30  ;;  %v10302_v6 = vpop.f32.mrb[191].mxu1  ;;  %v6266_v11 = vld [vmem:[#allocation3 + $0xf1] sm:$0xff]  ;;  %v5866_v44 = vld [vmem:[#allocation3 + $0xe8] sm:$0xff] }
 0x550   : > { %v10394_v41 = vpop.f32.mrb[19].mxu0 }
 0x551   : > { %v13250_v17 = vadd.f32 %v5684_v56, %v5413_v35  ;;  %10508 = vmatmul.mubr.msk.bf16.gmra.mrb[40].mxu1 %vm347_vm1, %v5893_v16  ;;  %v6265_v56 = vld [vmem:[#allocation3 + $0xe9] sm:$0xff]  ;;  %v5894_v41 = vpack.c.bf16 %v5867_v10, %v5866_v44 }
 0x552   : > { %10600 = vmatmul.mubr.msk.bf16.gmra.mrb[124].mxu0 %vm347_vm1, %v13248_v38  ;;  %10511 = vmatprep.mubr.msk.bf16.mxu1 %vm11008_vm0, %v14063_v2  ;;  %v13263_v16 = vpack.c.bf16 %v6266_v11, %v6265_v56 }
 0x553   : > { %14095 = vst [vmem:[#allocation10_spill] sm:$0xff] %v13250_v17  ;;  %10603 = vmatprep.mubr.msk.bf16.mxu0 %vm11008_vm0, %v14063_v2 }
 0x554   : > { %v5290_v25 = vpop.f32.mrb[192].mxu1 }
 0x555   : > { %v5689_v30 = vpop.f32.mrb[20].mxu0  ;;  %v5414_v9 = vadd.f32 %v5290_v25, %v12973_v36  ;;  %v10305_v43 = vpop.f32.mrb[193].mxu1  ;;  %v5869_v25 = vld [vmem:[#allocation3 + $0x100] sm:$0xff] }
 0x556   : > { %v10397_v8 = vpop.f32.mrb[21].mxu0  ;;  %v5293_v33 = vpop.f32.mrb[194].mxu1 }
 0x557   : > { %v5692_v12 = vpop.f32.mrb[22].mxu0  ;;  %v13260_v53 = vadd.f32 %v5689_v30, %v5414_v9  ;;  %v5415_v37 = vadd.f32 %v5293_v33, %v12975_v32  ;;  %v10306_v35 = vpop.f32.mrb[195].mxu1  ;;  %v6268_v30 = vld [vmem:[#allocation3 + $0x101] sm:$0xff]  ;;  %v5868_v33 = vld [vmem:[#allocation3 + $0xf8] sm:$0xff] }
 0x558   : > { %v10398_v6 = vpop.f32.mrb[23].mxu0 }
 0x559   : > { %v13265_v17 = vadd.f32 %v5692_v12, %v5415_v37  ;;  %10512 = vmatmul.mubr.msk.bf16.gmra.mrb[44].mxu1 %vm347_vm1, %v5894_v41  ;;  %v6267_v12 = vld [vmem:[#allocation3 + $0xf9] sm:$0xff]  ;;  %v5895_v6 = vpack.c.bf16 %v5869_v25, %v5868_v33 }
 0x55a   : > { %10604 = vmatmul.mubr.msk.bf16.gmra.mrb[128].mxu0 %vm347_vm1, %v13263_v16  ;;  %10515 = vmatprep.mubr.msk.bf16.mxu1 %vm11008_vm0, %v14063_v2  ;;  %v13278_v41 = vpack.c.bf16 %v6268_v30, %v6267_v12 }
 0x55b   : > { %14096 = vst [vmem:[#allocation11_spill] sm:$0xff] %v13265_v17  ;;  %10607 = vmatprep.mubr.msk.bf16.mxu0 %vm11008_vm0, %v14063_v2 }
 0x55c   : > { %v5298_v36 = vpop.f32.mrb[196].mxu1 }
 0x55d   : > { %v5697_v32 = vpop.f32.mrb[24].mxu0  ;;  %v5416_v10 = vadd.f32 %v5298_v36, %v12983_v62  ;;  %v10309_v11 = vpop.f32.mrb[197].mxu1  ;;  %v5871_v36 = vld [vmem:[#allocation3 + $0x110] sm:$0xff] }
 0x55e   : > { %v10401_v9 = vpop.f32.mrb[25].mxu0  ;;  %v5301_v43 = vpop.f32.mrb[198].mxu1 }
 0x55f   : > { %v5700_v8 = vpop.f32.mrb[26].mxu0  ;;  %v13275_v44 = vadd.f32 %v5697_v32, %v5416_v10  ;;  %v5417_v56 = vadd.f32 %v5301_v43, %v12985_v27  ;;  %v10310_v37 = vpop.f32.mrb[199].mxu1  ;;  %v6270_v32 = vld [vmem:[#allocation3 + $0x111] sm:$0xff]  ;;  %v5870_v43 = vld [vmem:[#allocation3 + $0x108] sm:$0xff] }
 0x560   : > { %v10402_v35 = vpop.f32.mrb[27].mxu0 }
 0x561   : > { %v13280_v17 = vadd.f32 %v5700_v8, %v5417_v56  ;;  %10516 = vmatmul.mubr.msk.bf16.gmra.mrb[48].mxu1 %vm347_vm1, %v5895_v6  ;;  %v6269_v8 = vld [vmem:[#allocation3 + $0x109] sm:$0xff]  ;;  %v5896_v35 = vpack.c.bf16 %v5871_v36, %v5870_v43 }
 0x562   : > { %10608 = vmatmul.mubr.msk.bf16.gmra.mrb[132].mxu0 %vm347_vm1, %v13278_v41  ;;  %10519 = vmatprep.mubr.msk.bf16.mxu1 %vm11008_vm0, %v14063_v2  ;;  %v13293_v6 = vpack.c.bf16 %v6270_v32, %v6269_v8 }
 0x563   : > { %14097 = vst [vmem:[#allocation12_spill] sm:$0xff] %v13280_v17  ;;  %10611 = vmatprep.mubr.msk.bf16.mxu0 %vm11008_vm0, %v14063_v2 }
 0x564   : > { %v5306_v62 = vpop.f32.mrb[200].mxu1 }
 0x565   : > { %v5705_v27 = vpop.f32.mrb[28].mxu0  ;;  %v5418_v25 = vadd.f32 %v5306_v62, %v12993_v4  ;;  %v10313_v30 = vpop.f32.mrb[201].mxu1  ;;  %v5873_v62 = vld [vmem:[#allocation3 + $0x120] sm:$0xff] }
 0x566   : > { %v10405_v10 = vpop.f32.mrb[29].mxu0  ;;  %v5309_v11 = vpop.f32.mrb[202].mxu1 }
 0x567   : > { %v5708_v9 = vpop.f32.mrb[30].mxu0  ;;  %v13290_v33 = vadd.f32 %v5705_v27, %v5418_v25  ;;  %v5419_v12 = vadd.f32 %v5309_v11, %v12995_v46  ;;  %v10314_v56 = vpop.f32.mrb[203].mxu1  ;;  %v6272_v27 = vld [vmem:[#allocation3 + $0x121] sm:$0xff]  ;;  %v5872_v11 = vld [vmem:[#allocation3 + $0x118] sm:$0xff] }
 0x568   : > { %v10406_v37 = vpop.f32.mrb[31].mxu0 }
 0x569   : > { %v13295_v17 = vadd.f32 %v5708_v9, %v5419_v12  ;;  %10520 = vmatmul.mubr.msk.bf16.gmra.mrb[52].mxu1 %vm347_vm1, %v5896_v35  ;;  %v6271_v9 = vld [vmem:[#allocation3 + $0x119] sm:$0xff]  ;;  %v5897_v37 = vpack.c.bf16 %v5873_v62, %v5872_v11 }
 0x56a   : > { %10612 = vmatmul.mubr.msk.bf16.gmra.mrb[136].mxu0 %vm347_vm1, %v13293_v6  ;;  %10523 = vmatprep.mubr.msk.bf16.mxu1 %vm11008_vm0, %v14063_v2  ;;  %v13308_v35 = vpack.c.bf16 %v6272_v27, %v6271_v9 }
 0x56b   : > { %14098 = vst [vmem:[#allocation13_spill] sm:$0xff] %v13295_v17  ;;  %10615 = vmatprep.mubr.msk.bf16.mxu0 %vm11008_vm0, %v14063_v2 }
 0x56c   : > { %v5314_v4 = vpop.f32.mrb[204].mxu1 }
 0x56d   : > { %v5713_v46 = vpop.f32.mrb[32].mxu0  ;;  %v5420_v36 = vadd.f32 %v5314_v4, %v13003_v28  ;;  %v10317_v32 = vpop.f32.mrb[205].mxu1  ;;  %v5875_v4 = vld [vmem:[#allocation3 + $0x130] sm:$0xff] }
 0x56e   : > { %v10409_v25 = vpop.f32.mrb[33].mxu0  ;;  %v5317_v30 = vpop.f32.mrb[206].mxu1 }
 0x56f   : > { %v5716_v10 = vpop.f32.mrb[34].mxu0  ;;  %v13305_v43 = vadd.f32 %v5713_v46, %v5420_v36  ;;  %v5421_v8 = vadd.f32 %v5317_v30, %v13005_v18  ;;  %v10318_v12 = vpop.f32.mrb[207].mxu1  ;;  %v6274_v46 = vld [vmem:[#allocation3 + $0x131] sm:$0xff]  ;;  %v5874_v30 = vld [vmem:[#allocation3 + $0x128] sm:$0xff] }
 0x570   : > { %v10410_v56 = vpop.f32.mrb[35].mxu0 }
 0x571   : > { %v13310_v17 = vadd.f32 %v5716_v10, %v5421_v8  ;;  %10524 = vmatmul.mubr.msk.bf16.gmra.mrb[56].mxu1 %vm347_vm1, %v5897_v37  ;;  %v6273_v10 = vld [vmem:[#allocation3 + $0x129] sm:$0xff]  ;;  %v5898_v56 = vpack.c.bf16 %v5875_v4, %v5874_v30 }
 0x572   : > { %10616 = vmatmul.mubr.msk.bf16.gmra.mrb[140].mxu0 %vm347_vm1, %v13308_v35  ;;  %10527 = vmatprep.mubr.msk.bf16.mxu1 %vm11008_vm0, %v14063_v2  ;;  %v13323_v37 = vpack.c.bf16 %v6274_v46, %v6273_v10 }
 0x573   : > { %14099 = vst [vmem:[#allocation14_spill] sm:$0xff] %v13310_v17  ;;  %10619 = vmatprep.mubr.msk.bf16.mxu0 %vm11008_vm0, %v14063_v2 }
 0x574   : > { %v5322_v28 = vpop.f32.mrb[208].mxu1 }
 0x575   : > { %v5721_v18 = vpop.f32.mrb[36].mxu0  ;;  %v5422_v62 = vadd.f32 %v5322_v28, %v13013_v58  ;;  %v10321_v27 = vpop.f32.mrb[209].mxu1  ;;  %v5877_v28 = vld [vmem:[#allocation3 + $0x140] sm:$0xff] }
 0x576   : > { %v10413_v36 = vpop.f32.mrb[37].mxu0  ;;  %v5325_v32 = vpop.f32.mrb[210].mxu1 }
 0x577   : > { %v5724_v25 = vpop.f32.mrb[38].mxu0  ;;  %v13320_v11 = vadd.f32 %v5721_v18, %v5422_v62  ;;  %v5423_v9 = vadd.f32 %v5325_v32, %v13015_v40  ;;  %v10322_v8 = vpop.f32.mrb[211].mxu1  ;;  %v6276_v18 = vld [vmem:[#allocation3 + $0x141] sm:$0xff]  ;;  %v5876_v32 = vld [vmem:[#allocation3 + $0x138] sm:$0xff] }
 0x578   : > { %v10414_v12 = vpop.f32.mrb[39].mxu0 }
 0x579   : > { %v13325_v17 = vadd.f32 %v5724_v25, %v5423_v9  ;;  %10528 = vmatmul.mubr.msk.bf16.gmra.mrb[60].mxu1 %vm347_vm1, %v5898_v56  ;;  %v6275_v25 = vld [vmem:[#allocation3 + $0x139] sm:$0xff]  ;;  %v5899_v12 = vpack.c.bf16 %v5877_v28, %v5876_v32 }
 0x57a   : > { %10620 = vmatmul.mubr.msk.bf16.gmra.mrb[144].mxu0 %vm347_vm1, %v13323_v37  ;;  %10531 = vmatprep.mubr.msk.bf16.mxu1 %vm11008_vm0, %v14063_v2  ;;  %v13338_v56 = vpack.c.bf16 %v6276_v18, %v6275_v25 }
 0x57b   : > { %14100 = vst [vmem:[#allocation15_spill] sm:$0xff] %v13325_v17  ;;  %10623 = vmatprep.mubr.msk.bf16.mxu0 %vm11008_vm0, %v14063_v2 }
 0x57c   : > { %v5330_v58 = vpop.f32.mrb[212].mxu1 }
 0x57d   : > { %v5729_v40 = vpop.f32.mrb[40].mxu0  ;;  %v5424_v4 = vadd.f32 %v5330_v58, %v13023_v45  ;;  %v10325_v46 = vpop.f32.mrb[213].mxu1  ;;  %v5879_v58 = vld [vmem:[#allocation3 + $0x150] sm:$0xff] }
 0x57e   : > { %v10417_v62 = vpop.f32.mrb[41].mxu0  ;;  %v5333_v27 = vpop.f32.mrb[214].mxu1 }
 0x57f   : > { %v5732_v36 = vpop.f32.mrb[42].mxu0  ;;  %v13335_v30 = vadd.f32 %v5729_v40, %v5424_v4  ;;  %v5425_v10 = vadd.f32 %v5333_v27, %v13025_v15  ;;  %v10326_v9 = vpop.f32.mrb[215].mxu1  ;;  %v6278_v40 = vld [vmem:[#allocation3 + $0x151] sm:$0xff]  ;;  %v5878_v27 = vld [vmem:[#allocation3 + $0x148] sm:$0xff] }
 0x580   : > { %v10418_v8 = vpop.f32.mrb[43].mxu0 }
 0x581   : > { %v13340_v17 = vadd.f32 %v5732_v36, %v5425_v10  ;;  %10532 = vmatmul.mubr.msk.bf16.gmra.mrb[64].mxu1 %vm347_vm1, %v5899_v12  ;;  %v6277_v36 = vld [vmem:[#allocation3 + $0x149] sm:$0xff]  ;;  %v5900_v8 = vpack.c.bf16 %v5879_v58, %v5878_v27 }
 0x582   : > { %10624 = vmatmul.mubr.msk.bf16.gmra.mrb[148].mxu0 %vm347_vm1, %v13338_v56  ;;  %10535 = vmatprep.mubr.msk.bf16.mxu1 %vm11008_vm0, %v14063_v2  ;;  %v13353_v12 = vpack.c.bf16 %v6278_v40, %v6277_v36 }
 0x583   : > { %14101 = vst [vmem:[#allocation16_spill] sm:$0xff] %v13340_v17  ;;  %10627 = vmatprep.mubr.msk.bf16.mxu0 %vm11008_vm0, %v14063_v2 }
 0x584   : > { %v5338_v45 = vpop.f32.mrb[216].mxu1 }
 0x585   : > { %v5737_v15 = vpop.f32.mrb[44].mxu0  ;;  %v5426_v28 = vadd.f32 %v5338_v45, %v13033_v26  ;;  %v10329_v18 = vpop.f32.mrb[217].mxu1  ;;  %v5880_v45 = vld [vmem:[#allocation3 + $0x158] sm:$0xf] }
 0x586   : > { %v10421_v4 = vpop.f32.mrb[45].mxu0  ;;  %v5341_v46 = vpop.f32.mrb[218].mxu1 }
 0x587   : > { %v5740_v62 = vpop.f32.mrb[46].mxu0  ;;  %v13350_v32 = vadd.f32 %v5737_v15, %v5426_v28  ;;  %v5427_v25 = vadd.f32 %v5341_v46, %v13035_v22  ;;  %v10330_v10 = vpop.f32.mrb[219].mxu1  ;;  %v6279_v15 = vld [vmem:[#allocation3 + $0x159] sm:$0xf] }
 0x588   : > { %v10422_v9 = vpop.f32.mrb[47].mxu0  ;;  %v6300_v10 = vpack.c.bf16 %v6279_v15, %v6279_v15 }
 0x589   : > { %v13355_v17 = vadd.f32 %v5740_v62, %v5427_v25  ;;  %10536 = vmatmul.mubr.msk.bf16.gmra.mrb[68].mxu1 %vm347_vm1, %v5900_v8  ;;  %v5901_v25 = vpack.c.bf16 %v5880_v45, %v5880_v45  ;;  %v7038_v8 = vld [vmem:[#allocation3 + $0x32] sm:$0xff] }
 0x58a   : > { %10628 = vmatmul.mubr.msk.bf16.gmra.mrb[152].mxu0 %vm347_vm1, %v13353_v12  ;;  %10539 = vmatprep.mubr.msk.bf16.mxu1 %vm11008_vm0, %v14063_v2 }
 0x58b   : > { %10631 = vmatprep.mubr.msk.bf16.mxu0 %vm11008_vm0, %v14063_v2 }
 0x58c   : > { %v5346_v26 = vpop.f32.mrb[220].mxu1 }
 0x58d   : > { %v5745_v22 = vpop.f32.mrb[48].mxu0  ;;  %v5428_v58 = vadd.f32 %v5346_v26, %v13043_v13  ;;  %v10333_v40 = vpop.f32.mrb[221].mxu1  ;;  %v6639_v13 = vld [vmem:[#allocation3 + $0x31] sm:$0xff] }
 0x58e   : > { %v10425_v28 = vpop.f32.mrb[49].mxu0  ;;  %v5349_v18 = vpop.f32.mrb[222].mxu1  ;;  %v7037_v40 = vld [vmem:[#allocation3 + $0x2a] sm:$0xff] }
 0x58f   : > { %v5748_v4 = vpop.f32.mrb[50].mxu0  ;;  %v13365_v46 = vadd.f32 %v5745_v22, %v5428_v58  ;;  %v5429_v62 = vadd.f32 %v5349_v18, %v13045_v48  ;;  %v10334_v27 = vpop.f32.mrb[223].mxu1  ;;  %v6638_v58 = vld [vmem:[#allocation3 + $0x29] sm:$0xff] }
 0x590   : > { %v10426_v36 = vpop.f32.mrb[51].mxu0  ;;  %v7078_v27 = vpack.c.bf16 %v7038_v8, %v7037_v40 }
 0x591   : > { %14102 = vst [vmem:[#allocation17_spill] sm:$0xff] %v13365_v46  ;;  %v13368_v9 = vadd.f32 %v5748_v4, %v5429_v62  ;;  %10540 = vmatmul.mubr.msk.bf16.gmra.mrb[72].mxu1 %vm347_vm1, %v5901_v25  ;;  %v10994_v4 = vld [vmem:[%s14055_s4 + $0x100] sm:$0xff]   ;;  %v6679_v62 = vpack.c.bf16 %v6639_v13, %v6638_v58 }
 0x592   : > { %10632 = vmatmul.mubr.msk.bf16.gmra.mrb[156].mxu0 %vm347_vm1, %v6300_v10  ;;  %10643 = vmatprep.mubr.msk.bf16.mxu1 %vm11008_vm0, %v14063_v2  ;;  %v7040_v13 = vld [vmem:[#allocation3 + $0x42] sm:$0xff] }
 0x593   : > { %14103 = vst [vmem:[#allocation18_spill] sm:$0xff] %v13368_v9  ;;  %10735 = vmatprep.mubr.msk.bf16.mxu0 %vm11008_vm0, %v14063_v2 }
 0x594   : > { %v5354_v26 = vpop.f32.mrb[224].mxu1 }
 0x595   : > { %v5753_v48 = vpop.f32.mrb[52].mxu0  ;;  %v5430_v22 = vadd.f32 %v5354_v26, %v13053_v47  ;;  %v10337_v45 = vpop.f32.mrb[225].mxu1  ;;  %v10995_v47 = vld [vmem:[%s14055_s4 + $0x108] sm:$0xff]  }
 0x596   : > { %v10429_v15 = vpop.f32.mrb[53].mxu0  ;;  %v5357_v28 = vpop.f32.mrb[226].mxu1 }
 0x597   : > { %v5756_v18 = vpop.f32.mrb[54].mxu0  ;;  %v13380_v36 = vadd.f32 %v5753_v48, %v5430_v22  ;;  %v5431_v25 = vadd.f32 %v5357_v28, %v13058_v55  ;;  %v10338_v10 = vpop.f32.mrb[227].mxu1  ;;  %v7039_v15 = vld [vmem:[#allocation3 + $0x3a] sm:$0xff] }
 0x598   : > { %v10430_v9 = vpop.f32.mrb[55].mxu0  ;;  %v7042_v10 = vld [vmem:[#allocation3 + $0x52] sm:$0xff] }
 0x599   : > { %v13383_v46 = vadd.f32 %v5756_v18, %v5431_v25  ;;  %10644 = vmatmul.mubr.msk.bf16.vlgmr.msra.gmra.mrb[76].mxu1 %vm347_vm1, %v6679_v62  ;;  %v10996_v62 = vld [vmem:[%s14055_s4 + $0x110] sm:$0xff]  }
 0x59a   : > { %10736 = vmatmul.mubr.msk.bf16.vlgmr.msra.gmra.mrb[160].mxu0 %vm347_vm1, %v7078_v27  ;;  %10820 = vmatpush3.bf16.msra.mxu1 %v10994_v4  ;;  %v7079_v4 = vpack.c.bf16 %v7040_v13, %v7039_v15 }
 0x59b   : > { %10647 = vmatprep.mubr.msk.bf16.mxu1 %vm11008_vm0, %v14063_v2  ;;  %10739 = vmatprep.mubr.msk.bf16.mxu0 %vm11008_vm0, %v14063_v2 }
 0x59c   : > { %10821 = vmatprep.subr.bf16.mxu1 %v14063_v2  ;;  %v5362_v55 = vpop.f32.mrb[228].mxu1 }
 0x59d   : > { %v5761_v9 = vpop.f32.mrb[56].mxu0  ;;  %v5432_v8 = vadd.f32 %v5362_v55, %v13070_v49  ;;  %v10341_v26 = vpop.f32.mrb[229].mxu1 }
 0x59e   : > { %v10433_v48 = vpop.f32.mrb[57].mxu0  ;;  %v5365_v22 = vpop.f32.mrb[230].mxu1  ;;  %10822 = vmatpush3.bf16.msra.mxu1 %v10995_v47 }
 0x59f   : > { %v5764_v45 = vpop.f32.mrb[58].mxu0  ;;  %v13396_v58 = vadd.f32 %v5761_v9, %v5432_v8  ;;  %v5433_v40 = vadd.f32 %v5365_v22, %v13072_v19  ;;  %v10342_v28 = vpop.f32.mrb[231].mxu1  ;;  %10823 = vmatprep.subr.bf16.mxu1 %v14063_v2  ;;  %v10997_v19 = vld [vmem:[%s14055_s4 + $0x118] sm:$0xff]   ;;  %v7041_v8 = vld [vmem:[#allocation3 + $0x4a] sm:$0xff] }
 0x5a0   : > { %v10434_v18 = vpop.f32.mrb[59].mxu0  ;;  %v7080_v15 = vpack.c.bf16 %v7042_v10, %v7041_v8  ;;  %v7046_v8 = vld [vmem:[#allocation3 + $0x72] sm:$0xff] }
 0x5a1   : > { %v13403_v49 = vadd.f32 %v5764_v45, %v5433_v40  ;;  %10648 = vmatmul.mubr.msk.bf16.gmra.mrb[80].mxu1 %vm347_vm1, %v13092_v42 }
 0x5a2   : > { %10740 = vmatmul.mubr.msk.bf16.gmra.mrb[164].mxu0 %vm347_vm1, %v7079_v4  ;;  %10651 = vmatprep.mubr.msk.bf16.mxu1 %vm11008_vm0, %v14063_v2 }
 0x5a3   : > { %10743 = vmatprep.mubr.msk.bf16.mxu0 %vm11008_vm0, %v14063_v2  ;;  %10824 = vmatpush3.bf16.msra.mxu1 %v10996_v62 }
 0x5a4   : > { %v5370_v27 = vpop.f32.mrb[232].mxu1  ;;  %10825 = vmatprep.subr.bf16.mxu1 %v14063_v2 }
 0x5a5   : > { %v5769_v25 = vpop.f32.mrb[60].mxu0  ;;  %v5434_v42 = vadd.f32 %v5370_v27, %v13088_v0  ;;  %v10345_v47 = vpop.f32.mrb[233].mxu1 }
 0x5a6   : > { %v10437_v55 = vpop.f32.mrb[61].mxu0  ;;  %v5373_v9 = vpop.f32.mrb[234].mxu1 }
 0x5a7   : > { %v5772_v13 = vpop.f32.mrb[62].mxu0  ;;  %v13417_v26 = vadd.f32 %v5769_v25, %v5434_v42  ;;  %v5435_v48 = vadd.f32 %v5373_v9, %v13090_v20  ;;  %v10346_v22 = vpop.f32.mrb[235].mxu1  ;;  %10826 = vmatpush3.bf16.msra.mxu1 %v10997_v19  ;;  %v7044_v20 = vld [vmem:[#allocation3 + $0x62] sm:$0xff]  ;;  %v7043_v25 = vld [vmem:[#allocation3 + $0x5a] sm:$0xff] }
 0x5a8   : > { %v10438_v45 = vpop.f32.mrb[63].mxu0  ;;  %v7081_v55 = vpack.c.bf16 %v7044_v20, %v7043_v25 }
 0x5a9   : > { %v13420_v40 = vadd.f32 %v5772_v13, %v5435_v48  ;;  %10652 = vmatmul.mubr.msk.bf16.gmra.mrb[84].mxu1 %vm347_vm1, %v13106_v39 }
 0x5aa   : > { %10744 = vmatmul.mubr.msk.bf16.gmra.mrb[168].mxu0 %vm347_vm1, %v7080_v15  ;;  %10655 = vmatprep.mubr.msk.bf16.mxu1 %vm11008_vm0, %v14063_v2 }
 0x5ab   : > { %10747 = vmatprep.mubr.msk.bf16.mxu0 %vm11008_vm0, %v14063_v2 }
 0x5ac   : > { %v5378_v0 = vpop.f32.mrb[236].mxu1 }
 0x5ad   : > { %v5777_v28 = vpop.f32.mrb[64].mxu0  ;;  %v5436_v18 = vadd.f32 %v5378_v0, %v13102_v60  ;;  %v10349_v4 = vpop.f32.mrb[237].mxu1  ;;  %v7045_v0 = vld [vmem:[#allocation3 + $0x6a] sm:$0xff] }
 0x5ae   : > { %v10441_v62 = vpop.f32.mrb[65].mxu0  ;;  %v5381_v19 = vpop.f32.mrb[238].mxu1  ;;  %v7082_v4 = vpack.c.bf16 %v7046_v8, %v7045_v0 }
 0x5af   : > { %v5780_v27 = vpop.f32.mrb[66].mxu0  ;;  %v13430_v10 = vadd.f32 %v5777_v28, %v5436_v18  ;;  %v5437_v39 = vadd.f32 %v5381_v19, %v13104_v29  ;;  %v10350_v42 = vpop.f32.mrb[239].mxu1 }
 0x5b0   : > { %v10442_v47 = vpop.f32.mrb[67].mxu0 }
 0x5b1   : > { %v13433_v9 = vadd.f32 %v5780_v27, %v5437_v39  ;;  %10656 = vmatmul.mubr.msk.bf16.gmra.mrb[88].mxu1 %vm347_vm1, %v13126_v14  ;;  %v7048_v27 = vld [vmem:[#allocation3 + $0x82] sm:$0xff] }
 0x5b2   : > { %10748 = vmatmul.mubr.msk.bf16.gmra.mrb[172].mxu0 %vm347_vm1, %v7081_v55  ;;  %10659 = vmatprep.mubr.msk.bf16.mxu1 %vm11008_vm0, %v14063_v2  ;;  %v7047_v55 = vld [vmem:[#allocation3 + $0x7a] sm:$0xff] }
 0x5b3   : > { %10751 = vmatprep.mubr.msk.bf16.mxu0 %vm11008_vm0, %v14063_v2  ;;  %v7083_v8 = vpack.c.bf16 %v7048_v27, %v7047_v55 }
 0x5b4   : > { %v5386_v60 = vpop.f32.mrb[240].mxu1 }
 0x5b5   : > { %v5785_v13 = vpop.f32.mrb[68].mxu0  ;;  %v5438_v29 = vadd.f32 %v5386_v60, %v13119_v52  ;;  %v10353_v48 = vpop.f32.mrb[241].mxu1 }
 0x5b6   : > { %v10445_v22 = vpop.f32.mrb[69].mxu0  ;;  %v5389_v45 = vpop.f32.mrb[242].mxu1  ;;  %v7050_v48 = vld [vmem:[#allocation3 + $0x92] sm:$0xff] }
 0x5b7   : > { %v5788_v15 = vpop.f32.mrb[70].mxu0  ;;  %v13443_v28 = vadd.f32 %v5785_v13, %v5438_v29  ;;  %v5439_v14 = vadd.f32 %v5389_v45, %v13124_v3  ;;  %v10354_v20 = vpop.f32.mrb[243].mxu1 }
 0x5b8   : > { %v10446_v18 = vpop.f32.mrb[71].mxu0  ;;  %v7049_v20 = vld [vmem:[#allocation3 + $0x8a] sm:$0xff] }
 0x5b9   : > { %v13446_v62 = vadd.f32 %v5788_v15, %v5439_v14  ;;  %10660 = vmatmul.mubr.msk.bf16.gmra.mrb[92].mxu1 %vm347_vm1, %v13145_v57  ;;  %v7084_v27 = vpack.c.bf16 %v7050_v48, %v7049_v20 }
 0x5ba   : > { %10752 = vmatmul.mubr.msk.bf16.gmra.mrb[176].mxu0 %vm347_vm1, %v7082_v4  ;;  %10663 = vmatprep.mubr.msk.bf16.mxu1 %vm11008_vm0, %v14063_v2 }
 0x5bb   : > { %10755 = vmatprep.mubr.msk.bf16.mxu0 %vm11008_vm0, %v14063_v2 }
 0x5bc   : > { %v5394_v52 = vpop.f32.mrb[244].mxu1 }
 0x5bd   : > { %v5793_v19 = vpop.f32.mrb[72].mxu0  ;;  %v5440_v3 = vadd.f32 %v5394_v52, %v13139_v63  ;;  %v10357_v25 = vpop.f32.mrb[245].mxu1 }
 0x5be   : > { %v10449_v39 = vpop.f32.mrb[73].mxu0  ;;  %v5397_v42 = vpop.f32.mrb[246].mxu1 }
 0x5bf   : > { %v5796_v47 = vpop.f32.mrb[74].mxu0  ;;  %v13456_v60 = vadd.f32 %v5793_v19, %v5440_v3  ;;  %v10358_v57 = vpop.f32.mrb[247].mxu1  ;;  %v7052_v39 = vld [vmem:[#allocation3 + $0xa2] sm:$0xff] }
 0x5c0   : > { %v10450_v13 = vpop.f32.mrb[75].mxu0 }
 0x5c1   : > { %10664 = vmatmul.mubr.msk.bf16.gmra.mrb[96].mxu1 %vm347_vm1, %v13158_v59  ;;  %v14104_v59 = vld [vmem:[#allocation4_spill] sm:$0xff] }
 0x5c2   : > { %10756 = vmatmul.mubr.msk.bf16.gmra.mrb[180].mxu0 %vm347_vm1, %v7083_v8  ;;  %10667 = vmatprep.mubr.msk.bf16.mxu1 %vm11008_vm0, %v14063_v2  ;;  %v7051_v8 = vld [vmem:[#allocation3 + $0x9a] sm:$0xff] }
 0x5c3   : > { %10759 = vmatprep.mubr.msk.bf16.mxu0 %vm11008_vm0, %v14063_v2 }
 0x5c4   : > { %v6032_v63 = vpop.f32.mrb[248].mxu1 }
 0x5c5   : > { %v6431_v29 = vpop.f32.mrb[76].mxu0  ;;  %v6198_v22 = vadd.f32 %v6032_v63, %v13155_v5  ;;  %v10461_v45 = vpop.f32.mrb[249].mxu1 }
 0x5c6   : > { %v10553_v15 = vpop.f32.mrb[77].mxu0  ;;  %v6035_v0 = vpop.f32.mrb[250].mxu1  ;;  %v7085_v45 = vpack.c.bf16 %v7052_v39, %v7051_v8 }
 0x5c7   : > { %v6434_v14 = vpop.f32.mrb[78].mxu0  ;;  %v13466_v18 = vadd.f32 %v6431_v29, %v6198_v22  ;;  %v6199_v4 = vadd.f32 %v6035_v0, %v14104_v59  ;;  %v10462_v52 = vpop.f32.mrb[251].mxu1 }
 0x5c8   : > { %v10554_v19 = vpop.f32.mrb[79].mxu0 }
 0x5c9   : > { %v13469_v3 = vadd.f32 %v6434_v14, %v6199_v4  ;;  %10668 = vmatmul.mubr.msk.bf16.gmra.mrb[100].mxu1 %vm347_vm1, %v13173_v23  ;;  %v14105_v23 = vld [vmem:[#allocation5_spill] sm:$0xff]  ;;  %v7054_v14 = vld [vmem:[#allocation3 + $0xb2] sm:$0xff] }
 0x5ca   : > { %10760 = vmatmul.mubr.msk.bf16.gmra.mrb[184].mxu0 %vm347_vm1, %v7084_v27  ;;  %10671 = vmatprep.mubr.msk.bf16.mxu1 %vm11008_vm0, %v14063_v2  ;;  %v7053_v27 = vld [vmem:[#allocation3 + $0xaa] sm:$0xff] }
 0x5cb   : > { %10763 = vmatprep.mubr.msk.bf16.mxu0 %vm11008_vm0, %v14063_v2 }
 0x5cc   : > { %v6040_v5 = vpop.f32.mrb[252].mxu1 }
 0x5cd   : > { %v6439_v25 = vpop.f32.mrb[80].mxu0  ;;  %v6200_v42 = vadd.f32 %v6040_v5, %v13170_v50  ;;  %v10465_v47 = vpop.f32.mrb[253].mxu1 }
 0x5ce   : > { %v10557_v55 = vpop.f32.mrb[81].mxu0  ;;  %v6043_v57 = vpop.f32.mrb[254].mxu1  ;;  %v7086_v47 = vpack.c.bf16 %v7054_v14, %v7053_v27 }
 0x5cf   : > { %v6442_v13 = vpop.f32.mrb[82].mxu0  ;;  %v13479_v63 = vadd.f32 %v6439_v25, %v6200_v42  ;;  %v6201_v29 = vadd.f32 %v6043_v57, %v14105_v23  ;;  %v10466_v48 = vpop.f32.mrb[255].mxu1 }
 0x5d0   : > { %v10558_v22 = vpop.f32.mrb[83].mxu0 }
 0x5d1   : > { %v13482_v15 = vadd.f32 %v6442_v13, %v6201_v29  ;;  %10672 = vmatmul.mubr.msk.bf16.gmra.mrb[104].mxu1 %vm347_vm1, %v13188_v61  ;;  %v14106_v61 = vld [vmem:[#allocation6_spill] sm:$0xff] }
 0x5d2   : > { %10764 = vmatmul.mubr.msk.bf16.gmra.mrb[188].mxu0 %vm347_vm1, %v7085_v45  ;;  %10675 = vmatprep.mubr.msk.bf16.mxu1 %vm11008_vm0, %v14063_v2  ;;  %v7056_v13 = vld [vmem:[#allocation3 + $0xc2] sm:$0xff]  ;;  %v7055_v45 = vld [vmem:[#allocation3 + $0xba] sm:$0xff] }
 0x5d3   : > { %10767 = vmatprep.mubr.msk.bf16.mxu0 %vm11008_vm0, %v14063_v2 }
 0x5d4   : > { %v6048_v50 = vpop.f32.mrb[0].mxu1 }
 0x5d5   : > { %v6447_v0 = vpop.f32.mrb[84].mxu0  ;;  %v6202_v20 = vadd.f32 %v6048_v50, %v13185_v24  ;;  %v10469_v59 = vpop.f32.mrb[1].mxu1 }
 0x5d6   : > { %v10561_v4 = vpop.f32.mrb[85].mxu0  ;;  %v6051_v52 = vpop.f32.mrb[2].mxu1  ;;  %v7087_v59 = vpack.c.bf16 %v7056_v13, %v7055_v45 }
 0x5d7   : > { %v6450_v19 = vpop.f32.mrb[86].mxu0  ;;  %v13492_v5 = vadd.f32 %v6447_v0, %v6202_v20  ;;  %v6203_v25 = vadd.f32 %v6051_v52, %v14106_v61  ;;  %v10470_v39 = vpop.f32.mrb[3].mxu1 }
 0x5d8   : > { %v10562_v42 = vpop.f32.mrb[87].mxu0 }
 0x5d9   : > { %v13495_v55 = vadd.f32 %v6450_v19, %v6203_v25  ;;  %10676 = vmatmul.mubr.msk.bf16.gmra.mrb[108].mxu1 %vm347_vm1, %v13203_v1  ;;  %v14107_v1 = vld [vmem:[#allocation7_spill] sm:$0xff] }
 0x5da   : > { %10768 = vmatmul.mubr.msk.bf16.gmra.mrb[192].mxu0 %vm347_vm1, %v7086_v47  ;;  %10679 = vmatprep.mubr.msk.bf16.mxu1 %vm11008_vm0, %v14063_v2  ;;  %v7058_v19 = vld [vmem:[#allocation3 + $0xd2] sm:$0xff]  ;;  %v7057_v47 = vld [vmem:[#allocation3 + $0xca] sm:$0xff] }
 0x5db   : > { %10771 = vmatprep.mubr.msk.bf16.mxu0 %vm11008_vm0, %v14063_v2 }
 0x5dc   : > { %v6056_v24 = vpop.f32.mrb[4].mxu1 }
 0x5dd   : > { %v6455_v57 = vpop.f32.mrb[88].mxu0  ;;  %v6204_v8 = vadd.f32 %v6056_v24, %v13200_v31  ;;  %v10473_v23 = vpop.f32.mrb[5].mxu1 }
 0x5de   : > { %v10565_v29 = vpop.f32.mrb[89].mxu0  ;;  %v6059_v48 = vpop.f32.mrb[6].mxu1  ;;  %v7088_v23 = vpack.c.bf16 %v7058_v19, %v7057_v47 }
 0x5df   : > { %v6458_v22 = vpop.f32.mrb[90].mxu0  ;;  %v13505_v50 = vadd.f32 %v6455_v57, %v6204_v8  ;;  %v6205_v0 = vadd.f32 %v6059_v48, %v14107_v1  ;;  %v10474_v14 = vpop.f32.mrb[7].mxu1 }
 0x5e0   : > { %v10566_v20 = vpop.f32.mrb[91].mxu0 }
 0x5e1   : > { %v13508_v4 = vadd.f32 %v6458_v22, %v6205_v0  ;;  %10680 = vmatmul.mubr.msk.bf16.gmra.mrb[112].mxu1 %vm347_vm1, %v13218_v7  ;;  %v14108_v7 = vld [vmem:[#allocation8_spill] sm:$0xff]  ;;  %v7060_v22 = vld [vmem:[#allocation3 + $0xe2] sm:$0xff] }
 0x5e2   : > { %10772 = vmatmul.mubr.msk.bf16.gmra.mrb[196].mxu0 %vm347_vm1, %v7087_v59  ;;  %10683 = vmatprep.mubr.msk.bf16.mxu1 %vm11008_vm0, %v14063_v2  ;;  %v7059_v59 = vld [vmem:[#allocation3 + $0xda] sm:$0xff] }
 0x5e3   : > { %10775 = vmatprep.mubr.msk.bf16.mxu0 %vm11008_vm0, %v14063_v2 }
 0x5e4   : > { %v6064_v31 = vpop.f32.mrb[8].mxu1 }
 0x5e5   : > { %v6463_v52 = vpop.f32.mrb[92].mxu0  ;;  %v6206_v27 = vadd.f32 %v6064_v31, %v13215_v51  ;;  %v10477_v61 = vpop.f32.mrb[9].mxu1 }
 0x5e6   : > { %v10569_v25 = vpop.f32.mrb[93].mxu0  ;;  %v6067_v39 = vpop.f32.mrb[10].mxu1  ;;  %v7089_v61 = vpack.c.bf16 %v7060_v22, %v7059_v59 }
 0x5e7   : > { %v6466_v42 = vpop.f32.mrb[94].mxu0  ;;  %v13518_v24 = vadd.f32 %v6463_v52, %v6206_v27  ;;  %v6207_v57 = vadd.f32 %v6067_v39, %v14108_v7  ;;  %v10478_v13 = vpop.f32.mrb[11].mxu1 }
 0x5e8   : > { %v10570_v8 = vpop.f32.mrb[95].mxu0 }
 0x5e9   : > { %v13521_v29 = vadd.f32 %v6466_v42, %v6207_v57  ;;  %10684 = vmatmul.mubr.msk.bf16.gmra.mrb[116].mxu1 %vm347_vm1, %v13233_v54  ;;  %v14109_v54 = vld [vmem:[#allocation9_spill] sm:$0xff]  ;;  %v7062_v42 = vld [vmem:[#allocation3 + $0xf2] sm:$0xff] }
 0x5ea   : > { %10776 = vmatmul.mubr.msk.bf16.gmra.mrb[200].mxu0 %vm347_vm1, %v7088_v23  ;;  %10687 = vmatprep.mubr.msk.bf16.mxu1 %vm11008_vm0, %v14063_v2  ;;  %v7061_v23 = vld [vmem:[#allocation3 + $0xea] sm:$0xff] }
 0x5eb   : > { %10779 = vmatprep.mubr.msk.bf16.mxu0 %vm11008_vm0, %v14063_v2 }
 0x5ec   : > { %v6072_v51 = vpop.f32.mrb[12].mxu1 }
 0x5ed   : > { %v6471_v48 = vpop.f32.mrb[96].mxu0  ;;  %v6208_v45 = vadd.f32 %v6072_v51, %v13230_v21  ;;  %v10481_v1 = vpop.f32.mrb[13].mxu1 }
 0x5ee   : > { %v10573_v0 = vpop.f32.mrb[97].mxu0  ;;  %v6075_v14 = vpop.f32.mrb[14].mxu1  ;;  %v7090_v1 = vpack.c.bf16 %v7062_v42, %v7061_v23 }
 0x5ef   : > { %v6474_v20 = vpop.f32.mrb[98].mxu0  ;;  %v13531_v31 = vadd.f32 %v6471_v48, %v6208_v45  ;;  %v6209_v52 = vadd.f32 %v6075_v14, %v14109_v54  ;;  %v10482_v19 = vpop.f32.mrb[15].mxu1 }
 0x5f0   : > { %v10574_v27 = vpop.f32.mrb[99].mxu0 }
 0x5f1   : > { %v13534_v25 = vadd.f32 %v6474_v20, %v6209_v52  ;;  %10688 = vmatmul.mubr.msk.bf16.gmra.mrb[120].mxu1 %vm347_vm1, %v13248_v38  ;;  %v14110_v38 = vld [vmem:[#allocation10_spill] sm:$0xff] }
 0x5f2   : > { %10780 = vmatmul.mubr.msk.bf16.gmra.mrb[204].mxu0 %vm347_vm1, %v7089_v61  ;;  %10691 = vmatprep.mubr.msk.bf16.mxu1 %vm11008_vm0, %v14063_v2  ;;  %v7064_v20 = vld [vmem:[#allocation3 + $0x102] sm:$0xff]  ;;  %v7063_v61 = vld [vmem:[#allocation3 + $0xfa] sm:$0xff] }
 0x5f3   : > { %10783 = vmatprep.mubr.msk.bf16.mxu0 %vm11008_vm0, %v14063_v2 }
 0x5f4   : > { %v6080_v21 = vpop.f32.mrb[16].mxu1 }
 0x5f5   : > { %v6479_v39 = vpop.f32.mrb[100].mxu0  ;;  %v6210_v47 = vadd.f32 %v6080_v21, %v13245_v34  ;;  %v10485_v7 = vpop.f32.mrb[17].mxu1 }
 0x5f6   : > { %v10577_v57 = vpop.f32.mrb[101].mxu0  ;;  %v6083_v13 = vpop.f32.mrb[18].mxu1  ;;  %v7091_v7 = vpack.c.bf16 %v7064_v20, %v7063_v61 }
 0x5f7   : > { %v6482_v8 = vpop.f32.mrb[102].mxu0  ;;  %v13544_v51 = vadd.f32 %v6479_v39, %v6210_v47  ;;  %v6211_v48 = vadd.f32 %v6083_v13, %v14110_v38  ;;  %v10486_v22 = vpop.f32.mrb[19].mxu1 }
 0x5f8   : > { %v10578_v45 = vpop.f32.mrb[103].mxu0 }
 0x5f9   : > { %v13547_v0 = vadd.f32 %v6482_v8, %v6211_v48  ;;  %10692 = vmatmul.mubr.msk.bf16.gmra.mrb[124].mxu1 %vm347_vm1, %v13263_v16  ;;  %v14111_v16 = vld [vmem:[#allocation11_spill] sm:$0xff] }
 0x5fa   : > { %10784 = vmatmul.mubr.msk.bf16.gmra.mrb[208].mxu0 %vm347_vm1, %v7090_v1  ;;  %10695 = vmatprep.mubr.msk.bf16.mxu1 %vm11008_vm0, %v14063_v2  ;;  %v7066_v8 = vld [vmem:[#allocation3 + $0x112] sm:$0xff]  ;;  %v7065_v1 = vld [vmem:[#allocation3 + $0x10a] sm:$0xff] }
 0x5fb   : > { %10787 = vmatprep.mubr.msk.bf16.mxu0 %vm11008_vm0, %v14063_v2 }
 0x5fc   : > { %v6088_v34 = vpop.f32.mrb[20].mxu1 }
 0x5fd   : > { %v6487_v14 = vpop.f32.mrb[104].mxu0  ;;  %v6212_v59 = vadd.f32 %v6088_v34, %v13260_v53  ;;  %v10489_v54 = vpop.f32.mrb[21].mxu1 }
 0x5fe   : > { %v10581_v52 = vpop.f32.mrb[105].mxu0  ;;  %v6091_v19 = vpop.f32.mrb[22].mxu1  ;;  %v7092_v54 = vpack.c.bf16 %v7066_v8, %v7065_v1 }
 0x5ff   : > { %v6490_v27 = vpop.f32.mrb[106].mxu0  ;;  %v13557_v21 = vadd.f32 %v6487_v14, %v6212_v59  ;;  %v6213_v39 = vadd.f32 %v6091_v19, %v14111_v16  ;;  %v10490_v42 = vpop.f32.mrb[23].mxu1 }
 0x600   : > { %v10582_v47 = vpop.f32.mrb[107].mxu0 }
 0x601   : > { %v13560_v57 = vadd.f32 %v6490_v27, %v6213_v39  ;;  %10696 = vmatmul.mubr.msk.bf16.gmra.mrb[128].mxu1 %vm347_vm1, %v13278_v41  ;;  %v14112_v41 = vld [vmem:[#allocation12_spill] sm:$0xff]  ;;  %v7068_v27 = vld [vmem:[#allocation3 + $0x122] sm:$0xff] }
 0x602   : > { %10788 = vmatmul.mubr.msk.bf16.gmra.mrb[212].mxu0 %vm347_vm1, %v7091_v7  ;;  %10699 = vmatprep.mubr.msk.bf16.mxu1 %vm11008_vm0, %v14063_v2  ;;  %v7067_v7 = vld [vmem:[#allocation3 + $0x11a] sm:$0xff] }
 0x603   : > { %10791 = vmatprep.mubr.msk.bf16.mxu0 %vm11008_vm0, %v14063_v2 }
 0x604   : > { %v6096_v53 = vpop.f32.mrb[24].mxu1 }
 0x605   : > { %v6495_v13 = vpop.f32.mrb[108].mxu0  ;;  %v6214_v23 = vadd.f32 %v6096_v53, %v13275_v44  ;;  %v10493_v38 = vpop.f32.mrb[25].mxu1 }
 0x606   : > { %v10585_v48 = vpop.f32.mrb[109].mxu0  ;;  %v6099_v22 = vpop.f32.mrb[26].mxu1  ;;  %v7093_v38 = vpack.c.bf16 %v7068_v27, %v7067_v7 }
 0x607   : > { %v6498_v45 = vpop.f32.mrb[110].mxu0  ;;  %v13570_v34 = vadd.f32 %v6495_v13, %v6214_v23  ;;  %v6215_v14 = vadd.f32 %v6099_v22, %v14112_v41  ;;  %v10494_v20 = vpop.f32.mrb[27].mxu1 }
 0x608   : > { %v10586_v59 = vpop.f32.mrb[111].mxu0 }
 0x609   : > { %v13573_v52 = vadd.f32 %v6498_v45, %v6215_v14  ;;  %10700 = vmatmul.mubr.msk.bf16.gmra.mrb[132].mxu1 %vm347_vm1, %v13293_v6  ;;  %v14113_v6 = vld [vmem:[#allocation13_spill] sm:$0xff]  ;;  %v7070_v45 = vld [vmem:[#allocation3 + $0x132] sm:$0xff] }
 0x60a   : > { %10792 = vmatmul.mubr.msk.bf16.gmra.mrb[216].mxu0 %vm347_vm1, %v7092_v54  ;;  %10703 = vmatprep.mubr.msk.bf16.mxu1 %vm11008_vm0, %v14063_v2  ;;  %v7069_v54 = vld [vmem:[#allocation3 + $0x12a] sm:$0xff] }
 0x60b   : > { %10795 = vmatprep.mubr.msk.bf16.mxu0 %vm11008_vm0, %v14063_v2 }
 0x60c   : > { %v6104_v44 = vpop.f32.mrb[28].mxu1 }
 0x60d   : > { %v6503_v19 = vpop.f32.mrb[112].mxu0  ;;  %v6216_v61 = vadd.f32 %v6104_v44, %v13290_v33  ;;  %v10497_v16 = vpop.f32.mrb[29].mxu1 }
 0x60e   : > { %v10589_v39 = vpop.f32.mrb[113].mxu0  ;;  %v6107_v42 = vpop.f32.mrb[30].mxu1  ;;  %v7094_v16 = vpack.c.bf16 %v7070_v45, %v7069_v54 }
 0x60f   : > { %v6506_v47 = vpop.f32.mrb[114].mxu0  ;;  %v13583_v53 = vadd.f32 %v6503_v19, %v6216_v61  ;;  %v6217_v13 = vadd.f32 %v6107_v42, %v14113_v6  ;;  %v10498_v8 = vpop.f32.mrb[31].mxu1 }
 0x610   : > { %v10590_v23 = vpop.f32.mrb[115].mxu0 }
 0x611   : > { %v13586_v48 = vadd.f32 %v6506_v47, %v6217_v13  ;;  %10704 = vmatmul.mubr.msk.bf16.gmra.mrb[136].mxu1 %vm347_vm1, %v13308_v35  ;;  %v14114_v35 = vld [vmem:[#allocation14_spill] sm:$0xff] }
 0x612   : > { %10796 = vmatmul.mubr.msk.bf16.gmra.mrb[220].mxu0 %vm347_vm1, %v7093_v38  ;;  %10707 = vmatprep.mubr.msk.bf16.mxu1 %vm11008_vm0, %v14063_v2  ;;  %v7072_v47 = vld [vmem:[#allocation3 + $0x142] sm:$0xff]  ;;  %v7071_v38 = vld [vmem:[#allocation3 + $0x13a] sm:$0xff] }
 0x613   : > { %10799 = vmatprep.mubr.msk.bf16.mxu0 %vm11008_vm0, %v14063_v2 }
 0x614   : > { %v6112_v33 = vpop.f32.mrb[32].mxu1 }
 0x615   : > { %v6511_v22 = vpop.f32.mrb[116].mxu0  ;;  %v6218_v1 = vadd.f32 %v6112_v33, %v13305_v43  ;;  %v10501_v41 = vpop.f32.mrb[33].mxu1 }
 0x616   : > { %v10593_v14 = vpop.f32.mrb[117].mxu0  ;;  %v6115_v20 = vpop.f32.mrb[34].mxu1  ;;  %v7095_v41 = vpack.c.bf16 %v7072_v47, %v7071_v38  ;;  %v6676_v38 = vld [vmem:[#allocation3 + $0x159] sm:$0xff] }
 0x617   : > { %v6514_v59 = vpop.f32.mrb[118].mxu0  ;;  %v13596_v44 = vadd.f32 %v6511_v22, %v6218_v1  ;;  %v6219_v19 = vadd.f32 %v6115_v20, %v14114_v35  ;;  %v10502_v27 = vpop.f32.mrb[35].mxu1 }
 0x618   : > { %v10594_v61 = vpop.f32.mrb[119].mxu0 }
 0x619   : > { %v13599_v39 = vadd.f32 %v6514_v59, %v6219_v19  ;;  %10708 = vmatmul.mubr.msk.bf16.gmra.mrb[140].mxu1 %vm347_vm1, %v13323_v37  ;;  %v14115_v37 = vld [vmem:[#allocation15_spill] sm:$0xff] }
 0x61a   : > { %10800 = vmatmul.mubr.msk.bf16.gmra.mrb[224].mxu0 %vm347_vm1, %v7094_v16  ;;  %10711 = vmatprep.mubr.msk.bf16.mxu1 %vm11008_vm0, %v14063_v2  ;;  %v7074_v59 = vld [vmem:[#allocation3 + $0x152] sm:$0xff]  ;;  %v7073_v16 = vld [vmem:[#allocation3 + $0x14a] sm:$0xff] }
 0x61b   : > { %10803 = vmatprep.mubr.msk.bf16.mxu0 %vm11008_vm0, %v14063_v2 }
 0x61c   : > { %v6120_v43 = vpop.f32.mrb[36].mxu1 }
 0x61d   : > { %v6519_v42 = vpop.f32.mrb[120].mxu0  ;;  %v6220_v7 = vadd.f32 %v6120_v43, %v13320_v11  ;;  %v10505_v6 = vpop.f32.mrb[37].mxu1 }
 0x61e   : > { %v10597_v13 = vpop.f32.mrb[121].mxu0  ;;  %v6123_v8 = vpop.f32.mrb[38].mxu1  ;;  %v7096_v6 = vpack.c.bf16 %v7074_v59, %v7073_v16  ;;  %v7077_v16 = vld [vmem:[#allocation3 + $0x16a] sm:$0xf] }
 0x61f   : > { %v6522_v23 = vpop.f32.mrb[122].mxu0  ;;  %v13609_v33 = vadd.f32 %v6519_v42, %v6220_v7  ;;  %v6221_v22 = vadd.f32 %v6123_v8, %v14115_v37  ;;  %v10506_v45 = vpop.f32.mrb[39].mxu1  ;;  %v7075_v37 = vld [vmem:[#allocation3 + $0x15a] sm:$0xff] }
 0x620   : > { %v10598_v1 = vpop.f32.mrb[123].mxu0 }
 0x621   : > { %v13612_v14 = vadd.f32 %v6522_v23, %v6221_v22  ;;  %10712 = vmatmul.mubr.msk.bf16.gmra.mrb[144].mxu1 %vm347_vm1, %v13338_v56  ;;  %v14116_v56 = vld [vmem:[#allocation16_spill] sm:$0xff]  ;;  %v7076_v22 = vld [vmem:[#allocation3 + $0x162] sm:$0xff] }
 0x622   : > { %10804 = vmatmul.mubr.msk.bf16.gmra.mrb[228].mxu0 %vm347_vm1, %v7095_v41  ;;  %10715 = vmatprep.mubr.msk.bf16.mxu1 %vm11008_vm0, %v14063_v2 }
 0x623   : > { %10807 = vmatprep.mubr.msk.bf16.mxu0 %vm11008_vm0, %v14063_v2 }
 0x624   : > { %v6128_v11 = vpop.f32.mrb[40].mxu1 }
 0x625   : > { %v6527_v20 = vpop.f32.mrb[124].mxu0  ;;  %v6222_v54 = vadd.f32 %v6128_v11, %v13335_v30  ;;  %v10509_v35 = vpop.f32.mrb[41].mxu1  ;;  %v6677_v30 = vld [vmem:[#allocation3 + $0x161] sm:$0xff] }
 0x626   : > { %v10601_v19 = vpop.f32.mrb[125].mxu0  ;;  %v6131_v27 = vpop.f32.mrb[42].mxu1 }
 0x627   : > { %v6530_v61 = vpop.f32.mrb[126].mxu0  ;;  %v13622_v43 = vadd.f32 %v6527_v20, %v6222_v54  ;;  %v6223_v42 = vadd.f32 %v6131_v27, %v14116_v56  ;;  %v10510_v47 = vpop.f32.mrb[43].mxu1  ;;  %v6698_v19 = vpack.c.bf16 %v6677_v30, %v6676_v38  ;;  %v7097_v27 = vpack.c.bf16 %v7076_v22, %v7075_v37  ;;  %v14118_v22 = vld [vmem:[#allocation18_spill] sm:$0xff] }
 0x628   : > { %v10602_v7 = vpop.f32.mrb[127].mxu0 }
 0x629   : > { %v13625_v13 = vadd.f32 %v6530_v61, %v6223_v42  ;;  %10716 = vmatmul.mubr.msk.bf16.gmra.mrb[148].mxu1 %vm347_vm1, %v13353_v12  ;;  %v14117_v42 = vld [vmem:[#allocation17_spill] sm:$0xff] }
 0x62a   : > { %10808 = vmatmul.mubr.msk.bf16.gmra.mrb[232].mxu0 %vm347_vm1, %v7096_v6  ;;  %10719 = vmatprep.mubr.msk.bf16.mxu1 %vm11008_vm0, %v14063_v2 }
 0x62b   : > { %10811 = vmatprep.mubr.msk.bf16.mxu0 %vm11008_vm0, %v14063_v2 }
 0x62c   : > { %v6136_v8 = vpop.f32.mrb[44].mxu1 }
 0x62d   : > { %v6535_v23 = vpop.f32.mrb[128].mxu0  ;;  %v6224_v45 = vadd.f32 %v6136_v8, %v13350_v32  ;;  %v10513_v1 = vpop.f32.mrb[45].mxu1  ;;  %v6678_v32 = vld [vmem:[#allocation3 + $0x169] sm:$0xf]  ;;  %v7098_v8 = vpack.c.bf16 %v7077_v16, %v7077_v16 }
 0x62e   : > { %v10605_v41 = vpop.f32.mrb[129].mxu0  ;;  %v6139_v11 = vpop.f32.mrb[46].mxu1  ;;  %v6699_v30 = vpack.c.bf16 %v6678_v32, %v6678_v32  ;;  %v7436_v32 = vld [vmem:[#allocation3 + $0x2b] sm:$0xff] }
 0x62f   : > { %v6538_v12 = vpop.f32.mrb[130].mxu0  ;;  %v13635_v20 = vadd.f32 %v6535_v23, %v6224_v45  ;;  %v6225_v59 = vadd.f32 %v6139_v11, %v13355_v17  ;;  %v10514_v54 = vpop.f32.mrb[47].mxu1 }
 0x630   : > { %v10606_v35 = vpop.f32.mrb[131].mxu0 }
 0x631   : > { %v13638_v61 = vadd.f32 %v6538_v12, %v6225_v59  ;;  %10720 = vmatmul.mubr.msk.bf16.gmra.mrb[152].mxu1 %vm347_vm1, %v6698_v19  ;;  %v7437_v12 = vld [vmem:[#allocation3 + $0x33] sm:$0xff] }
 0x632   : > { %10812 = vmatmul.mubr.msk.bf16.gmra.mrb[236].mxu0 %vm347_vm1, %v7097_v27  ;;  %10723 = vmatprep.mubr.msk.bf16.mxu1 %vm11008_vm0, %v14063_v2 }
 0x633   : > { %10815 = vmatprep.mubr.msk.bf16.mxu0 %vm11008_vm0, %v14063_v2 }
 0x634   : > { %v6144_v56 = vpop.f32.mrb[48].mxu1 }
 0x635   : > { %v6543_v17 = vpop.f32.mrb[132].mxu0  ;;  %v6226_v47 = vadd.f32 %v6144_v56, %v14117_v42  ;;  %v10517_v7 = vpop.f32.mrb[49].mxu1 }
 0x636   : > { %v10609_v6 = vpop.f32.mrb[133].mxu0  ;;  %v6147_v23 = vpop.f32.mrb[50].mxu1 }
 0x637   : > { %v6546_v38 = vpop.f32.mrb[134].mxu0  ;;  %v13647_v37 = vadd.f32 %v6543_v17, %v6226_v47  ;;  %v6227_v45 = vadd.f32 %v6147_v23, %v14118_v22  ;;  %v10518_v1 = vpop.f32.mrb[51].mxu1  ;;  %v7477_v17 = vpack.c.bf16 %v7437_v12, %v7436_v32  ;;  %v7439_v23 = vld [vmem:[#allocation3 + $0x43] sm:$0xff]  ;;  %v7438_v12 = vld [vmem:[#allocation3 + $0x3b] sm:$0xff] }
 0x638   : > { %v10610_v41 = vpop.f32.mrb[135].mxu0 }
 0x639   : > { %v13650_v11 = vadd.f32 %v6546_v38, %v6227_v45  ;;  %10724 = vmatmul.mubr.msk.bf16.gmra.mrb[156].mxu1 %vm347_vm1, %v6699_v30 }
 0x63a   : > { %10816 = vmatmul.mubr.msk.bf16.gmra.mrb[240].mxu0 %vm347_vm1, %v7098_v8  ;;  %10827 = vmatprep.mubr.msk.bf16.mxu1 %vm11008_vm0, %v14063_v2 }
 0x63c   : > { %v6152_v59 = vpop.f32.mrb[52].mxu1 }
 0x63d   : > { %v6551_v54 = vpop.f32.mrb[136].mxu0  ;;  %v6228_v35 = vadd.f32 %v6152_v59, %v13380_v36  ;;  %v10521_v19 = vpop.f32.mrb[53].mxu1 }
 0x63e   : > { %v10613_v27 = vpop.f32.mrb[137].mxu0  ;;  %v6155_v16 = vpop.f32.mrb[54].mxu1  ;;  %v7478_v19 = vpack.c.bf16 %v7439_v23, %v7438_v12 }
 0x63f   : > { %v6554_v56 = vpop.f32.mrb[138].mxu0  ;;  %v13657_v42 = vadd.f32 %v6551_v54, %v6228_v35  ;;  %v6229_v47 = vadd.f32 %v6155_v16, %v13383_v46  ;;  %v10522_v7 = vpop.f32.mrb[55].mxu1  ;;  %v7441_v16 = vld [vmem:[#allocation3 + $0x53] sm:$0xff] }
 0x640   : > { %v10614_v6 = vpop.f32.mrb[139].mxu0 }
 0x641   : > { %v13660_v30 = vadd.f32 %v6554_v56, %v6229_v47  ;;  %10828 = vmatmul.mubr.msk.bf16.vlgmr.msra.gmra.mrb[160].mxu1 %vm347_vm1, %v7477_v17 }
 0x642   : > { %10831 = vmatprep.mubr.msk.bf16.mxu1 %vm11008_vm0, %v14063_v2 }
 0x644   : > { %v6160_v36 = vpop.f32.mrb[56].mxu1 }
 0x645   : > { %v6559_v8 = vpop.f32.mrb[140].mxu0  ;;  %v6230_v38 = vadd.f32 %v6160_v36, %v13396_v58  ;;  %v10525_v22 = vpop.f32.mrb[57].mxu1 }
 0x646   : > { %v10617_v45 = vpop.f32.mrb[141].mxu0  ;;  %v6163_v1 = vpop.f32.mrb[58].mxu1 }
 0x647   : > { %v6562_v41 = vpop.f32.mrb[142].mxu0  ;;  %v13666_v46 = vadd.f32 %v6559_v8, %v6230_v38  ;;  %v6231_v59 = vadd.f32 %v6163_v1, %v13403_v49  ;;  %v10526_v54 = vpop.f32.mrb[59].mxu1  ;;  %v7440_v49 = vld [vmem:[#allocation3 + $0x4b] sm:$0xff] }
 0x648   : > { %v10618_v35 = vpop.f32.mrb[143].mxu0  ;;  %v7479_v22 = vpack.c.bf16 %v7441_v16, %v7440_v49 }
 0x649   : > { %v13669_v27 = vadd.f32 %v6562_v41, %v6231_v59  ;;  %10832 = vmatmul.mubr.msk.bf16.gmra.mrb[164].mxu1 %vm347_vm1, %v7478_v19  ;;  %v7443_v41 = vld [vmem:[#allocation3 + $0x63] sm:$0xff] }
 0x64a   : > { %10835 = vmatprep.mubr.msk.bf16.mxu1 %vm11008_vm0, %v14063_v2 }
 0x64c   : > { %v6168_v58 = vpop.f32.mrb[60].mxu1 }
 0x64d   : > { %v6567_v32 = vpop.f32.mrb[144].mxu0  ;;  %v6232_v56 = vadd.f32 %v6168_v58, %v13417_v26  ;;  %v10529_v17 = vpop.f32.mrb[61].mxu1 }
 0x64e   : > { %v10621_v47 = vpop.f32.mrb[145].mxu0  ;;  %v6171_v7 = vpop.f32.mrb[62].mxu1 }
 0x64f   : > { %v6570_v6 = vpop.f32.mrb[146].mxu0  ;;  %v13675_v36 = vadd.f32 %v6567_v32, %v6232_v56  ;;  %v6233_v8 = vadd.f32 %v6171_v7, %v13420_v40  ;;  %v10530_v23 = vpop.f32.mrb[63].mxu1  ;;  %v7442_v40 = vld [vmem:[#allocation3 + $0x5b] sm:$0xff] }
 0x650   : > { %v10622_v38 = vpop.f32.mrb[147].mxu0  ;;  %v7480_v17 = vpack.c.bf16 %v7443_v41, %v7442_v40 }
 0x651   : > { %v13678_v45 = vadd.f32 %v6570_v6, %v6233_v8  ;;  %10836 = vmatmul.mubr.msk.bf16.gmra.mrb[168].mxu1 %vm347_vm1, %v7479_v22  ;;  %v7445_v6 = vld [vmem:[#allocation3 + $0x73] sm:$0xff] }
 0x652   : > { %10839 = vmatprep.mubr.msk.bf16.mxu1 %vm11008_vm0, %v14063_v2 }
 0x654   : > { %v6176_v26 = vpop.f32.mrb[64].mxu1 }
 0x655   : > { %v6575_v1 = vpop.f32.mrb[148].mxu0  ;;  %v6234_v12 = vadd.f32 %v6176_v26, %v13430_v10  ;;  %v10533_v59 = vpop.f32.mrb[65].mxu1 }
 0x656   : > { %v10625_v54 = vpop.f32.mrb[149].mxu0  ;;  %v6179_v35 = vpop.f32.mrb[66].mxu1 }
 0x657   : > { %v6578_v19 = vpop.f32.mrb[150].mxu0  ;;  %v13684_v58 = vadd.f32 %v6575_v1, %v6234_v12  ;;  %v6235_v32 = vadd.f32 %v6179_v35, %v13433_v9  ;;  %v10534_v16 = vpop.f32.mrb[67].mxu1  ;;  %v7444_v9 = vld [vmem:[#allocation3 + $0x6b] sm:$0xff] }
 0x658   : > { %v10626_v56 = vpop.f32.mrb[151].mxu0  ;;  %v7481_v59 = vpack.c.bf16 %v7445_v6, %v7444_v9 }
 0x659   : > { %v13687_v47 = vadd.f32 %v6578_v19, %v6235_v32  ;;  %10840 = vmatmul.mubr.msk.bf16.gmra.mrb[172].mxu1 %vm347_vm1, %v7480_v17  ;;  %v7447_v19 = vld [vmem:[#allocation3 + $0x83] sm:$0xff] }
 0x65a   : > { %10843 = vmatprep.mubr.msk.bf16.mxu1 %vm11008_vm0, %v14063_v2 }
 0x65c   : > { %v6184_v10 = vpop.f32.mrb[68].mxu1 }
 0x65d   : > { %v6583_v7 = vpop.f32.mrb[152].mxu0  ;;  %v6236_v49 = vadd.f32 %v6184_v10, %v13443_v28  ;;  %v10537_v8 = vpop.f32.mrb[69].mxu1 }
 0x65e   : > { %v10629_v23 = vpop.f32.mrb[153].mxu0  ;;  %v6187_v38 = vpop.f32.mrb[70].mxu1 }
 0x65f   : > { %v6586_v22 = vpop.f32.mrb[154].mxu0  ;;  %v13693_v26 = vadd.f32 %v6583_v7, %v6236_v49  ;;  %v6237_v1 = vadd.f32 %v6187_v38, %v13446_v62  ;;  %v10538_v41 = vpop.f32.mrb[71].mxu1  ;;  %v7446_v62 = vld [vmem:[#allocation3 + $0x7b] sm:$0xff]  ;;  %v7449_v38 = vld [vmem:[#allocation3 + $0x93] sm:$0xff] }
 0x660   : > { %v10630_v12 = vpop.f32.mrb[155].mxu0  ;;  %v7482_v49 = vpack.c.bf16 %v7447_v19, %v7446_v62 }
 0x661   : > { %v13696_v54 = vadd.f32 %v6586_v22, %v6237_v1  ;;  %10844 = vmatmul.mubr.msk.bf16.gmra.mrb[176].mxu1 %vm347_vm1, %v7481_v59  ;;  %v7448_v12 = vld [vmem:[#allocation3 + $0x8b] sm:$0xff] }
 0x662   : > { %10847 = vmatprep.mubr.msk.bf16.mxu1 %vm11008_vm0, %v14063_v2 }
 0x664   : > { %v6192_v28 = vpop.f32.mrb[72].mxu1 }
 0x665   : > { %v6591_v35 = vpop.f32.mrb[156].mxu0  ;;  %v6238_v40 = vadd.f32 %v6192_v28, %v13456_v60  ;;  %v10541_v32 = vpop.f32.mrb[73].mxu1 }
 0x666   : > { %v10633_v16 = vpop.f32.mrb[157].mxu0  ;;  %v6195_v56 = vpop.f32.mrb[74].mxu1 }
 0x667   : > { %v6594_v17 = vpop.f32.mrb[158].mxu0  ;;  %v13702_v10 = vadd.f32 %v6591_v35, %v6238_v40  ;;  %v10542_v7 = vpop.f32.mrb[75].mxu1  ;;  %v7483_v40 = vpack.c.bf16 %v7449_v38, %v7448_v12  ;;  %v7451_v56 = vld [vmem:[#allocation3 + $0xa3] sm:$0xff] }
 0x668   : > { %v10634_v6 = vpop.f32.mrb[159].mxu0 }
 0x669   : > { %10848 = vmatmul.mubr.msk.bf16.gmra.mrb[180].mxu1 %vm347_vm1, %v7482_v49 }
 0x66a   : > { %10851 = vmatprep.mubr.msk.bf16.mxu1 %vm11008_vm0, %v14063_v2 }
 0x66c   : > { %v6830_v8 = vpop.f32.mrb[76].mxu1 }
 0x66d   : > { %v7229_v23 = vpop.f32.mrb[160].mxu0  ;;  %v6996_v60 = vadd.f32 %v6830_v8, %v13466_v18  ;;  %v10645_v22 = vpop.f32.mrb[77].mxu1 }
 0x66e   : > { %v10737_v9 = vpop.f32.mrb[161].mxu0  ;;  %v6833_v1 = vpop.f32.mrb[78].mxu1 }
 0x66f   : > { %v7232_v41 = vpop.f32.mrb[162].mxu0  ;;  %v13708_v59 = vadd.f32 %v7229_v23, %v6996_v60  ;;  %v6997_v28 = vadd.f32 %v6833_v1, %v13469_v3  ;;  %v10646_v35 = vpop.f32.mrb[79].mxu1  ;;  %v7450_v3 = vld [vmem:[#allocation3 + $0x9b] sm:$0xff] }
 0x670   : > { %v10738_v19 = vpop.f32.mrb[163].mxu0  ;;  %v7484_v22 = vpack.c.bf16 %v7451_v56, %v7450_v3 }
 0x671   : > { %v13711_v32 = vadd.f32 %v7232_v41, %v6997_v28  ;;  %10852 = vmatmul.mubr.msk.bf16.gmra.mrb[184].mxu1 %vm347_vm1, %v7483_v40  ;;  %v7453_v41 = vld [vmem:[#allocation3 + $0xb3] sm:$0xff] }
 0x672   : > { %10855 = vmatprep.mubr.msk.bf16.mxu1 %vm11008_vm0, %v14063_v2 }
 0x674   : > { %v6838_v18 = vpop.f32.mrb[80].mxu1 }
 0x675   : > { %v7237_v16 = vpop.f32.mrb[164].mxu0  ;;  %v6998_v17 = vadd.f32 %v6838_v18, %v13479_v63  ;;  %v10649_v62 = vpop.f32.mrb[81].mxu1 }
 0x676   : > { %v10741_v7 = vpop.f32.mrb[165].mxu0  ;;  %v6841_v6 = vpop.f32.mrb[82].mxu1 }
 0x677   : > { %v7240_v49 = vpop.f32.mrb[166].mxu0  ;;  %v13717_v8 = vadd.f32 %v7237_v16, %v6998_v17  ;;  %v6999_v23 = vadd.f32 %v6841_v6, %v13482_v15  ;;  %v10650_v38 = vpop.f32.mrb[83].mxu1  ;;  %v7452_v15 = vld [vmem:[#allocation3 + $0xab] sm:$0xff] }
 0x678   : > { %v10742_v60 = vpop.f32.mrb[167].mxu0  ;;  %v7485_v62 = vpack.c.bf16 %v7453_v41, %v7452_v15 }
 0x679   : > { %v13720_v9 = vadd.f32 %v7240_v49, %v6999_v23  ;;  %10856 = vmatmul.mubr.msk.bf16.gmra.mrb[188].mxu1 %vm347_vm1, %v7484_v22  ;;  %v7455_v49 = vld [vmem:[#allocation3 + $0xc3] sm:$0xff] }
 0x67a   : > { %10859 = vmatprep.mubr.msk.bf16.mxu1 %vm11008_vm0, %v14063_v2 }
 0x67c   : > { %v6846_v63 = vpop.f32.mrb[84].mxu1 }
 0x67d   : > { %v7245_v1 = vpop.f32.mrb[168].mxu0  ;;  %v7000_v12 = vadd.f32 %v6846_v63, %v13492_v5  ;;  %v10653_v28 = vpop.f32.mrb[85].mxu1 }
 0x67e   : > { %v10745_v35 = vpop.f32.mrb[169].mxu0  ;;  %v6849_v19 = vpop.f32.mrb[86].mxu1 }
 0x67f   : > { %v7248_v40 = vpop.f32.mrb[170].mxu0  ;;  %v13726_v18 = vadd.f32 %v7245_v1, %v7000_v12  ;;  %v7001_v16 = vadd.f32 %v6849_v19, %v13495_v55  ;;  %v10654_v56 = vpop.f32.mrb[87].mxu1  ;;  %v7454_v55 = vld [vmem:[#allocation3 + $0xbb] sm:$0xff] }
 0x680   : > { %v10746_v17 = vpop.f32.mrb[171].mxu0  ;;  %v7486_v28 = vpack.c.bf16 %v7455_v49, %v7454_v55 }
 0x681   : > { %v13729_v7 = vadd.f32 %v7248_v40, %v7001_v16  ;;  %10860 = vmatmul.mubr.msk.bf16.gmra.mrb[192].mxu1 %vm347_vm1, %v7485_v62  ;;  %v7457_v40 = vld [vmem:[#allocation3 + $0xd3] sm:$0xff] }
 0x682   : > { %10863 = vmatprep.mubr.msk.bf16.mxu1 %vm11008_vm0, %v14063_v2 }
 0x684   : > { %v6854_v5 = vpop.f32.mrb[88].mxu1 }
 0x685   : > { %v7253_v6 = vpop.f32.mrb[172].mxu0  ;;  %v7002_v3 = vadd.f32 %v6854_v5, %v13505_v50  ;;  %v10657_v23 = vpop.f32.mrb[89].mxu1 }
 0x686   : > { %v10749_v38 = vpop.f32.mrb[173].mxu0  ;;  %v6857_v60 = vpop.f32.mrb[90].mxu1 }
 0x687   : > { %v7256_v22 = vpop.f32.mrb[174].mxu0  ;;  %v13735_v63 = vadd.f32 %v7253_v6, %v7002_v3  ;;  %v7003_v1 = vadd.f32 %v6857_v60, %v13508_v4  ;;  %v10658_v41 = vpop.f32.mrb[91].mxu1  ;;  %v7456_v4 = vld [vmem:[#allocation3 + $0xcb] sm:$0xff] }
 0x688   : > { %v10750_v12 = vpop.f32.mrb[175].mxu0  ;;  %v7487_v23 = vpack.c.bf16 %v7457_v40, %v7456_v4 }
 0x689   : > { %v13738_v35 = vadd.f32 %v7256_v22, %v7003_v1  ;;  %10864 = vmatmul.mubr.msk.bf16.gmra.mrb[196].mxu1 %vm347_vm1, %v7486_v28  ;;  %v7459_v22 = vld [vmem:[#allocation3 + $0xe3] sm:$0xff] }
 0x68a   : > { %10867 = vmatprep.mubr.msk.bf16.mxu1 %vm11008_vm0, %v14063_v2 }
 0x68c   : > { %v6862_v50 = vpop.f32.mrb[92].mxu1 }
 0x68d   : > { %v7261_v19 = vpop.f32.mrb[176].mxu0  ;;  %v7004_v15 = vadd.f32 %v6862_v50, %v13518_v24  ;;  %v10661_v16 = vpop.f32.mrb[93].mxu1 }
 0x68e   : > { %v10753_v56 = vpop.f32.mrb[177].mxu0  ;;  %v6865_v17 = vpop.f32.mrb[94].mxu1 }
 0x68f   : > { %v7264_v62 = vpop.f32.mrb[178].mxu0  ;;  %v13744_v5 = vadd.f32 %v7261_v19, %v7004_v15  ;;  %v7005_v6 = vadd.f32 %v6865_v17, %v13521_v29  ;;  %v10662_v49 = vpop.f32.mrb[95].mxu1  ;;  %v7458_v29 = vld [vmem:[#allocation3 + $0xdb] sm:$0xff] }
 0x690   : > { %v10754_v3 = vpop.f32.mrb[179].mxu0  ;;  %v7488_v16 = vpack.c.bf16 %v7459_v22, %v7458_v29 }
 0x691   : > { %v13747_v38 = vadd.f32 %v7264_v62, %v7005_v6  ;;  %10868 = vmatmul.mubr.msk.bf16.gmra.mrb[200].mxu1 %vm347_vm1, %v7487_v23  ;;  %v7461_v62 = vld [vmem:[#allocation3 + $0xf3] sm:$0xff] }
 0x692   : > { %10871 = vmatprep.mubr.msk.bf16.mxu1 %vm11008_vm0, %v14063_v2 }
 0x694   : > { %v6870_v24 = vpop.f32.mrb[96].mxu1 }
 0x695   : > { %v7269_v60 = vpop.f32.mrb[180].mxu0  ;;  %v7006_v55 = vadd.f32 %v6870_v24, %v13531_v31  ;;  %v10665_v1 = vpop.f32.mrb[97].mxu1 }
 0x696   : > { %v10757_v41 = vpop.f32.mrb[181].mxu0  ;;  %v6873_v12 = vpop.f32.mrb[98].mxu1 }
 0x697   : > { %v7272_v28 = vpop.f32.mrb[182].mxu0  ;;  %v13753_v50 = vadd.f32 %v7269_v60, %v7006_v55  ;;  %v7007_v19 = vadd.f32 %v6873_v12, %v13534_v25  ;;  %v10666_v40 = vpop.f32.mrb[99].mxu1  ;;  %v7460_v25 = vld [vmem:[#allocation3 + $0xeb] sm:$0xff] }
 0x698   : > { %v10758_v15 = vpop.f32.mrb[183].mxu0  ;;  %v7489_v1 = vpack.c.bf16 %v7461_v62, %v7460_v25 }
 0x699   : > { %v13756_v56 = vadd.f32 %v7272_v28, %v7007_v19  ;;  %10872 = vmatmul.mubr.msk.bf16.gmra.mrb[204].mxu1 %vm347_vm1, %v7488_v16  ;;  %v7463_v28 = vld [vmem:[#allocation3 + $0x103] sm:$0xff] }
 0x69a   : > { %10875 = vmatprep.mubr.msk.bf16.mxu1 %vm11008_vm0, %v14063_v2 }
 0x69c   : > { %v6878_v31 = vpop.f32.mrb[100].mxu1 }
 0x69d   : > { %v7277_v17 = vpop.f32.mrb[184].mxu0  ;;  %v7008_v4 = vadd.f32 %v6878_v31, %v13544_v51  ;;  %v10669_v6 = vpop.f32.mrb[101].mxu1 }
 0x69e   : > { %v10761_v49 = vpop.f32.mrb[185].mxu0  ;;  %v6881_v3 = vpop.f32.mrb[102].mxu1 }
 0x69f   : > { %v7280_v23 = vpop.f32.mrb[186].mxu0  ;;  %v13762_v24 = vadd.f32 %v7277_v17, %v7008_v4  ;;  %v7009_v60 = vadd.f32 %v6881_v3, %v13547_v0  ;;  %v10670_v22 = vpop.f32.mrb[103].mxu1  ;;  %v7462_v0 = vld [vmem:[#allocation3 + $0xfb] sm:$0xff] }
 0x6a0   : > { %v10762_v55 = vpop.f32.mrb[187].mxu0  ;;  %v7490_v6 = vpack.c.bf16 %v7463_v28, %v7462_v0 }
 0x6a1   : > { %v13765_v41 = vadd.f32 %v7280_v23, %v7009_v60  ;;  %10876 = vmatmul.mubr.msk.bf16.gmra.mrb[208].mxu1 %vm347_vm1, %v7489_v1  ;;  %v7465_v23 = vld [vmem:[#allocation3 + $0x113] sm:$0xff] }
 0x6a2   : > { %10879 = vmatprep.mubr.msk.bf16.mxu1 %vm11008_vm0, %v14063_v2 }
 0x6a4   : > { %v6886_v51 = vpop.f32.mrb[104].mxu1 }
 0x6a5   : > { %v7285_v12 = vpop.f32.mrb[188].mxu0  ;;  %v7010_v29 = vadd.f32 %v6886_v51, %v13557_v21  ;;  %v10673_v19 = vpop.f32.mrb[105].mxu1 }
 0x6a6   : > { %v10765_v40 = vpop.f32.mrb[189].mxu0  ;;  %v6889_v15 = vpop.f32.mrb[106].mxu1 }
 0x6a7   : > { %v7288_v16 = vpop.f32.mrb[190].mxu0  ;;  %v13771_v31 = vadd.f32 %v7285_v12, %v7010_v29  ;;  %v7011_v17 = vadd.f32 %v6889_v15, %v13560_v57  ;;  %v10674_v62 = vpop.f32.mrb[107].mxu1  ;;  %v7464_v57 = vld [vmem:[#allocation3 + $0x10b] sm:$0xff] }
 0x6a8   : > { %v10766_v4 = vpop.f32.mrb[191].mxu0  ;;  %v7491_v19 = vpack.c.bf16 %v7465_v23, %v7464_v57 }
 0x6a9   : > { %v13774_v49 = vadd.f32 %v7288_v16, %v7011_v17  ;;  %10880 = vmatmul.mubr.msk.bf16.gmra.mrb[212].mxu1 %vm347_vm1, %v7490_v6  ;;  %v7467_v16 = vld [vmem:[#allocation3 + $0x123] sm:$0xff] }
 0x6aa   : > { %10883 = vmatprep.mubr.msk.bf16.mxu1 %vm11008_vm0, %v14063_v2 }
 0x6ac   : > { %v6894_v21 = vpop.f32.mrb[108].mxu1 }
 0x6ad   : > { %v7293_v3 = vpop.f32.mrb[192].mxu0  ;;  %v7012_v25 = vadd.f32 %v6894_v21, %v13570_v34  ;;  %v10677_v60 = vpop.f32.mrb[109].mxu1 }
 0x6ae   : > { %v10769_v22 = vpop.f32.mrb[193].mxu0  ;;  %v6897_v55 = vpop.f32.mrb[110].mxu1 }
 0x6af   : > { %v7296_v1 = vpop.f32.mrb[194].mxu0  ;;  %v13780_v51 = vadd.f32 %v7293_v3, %v7012_v25  ;;  %v7013_v12 = vadd.f32 %v6897_v55, %v13573_v52  ;;  %v10678_v28 = vpop.f32.mrb[111].mxu1  ;;  %v7466_v52 = vld [vmem:[#allocation3 + $0x11b] sm:$0xff] }
 0x6b0   : > { %v10770_v29 = vpop.f32.mrb[195].mxu0  ;;  %v7492_v60 = vpack.c.bf16 %v7467_v16, %v7466_v52 }
 0x6b1   : > { %v13783_v40 = vadd.f32 %v7296_v1, %v7013_v12  ;;  %10884 = vmatmul.mubr.msk.bf16.gmra.mrb[216].mxu1 %vm347_vm1, %v7491_v19  ;;  %v7469_v1 = vld [vmem:[#allocation3 + $0x133] sm:$0xff] }
 0x6b2   : > { %10887 = vmatprep.mubr.msk.bf16.mxu1 %vm11008_vm0, %v14063_v2 }
 0x6b4   : > { %v6902_v34 = vpop.f32.mrb[112].mxu1 }
 0x6b5   : > { %v7301_v15 = vpop.f32.mrb[196].mxu0  ;;  %v7014_v0 = vadd.f32 %v6902_v34, %v13583_v53  ;;  %v10681_v17 = vpop.f32.mrb[113].mxu1 }
 0x6b6   : > { %v10773_v62 = vpop.f32.mrb[197].mxu0  ;;  %v6905_v4 = vpop.f32.mrb[114].mxu1 }
 0x6b7   : > { %v7304_v6 = vpop.f32.mrb[198].mxu0  ;;  %v13789_v21 = vadd.f32 %v7301_v15, %v7014_v0  ;;  %v7015_v3 = vadd.f32 %v6905_v4, %v13586_v48  ;;  %v10682_v23 = vpop.f32.mrb[115].mxu1  ;;  %v7468_v48 = vld [vmem:[#allocation3 + $0x12b] sm:$0xff] }
 0x6b8   : > { %v10774_v25 = vpop.f32.mrb[199].mxu0  ;;  %v7493_v17 = vpack.c.bf16 %v7469_v1, %v7468_v48 }
 0x6b9   : > { %v13792_v22 = vadd.f32 %v7304_v6, %v7015_v3  ;;  %10888 = vmatmul.mubr.msk.bf16.gmra.mrb[220].mxu1 %vm347_vm1, %v7492_v60  ;;  %v7471_v6 = vld [vmem:[#allocation3 + $0x143] sm:$0xff] }
 0x6ba   : > { %10891 = vmatprep.mubr.msk.bf16.mxu1 %vm11008_vm0, %v14063_v2 }
 0x6bc   : > { %v6910_v53 = vpop.f32.mrb[116].mxu1 }
 0x6bd   : > { %v7309_v55 = vpop.f32.mrb[200].mxu0  ;;  %v7016_v57 = vadd.f32 %v6910_v53, %v13596_v44  ;;  %v10685_v12 = vpop.f32.mrb[117].mxu1 }
 0x6be   : > { %v10777_v28 = vpop.f32.mrb[201].mxu0  ;;  %v6913_v29 = vpop.f32.mrb[118].mxu1 }
 0x6bf   : > { %v7312_v19 = vpop.f32.mrb[202].mxu0  ;;  %v13798_v34 = vadd.f32 %v7309_v55, %v7016_v57  ;;  %v7017_v15 = vadd.f32 %v6913_v29, %v13599_v39  ;;  %v10686_v16 = vpop.f32.mrb[119].mxu1  ;;  %v7470_v39 = vld [vmem:[#allocation3 + $0x13b] sm:$0xff] }
 0x6c0   : > { %v10778_v0 = vpop.f32.mrb[203].mxu0  ;;  %v7494_v12 = vpack.c.bf16 %v7471_v6, %v7470_v39  ;;  %v7475_v39 = vld [vmem:[#allocation3 + $0x163] sm:$0xff] }
 0x6c1   : > { %v13801_v62 = vadd.f32 %v7312_v19, %v7017_v15  ;;  %10892 = vmatmul.mubr.msk.bf16.gmra.mrb[224].mxu1 %vm347_vm1, %v7493_v17  ;;  %v7473_v19 = vld [vmem:[#allocation3 + $0x153] sm:$0xff] }
 0x6c2   : > { %10895 = vmatprep.mubr.msk.bf16.mxu1 %vm11008_vm0, %v14063_v2 }
 0x6c4   : > { %v6918_v44 = vpop.f32.mrb[120].mxu1 }
 0x6c5   : > { %v7317_v4 = vpop.f32.mrb[204].mxu0  ;;  %v7018_v52 = vadd.f32 %v6918_v44, %v13609_v33  ;;  %v10689_v3 = vpop.f32.mrb[121].mxu1 }
 0x6c6   : > { %v10781_v23 = vpop.f32.mrb[205].mxu0  ;;  %v6921_v25 = vpop.f32.mrb[122].mxu1 }
 0x6c7   : > { %v7320_v60 = vpop.f32.mrb[206].mxu0  ;;  %v13807_v53 = vadd.f32 %v7317_v4, %v7018_v52  ;;  %v7019_v55 = vadd.f32 %v6921_v25, %v13612_v14  ;;  %v10690_v1 = vpop.f32.mrb[123].mxu1  ;;  %v7472_v14 = vld [vmem:[#allocation3 + $0x14b] sm:$0xff] }
 0x6c8   : > { %v10782_v57 = vpop.f32.mrb[207].mxu0  ;;  %v7495_v3 = vpack.c.bf16 %v7473_v19, %v7472_v14 }
 0x6c9   : > { %v13810_v28 = vadd.f32 %v7320_v60, %v7019_v55  ;;  %10896 = vmatmul.mubr.msk.bf16.gmra.mrb[228].mxu1 %vm347_vm1, %v7494_v12  ;;  %v7474_v60 = vld [vmem:[#allocation3 + $0x15b] sm:$0xff] }
 0x6ca   : > { %10899 = vmatprep.mubr.msk.bf16.mxu1 %vm11008_vm0, %v14063_v2 }
 0x6cc   : > { %v6926_v33 = vpop.f32.mrb[124].mxu1 }
 0x6cd   : > { %v7325_v29 = vpop.f32.mrb[208].mxu0  ;;  %v7020_v48 = vadd.f32 %v6926_v33, %v13622_v43  ;;  %v10693_v15 = vpop.f32.mrb[125].mxu1 }
 0x6ce   : > { %v10785_v16 = vpop.f32.mrb[209].mxu0  ;;  %v6929_v0 = vpop.f32.mrb[126].mxu1  ;;  %v7496_v15 = vpack.c.bf16 %v7475_v39, %v7474_v60 }
 0x6cf   : > { %v7328_v17 = vpop.f32.mrb[210].mxu0  ;;  %v13816_v44 = vadd.f32 %v7325_v29, %v7020_v48  ;;  %v7021_v4 = vadd.f32 %v6929_v0, %v13625_v13  ;;  %v10694_v6 = vpop.f32.mrb[127].mxu1  ;;  %v7476_v0 = vld [vmem:[#allocation3 + $0x16b] sm:$0xf] }
 0x6d0   : > { %v10786_v52 = vpop.f32.mrb[211].mxu0 }
 0x6d1   : > { %v13819_v23 = vadd.f32 %v7328_v17, %v7021_v4  ;;  %10900 = vmatmul.mubr.msk.bf16.gmra.mrb[232].mxu1 %vm347_vm1, %v7495_v3  ;;  %v7497_v52 = vpack.c.bf16 %v7476_v0, %v7476_v0 }
 0x6d2   : > { %10903 = vmatprep.mubr.msk.bf16.mxu1 %vm11008_vm0, %v14063_v2 }
 0x6d4   : > { %v6934_v43 = vpop.f32.mrb[128].mxu1 }
 0x6d5   : > { %v7333_v25 = vpop.f32.mrb[212].mxu0  ;;  %v7022_v55 = vadd.f32 %v6934_v43, %v13635_v20  ;;  %v10697_v1 = vpop.f32.mrb[129].mxu1 }
 0x6d6   : > { %v10789_v57 = vpop.f32.mrb[213].mxu0  ;;  %v6937_v12 = vpop.f32.mrb[130].mxu1 }
 0x6d7   : > { %v7336_v13 = vpop.f32.mrb[214].mxu0  ;;  %v13825_v33 = vadd.f32 %v7333_v25, %v7022_v55  ;;  %v7023_v29 = vadd.f32 %v6937_v12, %v13638_v61  ;;  %v10698_v19 = vpop.f32.mrb[131].mxu1 }
 0x6d8   : > { %v10790_v48 = vpop.f32.mrb[215].mxu0 }
 0x6d9   : > { %v13828_v16 = vadd.f32 %v7336_v13, %v7023_v29  ;;  %10904 = vmatmul.mubr.msk.bf16.gmra.mrb[236].mxu1 %vm347_vm1, %v7496_v15 }
 0x6da   : > { %10907 = vmatprep.mubr.msk.bf16.mxu1 %vm11008_vm0, %v14063_v2 }
 0x6dc   : > { %v6942_v20 = vpop.f32.mrb[132].mxu1 }
 0x6dd   : > { %v7341_v17 = vpop.f32.mrb[216].mxu0  ;;  %v7024_v14 = vadd.f32 %v6942_v20, %v13647_v37  ;;  %v10701_v4 = vpop.f32.mrb[133].mxu1 }
 0x6de   : > { %v10793_v6 = vpop.f32.mrb[217].mxu0  ;;  %v6945_v3 = vpop.f32.mrb[134].mxu1 }
 0x6df   : > { %v7344_v61 = vpop.f32.mrb[218].mxu0  ;;  %v13834_v43 = vadd.f32 %v7341_v17, %v7024_v14  ;;  %v7025_v25 = vadd.f32 %v6945_v3, %v13650_v11  ;;  %v10702_v60 = vpop.f32.mrb[135].mxu1 }
 0x6e0   : > { %v10794_v39 = vpop.f32.mrb[219].mxu0 }
 0x6e1   : > { %v13837_v55 = vadd.f32 %v7344_v61, %v7025_v25  ;;  %10908 = vmatmul.mubr.msk.bf16.gmra.mrb[240].mxu1 %vm347_vm1, %v7497_v52 }
 0x6e4   : > { %v6950_v2 = vpop.f32.mrb[136].mxu1 }
 0x6e5   : > { %v7349_v1 = vpop.f32.mrb[220].mxu0  ;;  %v7026_v57 = vadd.f32 %v6950_v2, %v13657_v42  ;;  %v10705_v37 = vpop.f32.mrb[137].mxu1 }
 0x6e6   : > { %v10797_v12 = vpop.f32.mrb[221].mxu0  ;;  %v6953_v13 = vpop.f32.mrb[138].mxu1 }
 0x6e7   : > { %v7352_v29 = vpop.f32.mrb[222].mxu0  ;;  %v13841_v19 = vadd.f32 %v7349_v1, %v7026_v57  ;;  %v7027_v48 = vadd.f32 %v6953_v13, %v13660_v30  ;;  %v10706_v15 = vpop.f32.mrb[139].mxu1 }
 0x6e8   : > { %v10798_v11 = vpop.f32.mrb[223].mxu0 }
 0x6e9   : > { %v13844_v0 = vadd.f32 %v7352_v29, %v7027_v48 }
 0x6ec   : > { %v6958_v20 = vpop.f32.mrb[140].mxu1 }
 0x6ed   : > { %v7357_v17 = vpop.f32.mrb[224].mxu0  ;;  %v7028_v14 = vadd.f32 %v6958_v20, %v13666_v46  ;;  %v10709_v4 = vpop.f32.mrb[141].mxu1 }
 0x6ee   : > { %v10801_v6 = vpop.f32.mrb[225].mxu0  ;;  %v6961_v52 = vpop.f32.mrb[142].mxu1 }
 0x6ef   : > { %v7360_v42 = vpop.f32.mrb[226].mxu0  ;;  %v13847_v3 = vadd.f32 %v7357_v17, %v7028_v14  ;;  %v7029_v61 = vadd.f32 %v6961_v52, %v13669_v27  ;;  %v10710_v25 = vpop.f32.mrb[143].mxu1 }
 0x6f0   : > { %v10802_v60 = vpop.f32.mrb[227].mxu0 }
 0x6f1   : > { %v13850_v39 = vadd.f32 %v7360_v42, %v7029_v61 }
 0x6f4   : > { %v6966_v30 = vpop.f32.mrb[144].mxu1 }
 0x6f5   : > { %v7365_v2 = vpop.f32.mrb[228].mxu0  ;;  %v7030_v1 = vadd.f32 %v6966_v30, %v13675_v36  ;;  %v10713_v57 = vpop.f32.mrb[145].mxu1 }
 0x6f6   : > { %v10805_v37 = vpop.f32.mrb[229].mxu0  ;;  %v6969_v12 = vpop.f32.mrb[146].mxu1 }
 0x6f7   : > { %v7368_v46 = vpop.f32.mrb[230].mxu0  ;;  %v13853_v13 = vadd.f32 %v7365_v2, %v7030_v1  ;;  %v7031_v29 = vadd.f32 %v6969_v12, %v13678_v45  ;;  %v10714_v48 = vpop.f32.mrb[147].mxu1 }
 0x6f8   : > { %v10806_v15 = vpop.f32.mrb[231].mxu0 }
 0x6f9   : > { %v13856_v11 = vadd.f32 %v7368_v46, %v7031_v29 }
 0x6fc   : > { %v6974_v27 = vpop.f32.mrb[148].mxu1 }
 0x6fd   : > { %v7373_v20 = vpop.f32.mrb[232].mxu0  ;;  %v7032_v17 = vadd.f32 %v6974_v27, %v13684_v58  ;;  %v10717_v14 = vpop.f32.mrb[149].mxu1 }
 0x6fe   : > { %v10809_v4 = vpop.f32.mrb[233].mxu0  ;;  %v6977_v6 = vpop.f32.mrb[150].mxu1 }
 0x6ff   : > { %v7376_v36 = vpop.f32.mrb[234].mxu0  ;;  %v13859_v52 = vadd.f32 %v7373_v20, %v7032_v17  ;;  %v7033_v42 = vadd.f32 %v6977_v6, %v13687_v47  ;;  %v10718_v61 = vpop.f32.mrb[151].mxu1 }
 0x700   : > { %v10810_v25 = vpop.f32.mrb[235].mxu0 }
 0x701   : > { %v13862_v60 = vadd.f32 %v7376_v36, %v7033_v42 }
 0x704   : > { %v6982_v45 = vpop.f32.mrb[152].mxu1 }
 0x705   : > { %v7381_v30 = vpop.f32.mrb[236].mxu0  ;;  %v7034_v2 = vadd.f32 %v6982_v45, %v13693_v26  ;;  %v10721_v1 = vpop.f32.mrb[153].mxu1 }
 0x706   : > { %v10813_v57 = vpop.f32.mrb[237].mxu0  ;;  %v6985_v37 = vpop.f32.mrb[154].mxu1 }
 0x707   : > { %v7384_v58 = vpop.f32.mrb[238].mxu0  ;;  %v13865_v12 = vadd.f32 %v7381_v30, %v7034_v2  ;;  %v7035_v46 = vadd.f32 %v6985_v37, %v13696_v54  ;;  %v10722_v29 = vpop.f32.mrb[155].mxu1  ;;  %v13876_v54 = vld [vmem:[%s14056_s5] ss:$0 sm:$0xff]  ;;  %v7835_v30 = vld [vmem:[#allocation2 + $0x18] sm:$0xff] }
 0x708   : > { %v10814_v48 = vpop.f32.mrb[239].mxu0  ;;  %v7836_v37 = vld [vmem:[#allocation2 + $0x20] sm:$0xff] }
 0x709   : > { %v13868_v47 = vadd.f32 %v7384_v58, %v7035_v46 }
 0x70c   : > { %v6990_v15 = vpop.f32.mrb[156].mxu1 }
 0x70d   : > { %v7389_v27 = vpop.f32.mrb[240].mxu0  ;;  %v7036_v20 = vadd.f32 %v6990_v15, %v13702_v10  ;;  %v10725_v17 = vpop.f32.mrb[157].mxu1 }
 0x70e   : > { %v10817_v14 = vpop.f32.mrb[241].mxu0  ;;  %v6993_v26 = vpop.f32.mrb[158].mxu1 }
 0x70f   : > { %v7392_v4 = vpop.f32.mrb[242].mxu0  ;;  %v13871_v6 = vadd.f32 %v7389_v27, %v7036_v20  ;;  %v10726_v36 = vpop.f32.mrb[159].mxu1  ;;  %v7837_v20 = vld [vmem:[#allocation2 + $0x28] sm:$0xff] }
 0x710   : > { %v10818_v42 = vpop.f32.mrb[243].mxu0  ;;  %v7838_v36 = vld [vmem:[#allocation2 + $0x30] sm:$0xff] }
 0x714   : > { %v7628_v61 = vpop.f32.mrb[160].mxu1 }
 0x715   : > { %v7794_v25 = vadd.f32 %v7628_v61, %v13708_v59  ;;  %v10829_v45 = vpop.f32.mrb[161].mxu1 }
 0x716   : > { %v7631_v10 = vpop.f32.mrb[162].mxu1 }
 0x717   : > { %v7883_v2 = vadd.f32 %v13876_v54, %v7794_v25  ;;  %v7795_v1 = vadd.f32 %v7631_v10, %v13711_v32  ;;  %v10830_v57 = vpop.f32.mrb[163].mxu1 }
 0x719   : > { %v7924_v58 = vadd.f32 %v7883_v2, %v7835_v30  ;;  %v7884_v46 = vadd.f32 %v13876_v54, %v7795_v1  ;;  %v7839_v1 = vld [vmem:[#allocation2 + $0x38] sm:$0xff] }
 0x71b   : > { %v7965_v59 = vmax.f32 %v7924_v58, 0.0  ;;  %v7925_v29 = vadd.f32 %v7884_v46, %v7836_v37  ;;  %v7840_v46 = vld [vmem:[#allocation2 + $0x40] sm:$0xff] }
 0x71c   : > { %v7636_v48 = vpop.f32.mrb[164].mxu1 }
 0x71d   : > { %8006 = vst.msk [vmem:[%s13886_s20] sm:$0xff] %vm347_vm1, %v7965_v59  ;;  %v7966_v15 = vmax.f32 %v7925_v29, 0.0  ;;  %v7796_v32 = vadd.f32 %v7636_v48, %v13717_v8  ;;  %v10833_v27 = vpop.f32.mrb[165].mxu1 }
 0x71e   : > { %v7639_v17 = vpop.f32.mrb[166].mxu1 }
 0x71f   : > { %8007 = vst.msk [vmem:[%s13886_s20 + $0x8] sm:$0xff] %vm347_vm1, %v7966_v15  ;;  %v7885_v14 = vadd.f32 %v13876_v54, %v7796_v32  ;;  %v7797_v26 = vadd.f32 %v7639_v17, %v13720_v9  ;;  %v10834_v4 = vpop.f32.mrb[167].mxu1  ;;  %v7841_v17 = vld [vmem:[#allocation2 + $0x48] sm:$0xff] }
 0x721   : > { %v7926_v42 = vadd.f32 %v7885_v14, %v7837_v20  ;;  %v7886_v61 = vadd.f32 %v13876_v54, %v7797_v26 }
 0x723   : > { %v7967_v25 = vmax.f32 %v7926_v42, 0.0  ;;  %v7927_v45 = vadd.f32 %v7886_v61, %v7838_v36  ;;  %v7842_v36 = vld [vmem:[#allocation2 + $0x50] sm:$0xff] }
 0x724   : > { %v7644_v30 = vpop.f32.mrb[168].mxu1 }
 0x725   : > { %8008 = vst.msk [vmem:[%s13886_s20 + $0x10] sm:$0xff] %vm347_vm1, %v7967_v25  ;;  %v7968_v8 = vmax.f32 %v7927_v45, 0.0  ;;  %v7798_v10 = vadd.f32 %v7644_v30, %v13726_v18  ;;  %v10837_v2 = vpop.f32.mrb[169].mxu1 }
 0x726   : > { %v7647_v57 = vpop.f32.mrb[170].mxu1  ;;  %v7843_v2 = vld [vmem:[#allocation2 + $0x58] sm:$0xff] }
 0x727   : > { %8009 = vst.msk [vmem:[%s13886_s20 + $0x18] sm:$0xff] %vm347_vm1, %v7968_v8  ;;  %v7887_v9 = vadd.f32 %v13876_v54, %v7798_v10  ;;  %v7799_v37 = vadd.f32 %v7647_v57, %v13729_v7  ;;  %v10838_v58 = vpop.f32.mrb[171].mxu1 }
 0x729   : > { %v7928_v59 = vadd.f32 %v7887_v9, %v7839_v1  ;;  %v7888_v29 = vadd.f32 %v13876_v54, %v7799_v37  ;;  %v7844_v37 = vld [vmem:[#allocation2 + $0x60] sm:$0xff] }
 0x72b   : > { %v7969_v48 = vmax.f32 %v7928_v59, 0.0  ;;  %v7929_v15 = vadd.f32 %v7888_v29, %v7840_v46 }
 0x72c   : > { %v7652_v32 = vpop.f32.mrb[172].mxu1 }
 0x72d   : > { %8010 = vst.msk [vmem:[%s13886_s20 + $0x20] sm:$0xff] %vm347_vm1, %v7969_v48  ;;  %v7970_v18 = vmax.f32 %v7929_v15, 0.0  ;;  %v7800_v27 = vadd.f32 %v7652_v32, %v13735_v63  ;;  %v10841_v20 = vpop.f32.mrb[173].mxu1 }
 0x72e   : > { %v7655_v14 = vpop.f32.mrb[174].mxu1 }
 0x72f   : > { %8011 = vst.msk [vmem:[%s13886_s20 + $0x28] sm:$0xff] %vm347_vm1, %v7970_v18  ;;  %v7889_v7 = vadd.f32 %v13876_v54, %v7800_v27  ;;  %v7801_v26 = vadd.f32 %v7655_v14, %v13738_v35  ;;  %v10842_v4 = vpop.f32.mrb[175].mxu1  ;;  %v7845_v18 = vld [vmem:[#allocation2 + $0x68] sm:$0xff]  ;;  %v7846_v14 = vld [vmem:[#allocation2 + $0x70] sm:$0xff] }
 0x731   : > { %v7930_v42 = vadd.f32 %v7889_v7, %v7841_v17  ;;  %v7890_v61 = vadd.f32 %v13876_v54, %v7801_v26 }
 0x733   : > { %v7971_v25 = vmax.f32 %v7930_v42, 0.0  ;;  %v7931_v45 = vadd.f32 %v7890_v61, %v7842_v36 }
 0x734   : > { %v7660_v30 = vpop.f32.mrb[176].mxu1 }
 0x735   : > { %8012 = vst.msk [vmem:[%s13886_s20 + $0x30] sm:$0xff] %vm347_vm1, %v7971_v25  ;;  %v7972_v63 = vmax.f32 %v7931_v45, 0.0  ;;  %v7802_v8 = vadd.f32 %v7660_v30, %v13744_v5  ;;  %v10845_v10 = vpop.f32.mrb[177].mxu1  ;;  %v7847_v45 = vld [vmem:[#allocation2 + $0x78] sm:$0xff] }
 0x736   : > { %v7663_v1 = vpop.f32.mrb[178].mxu1  ;;  %v7848_v10 = vld [vmem:[#allocation2 + $0x80] sm:$0xff] }
 0x737   : > { %8013 = vst.msk [vmem:[%s13886_s20 + $0x38] sm:$0xff] %vm347_vm1, %v7972_v63  ;;  %v7891_v35 = vadd.f32 %v13876_v54, %v7802_v8  ;;  %v7803_v57 = vadd.f32 %v7663_v1, %v13747_v38  ;;  %v10846_v9 = vpop.f32.mrb[179].mxu1 }
 0x739   : > { %v7932_v58 = vadd.f32 %v7891_v35, %v7843_v2  ;;  %v7892_v46 = vadd.f32 %v13876_v54, %v7803_v57 }
 0x73b   : > { %v7973_v59 = vmax.f32 %v7932_v58, 0.0  ;;  %v7933_v29 = vadd.f32 %v7892_v46, %v7844_v37  ;;  %v7849_v46 = vld [vmem:[#allocation2 + $0x88] sm:$0xff] }
 0x73c   : > { %v7668_v48 = vpop.f32.mrb[180].mxu1 }
 0x73d   : > { %8014 = vst.msk [vmem:[%s13886_s20 + $0x40] sm:$0xff] %vm347_vm1, %v7973_v59  ;;  %v7974_v5 = vmax.f32 %v7933_v29, 0.0  ;;  %v7804_v15 = vadd.f32 %v7668_v48, %v13753_v50  ;;  %v10849_v32 = vpop.f32.mrb[181].mxu1 }
 0x73e   : > { %v7671_v27 = vpop.f32.mrb[182].mxu1 }
 0x73f   : > { %8015 = vst.msk [vmem:[%s13886_s20 + $0x48] sm:$0xff] %vm347_vm1, %v7974_v5  ;;  %v7893_v38 = vadd.f32 %v13876_v54, %v7804_v15  ;;  %v7805_v20 = vadd.f32 %v7671_v27, %v13756_v56  ;;  %v10850_v17 = vpop.f32.mrb[183].mxu1  ;;  %v7850_v5 = vld [vmem:[#allocation2 + $0x90] sm:$0xff] }
 0x741   : > { %v7934_v7 = vadd.f32 %v7893_v38, %v7845_v18  ;;  %v7894_v26 = vadd.f32 %v13876_v54, %v7805_v20 }
 0x743   : > { %v7975_v4 = vmax.f32 %v7934_v7, 0.0  ;;  %v7935_v36 = vadd.f32 %v7894_v26, %v7846_v14  ;;  %v7851_v14 = vld [vmem:[#allocation2 + $0x98] sm:$0xff] }
 0x744   : > { %v7676_v42 = vpop.f32.mrb[184].mxu1 }
 0x745   : > { %8016 = vst.msk [vmem:[%s13886_s20 + $0x50] sm:$0xff] %vm347_vm1, %v7975_v4  ;;  %v7976_v50 = vmax.f32 %v7935_v36, 0.0  ;;  %v7806_v61 = vadd.f32 %v7676_v42, %v13762_v24  ;;  %v10853_v25 = vpop.f32.mrb[185].mxu1  ;;  %v7852_v36 = vld [vmem:[#allocation2 + $0xa0] sm:$0xff] }
 0x746   : > { %v7679_v30 = vpop.f32.mrb[186].mxu1 }
 0x747   : > { %8017 = vst.msk [vmem:[%s13886_s20 + $0x58] sm:$0xff] %vm347_vm1, %v7976_v50  ;;  %v7895_v56 = vadd.f32 %v13876_v54, %v7806_v61  ;;  %v7807_v63 = vadd.f32 %v7679_v30, %v13765_v41  ;;  %v10854_v8 = vpop.f32.mrb[187].mxu1 }
 0x749   : > { %v7936_v2 = vadd.f32 %v7895_v56, %v7847_v45  ;;  %v7896_v1 = vadd.f32 %v13876_v54, %v7807_v63  ;;  %v7853_v63 = vld [vmem:[#allocation2 + $0xa8] sm:$0xff] }
 0x74b   : > { %v7977_v35 = vmax.f32 %v7936_v2, 0.0  ;;  %v7937_v57 = vadd.f32 %v7896_v1, %v7848_v10  ;;  %v7854_v1 = vld [vmem:[#allocation2 + $0xb0] sm:$0xff] }
 0x74c   : > { %v7684_v9 = vpop.f32.mrb[188].mxu1 }
 0x74d   : > { %8018 = vst.msk [vmem:[%s13886_s20 + $0x60] sm:$0xff] %vm347_vm1, %v7977_v35  ;;  %v7978_v24 = vmax.f32 %v7937_v57, 0.0  ;;  %v7808_v37 = vadd.f32 %v7684_v9, %v13771_v31  ;;  %v10857_v58 = vpop.f32.mrb[189].mxu1 }
 0x74e   : > { %v7687_v59 = vpop.f32.mrb[190].mxu1 }
 0x74f   : > { %8019 = vst.msk [vmem:[%s13886_s20 + $0x68] sm:$0xff] %vm347_vm1, %v7978_v24  ;;  %v7897_v41 = vadd.f32 %v13876_v54, %v7808_v37  ;;  %v7809_v29 = vadd.f32 %v7687_v59, %v13774_v49  ;;  %v10858_v48 = vpop.f32.mrb[191].mxu1  ;;  %v7855_v59 = vld [vmem:[#allocation2 + $0xb8] sm:$0xff] }
 0x751   : > { %v7938_v15 = vadd.f32 %v7897_v41, %v7849_v46  ;;  %v7898_v32 = vadd.f32 %v13876_v54, %v7809_v29 }
 0x753   : > { %v7979_v18 = vmax.f32 %v7938_v15, 0.0  ;;  %v7939_v27 = vadd.f32 %v7898_v32, %v7850_v5  ;;  %v7856_v5 = vld [vmem:[#allocation2 + $0xc0] sm:$0xff] }
 0x754   : > { %v7692_v38 = vpop.f32.mrb[192].mxu1 }
 0x755   : > { %8020 = vst.msk [vmem:[%s13886_s20 + $0x70] sm:$0xff] %vm347_vm1, %v7979_v18  ;;  %v7980_v31 = vmax.f32 %v7939_v27, 0.0  ;;  %v7810_v20 = vadd.f32 %v7692_v38, %v13780_v51  ;;  %v10861_v17 = vpop.f32.mrb[193].mxu1 }
 0x756   : > { %v7695_v7 = vpop.f32.mrb[194].mxu1  ;;  %v7857_v17 = vld [vmem:[#allocation2 + $0xc8] sm:$0xff] }
 0x757   : > { %8021 = vst.msk [vmem:[%s13886_s20 + $0x78] sm:$0xff] %vm347_vm1, %v7980_v31  ;;  %v7899_v49 = vadd.f32 %v13876_v54, %v7810_v20  ;;  %v7811_v26 = vadd.f32 %v7695_v7, %v13783_v40  ;;  %v10862_v4 = vpop.f32.mrb[195].mxu1 }
 0x759   : > { %v7940_v42 = vadd.f32 %v7899_v49, %v7851_v14  ;;  %v7900_v50 = vadd.f32 %v13876_v54, %v7811_v26  ;;  %v7858_v26 = vld [vmem:[#allocation2 + $0xd0] sm:$0xff] }
 0x75b   : > { %v7981_v61 = vmax.f32 %v7940_v42, 0.0  ;;  %v7941_v25 = vadd.f32 %v7900_v50, %v7852_v36 }
 0x75c   : > { %v7700_v45 = vpop.f32.mrb[196].mxu1 }
 0x75d   : > { %8022 = vst.msk [vmem:[%s13886_s20 + $0x80] sm:$0xff] %vm347_vm1, %v7981_v61  ;;  %v7982_v51 = vmax.f32 %v7941_v25, 0.0  ;;  %v7812_v30 = vadd.f32 %v7700_v45, %v13789_v21  ;;  %v10865_v56 = vpop.f32.mrb[197].mxu1 }
 0x75e   : > { %v7703_v8 = vpop.f32.mrb[198].mxu1 }
 0x75f   : > { %8023 = vst.msk [vmem:[%s13886_s20 + $0x88] sm:$0xff] %vm347_vm1, %v7982_v51  ;;  %v7901_v40 = vadd.f32 %v13876_v54, %v7812_v30  ;;  %v7813_v10 = vadd.f32 %v7703_v8, %v13792_v22  ;;  %v10866_v2 = vpop.f32.mrb[199].mxu1  ;;  %v7859_v51 = vld [vmem:[#allocation2 + $0xd8] sm:$0xff]  ;;  %v7860_v8 = vld [vmem:[#allocation2 + $0xe0] sm:$0xff] }
 0x761   : > { %v7942_v35 = vadd.f32 %v7901_v40, %v7853_v63  ;;  %v7902_v57 = vadd.f32 %v13876_v54, %v7813_v10 }
 0x763   : > { %v7983_v9 = vmax.f32 %v7942_v35, 0.0  ;;  %v7943_v24 = vadd.f32 %v7902_v57, %v7854_v1 }
 0x764   : > { %v7708_v37 = vpop.f32.mrb[200].mxu1 }
 0x765   : > { %8024 = vst.msk [vmem:[%s13886_s20 + $0x90] sm:$0xff] %vm347_vm1, %v7983_v9  ;;  %v7984_v21 = vmax.f32 %v7943_v24, 0.0  ;;  %v7814_v58 = vadd.f32 %v7708_v37, %v13798_v34  ;;  %v10869_v46 = vpop.f32.mrb[201].mxu1  ;;  %v7861_v24 = vld [vmem:[#allocation2 + $0xe8] sm:$0xff] }
 0x766   : > { %v7711_v41 = vpop.f32.mrb[202].mxu1  ;;  %v7862_v46 = vld [vmem:[#allocation2 + $0xf0] sm:$0xff] }
 0x767   : > { %8025 = vst.msk [vmem:[%s13886_s20 + $0x98] sm:$0xff] %vm347_vm1, %v7984_v21  ;;  %v7903_v22 = vadd.f32 %v13876_v54, %v7814_v58  ;;  %v7815_v29 = vadd.f32 %v7711_v41, %v13801_v62  ;;  %v10870_v48 = vpop.f32.mrb[203].mxu1 }
 0x769   : > { %v7944_v15 = vadd.f32 %v7903_v22, %v7855_v59  ;;  %v7904_v32 = vadd.f32 %v13876_v54, %v7815_v29 }
 0x76b   : > { %v7985_v18 = vmax.f32 %v7944_v15, 0.0  ;;  %v7945_v27 = vadd.f32 %v7904_v32, %v7856_v5  ;;  %v7863_v32 = vld [vmem:[#allocation2 + $0xf8] sm:$0xff] }
 0x76c   : > { %v7716_v38 = vpop.f32.mrb[204].mxu1 }
 0x76d   : > { %8026 = vst.msk [vmem:[%s13886_s20 + $0xa0] sm:$0xff] %vm347_vm1, %v7985_v18  ;;  %v7986_v34 = vmax.f32 %v7945_v27, 0.0  ;;  %v7816_v31 = vadd.f32 %v7716_v38, %v13807_v53  ;;  %v10873_v20 = vpop.f32.mrb[205].mxu1 }
 0x76e   : > { %v7719_v14 = vpop.f32.mrb[206].mxu1 }
 0x76f   : > { %8027 = vst.msk [vmem:[%s13886_s20 + $0xa8] sm:$0xff] %vm347_vm1, %v7986_v34  ;;  %v7905_v62 = vadd.f32 %v13876_v54, %v7816_v31  ;;  %v7817_v7 = vadd.f32 %v7719_v14, %v13810_v28  ;;  %v10874_v49 = vpop.f32.mrb[207].mxu1  ;;  %v7864_v34 = vld [vmem:[#allocation2 + $0x100] sm:$0xff] }
 0x771   : > { %v7946_v4 = vadd.f32 %v7905_v62, %v7857_v17  ;;  %v7906_v36 = vadd.f32 %v13876_v54, %v7817_v7 }
 0x773   : > { %v7987_v42 = vmax.f32 %v7946_v4, 0.0  ;;  %v7947_v50 = vadd.f32 %v7906_v36, %v7858_v26  ;;  %v7865_v26 = vld [vmem:[#allocation2 + $0x108] sm:$0xff] }
 0x774   : > { %v7724_v61 = vpop.f32.mrb[208].mxu1 }
 0x775   : > { %8028 = vst.msk [vmem:[%s13886_s20 + $0xb0] sm:$0xff] %vm347_vm1, %v7987_v42  ;;  %v7988_v53 = vmax.f32 %v7947_v50, 0.0  ;;  %v7818_v25 = vadd.f32 %v7724_v61, %v13816_v44  ;;  %v10877_v45 = vpop.f32.mrb[209].mxu1  ;;  %v7866_v50 = vld [vmem:[#allocation2 + $0x110] sm:$0xff] }
 0x776   : > { %v7727_v30 = vpop.f32.mrb[210].mxu1 }
 0x777   : > { %8029 = vst.msk [vmem:[%s13886_s20 + $0xb8] sm:$0xff] %vm347_vm1, %v7988_v53  ;;  %v7907_v28 = vadd.f32 %v13876_v54, %v7818_v25  ;;  %v7819_v56 = vadd.f32 %v7727_v30, %v13819_v23  ;;  %v10878_v63 = vpop.f32.mrb[211].mxu1 }
 0x779   : > { %v7948_v40 = vadd.f32 %v7907_v28, %v7859_v51  ;;  %v7908_v10 = vadd.f32 %v13876_v54, %v7819_v56  ;;  %v7867_v56 = vld [vmem:[#allocation2 + $0x118] sm:$0xff] }
 0x77b   : > { %v7989_v2 = vmax.f32 %v7948_v40, 0.0  ;;  %v7949_v1 = vadd.f32 %v7908_v10, %v7860_v8  ;;  %v7868_v10 = vld [vmem:[#allocation2 + $0x120] sm:$0xff] }
 0x77c   : > { %v7732_v35 = vpop.f32.mrb[212].mxu1 }
 0x77d   : > { %8030 = vst.msk [vmem:[%s13886_s20 + $0xc0] sm:$0xff] %vm347_vm1, %v7989_v2  ;;  %v7990_v44 = vmax.f32 %v7949_v1, 0.0  ;;  %v7820_v57 = vadd.f32 %v7732_v35, %v13825_v33  ;;  %v10881_v9 = vpop.f32.mrb[213].mxu1 }
 0x77e   : > { %v7735_v37 = vpop.f32.mrb[214].mxu1 }
 0x77f   : > { %8031 = vst.msk [vmem:[%s13886_s20 + $0xc8] sm:$0xff] %vm347_vm1, %v7990_v44  ;;  %v7909_v23 = vadd.f32 %v13876_v54, %v7820_v57  ;;  %v7821_v21 = vadd.f32 %v7735_v37, %v13828_v16  ;;  %v10882_v58 = vpop.f32.mrb[215].mxu1  ;;  %v7869_v37 = vld [vmem:[#allocation2 + $0x128] sm:$0xff] }
 0x781   : > { %v7950_v59 = vadd.f32 %v7909_v23, %v7861_v24  ;;  %v7910_v41 = vadd.f32 %v13876_v54, %v7821_v21 }
 0x783   : > { %v7991_v22 = vmax.f32 %v7950_v59, 0.0  ;;  %v7951_v29 = vadd.f32 %v7910_v41, %v7862_v46  ;;  %v7870_v46 = vld [vmem:[#allocation2 + $0x130] sm:$0xff] }
 0x784   : > { %v7740_v48 = vpop.f32.mrb[216].mxu1 }
 0x785   : > { %8032 = vst.msk [vmem:[%s13886_s20 + $0xd0] sm:$0xff] %vm347_vm1, %v7991_v22  ;;  %v7992_v33 = vmax.f32 %v7951_v29, 0.0  ;;  %v7822_v5 = vadd.f32 %v7740_v48, %v13834_v43  ;;  %v10885_v15 = vpop.f32.mrb[217].mxu1 }
 0x786   : > { %v7743_v18 = vpop.f32.mrb[218].mxu1  ;;  %v7871_v15 = vld [vmem:[#allocation2 + $0x138] sm:$0xff] }
 0x787   : > { %8033 = vst.msk [vmem:[%s13886_s20 + $0xd8] sm:$0xff] %vm347_vm1, %v7992_v33  ;;  %v7911_v16 = vadd.f32 %v13876_v54, %v7822_v5  ;;  %v7823_v27 = vadd.f32 %v7743_v18, %v13837_v55  ;;  %v10886_v38 = vpop.f32.mrb[219].mxu1 }
 0x789   : > { %v7952_v31 = vadd.f32 %v7911_v16, %v7863_v32  ;;  %v7912_v20 = vadd.f32 %v13876_v54, %v7823_v27  ;;  %v7872_v27 = vld [vmem:[#allocation2 + $0x140] sm:$0xff] }
 0x78b   : > { %v7993_v17 = vmax.f32 %v7952_v31, 0.0  ;;  %v7953_v14 = vadd.f32 %v7912_v20, %v7864_v34 }
 0x78c   : > { %v7748_v62 = vpop.f32.mrb[220].mxu1 }
 0x78d   : > { %8034 = vst.msk [vmem:[%s13886_s20 + $0xe0] sm:$0xff] %vm347_vm1, %v7993_v17  ;;  %v7994_v43 = vmax.f32 %v7953_v14, 0.0  ;;  %v7824_v7 = vadd.f32 %v7748_v62, %v13841_v19  ;;  %v10889_v49 = vpop.f32.mrb[221].mxu1 }
 0x78e   : > { %v7751_v4 = vpop.f32.mrb[222].mxu1 }
 0x78f   : > { %8035 = vst.msk [vmem:[%s13886_s20 + $0xe8] sm:$0xff] %vm347_vm1, %v7994_v43  ;;  %v7913_v55 = vadd.f32 %v13876_v54, %v7824_v7  ;;  %v7825_v36 = vadd.f32 %v7751_v4, %v13844_v0  ;;  %v10890_v42 = vpop.f32.mrb[223].mxu1  ;;  %v7873_v43 = vld [vmem:[#allocation2 + $0x148] sm:$0xff]  ;;  %v7874_v4 = vld [vmem:[#allocation2 + $0x150] sm:$0xff] }
 0x791   : > { %v7954_v61 = vadd.f32 %v7913_v55, %v7865_v26  ;;  %v7914_v53 = vadd.f32 %v13876_v54, %v7825_v36 }
 0x793   : > { %v7995_v25 = vmax.f32 %v7954_v61, 0.0  ;;  %v7955_v45 = vadd.f32 %v7914_v53, %v7866_v50 }
 0x794   : > { %v7756_v51 = vpop.f32.mrb[224].mxu1 }
 0x795   : > { %8036 = vst.msk [vmem:[%s13886_s20 + $0xf0] sm:$0xff] %vm347_vm1, %v7995_v25  ;;  %v7996_v19 = vmax.f32 %v7955_v45, 0.0  ;;  %v7826_v30 = vadd.f32 %v7756_v51, %v13847_v3  ;;  %v10893_v28 = vpop.f32.mrb[225].mxu1  ;;  %v7875_v45 = vld [vmem:[#allocation2 + $0x158] sm:$0xf] }
 0x796   : > { %v7759_v63 = vpop.f32.mrb[226].mxu1 }
 0x797   : > { %8037 = vst.msk [vmem:[%s13886_s20 + $0xf8] sm:$0xff] %vm347_vm1, %v7996_v19  ;;  %v7915_v0 = vadd.f32 %v13876_v54, %v7826_v30  ;;  %v7827_v8 = vadd.f32 %v7759_v63, %v13850_v39  ;;  %v10894_v40 = vpop.f32.mrb[227].mxu1 }
 0x799   : > { %v7956_v2 = vadd.f32 %v7915_v0, %v7867_v56  ;;  %v7916_v1 = vadd.f32 %v13876_v54, %v7827_v8 }
 0x79b   : > { %v7997_v35 = vmax.f32 %v7956_v2, 0.0  ;;  %v7957_v44 = vadd.f32 %v7916_v1, %v7868_v10 }
 0x79c   : > { %v7764_v57 = vpop.f32.mrb[228].mxu1 }
 0x79d   : > { %8038 = vst.msk [vmem:[%s13886_s20 + $0x100] sm:$0xff] %vm347_vm1, %v7997_v35  ;;  %v7998_v3 = vmax.f32 %v7957_v44, 0.0  ;;  %v7828_v9 = vadd.f32 %v7764_v57, %v13853_v13  ;;  %v10897_v24 = vpop.f32.mrb[229].mxu1 }
 0x79e   : > { %v7767_v23 = vpop.f32.mrb[230].mxu1 }
 0x79f   : > { %8039 = vst.msk [vmem:[%s13886_s20 + $0x108] sm:$0xff] %vm347_vm1, %v7998_v3  ;;  %v7917_v39 = vadd.f32 %v13876_v54, %v7828_v9  ;;  %v7829_v21 = vadd.f32 %v7767_v23, %v13856_v11  ;;  %v10898_v58 = vpop.f32.mrb[231].mxu1 }
 0x7a1   : > { %v7958_v59 = vadd.f32 %v7917_v39, %v7869_v37  ;;  %v7918_v41 = vadd.f32 %v13876_v54, %v7829_v21 }
 0x7a3   : > { %v7999_v22 = vmax.f32 %v7958_v59, 0.0  ;;  %v7959_v29 = vadd.f32 %v7918_v41, %v7870_v46 }
 0x7a4   : > { %v7772_v48 = vpop.f32.mrb[232].mxu1 }
 0x7a5   : > { %8040 = vst.msk [vmem:[%s13886_s20 + $0x110] sm:$0xff] %vm347_vm1, %v7999_v22  ;;  %v8000_v13 = vmax.f32 %v7959_v29, 0.0  ;;  %v7830_v33 = vadd.f32 %v7772_v48, %v13859_v52  ;;  %v10901_v5 = vpop.f32.mrb[233].mxu1 }
 0x7a6   : > { %v7775_v32 = vpop.f32.mrb[234].mxu1 }
 0x7a7   : > { %8041 = vst.msk [vmem:[%s13886_s20 + $0x118] sm:$0xff] %vm347_vm1, %v8000_v13  ;;  %v7919_v11 = vadd.f32 %v13876_v54, %v7830_v33  ;;  %v7831_v18 = vadd.f32 %v7775_v32, %v13862_v60  ;;  %v10902_v16 = vpop.f32.mrb[235].mxu1 }
 0x7a9   : > { %v7960_v38 = vadd.f32 %v7919_v11, %v7871_v15  ;;  %v7920_v34 = vadd.f32 %v13876_v54, %v7831_v18 }
 0x7ab   : > { %v8001_v31 = vmax.f32 %v7960_v38, 0.0  ;;  %v7961_v20 = vadd.f32 %v7920_v34, %v7872_v27 }
 0x7ac   : > { %v7780_v17 = vpop.f32.mrb[236].mxu1 }
 0x7ad   : > { %8042 = vst.msk [vmem:[%s13886_s20 + $0x120] sm:$0xff] %vm347_vm1, %v8001_v31  ;;  %v8002_v52 = vmax.f32 %v7961_v20, 0.0  ;;  %v7832_v14 = vadd.f32 %v7780_v17, %v13865_v12  ;;  %v10905_v62 = vpop.f32.mrb[237].mxu1 }
 0x7ae   : > { %v7783_v7 = vpop.f32.mrb[238].mxu1 }
 0x7af   : > { %8043 = vst.msk [vmem:[%s13886_s20 + $0x128] sm:$0xff] %vm347_vm1, %v8002_v52  ;;  %v7921_v60 = vadd.f32 %v13876_v54, %v7832_v14  ;;  %v7833_v49 = vadd.f32 %v7783_v7, %v13868_v47  ;;  %v10906_v26 = vpop.f32.mrb[239].mxu1 }
 0x7b1   : > { %v7962_v55 = vadd.f32 %v7921_v60, %v7873_v43  ;;  %v7922_v36 = vadd.f32 %v13876_v54, %v7833_v49 }
 0x7b3   : > { %v8003_v42 = vmax.f32 %v7962_v55, 0.0  ;;  %v7963_v50 = vadd.f32 %v7922_v36, %v7874_v4 }
 0x7b4   : > { %v7788_v61 = vpop.f32.mrb[240].mxu1 }
 0x7b5   : > { %8044 = vst.msk [vmem:[%s13886_s20 + $0x130] sm:$0xff] %vm347_vm1, %v8003_v42  ;;  %v8004_v12 = vmax.f32 %v7963_v50, 0.0  ;;  %v7834_v53 = vadd.f32 %v7788_v61, %v13871_v6  ;;  %v10909_v25 = vpop.f32.mrb[241].mxu1 }
 0x7b6   : > { %v7791_v51 = vpop.f32.mrb[242].mxu1 }
 0x7b7   : > { %8045 = vst.msk [vmem:[%s13886_s20 + $0x138] sm:$0xff] %vm347_vm1, %v8004_v12  ;;  %v7923_v47 = vadd.f32 %v13876_v54, %v7834_v53  ;;  %v10910_v19 = vpop.f32.mrb[243].mxu1 }
 0x7b9   : > { %v7964_v30 = vadd.f32 %v7923_v47, %v7875_v45 }
 0x7bb   : > { %v8005_v28 = vmax.f32 %v7964_v30, 0.0 }
 0x7bd   : > { %8046 = vst.msk [vmem:[%s13886_s20 + $0x140] sm:$0xf] %vm394_vm2, %v8005_v28 }
 0x7be PF: > { %s16_s21 = sadd.s32 1, %s11005_s21  }
 0x7bf   : > { %p13_p4 = scmp.ge.s32.totalorder %s16_s21, 4  }
 0x7c1   :  { %15 = sbr.rel (!%p13_p4) target bundleno = 1 (0x1), region = 90 }

</bundles_post_ra>
